<compile_context>
chip_gen: v7x
topology: tpu7x:2x2x1
jax: 0.10.0
libtpu: 0.0.40
codegen_flags: <defaults>
</compile_context>

<pallas_src>
import functools

import jax
import jax.numpy as jnp
import numpy as np
from jax.experimental import pallas as pl
from jax.experimental.pallas import tpu as pltpu

_CP = 128  # padded channel width (lane-dense)


# ----------------------------------------------------------------------------
# Fused kernel
# ----------------------------------------------------------------------------
def _fused_kernel(p1_ref, w1_ref, w2_ref, w3_ref, w4_ref, w5_ref, sel_ref,
                  o_ref,
                  pbuf2, pbuf3, pbuf4, pbuf5, acc_big, acc_small,
                  *, H1, W1, H2, W2, H3, W3):
    f32 = jnp.float32

    def leaky(v):                                  # f32 VPU math (v5e-safe)
        return jnp.where(v >= 0.0, v, 0.2 * v)

    # Zero the halo'ed activation buffers (interiors are fully overwritten below;
    # the halo is the conv zero-padding).
    pbuf2[...] = jnp.zeros_like(pbuf2)
    pbuf3[...] = jnp.zeros_like(pbuf3)
    pbuf4[...] = jnp.zeros_like(pbuf4)
    pbuf5[...] = jnp.zeros_like(pbuf5)

    def tap_sum_conv(src_ref, w_ref, acc_ref, KH, KW, Ho, Wo):
        """Stride-1 conv as a sum of KH*KW shifted GEMMs (bf16 MXU, f32 accum)."""
        acc_ref[...] = jnp.zeros_like(acc_ref)
        for kw in range(KW):                       # static sublane (W) offsets
            def body(kh, carry, kw=kw):
                tap = src_ref[pl.ds(kh, Ho), kw:kw + Wo, :]        # (Ho, Wo, 128) f32
                tap = tap.reshape(Ho * Wo, _CP).astype(jnp.bfloat16)
                acc_ref[...] += jnp.dot(tap, w_ref[kh * KW + kw],
                                        preferred_element_type=f32)
                return carry
            jax.lax.fori_loop(0, KH, body, 0)
        return acc_ref[...]

    # Layer 1: Conv(1, 16, 9, s2, p4) — host-side im2col, single GEMM here.
    y1 = jnp.dot(p1_ref[0], w1_ref[...], preferred_element_type=f32)    # (H1*W1, 128)
    pbuf2[3:3 + H1, 3:3 + W1, :] = leaky(y1).reshape(H1, W1, _CP)

    # Layer 2: Conv(16, 32, 7, s1, p3)
    y2 = leaky(tap_sum_conv(pbuf2, w2_ref, acc_big, 7, 7, H2, W2))
    pbuf3[2:2 + H2, 2:2 + W2, :] = y2.reshape(H2, W2, _CP)

    # Layer 3: Conv(32, 64, 5, s2, p2) — full stride-1 conv, then exact 0/1
    # row-selection matmul implements the stride-2 subsample.
    y3f = tap_sum_conv(pbuf3, w3_ref, acc_big, 5, 5, H2, W2)            # (H2*W2, 128)
    y3 = leaky(jnp.dot(sel_ref[...], y3f, preferred_element_type=f32))  # (H3*W3, 128)
    pbuf4[1:1 + H3, 1:1 + W3, :] = y3.reshape(H3, W3, _CP)

    # Layer 4: Conv(64, oc, 3, s1, p1)
    y4 = leaky(tap_sum_conv(pbuf4, w4_ref, acc_small, 3, 3, H3, W3))
    pbuf5[1:1 + H3, 1:1 + W3, :] = y4.reshape(H3, W3, _CP)

    # Layer 5: Conv(oc, oc, 3, s1, p1) + Sigmoid (f32 EUP), lane-dense 128-wide store.
    y5 = tap_sum_conv(pbuf5, w5_ref, acc_small, 3, 3, H3, W3)
    o_ref[0] = jax.nn.sigmoid(y5)


# ----------------------------------------------------------------------------
# Host-side (XLA) preprocessing — runs inside the same jit as the pallas_call.
# ----------------------------------------------------------------------------
def _layer1_patches(x_nhwc, H1, W1):
    """im2col for the first conv (9x9, stride 2, pad 4) on the 1-channel input."""
    N = x_nhwc.shape[0]
    xp = jnp.pad(x_nhwc, ((0, 0), (4, 4), (4, 4), (0, 0)))
    cols = []
    for kh in range(9):
        for kw in range(9):
            cols.append(xp[:, kh:kh + 2 * H1 - 1:2, kw:kw + 2 * W1 - 1:2, :])
    patches = jnp.concatenate(cols, axis=-1).reshape(N, H1 * W1, 81)
    patches = jnp.pad(patches, ((0, 0), (0, 0), (0, _CP - 81)))   # K: 81 -> 128 (zeros)
    return patches.astype(jnp.bfloat16)


def _pad_weight_taps(w_hwio):
    """(KH,KW,Cin,Cout) -> (KH*KW, 128, 128) bf16, zero-padded channels."""
    KH, KW, Cin, Cout = w_hwio.shape
    w = w_hwio.reshape(KH * KW, Cin, Cout)
    w = jnp.pad(w, ((0, 0), (0, _CP - Cin), (0, _CP - Cout)))
    return w.astype(jnp.bfloat16)


def _forward_impl(x_nchw, w1, w2, w3, w4, w5):
    N, Cin, H, W = x_nchw.shape
    out_channels = w5.shape[-1]

    # Architecture / alignment checks (trace-time; all shapes are static).
    assert Cin == 1 and w1.shape == (9, 9, 1, 16)
    assert w2.shape == (7, 7, 16, 32) and w3.shape == (5, 5, 32, 64)
    assert w4.shape[:3] == (3, 3, 64) and w5.shape[:3] == (3, 3, out_channels)
    assert out_channels <= _CP

    H1 = (H + 2 * 4 - 9) // 2 + 1
    W1 = (W + 2 * 4 - 9) // 2 + 1
    H2, W2 = H1, W1                              # 7x7, s1, p3: same spatial size
    H3 = (H2 + 2 * 2 - 5) // 2 + 1
    W3 = (W2 + 2 * 2 - 5) // 2 + 1
    # Keep in-kernel (H, W, 128) <-> (H*W, 128) reshapes layout-trivial.
    assert W1 % 8 == 0 and W3 % 8 == 0, "input spatial size must keep W1, W3 8-aligned"

    patches1 = _layer1_patches(jnp.transpose(x_nchw, (0, 2, 3, 1)), H1, W1)

    w1p = jnp.pad(w1.reshape(81, 16),
                  ((0, _CP - 81), (0, _CP - 16))).astype(jnp.bfloat16)
    w2p = _pad_weight_taps(w2)
    w3p = _pad_weight_taps(w3)
    w4p = _pad_weight_taps(w4)
    w5p = _pad_weight_taps(w5)

    # 0/1 selection matrix: stride-2 subsample of the full layer-3 output rows.
    idx = jnp.arange(H3 * W3)
    src = (2 * (idx // W3)) * W2 + 2 * (idx % W3)
    sel3 = (src[:, None] == jnp.arange(H2 * W2)[None, :]).astype(jnp.float32)

    kernel = functools.partial(_fused_kernel, H1=H1, W1=W1, H2=H2, W2=W2,
                               H3=H3, W3=W3)

    out = pl.pallas_call(
        kernel,
        out_shape=jax.ShapeDtypeStruct((N, H3 * W3, _CP), jnp.float32),
        grid_spec=pltpu.PrefetchScalarGridSpec(
            num_scalar_prefetch=0,
            grid=(N,),                                      # one step per batch element
            in_specs=[
                pl.BlockSpec((1, H1 * W1, _CP), lambda n: (n, 0, 0)),  # layer-1 patches
                pl.BlockSpec((_CP, _CP), lambda n: (0, 0)),            # w1 (padded)
                pl.BlockSpec((49, _CP, _CP), lambda n: (0, 0, 0)),     # w2 taps
                pl.BlockSpec((25, _CP, _CP), lambda n: (0, 0, 0)),     # w3 taps
                pl.BlockSpec((9, _CP, _CP), lambda n: (0, 0, 0)),      # w4 taps
                pl.BlockSpec((9, _CP, _CP), lambda n: (0, 0, 0)),      # w5 taps
                pl.BlockSpec((H3 * W3, H2 * W2), lambda n: (0, 0)),    # stride-2 select
            ],
            out_specs=pl.BlockSpec((1, H3 * W3, _CP), lambda n: (n, 0, 0)),
            scratch_shapes=[
                pltpu.VMEM((H1 + 6, W1 + 6, _CP), jnp.float32),  # layer-2 input (pad 3)
                pltpu.VMEM((H2 + 4, W2 + 4, _CP), jnp.float32),  # layer-3 input (pad 2)
                pltpu.VMEM((H3 + 2, W3 + 2, _CP), jnp.float32),  # layer-4 input (pad 1)
                pltpu.VMEM((H3 + 2, W3 + 2, _CP), jnp.float32),  # layer-5 input (pad 1)
                pltpu.VMEM((H2 * W2, _CP), jnp.float32),         # f32 accumulator (big)
                pltpu.VMEM((H3 * W3, _CP), jnp.float32),         # f32 accumulator (small)
            ],
        ),
        compiler_params=pltpu.CompilerParams(
            dimension_semantics=("parallel",),               # 2 TCs on v7x
            vmem_limit_bytes=32 * 1024 * 1024,
        ),
    )(patches1, w1p, w2p, w3p, w4p, w5p, sel3)

    out = out[:, :, :out_channels].reshape(N, H3, W3, out_channels)
    return jnp.transpose(out, (0, 3, 1, 2))                  # NHWC -> NCHW


_forward_jit = jax.jit(_forward_impl)


# ----------------------------------------------------------------------------
# MaskConditionModel parameters & public forward
# ----------------------------------------------------------------------------
_LAYER_CFGS = lambda out_channels: [
    # (cin, cout, kernel, stride, pad)
    (1, 16, 9, 2, 4),
    (16, 32, 7, 1, 3),
    (32, 64, 5, 2, 2),
    (64, out_channels, 3, 1, 1),
    (out_channels, out_channels, 3, 1, 1),
]


def init_mask_condition_params(out_channels, key):
    params = []
    for (cin, cout, k, s, p) in _LAYER_CFGS(out_channels):
        key, sub = jax.random.split(key)
        fan_in = float(cin * k * k)
        w = jax.random.normal(sub, (k, k, cin, cout), jnp.float32) / jnp.sqrt(fan_in)
        params.append((w, s, p))
    return params


def mask_condition_forward(x_nchw, params):
    """Matches MaskConditionModel.forward: NCHW in, NCHW out."""
    weights = tuple(w for (w, _, _) in params)
    return _forward_jit(x_nchw, *weights)


def reference_forward(x_nchw, params, *, bf16_operands):
    """Pure-JAX reference (lax.conv). bf16_operands matches the kernel's precision."""
    x = jnp.transpose(x_nchw, (0, 2, 3, 1))
    acts = ["leaky_relu"] * 4 + ["sigmoid"]
    for (w, s, p), act in zip(params, acts):
        xin = x.astype(jnp.bfloat16) if bf16_operands else x
        win = w.astype(jnp.bfloat16) if bf16_operands else w
        y = jax.lax.conv_general_dilated(
            xin, win, window_strides=(s, s), padding=[(p, p), (p, p)],
            dimension_numbers=("NHWC", "HWIO", "NHWC"),
            preferred_element_type=jnp.float32)
        x = jnp.where(y >= 0.0, y, 0.2 * y) if act == "leaky_relu" else jax.nn.sigmoid(y)
    return jnp.transpose(x, (0, 3, 1, 2))


if __name__ == "__main__":
    key = jax.random.PRNGKey(0)
    kx, kp = jax.random.split(key)

    out_channels = 32
    # mask-like single-channel input, small spatial size
    x = jax.random.uniform(kx, (2, 1, 32, 32), dtype=jnp.float32)
    params = init_mask_condition_params(out_channels, kp)

    out = jax.block_until_ready(mask_condition_forward(x, params))

    # two stride-2 convs: 32 -> 16 -> 8 spatial
    assert out.shape == (2, out_channels, 8, 8), out.shape

    # Exact-precision reference (bf16 conv operands, f32 accumulation — same as kernel).
    ref_bf16 = reference_forward(x, params, bf16_operands=True)
    np.testing.assert_allclose(np.asarray(out), np.asarray(ref_bf16),
                               rtol=2e-3, atol=2e-3)

    # Sanity bound vs. the pure-f32 module semantics (bf16 operand rounding only).
    ref_f32 = reference_forward(x, params, bf16_operands=False)
    np.testing.assert_allclose(np.asarray(out), np.asarray(ref_f32),
                               rtol=5e-2, atol=2e-2)

    print("KERNEL_OK")
</pallas_src>

<mosaic_0001>
module attributes {stable_mosaic.version = 11 : i64} {
  func.func @_fused_kernel(%arg0: i32, %arg1: memref<1x256x128xbf16, #tpu.memory_space<vmem>>, %arg2: memref<128x128xbf16, #tpu.memory_space<vmem>>, %arg3: memref<49x128x128xbf16, #tpu.memory_space<vmem>>, %arg4: memref<25x128x128xbf16, #tpu.memory_space<vmem>>, %arg5: memref<9x128x128xbf16, #tpu.memory_space<vmem>>, %arg6: memref<9x128x128xbf16, #tpu.memory_space<vmem>>, %arg7: memref<64x256xf32, #tpu.memory_space<vmem>>, %arg8: memref<1x64x128xf32, #tpu.memory_space<vmem>>, %arg9: memref<22x22x128xf32, #tpu.memory_space<vmem>>, %arg10: memref<20x20x128xf32, #tpu.memory_space<vmem>>, %arg11: memref<10x10x128xf32, #tpu.memory_space<vmem>>, %arg12: memref<10x10x128xf32, #tpu.memory_space<vmem>>, %arg13: memref<256x128xf32, #tpu.memory_space<vmem>>, %arg14: memref<64x128xf32, #tpu.memory_space<vmem>>) attributes {dimension_semantics = [#tpu.dimension_semantics<parallel>], iteration_bounds = array<i64: 2>, scalar_prefetch = 0 : i64, scratch_operands = 6 : i64, tpu.core_type = #tpu.core_type<tc>, window_params = [{transform_indices = @transform_0, window_bounds = array<i64: 1, 256, 128>}, {pipeline_mode = #tpu.pipeline_mode<synchronous>, transform_indices = @transform_1, window_bounds = array<i64: 128, 128>}, {pipeline_mode = #tpu.pipeline_mode<synchronous>, transform_indices = @transform_2, window_bounds = array<i64: 49, 128, 128>}, {pipeline_mode = #tpu.pipeline_mode<synchronous>, transform_indices = @transform_3, window_bounds = array<i64: 25, 128, 128>}, {pipeline_mode = #tpu.pipeline_mode<synchronous>, transform_indices = @transform_4, window_bounds = array<i64: 9, 128, 128>}, {pipeline_mode = #tpu.pipeline_mode<synchronous>, transform_indices = @transform_5, window_bounds = array<i64: 9, 128, 128>}, {pipeline_mode = #tpu.pipeline_mode<synchronous>, transform_indices = @transform_6, window_bounds = array<i64: 64, 256>}, {transform_indices = @transform_7, window_bounds = array<i64: 1, 64, 128>}]} {
    %cst = arith.constant 0.000000e+00 : f32
    %0 = vector.broadcast %cst : f32 to vector<22x22x128xf32>
    %c0 = arith.constant 0 : index
    %c0_0 = arith.constant 0 : index
    %c0_1 = arith.constant 0 : index
    %1 = vector.load %arg9[%c0, %c0_0, %c0_1] : memref<22x22x128xf32, #tpu.memory_space<vmem>>, vector<22x22x128xf32>
    tpu.vector_store %arg9[%c0, %c0_0, %c0_1], %0 {strides = array<i32>} : memref<22x22x128xf32, #tpu.memory_space<vmem>>, vector<22x22x128xf32>,
    %cst_2 = arith.constant 0.000000e+00 : f32
    %2 = vector.broadcast %cst_2 : f32 to vector<20x20x128xf32>
    %c0_3 = arith.constant 0 : index
    %c0_4 = arith.constant 0 : index
    %c0_5 = arith.constant 0 : index
    %3 = vector.load %arg10[%c0_3, %c0_4, %c0_5] : memref<20x20x128xf32, #tpu.memory_space<vmem>>, vector<20x20x128xf32>
    tpu.vector_store %arg10[%c0_3, %c0_4, %c0_5], %2 {strides = array<i32>} : memref<20x20x128xf32, #tpu.memory_space<vmem>>, vector<20x20x128xf32>,
    %cst_6 = arith.constant 0.000000e+00 : f32
    %4 = vector.broadcast %cst_6 : f32 to vector<10x10x128xf32>
    %c0_7 = arith.constant 0 : index
    %c0_8 = arith.constant 0 : index
    %c0_9 = arith.constant 0 : index
    %5 = vector.load %arg11[%c0_7, %c0_8, %c0_9] : memref<10x10x128xf32, #tpu.memory_space<vmem>>, vector<10x10x128xf32>
    tpu.vector_store %arg11[%c0_7, %c0_8, %c0_9], %4 {strides = array<i32>} : memref<10x10x128xf32, #tpu.memory_space<vmem>>, vector<10x10x128xf32>,
    %cst_10 = arith.constant 0.000000e+00 : f32
    %6 = vector.broadcast %cst_10 : f32 to vector<10x10x128xf32>
    %c0_11 = arith.constant 0 : index
    %c0_12 = arith.constant 0 : index
    %c0_13 = arith.constant 0 : index
    %7 = vector.load %arg12[%c0_11, %c0_12, %c0_13] : memref<10x10x128xf32, #tpu.memory_space<vmem>>, vector<10x10x128xf32>
    tpu.vector_store %arg12[%c0_11, %c0_12, %c0_13], %6 {strides = array<i32>} : memref<10x10x128xf32, #tpu.memory_space<vmem>>, vector<10x10x128xf32>,
    %c0_14 = arith.constant 0 : index
    %c0_15 = arith.constant 0 : index
    %c0_16 = arith.constant 0 : index
    %8 = vector.load %arg1[%c0_14, %c0_15, %c0_16] : memref<1x256x128xbf16, #tpu.memory_space<vmem>>, vector<1x256x128xbf16>
    %9 = vector.shape_cast %8 : vector<1x256x128xbf16> to vector<256x128xbf16>
    %c0_17 = arith.constant 0 : index
    %c0_18 = arith.constant 0 : index
    %10 = vector.load %arg2[%c0_17, %c0_18] : memref<128x128xbf16, #tpu.memory_space<vmem>>, vector<128x128xbf16>
    %cst_19 = arith.constant dense<0.000000e+00> : vector<256x128xf32>
    %11 = tpu.matmul %9, %10, %cst_19 {dimension_numbers = #tpu.dot_dimension_numbers<[1], [0], [0], [1], [0, 0, 1, 1], [], []>} : vector<256x128xbf16>, vector<128x128xbf16>, vector<256x128xf32> -> vector<256x128xf32>
    %cst_20 = arith.constant 0.000000e+00 : f32
    %12 = vector.broadcast %cst_20 : f32 to vector<256x128xf32>
    %13 = arith.cmpf oge, %11, %12 : vector<256x128xf32>
    %cst_21 = arith.constant 2.000000e-01 : f32
    %14 = vector.broadcast %cst_21 : f32 to vector<256x128xf32>
    %15 = arith.mulf %14, %11 : vector<256x128xf32>
    %16 = arith.select %13, %11, %15 : vector<256x128xi1>, vector<256x128xf32>
    %17 = vector.shape_cast %16 : vector<256x128xf32> to vector<16x16x128xf32>
    %c3 = arith.constant 3 : index
    %c3_22 = arith.constant 3 : index
    %c0_23 = arith.constant 0 : index
    %18 = vector.load %arg9[%c3, %c3_22, %c0_23] : memref<22x22x128xf32, #tpu.memory_space<vmem>>, vector<16x16x128xf32>
    tpu.vector_store %arg9[%c3, %c3_22, %c0_23], %17 {strides = array<i32>} : memref<22x22x128xf32, #tpu.memory_space<vmem>>, vector<16x16x128xf32>,
    %cst_24 = arith.constant 0.000000e+00 : f32
    %19 = vector.broadcast %cst_24 : f32 to vector<256x128xf32>
    %c0_25 = arith.constant 0 : index
    %c0_26 = arith.constant 0 : index
    %20 = vector.load %arg13[%c0_25, %c0_26] : memref<256x128xf32, #tpu.memory_space<vmem>>, vector<256x128xf32>
    tpu.vector_store %arg13[%c0_25, %c0_26], %19 {strides = array<i32>} : memref<256x128xf32, #tpu.memory_space<vmem>>, vector<256x128xf32>,
    %c0_i32 = arith.constant 0 : i32
    %c7_i32 = arith.constant 7 : i32
    %21 = arith.addi %c0_i32, %c7_i32 : i32
    %c1_i32 = arith.constant 1 : i32
    scf.for %arg15 = %c0_i32 to %21 step %c1_i32  : i32 {
      %80 = arith.index_cast %arg15 : i32 to index
      %c0_131 = arith.constant 0 : index
      %c0_132 = arith.constant 0 : index
      %81 = vector.load %arg9[%80, %c0_131, %c0_132] : memref<22x22x128xf32, #tpu.memory_space<vmem>>, vector<16x16x128xf32>
      %82 = vector.shape_cast %81 : vector<16x16x128xf32> to vector<256x128xf32>
      %83 = arith.truncf %82 : vector<256x128xf32> to vector<256x128xbf16>
      %c0_133 = arith.constant 0 : index
      %c0_134 = arith.constant 0 : index
      %84 = vector.load %arg13[%c0_133, %c0_134] : memref<256x128xf32, #tpu.memory_space<vmem>>, vector<256x128xf32>
      %c7_i32_135 = arith.constant 7 : i32
      %85 = arith.muli %arg15, %c7_i32_135 : i32
      %c0_i32_136 = arith.constant 0 : i32
      %86 = arith.addi %85, %c0_i32_136 : i32
      %87 = arith.index_cast %86 : i32 to index
      %c0_137 = arith.constant 0 : index
      %c0_138 = arith.constant 0 : index
      %88 = vector.load %arg3[%87, %c0_137, %c0_138] : memref<49x128x128xbf16, #tpu.memory_space<vmem>>, vector<1x128x128xbf16>
      %89 = vector.shape_cast %88 : vector<1x128x128xbf16> to vector<128x128xbf16>
      %cst_139 = arith.constant dense<0.000000e+00> : vector<256x128xf32>
      %90 = tpu.matmul %83, %89, %cst_139 {dimension_numbers = #tpu.dot_dimension_numbers<[1], [0], [0], [1], [0, 0, 1, 1], [], []>} : vector<256x128xbf16>, vector<128x128xbf16>, vector<256x128xf32> -> vector<256x128xf32>
      %91 = arith.addf %84, %90 : vector<256x128xf32>
      %c0_140 = arith.constant 0 : index
      %c0_141 = arith.constant 0 : index
      %92 = vector.load %arg13[%c0_140, %c0_141] : memref<256x128xf32, #tpu.memory_space<vmem>>, vector<256x128xf32>
      tpu.vector_store %arg13[%c0_140, %c0_141], %91 {strides = array<i32>} : memref<256x128xf32, #tpu.memory_space<vmem>>, vector<256x128xf32>,
    }
    %c7_i32_27 = arith.constant 7 : i32
    %c0_i32_28 = arith.constant 0 : i32
    %c7_i32_29 = arith.constant 7 : i32
    %22 = arith.addi %c0_i32_28, %c7_i32_29 : i32
    %c1_i32_30 = arith.constant 1 : i32
    scf.for %arg15 = %c0_i32_28 to %22 step %c1_i32_30  : i32 {
      %80 = arith.index_cast %arg15 : i32 to index
      %c1_131 = arith.constant 1 : index
      %c0_132 = arith.constant 0 : index
      %81 = vector.load %arg9[%80, %c1_131, %c0_132] : memref<22x22x128xf32, #tpu.memory_space<vmem>>, vector<16x16x128xf32>
      %82 = vector.shape_cast %81 : vector<16x16x128xf32> to vector<256x128xf32>
      %83 = arith.truncf %82 : vector<256x128xf32> to vector<256x128xbf16>
      %c0_133 = arith.constant 0 : index
      %c0_134 = arith.constant 0 : index
      %84 = vector.load %arg13[%c0_133, %c0_134] : memref<256x128xf32, #tpu.memory_space<vmem>>, vector<256x128xf32>
      %c7_i32_135 = arith.constant 7 : i32
      %85 = arith.muli %arg15, %c7_i32_135 : i32
      %c1_i32_136 = arith.constant 1 : i32
      %86 = arith.addi %85, %c1_i32_136 : i32
      %87 = arith.index_cast %86 : i32 to index
      %c0_137 = arith.constant 0 : index
      %c0_138 = arith.constant 0 : index
      %88 = vector.load %arg3[%87, %c0_137, %c0_138] : memref<49x128x128xbf16, #tpu.memory_space<vmem>>, vector<1x128x128xbf16>
      %89 = vector.shape_cast %88 : vector<1x128x128xbf16> to vector<128x128xbf16>
      %cst_139 = arith.constant dense<0.000000e+00> : vector<256x128xf32>
      %90 = tpu.matmul %83, %89, %cst_139 {dimension_numbers = #tpu.dot_dimension_numbers<[1], [0], [0], [1], [0, 0, 1, 1], [], []>} : vector<256x128xbf16>, vector<128x128xbf16>, vector<256x128xf32> -> vector<256x128xf32>
      %91 = arith.addf %84, %90 : vector<256x128xf32>
      %c0_140 = arith.constant 0 : index
      %c0_141 = arith.constant 0 : index
      %92 = vector.load %arg13[%c0_140, %c0_141] : memref<256x128xf32, #tpu.memory_space<vmem>>, vector<256x128xf32>
      tpu.vector_store %arg13[%c0_140, %c0_141], %91 {strides = array<i32>} : memref<256x128xf32, #tpu.memory_space<vmem>>, vector<256x128xf32>,
    }
    %c7_i32_31 = arith.constant 7 : i32
    %c0_i32_32 = arith.constant 0 : i32
    %c7_i32_33 = arith.constant 7 : i32
    %23 = arith.addi %c0_i32_32, %c7_i32_33 : i32
    %c1_i32_34 = arith.constant 1 : i32
    scf.for %arg15 = %c0_i32_32 to %23 step %c1_i32_34  : i32 {
      %80 = arith.index_cast %arg15 : i32 to index
      %c2_131 = arith.constant 2 : index
      %c0_132 = arith.constant 0 : index
      %81 = vector.load %arg9[%80, %c2_131, %c0_132] : memref<22x22x128xf32, #tpu.memory_space<vmem>>, vector<16x16x128xf32>
      %82 = vector.shape_cast %81 : vector<16x16x128xf32> to vector<256x128xf32>
      %83 = arith.truncf %82 : vector<256x128xf32> to vector<256x128xbf16>
      %c0_133 = arith.constant 0 : index
      %c0_134 = arith.constant 0 : index
      %84 = vector.load %arg13[%c0_133, %c0_134] : memref<256x128xf32, #tpu.memory_space<vmem>>, vector<256x128xf32>
      %c7_i32_135 = arith.constant 7 : i32
      %85 = arith.muli %arg15, %c7_i32_135 : i32
      %c2_i32 = arith.constant 2 : i32
      %86 = arith.addi %85, %c2_i32 : i32
      %87 = arith.index_cast %86 : i32 to index
      %c0_136 = arith.constant 0 : index
      %c0_137 = arith.constant 0 : index
      %88 = vector.load %arg3[%87, %c0_136, %c0_137] : memref<49x128x128xbf16, #tpu.memory_space<vmem>>, vector<1x128x128xbf16>
      %89 = vector.shape_cast %88 : vector<1x128x128xbf16> to vector<128x128xbf16>
      %cst_138 = arith.constant dense<0.000000e+00> : vector<256x128xf32>
      %90 = tpu.matmul %83, %89, %cst_138 {dimension_numbers = #tpu.dot_dimension_numbers<[1], [0], [0], [1], [0, 0, 1, 1], [], []>} : vector<256x128xbf16>, vector<128x128xbf16>, vector<256x128xf32> -> vector<256x128xf32>
      %91 = arith.addf %84, %90 : vector<256x128xf32>
      %c0_139 = arith.constant 0 : index
      %c0_140 = arith.constant 0 : index
      %92 = vector.load %arg13[%c0_139, %c0_140] : memref<256x128xf32, #tpu.memory_space<vmem>>, vector<256x128xf32>
      tpu.vector_store %arg13[%c0_139, %c0_140], %91 {strides = array<i32>} : memref<256x128xf32, #tpu.memory_space<vmem>>, vector<256x128xf32>,
    }
    %c7_i32_35 = arith.constant 7 : i32
    %c0_i32_36 = arith.constant 0 : i32
    %c7_i32_37 = arith.constant 7 : i32
    %24 = arith.addi %c0_i32_36, %c7_i32_37 : i32
    %c1_i32_38 = arith.constant 1 : i32
    scf.for %arg15 = %c0_i32_36 to %24 step %c1_i32_38  : i32 {
      %80 = arith.index_cast %arg15 : i32 to index
      %c3_131 = arith.constant 3 : index
      %c0_132 = arith.constant 0 : index
      %81 = vector.load %arg9[%80, %c3_131, %c0_132] : memref<22x22x128xf32, #tpu.memory_space<vmem>>, vector<16x16x128xf32>
      %82 = vector.shape_cast %81 : vector<16x16x128xf32> to vector<256x128xf32>
      %83 = arith.truncf %82 : vector<256x128xf32> to vector<256x128xbf16>
      %c0_133 = arith.constant 0 : index
      %c0_134 = arith.constant 0 : index
      %84 = vector.load %arg13[%c0_133, %c0_134] : memref<256x128xf32, #tpu.memory_space<vmem>>, vector<256x128xf32>
      %c7_i32_135 = arith.constant 7 : i32
      %85 = arith.muli %arg15, %c7_i32_135 : i32
      %c3_i32_136 = arith.constant 3 : i32
      %86 = arith.addi %85, %c3_i32_136 : i32
      %87 = arith.index_cast %86 : i32 to index
      %c0_137 = arith.constant 0 : index
      %c0_138 = arith.constant 0 : index
      %88 = vector.load %arg3[%87, %c0_137, %c0_138] : memref<49x128x128xbf16, #tpu.memory_space<vmem>>, vector<1x128x128xbf16>
      %89 = vector.shape_cast %88 : vector<1x128x128xbf16> to vector<128x128xbf16>
      %cst_139 = arith.constant dense<0.000000e+00> : vector<256x128xf32>
      %90 = tpu.matmul %83, %89, %cst_139 {dimension_numbers = #tpu.dot_dimension_numbers<[1], [0], [0], [1], [0, 0, 1, 1], [], []>} : vector<256x128xbf16>, vector<128x128xbf16>, vector<256x128xf32> -> vector<256x128xf32>
      %91 = arith.addf %84, %90 : vector<256x128xf32>
      %c0_140 = arith.constant 0 : index
      %c0_141 = arith.constant 0 : index
      %92 = vector.load %arg13[%c0_140, %c0_141] : memref<256x128xf32, #tpu.memory_space<vmem>>, vector<256x128xf32>
      tpu.vector_store %arg13[%c0_140, %c0_141], %91 {strides = array<i32>} : memref<256x128xf32, #tpu.memory_space<vmem>>, vector<256x128xf32>,
    }
    %c7_i32_39 = arith.constant 7 : i32
    %c0_i32_40 = arith.constant 0 : i32
    %c7_i32_41 = arith.constant 7 : i32
    %25 = arith.addi %c0_i32_40, %c7_i32_41 : i32
    %c1_i32_42 = arith.constant 1 : i32
    scf.for %arg15 = %c0_i32_40 to %25 step %c1_i32_42  : i32 {
      %80 = arith.index_cast %arg15 : i32 to index
      %c4 = arith.constant 4 : index
      %c0_131 = arith.constant 0 : index
      %81 = vector.load %arg9[%80, %c4, %c0_131] : memref<22x22x128xf32, #tpu.memory_space<vmem>>, vector<16x16x128xf32>
      %82 = vector.shape_cast %81 : vector<16x16x128xf32> to vector<256x128xf32>
      %83 = arith.truncf %82 : vector<256x128xf32> to vector<256x128xbf16>
      %c0_132 = arith.constant 0 : index
      %c0_133 = arith.constant 0 : index
      %84 = vector.load %arg13[%c0_132, %c0_133] : memref<256x128xf32, #tpu.memory_space<vmem>>, vector<256x128xf32>
      %c7_i32_134 = arith.constant 7 : i32
      %85 = arith.muli %arg15, %c7_i32_134 : i32
      %c4_i32 = arith.constant 4 : i32
      %86 = arith.addi %85, %c4_i32 : i32
      %87 = arith.index_cast %86 : i32 to index
      %c0_135 = arith.constant 0 : index
      %c0_136 = arith.constant 0 : index
      %88 = vector.load %arg3[%87, %c0_135, %c0_136] : memref<49x128x128xbf16, #tpu.memory_space<vmem>>, vector<1x128x128xbf16>
      %89 = vector.shape_cast %88 : vector<1x128x128xbf16> to vector<128x128xbf16>
      %cst_137 = arith.constant dense<0.000000e+00> : vector<256x128xf32>
      %90 = tpu.matmul %83, %89, %cst_137 {dimension_numbers = #tpu.dot_dimension_numbers<[1], [0], [0], [1], [0, 0, 1, 1], [], []>} : vector<256x128xbf16>, vector<128x128xbf16>, vector<256x128xf32> -> vector<256x128xf32>
      %91 = arith.addf %84, %90 : vector<256x128xf32>
      %c0_138 = arith.constant 0 : index
      %c0_139 = arith.constant 0 : index
      %92 = vector.load %arg13[%c0_138, %c0_139] : memref<256x128xf32, #tpu.memory_space<vmem>>, vector<256x128xf32>
      tpu.vector_store %arg13[%c0_138, %c0_139], %91 {strides = array<i32>} : memref<256x128xf32, #tpu.memory_space<vmem>>, vector<256x128xf32>,
    }
    %c7_i32_43 = arith.constant 7 : i32
    %c0_i32_44 = arith.constant 0 : i32
    %c7_i32_45 = arith.constant 7 : i32
    %26 = arith.addi %c0_i32_44, %c7_i32_45 : i32
    %c1_i32_46 = arith.constant 1 : i32
    scf.for %arg15 = %c0_i32_44 to %26 step %c1_i32_46  : i32 {
      %80 = arith.index_cast %arg15 : i32 to index
      %c5 = arith.constant 5 : index
      %c0_131 = arith.constant 0 : index
      %81 = vector.load %arg9[%80, %c5, %c0_131] : memref<22x22x128xf32, #tpu.memory_space<vmem>>, vector<16x16x128xf32>
      %82 = vector.shape_cast %81 : vector<16x16x128xf32> to vector<256x128xf32>
      %83 = arith.truncf %82 : vector<256x128xf32> to vector<256x128xbf16>
      %c0_132 = arith.constant 0 : index
      %c0_133 = arith.constant 0 : index
      %84 = vector.load %arg13[%c0_132, %c0_133] : memref<256x128xf32, #tpu.memory_space<vmem>>, vector<256x128xf32>
      %c7_i32_134 = arith.constant 7 : i32
      %85 = arith.muli %arg15, %c7_i32_134 : i32
      %c5_i32_135 = arith.constant 5 : i32
      %86 = arith.addi %85, %c5_i32_135 : i32
      %87 = arith.index_cast %86 : i32 to index
      %c0_136 = arith.constant 0 : index
      %c0_137 = arith.constant 0 : index
      %88 = vector.load %arg3[%87, %c0_136, %c0_137] : memref<49x128x128xbf16, #tpu.memory_space<vmem>>, vector<1x128x128xbf16>
      %89 = vector.shape_cast %88 : vector<1x128x128xbf16> to vector<128x128xbf16>
      %cst_138 = arith.constant dense<0.000000e+00> : vector<256x128xf32>
      %90 = tpu.matmul %83, %89, %cst_138 {dimension_numbers = #tpu.dot_dimension_numbers<[1], [0], [0], [1], [0, 0, 1, 1], [], []>} : vector<256x128xbf16>, vector<128x128xbf16>, vector<256x128xf32> -> vector<256x128xf32>
      %91 = arith.addf %84, %90 : vector<256x128xf32>
      %c0_139 = arith.constant 0 : index
      %c0_140 = arith.constant 0 : index
      %92 = vector.load %arg13[%c0_139, %c0_140] : memref<256x128xf32, #tpu.memory_space<vmem>>, vector<256x128xf32>
      tpu.vector_store %arg13[%c0_139, %c0_140], %91 {strides = array<i32>} : memref<256x128xf32, #tpu.memory_space<vmem>>, vector<256x128xf32>,
    }
    %c7_i32_47 = arith.constant 7 : i32
    %c0_i32_48 = arith.constant 0 : i32
    %c7_i32_49 = arith.constant 7 : i32
    %27 = arith.addi %c0_i32_48, %c7_i32_49 : i32
    %c1_i32_50 = arith.constant 1 : i32
    scf.for %arg15 = %c0_i32_48 to %27 step %c1_i32_50  : i32 {
      %80 = arith.index_cast %arg15 : i32 to index
      %c6 = arith.constant 6 : index
      %c0_131 = arith.constant 0 : index
      %81 = vector.load %arg9[%80, %c6, %c0_131] : memref<22x22x128xf32, #tpu.memory_space<vmem>>, vector<16x16x128xf32>
      %82 = vector.shape_cast %81 : vector<16x16x128xf32> to vector<256x128xf32>
      %83 = arith.truncf %82 : vector<256x128xf32> to vector<256x128xbf16>
      %c0_132 = arith.constant 0 : index
      %c0_133 = arith.constant 0 : index
      %84 = vector.load %arg13[%c0_132, %c0_133] : memref<256x128xf32, #tpu.memory_space<vmem>>, vector<256x128xf32>
      %c7_i32_134 = arith.constant 7 : i32
      %85 = arith.muli %arg15, %c7_i32_134 : i32
      %c6_i32 = arith.constant 6 : i32
      %86 = arith.addi %85, %c6_i32 : i32
      %87 = arith.index_cast %86 : i32 to index
      %c0_135 = arith.constant 0 : index
      %c0_136 = arith.constant 0 : index
      %88 = vector.load %arg3[%87, %c0_135, %c0_136] : memref<49x128x128xbf16, #tpu.memory_space<vmem>>, vector<1x128x128xbf16>
      %89 = vector.shape_cast %88 : vector<1x128x128xbf16> to vector<128x128xbf16>
      %cst_137 = arith.constant dense<0.000000e+00> : vector<256x128xf32>
      %90 = tpu.matmul %83, %89, %cst_137 {dimension_numbers = #tpu.dot_dimension_numbers<[1], [0], [0], [1], [0, 0, 1, 1], [], []>} : vector<256x128xbf16>, vector<128x128xbf16>, vector<256x128xf32> -> vector<256x128xf32>
      %91 = arith.addf %84, %90 : vector<256x128xf32>
      %c0_138 = arith.constant 0 : index
      %c0_139 = arith.constant 0 : index
      %92 = vector.load %arg13[%c0_138, %c0_139] : memref<256x128xf32, #tpu.memory_space<vmem>>, vector<256x128xf32>
      tpu.vector_store %arg13[%c0_138, %c0_139], %91 {strides = array<i32>} : memref<256x128xf32, #tpu.memory_space<vmem>>, vector<256x128xf32>,
    }
    %c7_i32_51 = arith.constant 7 : i32
    %c0_52 = arith.constant 0 : index
    %c0_53 = arith.constant 0 : index
    %28 = vector.load %arg13[%c0_52, %c0_53] : memref<256x128xf32, #tpu.memory_space<vmem>>, vector<256x128xf32>
    %cst_54 = arith.constant 0.000000e+00 : f32
    %29 = vector.broadcast %cst_54 : f32 to vector<256x128xf32>
    %30 = arith.cmpf oge, %28, %29 : vector<256x128xf32>
    %cst_55 = arith.constant 2.000000e-01 : f32
    %31 = vector.broadcast %cst_55 : f32 to vector<256x128xf32>
    %32 = arith.mulf %31, %28 : vector<256x128xf32>
    %33 = arith.select %30, %28, %32 : vector<256x128xi1>, vector<256x128xf32>
    %34 = vector.shape_cast %33 : vector<256x128xf32> to vector<16x16x128xf32>
    %c2 = arith.constant 2 : index
    %c2_56 = arith.constant 2 : index
    %c0_57 = arith.constant 0 : index
    %35 = vector.load %arg10[%c2, %c2_56, %c0_57] : memref<20x20x128xf32, #tpu.memory_space<vmem>>, vector<16x16x128xf32>
    tpu.vector_store %arg10[%c2, %c2_56, %c0_57], %34 {strides = array<i32>} : memref<20x20x128xf32, #tpu.memory_space<vmem>>, vector<16x16x128xf32>,
    %cst_58 = arith.constant 0.000000e+00 : f32
    %36 = vector.broadcast %cst_58 : f32 to vector<256x128xf32>
    %c0_59 = arith.constant 0 : index
    %c0_60 = arith.constant 0 : index
    %37 = vector.load %arg13[%c0_59, %c0_60] : memref<256x128xf32, #tpu.memory_space<vmem>>, vector<256x128xf32>
    tpu.vector_store %arg13[%c0_59, %c0_60], %36 {strides = array<i32>} : memref<256x128xf32, #tpu.memory_space<vmem>>, vector<256x128xf32>,
    %c0_i32_61 = arith.constant 0 : i32
    %c5_i32 = arith.constant 5 : i32
    %38 = arith.addi %c0_i32_61, %c5_i32 : i32
    %c1_i32_62 = arith.constant 1 : i32
    scf.for %arg15 = %c0_i32_61 to %38 step %c1_i32_62  : i32 {
      %80 = arith.index_cast %arg15 : i32 to index
      %c0_131 = arith.constant 0 : index
      %c0_132 = arith.constant 0 : index
      %81 = vector.load %arg10[%80, %c0_131, %c0_132] : memref<20x20x128xf32, #tpu.memory_space<vmem>>, vector<16x16x128xf32>
      %82 = vector.shape_cast %81 : vector<16x16x128xf32> to vector<256x128xf32>
      %83 = arith.truncf %82 : vector<256x128xf32> to vector<256x128xbf16>
      %c0_133 = arith.constant 0 : index
      %c0_134 = arith.constant 0 : index
      %84 = vector.load %arg13[%c0_133, %c0_134] : memref<256x128xf32, #tpu.memory_space<vmem>>, vector<256x128xf32>
      %c5_i32_135 = arith.constant 5 : i32
      %85 = arith.muli %arg15, %c5_i32_135 : i32
      %c0_i32_136 = arith.constant 0 : i32
      %86 = arith.addi %85, %c0_i32_136 : i32
      %87 = arith.index_cast %86 : i32 to index
      %c0_137 = arith.constant 0 : index
      %c0_138 = arith.constant 0 : index
      %88 = vector.load %arg4[%87, %c0_137, %c0_138] : memref<25x128x128xbf16, #tpu.memory_space<vmem>>, vector<1x128x128xbf16>
      %89 = vector.shape_cast %88 : vector<1x128x128xbf16> to vector<128x128xbf16>
      %cst_139 = arith.constant dense<0.000000e+00> : vector<256x128xf32>
      %90 = tpu.matmul %83, %89, %cst_139 {dimension_numbers = #tpu.dot_dimension_numbers<[1], [0], [0], [1], [0, 0, 1, 1], [], []>} : vector<256x128xbf16>, vector<128x128xbf16>, vector<256x128xf32> -> vector<256x128xf32>
      %91 = arith.addf %84, %90 : vector<256x128xf32>
      %c0_140 = arith.constant 0 : index
      %c0_141 = arith.constant 0 : index
      %92 = vector.load %arg13[%c0_140, %c0_141] : memref<256x128xf32, #tpu.memory_space<vmem>>, vector<256x128xf32>
      tpu.vector_store %arg13[%c0_140, %c0_141], %91 {strides = array<i32>} : memref<256x128xf32, #tpu.memory_space<vmem>>, vector<256x128xf32>,
    }
    %c5_i32_63 = arith.constant 5 : i32
    %c0_i32_64 = arith.constant 0 : i32
    %c5_i32_65 = arith.constant 5 : i32
    %39 = arith.addi %c0_i32_64, %c5_i32_65 : i32
    %c1_i32_66 = arith.constant 1 : i32
    scf.for %arg15 = %c0_i32_64 to %39 step %c1_i32_66  : i32 {
      %80 = arith.index_cast %arg15 : i32 to index
      %c1_131 = arith.constant 1 : index
      %c0_132 = arith.constant 0 : index
      %81 = vector.load %arg10[%80, %c1_131, %c0_132] : memref<20x20x128xf32, #tpu.memory_space<vmem>>, vector<16x16x128xf32>
      %82 = vector.shape_cast %81 : vector<16x16x128xf32> to vector<256x128xf32>
      %83 = arith.truncf %82 : vector<256x128xf32> to vector<256x128xbf16>
      %c0_133 = arith.constant 0 : index
      %c0_134 = arith.constant 0 : index
      %84 = vector.load %arg13[%c0_133, %c0_134] : memref<256x128xf32, #tpu.memory_space<vmem>>, vector<256x128xf32>
      %c5_i32_135 = arith.constant 5 : i32
      %85 = arith.muli %arg15, %c5_i32_135 : i32
      %c1_i32_136 = arith.constant 1 : i32
      %86 = arith.addi %85, %c1_i32_136 : i32
      %87 = arith.index_cast %86 : i32 to index
      %c0_137 = arith.constant 0 : index
      %c0_138 = arith.constant 0 : index
      %88 = vector.load %arg4[%87, %c0_137, %c0_138] : memref<25x128x128xbf16, #tpu.memory_space<vmem>>, vector<1x128x128xbf16>
      %89 = vector.shape_cast %88 : vector<1x128x128xbf16> to vector<128x128xbf16>
      %cst_139 = arith.constant dense<0.000000e+00> : vector<256x128xf32>
      %90 = tpu.matmul %83, %89, %cst_139 {dimension_numbers = #tpu.dot_dimension_numbers<[1], [0], [0], [1], [0, 0, 1, 1], [], []>} : vector<256x128xbf16>, vector<128x128xbf16>, vector<256x128xf32> -> vector<256x128xf32>
      %91 = arith.addf %84, %90 : vector<256x128xf32>
      %c0_140 = arith.constant 0 : index
      %c0_141 = arith.constant 0 : index
      %92 = vector.load %arg13[%c0_140, %c0_141] : memref<256x128xf32, #tpu.memory_space<vmem>>, vector<256x128xf32>
      tpu.vector_store %arg13[%c0_140, %c0_141], %91 {strides = array<i32>} : memref<256x128xf32, #tpu.memory_space<vmem>>, vector<256x128xf32>,
    }
    %c5_i32_67 = arith.constant 5 : i32
    %c0_i32_68 = arith.constant 0 : i32
    %c5_i32_69 = arith.constant 5 : i32
    %40 = arith.addi %c0_i32_68, %c5_i32_69 : i32
    %c1_i32_70 = arith.constant 1 : i32
    scf.for %arg15 = %c0_i32_68 to %40 step %c1_i32_70  : i32 {
      %80 = arith.index_cast %arg15 : i32 to index
      %c2_131 = arith.constant 2 : index
      %c0_132 = arith.constant 0 : index
      %81 = vector.load %arg10[%80, %c2_131, %c0_132] : memref<20x20x128xf32, #tpu.memory_space<vmem>>, vector<16x16x128xf32>
      %82 = vector.shape_cast %81 : vector<16x16x128xf32> to vector<256x128xf32>
      %83 = arith.truncf %82 : vector<256x128xf32> to vector<256x128xbf16>
      %c0_133 = arith.constant 0 : index
      %c0_134 = arith.constant 0 : index
      %84 = vector.load %arg13[%c0_133, %c0_134] : memref<256x128xf32, #tpu.memory_space<vmem>>, vector<256x128xf32>
      %c5_i32_135 = arith.constant 5 : i32
      %85 = arith.muli %arg15, %c5_i32_135 : i32
      %c2_i32 = arith.constant 2 : i32
      %86 = arith.addi %85, %c2_i32 : i32
      %87 = arith.index_cast %86 : i32 to index
      %c0_136 = arith.constant 0 : index
      %c0_137 = arith.constant 0 : index
      %88 = vector.load %arg4[%87, %c0_136, %c0_137] : memref<25x128x128xbf16, #tpu.memory_space<vmem>>, vector<1x128x128xbf16>
      %89 = vector.shape_cast %88 : vector<1x128x128xbf16> to vector<128x128xbf16>
      %cst_138 = arith.constant dense<0.000000e+00> : vector<256x128xf32>
      %90 = tpu.matmul %83, %89, %cst_138 {dimension_numbers = #tpu.dot_dimension_numbers<[1], [0], [0], [1], [0, 0, 1, 1], [], []>} : vector<256x128xbf16>, vector<128x128xbf16>, vector<256x128xf32> -> vector<256x128xf32>
      %91 = arith.addf %84, %90 : vector<256x128xf32>
      %c0_139 = arith.constant 0 : index
      %c0_140 = arith.constant 0 : index
      %92 = vector.load %arg13[%c0_139, %c0_140] : memref<256x128xf32, #tpu.memory_space<vmem>>, vector<256x128xf32>
      tpu.vector_store %arg13[%c0_139, %c0_140], %91 {strides = array<i32>} : memref<256x128xf32, #tpu.memory_space<vmem>>, vector<256x128xf32>,
    }
    %c5_i32_71 = arith.constant 5 : i32
    %c0_i32_72 = arith.constant 0 : i32
    %c5_i32_73 = arith.constant 5 : i32
    %41 = arith.addi %c0_i32_72, %c5_i32_73 : i32
    %c1_i32_74 = arith.constant 1 : i32
    scf.for %arg15 = %c0_i32_72 to %41 step %c1_i32_74  : i32 {
      %80 = arith.index_cast %arg15 : i32 to index
      %c3_131 = arith.constant 3 : index
      %c0_132 = arith.constant 0 : index
      %81 = vector.load %arg10[%80, %c3_131, %c0_132] : memref<20x20x128xf32, #tpu.memory_space<vmem>>, vector<16x16x128xf32>
      %82 = vector.shape_cast %81 : vector<16x16x128xf32> to vector<256x128xf32>
      %83 = arith.truncf %82 : vector<256x128xf32> to vector<256x128xbf16>
      %c0_133 = arith.constant 0 : index
      %c0_134 = arith.constant 0 : index
      %84 = vector.load %arg13[%c0_133, %c0_134] : memref<256x128xf32, #tpu.memory_space<vmem>>, vector<256x128xf32>
      %c5_i32_135 = arith.constant 5 : i32
      %85 = arith.muli %arg15, %c5_i32_135 : i32
      %c3_i32_136 = arith.constant 3 : i32
      %86 = arith.addi %85, %c3_i32_136 : i32
      %87 = arith.index_cast %86 : i32 to index
      %c0_137 = arith.constant 0 : index
      %c0_138 = arith.constant 0 : index
      %88 = vector.load %arg4[%87, %c0_137, %c0_138] : memref<25x128x128xbf16, #tpu.memory_space<vmem>>, vector<1x128x128xbf16>
      %89 = vector.shape_cast %88 : vector<1x128x128xbf16> to vector<128x128xbf16>
      %cst_139 = arith.constant dense<0.000000e+00> : vector<256x128xf32>
      %90 = tpu.matmul %83, %89, %cst_139 {dimension_numbers = #tpu.dot_dimension_numbers<[1], [0], [0], [1], [0, 0, 1, 1], [], []>} : vector<256x128xbf16>, vector<128x128xbf16>, vector<256x128xf32> -> vector<256x128xf32>
      %91 = arith.addf %84, %90 : vector<256x128xf32>
      %c0_140 = arith.constant 0 : index
      %c0_141 = arith.constant 0 : index
      %92 = vector.load %arg13[%c0_140, %c0_141] : memref<256x128xf32, #tpu.memory_space<vmem>>, vector<256x128xf32>
      tpu.vector_store %arg13[%c0_140, %c0_141], %91 {strides = array<i32>} : memref<256x128xf32, #tpu.memory_space<vmem>>, vector<256x128xf32>,
    }
    %c5_i32_75 = arith.constant 5 : i32
    %c0_i32_76 = arith.constant 0 : i32
    %c5_i32_77 = arith.constant 5 : i32
    %42 = arith.addi %c0_i32_76, %c5_i32_77 : i32
    %c1_i32_78 = arith.constant 1 : i32
    scf.for %arg15 = %c0_i32_76 to %42 step %c1_i32_78  : i32 {
      %80 = arith.index_cast %arg15 : i32 to index
      %c4 = arith.constant 4 : index
      %c0_131 = arith.constant 0 : index
      %81 = vector.load %arg10[%80, %c4, %c0_131] : memref<20x20x128xf32, #tpu.memory_space<vmem>>, vector<16x16x128xf32>
      %82 = vector.shape_cast %81 : vector<16x16x128xf32> to vector<256x128xf32>
      %83 = arith.truncf %82 : vector<256x128xf32> to vector<256x128xbf16>
      %c0_132 = arith.constant 0 : index
      %c0_133 = arith.constant 0 : index
      %84 = vector.load %arg13[%c0_132, %c0_133] : memref<256x128xf32, #tpu.memory_space<vmem>>, vector<256x128xf32>
      %c5_i32_134 = arith.constant 5 : i32
      %85 = arith.muli %arg15, %c5_i32_134 : i32
      %c4_i32 = arith.constant 4 : i32
      %86 = arith.addi %85, %c4_i32 : i32
      %87 = arith.index_cast %86 : i32 to index
      %c0_135 = arith.constant 0 : index
      %c0_136 = arith.constant 0 : index
      %88 = vector.load %arg4[%87, %c0_135, %c0_136] : memref<25x128x128xbf16, #tpu.memory_space<vmem>>, vector<1x128x128xbf16>
      %89 = vector.shape_cast %88 : vector<1x128x128xbf16> to vector<128x128xbf16>
      %cst_137 = arith.constant dense<0.000000e+00> : vector<256x128xf32>
      %90 = tpu.matmul %83, %89, %cst_137 {dimension_numbers = #tpu.dot_dimension_numbers<[1], [0], [0], [1], [0, 0, 1, 1], [], []>} : vector<256x128xbf16>, vector<128x128xbf16>, vector<256x128xf32> -> vector<256x128xf32>
      %91 = arith.addf %84, %90 : vector<256x128xf32>
      %c0_138 = arith.constant 0 : index
      %c0_139 = arith.constant 0 : index
      %92 = vector.load %arg13[%c0_138, %c0_139] : memref<256x128xf32, #tpu.memory_space<vmem>>, vector<256x128xf32>
      tpu.vector_store %arg13[%c0_138, %c0_139], %91 {strides = array<i32>} : memref<256x128xf32, #tpu.memory_space<vmem>>, vector<256x128xf32>,
    }
    %c5_i32_79 = arith.constant 5 : i32
    %c0_80 = arith.constant 0 : index
    %c0_81 = arith.constant 0 : index
    %43 = vector.load %arg13[%c0_80, %c0_81] : memref<256x128xf32, #tpu.memory_space<vmem>>, vector<256x128xf32>
    %c0_82 = arith.constant 0 : index
    %c0_83 = arith.constant 0 : index
    %44 = vector.load %arg7[%c0_82, %c0_83] : memref<64x256xf32, #tpu.memory_space<vmem>>, vector<64x256xf32>
    %cst_84 = arith.constant dense<0.000000e+00> : vector<64x128xf32>
    %45 = tpu.matmul %44, %43, %cst_84 {dimension_numbers = #tpu.dot_dimension_numbers<[1], [0], [0], [1], [0, 0, 1, 1], [], []>} : vector<64x256xf32>, vector<256x128xf32>, vector<64x128xf32> -> vector<64x128xf32>
    %cst_85 = arith.constant 0.000000e+00 : f32
    %46 = vector.broadcast %cst_85 : f32 to vector<64x128xf32>
    %47 = arith.cmpf oge, %45, %46 : vector<64x128xf32>
    %cst_86 = arith.constant 2.000000e-01 : f32
    %48 = vector.broadcast %cst_86 : f32 to vector<64x128xf32>
    %49 = arith.mulf %48, %45 : vector<64x128xf32>
    %50 = arith.select %47, %45, %49 : vector<64x128xi1>, vector<64x128xf32>
    %51 = vector.shape_cast %50 : vector<64x128xf32> to vector<8x8x128xf32>
    %c1 = arith.constant 1 : index
    %c1_87 = arith.constant 1 : index
    %c0_88 = arith.constant 0 : index
    %52 = vector.load %arg11[%c1, %c1_87, %c0_88] : memref<10x10x128xf32, #tpu.memory_space<vmem>>, vector<8x8x128xf32>
    tpu.vector_store %arg11[%c1, %c1_87, %c0_88], %51 {strides = array<i32>} : memref<10x10x128xf32, #tpu.memory_space<vmem>>, vector<8x8x128xf32>,
    %cst_89 = arith.constant 0.000000e+00 : f32
    %53 = vector.broadcast %cst_89 : f32 to vector<64x128xf32>
    %c0_90 = arith.constant 0 : index
    %c0_91 = arith.constant 0 : index
    %54 = vector.load %arg14[%c0_90, %c0_91] : memref<64x128xf32, #tpu.memory_space<vmem>>, vector<64x128xf32>
    tpu.vector_store %arg14[%c0_90, %c0_91], %53 {strides = array<i32>} : memref<64x128xf32, #tpu.memory_space<vmem>>, vector<64x128xf32>,
    %c0_i32_92 = arith.constant 0 : i32
    %c3_i32 = arith.constant 3 : i32
    %55 = arith.addi %c0_i32_92, %c3_i32 : i32
    %c1_i32_93 = arith.constant 1 : i32
    scf.for %arg15 = %c0_i32_92 to %55 step %c1_i32_93  : i32 {
      %80 = arith.index_cast %arg15 : i32 to index
      %c0_131 = arith.constant 0 : index
      %c0_132 = arith.constant 0 : index
      %81 = vector.load %arg11[%80, %c0_131, %c0_132] : memref<10x10x128xf32, #tpu.memory_space<vmem>>, vector<8x8x128xf32>
      %82 = vector.shape_cast %81 : vector<8x8x128xf32> to vector<64x128xf32>
      %83 = arith.truncf %82 : vector<64x128xf32> to vector<64x128xbf16>
      %c0_133 = arith.constant 0 : index
      %c0_134 = arith.constant 0 : index
      %84 = vector.load %arg14[%c0_133, %c0_134] : memref<64x128xf32, #tpu.memory_space<vmem>>, vector<64x128xf32>
      %c3_i32_135 = arith.constant 3 : i32
      %85 = arith.muli %arg15, %c3_i32_135 : i32
      %c0_i32_136 = arith.constant 0 : i32
      %86 = arith.addi %85, %c0_i32_136 : i32
      %87 = arith.index_cast %86 : i32 to index
      %c0_137 = arith.constant 0 : index
      %c0_138 = arith.constant 0 : index
      %88 = vector.load %arg5[%87, %c0_137, %c0_138] : memref<9x128x128xbf16, #tpu.memory_space<vmem>>, vector<1x128x128xbf16>
      %89 = vector.shape_cast %88 : vector<1x128x128xbf16> to vector<128x128xbf16>
      %cst_139 = arith.constant dense<0.000000e+00> : vector<64x128xf32>
      %90 = tpu.matmul %83, %89, %cst_139 {dimension_numbers = #tpu.dot_dimension_numbers<[1], [0], [0], [1], [0, 0, 1, 1], [], []>} : vector<64x128xbf16>, vector<128x128xbf16>, vector<64x128xf32> -> vector<64x128xf32>
      %91 = arith.addf %84, %90 : vector<64x128xf32>
      %c0_140 = arith.constant 0 : index
      %c0_141 = arith.constant 0 : index
      %92 = vector.load %arg14[%c0_140, %c0_141] : memref<64x128xf32, #tpu.memory_space<vmem>>, vector<64x128xf32>
      tpu.vector_store %arg14[%c0_140, %c0_141], %91 {strides = array<i32>} : memref<64x128xf32, #tpu.memory_space<vmem>>, vector<64x128xf32>,
    }
    %c3_i32_94 = arith.constant 3 : i32
    %c0_i32_95 = arith.constant 0 : i32
    %c3_i32_96 = arith.constant 3 : i32
    %56 = arith.addi %c0_i32_95, %c3_i32_96 : i32
    %c1_i32_97 = arith.constant 1 : i32
    scf.for %arg15 = %c0_i32_95 to %56 step %c1_i32_97  : i32 {
      %80 = arith.index_cast %arg15 : i32 to index
      %c1_131 = arith.constant 1 : index
      %c0_132 = arith.constant 0 : index
      %81 = vector.load %arg11[%80, %c1_131, %c0_132] : memref<10x10x128xf32, #tpu.memory_space<vmem>>, vector<8x8x128xf32>
      %82 = vector.shape_cast %81 : vector<8x8x128xf32> to vector<64x128xf32>
      %83 = arith.truncf %82 : vector<64x128xf32> to vector<64x128xbf16>
      %c0_133 = arith.constant 0 : index
      %c0_134 = arith.constant 0 : index
      %84 = vector.load %arg14[%c0_133, %c0_134] : memref<64x128xf32, #tpu.memory_space<vmem>>, vector<64x128xf32>
      %c3_i32_135 = arith.constant 3 : i32
      %85 = arith.muli %arg15, %c3_i32_135 : i32
      %c1_i32_136 = arith.constant 1 : i32
      %86 = arith.addi %85, %c1_i32_136 : i32
      %87 = arith.index_cast %86 : i32 to index
      %c0_137 = arith.constant 0 : index
      %c0_138 = arith.constant 0 : index
      %88 = vector.load %arg5[%87, %c0_137, %c0_138] : memref<9x128x128xbf16, #tpu.memory_space<vmem>>, vector<1x128x128xbf16>
      %89 = vector.shape_cast %88 : vector<1x128x128xbf16> to vector<128x128xbf16>
      %cst_139 = arith.constant dense<0.000000e+00> : vector<64x128xf32>
      %90 = tpu.matmul %83, %89, %cst_139 {dimension_numbers = #tpu.dot_dimension_numbers<[1], [0], [0], [1], [0, 0, 1, 1], [], []>} : vector<64x128xbf16>, vector<128x128xbf16>, vector<64x128xf32> -> vector<64x128xf32>
      %91 = arith.addf %84, %90 : vector<64x128xf32>
      %c0_140 = arith.constant 0 : index
      %c0_141 = arith.constant 0 : index
      %92 = vector.load %arg14[%c0_140, %c0_141] : memref<64x128xf32, #tpu.memory_space<vmem>>, vector<64x128xf32>
      tpu.vector_store %arg14[%c0_140, %c0_141], %91 {strides = array<i32>} : memref<64x128xf32, #tpu.memory_space<vmem>>, vector<64x128xf32>,
    }
    %c3_i32_98 = arith.constant 3 : i32
    %c0_i32_99 = arith.constant 0 : i32
    %c3_i32_100 = arith.constant 3 : i32
    %57 = arith.addi %c0_i32_99, %c3_i32_100 : i32
    %c1_i32_101 = arith.constant 1 : i32
    scf.for %arg15 = %c0_i32_99 to %57 step %c1_i32_101  : i32 {
      %80 = arith.index_cast %arg15 : i32 to index
      %c2_131 = arith.constant 2 : index
      %c0_132 = arith.constant 0 : index
      %81 = vector.load %arg11[%80, %c2_131, %c0_132] : memref<10x10x128xf32, #tpu.memory_space<vmem>>, vector<8x8x128xf32>
      %82 = vector.shape_cast %81 : vector<8x8x128xf32> to vector<64x128xf32>
      %83 = arith.truncf %82 : vector<64x128xf32> to vector<64x128xbf16>
      %c0_133 = arith.constant 0 : index
      %c0_134 = arith.constant 0 : index
      %84 = vector.load %arg14[%c0_133, %c0_134] : memref<64x128xf32, #tpu.memory_space<vmem>>, vector<64x128xf32>
      %c3_i32_135 = arith.constant 3 : i32
      %85 = arith.muli %arg15, %c3_i32_135 : i32
      %c2_i32 = arith.constant 2 : i32
      %86 = arith.addi %85, %c2_i32 : i32
      %87 = arith.index_cast %86 : i32 to index
      %c0_136 = arith.constant 0 : index
      %c0_137 = arith.constant 0 : index
      %88 = vector.load %arg5[%87, %c0_136, %c0_137] : memref<9x128x128xbf16, #tpu.memory_space<vmem>>, vector<1x128x128xbf16>
      %89 = vector.shape_cast %88 : vector<1x128x128xbf16> to vector<128x128xbf16>
      %cst_138 = arith.constant dense<0.000000e+00> : vector<64x128xf32>
      %90 = tpu.matmul %83, %89, %cst_138 {dimension_numbers = #tpu.dot_dimension_numbers<[1], [0], [0], [1], [0, 0, 1, 1], [], []>} : vector<64x128xbf16>, vector<128x128xbf16>, vector<64x128xf32> -> vector<64x128xf32>
      %91 = arith.addf %84, %90 : vector<64x128xf32>
      %c0_139 = arith.constant 0 : index
      %c0_140 = arith.constant 0 : index
      %92 = vector.load %arg14[%c0_139, %c0_140] : memref<64x128xf32, #tpu.memory_space<vmem>>, vector<64x128xf32>
      tpu.vector_store %arg14[%c0_139, %c0_140], %91 {strides = array<i32>} : memref<64x128xf32, #tpu.memory_space<vmem>>, vector<64x128xf32>,
    }
    %c3_i32_102 = arith.constant 3 : i32
    %c0_103 = arith.constant 0 : index
    %c0_104 = arith.constant 0 : index
    %58 = vector.load %arg14[%c0_103, %c0_104] : memref<64x128xf32, #tpu.memory_space<vmem>>, vector<64x128xf32>
    %cst_105 = arith.constant 0.000000e+00 : f32
    %59 = vector.broadcast %cst_105 : f32 to vector<64x128xf32>
    %60 = arith.cmpf oge, %58, %59 : vector<64x128xf32>
    %cst_106 = arith.constant 2.000000e-01 : f32
    %61 = vector.broadcast %cst_106 : f32 to vector<64x128xf32>
    %62 = arith.mulf %61, %58 : vector<64x128xf32>
    %63 = arith.select %60, %58, %62 : vector<64x128xi1>, vector<64x128xf32>
    %64 = vector.shape_cast %63 : vector<64x128xf32> to vector<8x8x128xf32>
    %c1_107 = arith.constant 1 : index
    %c1_108 = arith.constant 1 : index
    %c0_109 = arith.constant 0 : index
    %65 = vector.load %arg12[%c1_107, %c1_108, %c0_109] : memref<10x10x128xf32, #tpu.memory_space<vmem>>, vector<8x8x128xf32>
    tpu.vector_store %arg12[%c1_107, %c1_108, %c0_109], %64 {strides = array<i32>} : memref<10x10x128xf32, #tpu.memory_space<vmem>>, vector<8x8x128xf32>,
    %cst_110 = arith.constant 0.000000e+00 : f32
    %66 = vector.broadcast %cst_110 : f32 to vector<64x128xf32>
    %c0_111 = arith.constant 0 : index
    %c0_112 = arith.constant 0 : index
    %67 = vector.load %arg14[%c0_111, %c0_112] : memref<64x128xf32, #tpu.memory_space<vmem>>, vector<64x128xf32>
    tpu.vector_store %arg14[%c0_111, %c0_112], %66 {strides = array<i32>} : memref<64x128xf32, #tpu.memory_space<vmem>>, vector<64x128xf32>,
    %c0_i32_113 = arith.constant 0 : i32
    %c3_i32_114 = arith.constant 3 : i32
    %68 = arith.addi %c0_i32_113, %c3_i32_114 : i32
    %c1_i32_115 = arith.constant 1 : i32
    scf.for %arg15 = %c0_i32_113 to %68 step %c1_i32_115  : i32 {
      %80 = arith.index_cast %arg15 : i32 to index
      %c0_131 = arith.constant 0 : index
      %c0_132 = arith.constant 0 : index
      %81 = vector.load %arg12[%80, %c0_131, %c0_132] : memref<10x10x128xf32, #tpu.memory_space<vmem>>, vector<8x8x128xf32>
      %82 = vector.shape_cast %81 : vector<8x8x128xf32> to vector<64x128xf32>
      %83 = arith.truncf %82 : vector<64x128xf32> to vector<64x128xbf16>
      %c0_133 = arith.constant 0 : index
      %c0_134 = arith.constant 0 : index
      %84 = vector.load %arg14[%c0_133, %c0_134] : memref<64x128xf32, #tpu.memory_space<vmem>>, vector<64x128xf32>
      %c3_i32_135 = arith.constant 3 : i32
      %85 = arith.muli %arg15, %c3_i32_135 : i32
      %c0_i32_136 = arith.constant 0 : i32
      %86 = arith.addi %85, %c0_i32_136 : i32
      %87 = arith.index_cast %86 : i32 to index
      %c0_137 = arith.constant 0 : index
      %c0_138 = arith.constant 0 : index
      %88 = vector.load %arg6[%87, %c0_137, %c0_138] : memref<9x128x128xbf16, #tpu.memory_space<vmem>>, vector<1x128x128xbf16>
      %89 = vector.shape_cast %88 : vector<1x128x128xbf16> to vector<128x128xbf16>
      %cst_139 = arith.constant dense<0.000000e+00> : vector<64x128xf32>
      %90 = tpu.matmul %83, %89, %cst_139 {dimension_numbers = #tpu.dot_dimension_numbers<[1], [0], [0], [1], [0, 0, 1, 1], [], []>} : vector<64x128xbf16>, vector<128x128xbf16>, vector<64x128xf32> -> vector<64x128xf32>
      %91 = arith.addf %84, %90 : vector<64x128xf32>
      %c0_140 = arith.constant 0 : index
      %c0_141 = arith.constant 0 : index
      %92 = vector.load %arg14[%c0_140, %c0_141] : memref<64x128xf32, #tpu.memory_space<vmem>>, vector<64x128xf32>
      tpu.vector_store %arg14[%c0_140, %c0_141], %91 {strides = array<i32>} : memref<64x128xf32, #tpu.memory_space<vmem>>, vector<64x128xf32>,
    }
    %c3_i32_116 = arith.constant 3 : i32
    %c0_i32_117 = arith.constant 0 : i32
    %c3_i32_118 = arith.constant 3 : i32
    %69 = arith.addi %c0_i32_117, %c3_i32_118 : i32
    %c1_i32_119 = arith.constant 1 : i32
    scf.for %arg15 = %c0_i32_117 to %69 step %c1_i32_119  : i32 {
      %80 = arith.index_cast %arg15 : i32 to index
      %c1_131 = arith.constant 1 : index
      %c0_132 = arith.constant 0 : index
      %81 = vector.load %arg12[%80, %c1_131, %c0_132] : memref<10x10x128xf32, #tpu.memory_space<vmem>>, vector<8x8x128xf32>
      %82 = vector.shape_cast %81 : vector<8x8x128xf32> to vector<64x128xf32>
      %83 = arith.truncf %82 : vector<64x128xf32> to vector<64x128xbf16>
      %c0_133 = arith.constant 0 : index
      %c0_134 = arith.constant 0 : index
      %84 = vector.load %arg14[%c0_133, %c0_134] : memref<64x128xf32, #tpu.memory_space<vmem>>, vector<64x128xf32>
      %c3_i32_135 = arith.constant 3 : i32
      %85 = arith.muli %arg15, %c3_i32_135 : i32
      %c1_i32_136 = arith.constant 1 : i32
      %86 = arith.addi %85, %c1_i32_136 : i32
      %87 = arith.index_cast %86 : i32 to index
      %c0_137 = arith.constant 0 : index
      %c0_138 = arith.constant 0 : index
      %88 = vector.load %arg6[%87, %c0_137, %c0_138] : memref<9x128x128xbf16, #tpu.memory_space<vmem>>, vector<1x128x128xbf16>
      %89 = vector.shape_cast %88 : vector<1x128x128xbf16> to vector<128x128xbf16>
      %cst_139 = arith.constant dense<0.000000e+00> : vector<64x128xf32>
      %90 = tpu.matmul %83, %89, %cst_139 {dimension_numbers = #tpu.dot_dimension_numbers<[1], [0], [0], [1], [0, 0, 1, 1], [], []>} : vector<64x128xbf16>, vector<128x128xbf16>, vector<64x128xf32> -> vector<64x128xf32>
      %91 = arith.addf %84, %90 : vector<64x128xf32>
      %c0_140 = arith.constant 0 : index
      %c0_141 = arith.constant 0 : index
      %92 = vector.load %arg14[%c0_140, %c0_141] : memref<64x128xf32, #tpu.memory_space<vmem>>, vector<64x128xf32>
      tpu.vector_store %arg14[%c0_140, %c0_141], %91 {strides = array<i32>} : memref<64x128xf32, #tpu.memory_space<vmem>>, vector<64x128xf32>,
    }
    %c3_i32_120 = arith.constant 3 : i32
    %c0_i32_121 = arith.constant 0 : i32
    %c3_i32_122 = arith.constant 3 : i32
    %70 = arith.addi %c0_i32_121, %c3_i32_122 : i32
    %c1_i32_123 = arith.constant 1 : i32
    scf.for %arg15 = %c0_i32_121 to %70 step %c1_i32_123  : i32 {
      %80 = arith.index_cast %arg15 : i32 to index
      %c2_131 = arith.constant 2 : index
      %c0_132 = arith.constant 0 : index
      %81 = vector.load %arg12[%80, %c2_131, %c0_132] : memref<10x10x128xf32, #tpu.memory_space<vmem>>, vector<8x8x128xf32>
      %82 = vector.shape_cast %81 : vector<8x8x128xf32> to vector<64x128xf32>
      %83 = arith.truncf %82 : vector<64x128xf32> to vector<64x128xbf16>
      %c0_133 = arith.constant 0 : index
      %c0_134 = arith.constant 0 : index
      %84 = vector.load %arg14[%c0_133, %c0_134] : memref<64x128xf32, #tpu.memory_space<vmem>>, vector<64x128xf32>
      %c3_i32_135 = arith.constant 3 : i32
      %85 = arith.muli %arg15, %c3_i32_135 : i32
      %c2_i32 = arith.constant 2 : i32
      %86 = arith.addi %85, %c2_i32 : i32
      %87 = arith.index_cast %86 : i32 to index
      %c0_136 = arith.constant 0 : index
      %c0_137 = arith.constant 0 : index
      %88 = vector.load %arg6[%87, %c0_136, %c0_137] : memref<9x128x128xbf16, #tpu.memory_space<vmem>>, vector<1x128x128xbf16>
      %89 = vector.shape_cast %88 : vector<1x128x128xbf16> to vector<128x128xbf16>
      %cst_138 = arith.constant dense<0.000000e+00> : vector<64x128xf32>
      %90 = tpu.matmul %83, %89, %cst_138 {dimension_numbers = #tpu.dot_dimension_numbers<[1], [0], [0], [1], [0, 0, 1, 1], [], []>} : vector<64x128xbf16>, vector<128x128xbf16>, vector<64x128xf32> -> vector<64x128xf32>
      %91 = arith.addf %84, %90 : vector<64x128xf32>
      %c0_139 = arith.constant 0 : index
      %c0_140 = arith.constant 0 : index
      %92 = vector.load %arg14[%c0_139, %c0_140] : memref<64x128xf32, #tpu.memory_space<vmem>>, vector<64x128xf32>
      tpu.vector_store %arg14[%c0_139, %c0_140], %91 {strides = array<i32>} : memref<64x128xf32, #tpu.memory_space<vmem>>, vector<64x128xf32>,
    }
    %c3_i32_124 = arith.constant 3 : i32
    %c0_125 = arith.constant 0 : index
    %c0_126 = arith.constant 0 : index
    %71 = vector.load %arg14[%c0_125, %c0_126] : memref<64x128xf32, #tpu.memory_space<vmem>>, vector<64x128xf32>
    %72 = arith.negf %71 : vector<64x128xf32>
    %73 = math.exp %72 : vector<64x128xf32>
    %cst_127 = arith.constant 1.000000e+00 : f32
    %74 = vector.broadcast %cst_127 : f32 to vector<64x128xf32>
    %75 = arith.addf %74, %73 : vector<64x128xf32>
    %76 = arith.divf %74, %75 : vector<64x128xf32>
    %c0_128 = arith.constant 0 : index
    %c0_129 = arith.constant 0 : index
    %c0_130 = arith.constant 0 : index
    %77 = vector.load %arg8[%c0_128, %c0_129, %c0_130] : memref<1x64x128xf32, #tpu.memory_space<vmem>>, vector<1x64x128xf32>
    %78 = vector.shape_cast %77 : vector<1x64x128xf32> to vector<64x128xf32>
    %79 = vector.shape_cast %76 : vector<64x128xf32> to vector<1x64x128xf32>
    tpu.vector_store %arg8[%c0_128, %c0_129, %c0_130], %79 {strides = array<i32>} : memref<1x64x128xf32, #tpu.memory_space<vmem>>, vector<1x64x128xf32>,
    return
  }
  func.func @transform_0(%arg0: i32) -> (i32, i32, i32) {
    %c0_i32 = arith.constant 0 : i32
    %c0_i32_0 = arith.constant 0 : i32
    %c0_i32_1 = arith.constant 0 : i32
    return %arg0, %c0_i32, %c0_i32_0 : i32, i32, i32
  }
  func.func @transform_1(%arg0: i32) -> (i32, i32) {
    %c0_i32 = arith.constant 0 : i32
    %c0_i32_0 = arith.constant 0 : i32
    %c0_i32_1 = arith.constant 0 : i32
    return %c0_i32, %c0_i32_0 : i32, i32
  }
  func.func @transform_2(%arg0: i32) -> (i32, i32, i32) {
    %c0_i32 = arith.constant 0 : i32
    %c0_i32_0 = arith.constant 0 : i32
    %c0_i32_1 = arith.constant 0 : i32
    %c0_i32_2 = arith.constant 0 : i32
    return %c0_i32, %c0_i32_0, %c0_i32_1 : i32, i32, i32
  }
  func.func @transform_3(%arg0: i32) -> (i32, i32, i32) {
    %c0_i32 = arith.constant 0 : i32
    %c0_i32_0 = arith.constant 0 : i32
    %c0_i32_1 = arith.constant 0 : i32
    %c0_i32_2 = arith.constant 0 : i32
    return %c0_i32, %c0_i32_0, %c0_i32_1 : i32, i32, i32
  }
  func.func @transform_4(%arg0: i32) -> (i32, i32, i32) {
    %c0_i32 = arith.constant 0 : i32
    %c0_i32_0 = arith.constant 0 : i32
    %c0_i32_1 = arith.constant 0 : i32
    %c0_i32_2 = arith.constant 0 : i32
    return %c0_i32, %c0_i32_0, %c0_i32_1 : i32, i32, i32
  }
  func.func @transform_5(%arg0: i32) -> (i32, i32, i32) {
    %c0_i32 = arith.constant 0 : i32
    %c0_i32_0 = arith.constant 0 : i32
    %c0_i32_1 = arith.constant 0 : i32
    %c0_i32_2 = arith.constant 0 : i32
    return %c0_i32, %c0_i32_0, %c0_i32_1 : i32, i32, i32
  }
  func.func @transform_6(%arg0: i32) -> (i32, i32) {
    %c0_i32 = arith.constant 0 : i32
    %c0_i32_0 = arith.constant 0 : i32
    %c0_i32_1 = arith.constant 0 : i32
    return %c0_i32, %c0_i32_0 : i32, i32
  }
  func.func @transform_7(%arg0: i32) -> (i32, i32, i32) {
    %c0_i32 = arith.constant 0 : i32
    %c0_i32_0 = arith.constant 0 : i32
    %c0_i32_1 = arith.constant 0 : i32
    return %arg0, %c0_i32, %c0_i32_0 : i32, i32, i32
  }
}

</mosaic_0001>

<bundles_post_ra>
// kernel: _forward_impl.1
= control target key start
LH: loop header
LB: loop body
LE: loop exit
PB: predicated region body
PF: predicated region fallthrough
CT: control target
= control target key end

     0   :  { %s9904_s24 = smov 0   ;;  %s11232_s0 = inlined_call_operand.vmem [shape: bf16[2,256,128], index: 0, kind: input, shape index: {}]   ;;  %s11233_s1 = inlined_call_operand.vmem [shape: bf16[128,128], index: 1, kind: input, shape index: {}]   ;;  %s11234_s2 = inlined_call_operand.vmem [shape: bf16[49,128,128], index: 2, kind: input, shape index: {}]   ;;  %s11235_s3 = inlined_call_operand.vmem [shape: bf16[25,128,128], index: 3, kind: input, shape index: {}]   ;;  %s11236_s4 = inlined_call_operand.vmem [shape: bf16[9,128,128], index: 4, kind: input, shape index: {}]   ;;  %s11237_s5 = inlined_call_operand.vmem [shape: bf16[9,128,128], index: 5, kind: input, shape index: {}]   ;;  %s11238_s6 = inlined_call_operand.vmem [shape: f32[64,256], index: 6, kind: input, shape index: {}]   ;;  %s11239_s7 = inlined_call_operand.vmem [shape: f32[2,64,128], index: 7, kind: output, shape index: {}]  }
   0x1 LB: > { %s7353_s25 = sadd.s32 4294967295, %s9789_s24   ;;  %p7357_p0 = scmp.ge.s32.totalorder %s9789_s24, 1  ;;  %s9789_s24 = sphi %s9904_s24, %s17_s24  }
   0x2   : > { %p237_p1 = scmp.lt.s32.totalorder %s9789_s24, 3 }
   0x4   : > { %p238_p2 = pnand %p7357_p0, %p237_p1 }
   0x5   : > { %v9915_v0 = vld [vmem:[%s11233_s1] sm:$0xff] (!%p238_p2)   ;;  %p269_p3 = scmp.lt.s32.totalorder (!%p238_p2), %s7353_s25, 1  ;;  %v9920_v1 = vld [vmem:[%s11233_s1 + $0x8] sm:$0xff] (!%p238_p2)   ;;  %v9863_v2 = vmov (!%p238_p2), 0.0   ;;  %v9513_v3 = vld [vmem:[%s11233_s1 + $0x10] sm:$0xff] (!%p238_p2)   ;;  %s10176_s28 = smov (!%p238_p2), 0  }
   0x6   : > { %241 = sbr.rel (%p238_p2) target bundleno = 5486 (0x156e), region = 48  ;;  %8238 = vmatprep.subr.bf16.mxu0 (!%p238_p2), %v9915_v0  ;;  %9038 = vmatprep.subr.bf16.mxu1 (!%p238_p2), %v9915_v0  ;;  %280 = vst [vmem:[#allocation2] sm:$0xff] (!%p238_p2), %v9863_v2  ;;  %281 = vst [vmem:[#allocation2 + $0x8] sm:$0xff] (!%p238_p2), %v9863_v2  ;;  %v9514_v4 = vld [vmem:[%s11233_s1 + $0x18] sm:$0xff] (!%p238_p2)   ;;  %v9515_v7 = vld [vmem:[%s11233_s1 + $0x20] sm:$0xff] (!%p238_p2)  }
   0x7   : > { %282 = vst [vmem:[#allocation2 + $0x10] sm:$0x3f] (!%p238_p2), %v9863_v2  ;;  %283 = vst [vmem:[#allocation2 + $0x18] sm:$0xff] (!%p238_p2), %v9863_v2  ;;  %8239 = vmatpush3.bf16.msra.mxu0 (!%p238_p2), %v9915_v0  ;;  %9046 = vmatpush3.bf16.msra.mxu1 (!%p238_p2), %v9915_v0  ;;  %v9516_v8 = vld [vmem:[%s11233_s1 + $0x28] sm:$0xff] (!%p238_p2)   ;;  %v9517_v9 = vld [vmem:[%s11233_s1 + $0x30] sm:$0xff] (!%p238_p2)  }
   0x8   : > { %284 = vst [vmem:[#allocation2 + $0x20] sm:$0xff] (!%p238_p2), %v9863_v2  ;;  %285 = vst [vmem:[#allocation2 + $0x28] sm:$0x3f] (!%p238_p2), %v9863_v2  ;;  %8240 = vmatprep.subr.bf16.mxu0 (!%p238_p2), %v9920_v1  ;;  %9039 = vmatprep.subr.bf16.mxu1 (!%p238_p2), %v9920_v1  ;;  %v9518_v10 = vld [vmem:[%s11233_s1 + $0x38] sm:$0xff] (!%p238_p2)  }
   0x9   : > { %286 = vst [vmem:[#allocation2 + $0x30] sm:$0xff] (!%p238_p2), %v9863_v2  ;;  %287 = vst [vmem:[#allocation2 + $0x38] sm:$0xff] (!%p238_p2), %v9863_v2 }
   0xa   : > { %288 = vst [vmem:[#allocation2 + $0x40] sm:$0x3f] (!%p238_p2), %v9863_v2  ;;  %292 = vst [vmem:[#allocation2 + $0x60] sm:$0xff] (!%p238_p2), %v9863_v2 }
   0xb   : > { %293 = vst [vmem:[#allocation2 + $0x68] sm:$0xff] (!%p238_p2), %v9863_v2  ;;  %337 = vst [vmem:[#allocation2 + $0x1c8] sm:$0xff] (!%p238_p2), %v9863_v2  ;;  %8241 = vmatpush3.bf16.msra.mxu0 (!%p238_p2), %v9920_v1  ;;  %9047 = vmatpush3.bf16.msra.mxu1 (!%p238_p2), %v9920_v1 }
   0xc   : > { %338 = vst [vmem:[#allocation2 + $0x1d0] sm:$0xff] (!%p238_p2), %v9863_v2  ;;  %339 = vst [vmem:[#allocation2 + $0x1d8] sm:$0x3f] (!%p238_p2), %v9863_v2  ;;  %8242 = vmatprep.subr.bf16.mxu0 (!%p238_p2), %v9513_v3  ;;  %9040 = vmatprep.subr.bf16.mxu1 (!%p238_p2), %v9513_v3 }
   0xd   : > { %s11241_s25 = smov (!%p269_p3, %s7353_s25), 1  ;;  %340 = vst [vmem:[#allocation2 + $0x1e0] sm:$0xff] %v9863_v2  ;;  %341 = vst [vmem:[#allocation2 + $0x1e8] sm:$0xff] %v9863_v2 }
   0xe   : > { %342 = vst [vmem:[#allocation2 + $0x1f0] sm:$0x3f] %v9863_v2  ;;  %343 = vst [vmem:[#allocation2 + $0x1f8] sm:$0xff] %v9863_v2  ;;  %s7792_s9 = sshll.u32 %s11241_s25, 7  ;;  %s7793_s13 = sshll.u32 %s11241_s25, 6 }
   0xf   : > { %344 = vst [vmem:[#allocation2 + $0x200] sm:$0xff] %v9863_v2  ;;  %345 = vst [vmem:[#allocation2 + $0x208] sm:$0x3f] %v9863_v2  ;;  %s10135_s12 = scalar_lea.vmem %s11232_s0, %s7792_s9  ;;  %s10141_s16 = scalar_lea.vmem %s11239_s7, %s7793_s13  ;;  %8243 = vmatpush3.bf16.msra.mxu0 %v9513_v3  ;;  %9048 = vmatpush3.bf16.msra.mxu1 %v9513_v3 }
  0x10   : > { %346 = vst [vmem:[#allocation3] sm:$0xff] %v9863_v2  ;;  %347 = vst [vmem:[#allocation3 + $0x8] sm:$0xff] %v9863_v2  ;;  %v9519_v5 = vld [vmem:[%s10135_s12] sm:$0xff]   ;;  %8244 = vmatprep.subr.bf16.mxu0 %v9514_v4  ;;  %9041 = vmatprep.subr.bf16.mxu1 %v9514_v4  ;;  %v9521_v11 = vld [vmem:[%s10135_s12 + $0x8] sm:$0xff]  }
  0x11   : > { %348 = vst [vmem:[#allocation3 + $0x10] sm:$0xf] %v9863_v2  ;;  %349 = vst [vmem:[#allocation3 + $0x18] sm:$0xff] %v9863_v2  ;;  %v9520_v6 = vld [vmem:[%s10135_s12 + $0x40] sm:$0xff]   ;;  %8254 = vmatprep.mubr.bf16.mxu0 %v9519_v5  ;;  %v9522_v12 = vld [vmem:[%s10135_s12 + $0x48] sm:$0xff]  }
  0x12   : > { %350 = vst [vmem:[#allocation3 + $0x20] sm:$0xff] %v9863_v2  ;;  %351 = vst [vmem:[#allocation3 + $0x28] sm:$0xf] %v9863_v2  ;;  %8270 = vmatprep.mubr.bf16.mxu1 %v9520_v6  ;;  %v9523_v13 = vld [vmem:[%s10135_s12 + $0x10] sm:$0xff]   ;;  %v9525_v15 = vld [vmem:[%s10135_s12 + $0x18] sm:$0xff]  }
  0x13   : > { %352 = vst [vmem:[#allocation3 + $0x30] sm:$0xff] %v9863_v2  ;;  %353 = vst [vmem:[#allocation3 + $0x38] sm:$0xff] %v9863_v2  ;;  %8245 = vmatpush3.bf16.msra.mxu0 %v9514_v4  ;;  %9049 = vmatpush3.bf16.msra.mxu1 %v9514_v4  ;;  %v9524_v14 = vld [vmem:[%s10135_s12 + $0x50] sm:$0xff]   ;;  %v9526_v16 = vld [vmem:[%s10135_s12 + $0x58] sm:$0xff]  }
  0x14   : > { %354 = vst [vmem:[#allocation3 + $0x40] sm:$0xf] %v9863_v2  ;;  %355 = vst [vmem:[#allocation3 + $0x48] sm:$0xff] %v9863_v2  ;;  %8246 = vmatprep.subr.bf16.mxu0 %v9515_v7  ;;  %9042 = vmatprep.subr.bf16.mxu1 %v9515_v7  ;;  %v9527_v17 = vld [vmem:[%s10135_s12 + $0x20] sm:$0xff]   ;;  %v9529_v19 = vld [vmem:[%s10135_s12 + $0x28] sm:$0xff]  }
  0x15   : > { %356 = vst [vmem:[#allocation3 + $0x50] sm:$0xff] %v9863_v2  ;;  %357 = vst [vmem:[#allocation3 + $0x58] sm:$0xf] %v9863_v2  ;;  %v9528_v18 = vld [vmem:[%s10135_s12 + $0x60] sm:$0xff]   ;;  %v9530_v20 = vld [vmem:[%s10135_s12 + $0x68] sm:$0xff]  }
  0x16   : > { %358 = vst [vmem:[#allocation3 + $0x60] sm:$0xff] %v9863_v2  ;;  %359 = vst [vmem:[#allocation3 + $0x68] sm:$0xff] %v9863_v2  ;;  %v9531_v21 = vld [vmem:[%s10135_s12 + $0x30] sm:$0xff]   ;;  %v9533_v23 = vld [vmem:[%s10135_s12 + $0x38] sm:$0xff]  }
  0x17   : > { %360 = vst [vmem:[#allocation3 + $0x70] sm:$0xf] %v9863_v2  ;;  %361 = vst [vmem:[#allocation3 + $0x78] sm:$0xff] %v9863_v2  ;;  %8247 = vmatpush3.bf16.msra.mxu0 %v9515_v7  ;;  %9050 = vmatpush3.bf16.msra.mxu1 %v9515_v7  ;;  %v9532_v22 = vld [vmem:[%s10135_s12 + $0x70] sm:$0xff]   ;;  %v9534_v24 = vld [vmem:[%s10135_s12 + $0x78] sm:$0xff]  }
  0x18   : > { %362 = vst [vmem:[#allocation3 + $0x80] sm:$0xff] %v9863_v2  ;;  %363 = vst [vmem:[#allocation3 + $0x88] sm:$0xf] %v9863_v2  ;;  %8248 = vmatprep.subr.bf16.mxu0 %v9516_v8  ;;  %9043 = vmatprep.subr.bf16.mxu1 %v9516_v8 }
  0x19   : > { %364 = vst [vmem:[#allocation3 + $0x90] sm:$0xff] %v9863_v2  ;;  %365 = vst [vmem:[#allocation3 + $0x98] sm:$0xff] %v9863_v2 }
  0x1a   : > { %366 = vst [vmem:[#allocation3 + $0xa0] sm:$0xf] %v9863_v2  ;;  %367 = vst [vmem:[#allocation3 + $0xa8] sm:$0xff] %v9863_v2 }
  0x1b   : > { %368 = vst [vmem:[#allocation3 + $0xb0] sm:$0xff] %v9863_v2  ;;  %369 = vst [vmem:[#allocation3 + $0xb8] sm:$0xf] %v9863_v2  ;;  %8249 = vmatpush3.bf16.msra.mxu0 %v9516_v8  ;;  %9051 = vmatpush3.bf16.msra.mxu1 %v9516_v8 }
  0x1c   : > { %370 = vst [vmem:[#allocation3 + $0xc0] sm:$0xff] %v9863_v2  ;;  %371 = vst [vmem:[#allocation3 + $0xc8] sm:$0xff] %v9863_v2  ;;  %8250 = vmatprep.subr.bf16.mxu0 %v9517_v9  ;;  %9044 = vmatprep.subr.bf16.mxu1 %v9517_v9 }
  0x1d   : > { %372 = vst [vmem:[#allocation3 + $0xd0] sm:$0xf] %v9863_v2  ;;  %373 = vst [vmem:[#allocation3 + $0xd8] sm:$0xff] %v9863_v2 }
  0x1e   : > { %374 = vst [vmem:[#allocation3 + $0xe0] sm:$0xff] %v9863_v2  ;;  %375 = vst [vmem:[#allocation3 + $0xe8] sm:$0xf] %v9863_v2 }
  0x1f   : > { %376 = vst [vmem:[#allocation3 + $0xf0] sm:$0xff] %v9863_v2  ;;  %377 = vst [vmem:[#allocation3 + $0xf8] sm:$0xff] %v9863_v2  ;;  %8251 = vmatpush3.bf16.msra.mxu0 %v9517_v9  ;;  %9052 = vmatpush3.bf16.msra.mxu1 %v9517_v9 }
  0x20   : > { %378 = vst [vmem:[#allocation3 + $0x100] sm:$0xf] %v9863_v2  ;;  %379 = vst [vmem:[#allocation3 + $0x108] sm:$0xff] %v9863_v2  ;;  %8252 = vmatprep.subr.bf16.mxu0 %v9518_v10  ;;  %9045 = vmatprep.subr.bf16.mxu1 %v9518_v10 }
  0x21   : > { %380 = vst [vmem:[#allocation3 + $0x110] sm:$0xff] %v9863_v2  ;;  %381 = vst [vmem:[#allocation3 + $0x118] sm:$0xf] %v9863_v2 }
  0x22   : > { %382 = vst [vmem:[#allocation3 + $0x120] sm:$0xff] %v9863_v2  ;;  %383 = vst [vmem:[#allocation3 + $0x128] sm:$0xff] %v9863_v2 }
  0x23   : > { %384 = vst [vmem:[#allocation3 + $0x130] sm:$0xf] %v9863_v2  ;;  %385 = vst [vmem:[#allocation3 + $0x138] sm:$0xff] %v9863_v2  ;;  %8253 = vmatpush3.bf16.msra.mxu0 %v9518_v10  ;;  %9053 = vmatpush3.bf16.msra.mxu1 %v9518_v10 }
  0x24   : > { %386 = vst [vmem:[#allocation3 + $0x140] sm:$0xff] %v9863_v2  ;;  %387 = vst [vmem:[#allocation3 + $0x148] sm:$0xf] %v9863_v2 }
  0x25   : > { %388 = vst [vmem:[#allocation3 + $0x150] sm:$0xff] %v9863_v2  ;;  %389 = vst [vmem:[#allocation3 + $0x158] sm:$0xff] %v9863_v2 }
  0x26   : > { %390 = vst [vmem:[#allocation3 + $0x160] sm:$0xf] %v9863_v2  ;;  %391 = vst [vmem:[#allocation3 + $0x168] sm:$0xff] %v9863_v2  ;;  %8255 = vmatmul.mubr.bf16.vlgmr.msra.gmra.mrb[0].mxu0 %v9521_v11  ;;  %8271 = vmatmul.mubr.bf16.vlgmr.msra.gmra.mrb[0].mxu1 %v9522_v12 }
  0x27   : > { %392 = vst [vmem:[#allocation3 + $0x170] sm:$0xff] %v9863_v2  ;;  %393 = vst [vmem:[#allocation3 + $0x178] sm:$0xf] %v9863_v2  ;;  %8258 = vmatprep.mubr.bf16.mxu0 %v9523_v13  ;;  %8274 = vmatprep.mubr.bf16.mxu1 %v9524_v14 }
  0x28   : > { %394 = vst [vmem:[#allocation3 + $0x180] sm:$0xff] %v9863_v2  ;;  %395 = vst [vmem:[#allocation3 + $0x188] sm:$0xff] %v9863_v2 }
  0x29   : > { %396 = vst [vmem:[#allocation3 + $0x190] sm:$0xf] %v9863_v2  ;;  %397 = vst [vmem:[#allocation3 + $0x198] sm:$0xff] %v9863_v2 }
  0x2a   : > { %398 = vst [vmem:[#allocation3 + $0x1a0] sm:$0xff] %v9863_v2  ;;  %399 = vst [vmem:[#allocation3 + $0x1a8] sm:$0xf] %v9863_v2 }
  0x2b   : > { %400 = vst [vmem:[#allocation3 + $0x1b0] sm:$0xff] %v9863_v2  ;;  %401 = vst [vmem:[#allocation3 + $0x1b8] sm:$0xff] %v9863_v2 }
  0x2c   : > { %402 = vst [vmem:[#allocation3 + $0x1c0] sm:$0xf] %v9863_v2  ;;  %403 = vst [vmem:[#allocation3 + $0x1c8] sm:$0xff] %v9863_v2 }
  0x2d   : > { %404 = vst [vmem:[#allocation3 + $0x1d0] sm:$0xff] %v9863_v2  ;;  %405 = vst [vmem:[#allocation3 + $0x1d8] sm:$0xf] %v9863_v2 }
  0x2e   : > { %406 = vst [vmem:[#allocation4] sm:$0xff] %v9863_v2  ;;  %407 = vst [vmem:[#allocation4 + $0x8] sm:$0x3] %v9863_v2  ;;  %8259 = vmatmul.mubr.bf16.gmra.mrb[4].mxu0 %v9525_v15  ;;  %8275 = vmatmul.mubr.bf16.gmra.mrb[4].mxu1 %v9526_v16 }
  0x2f   : > { %408 = vst [vmem:[#allocation4 + $0x10] sm:$0xff] %v9863_v2  ;;  %409 = vst [vmem:[#allocation4 + $0x18] sm:$0x3] %v9863_v2  ;;  %8262 = vmatprep.mubr.bf16.mxu0 %v9527_v17  ;;  %8278 = vmatprep.mubr.bf16.mxu1 %v9528_v18 }
  0x30   : > { %410 = vst [vmem:[#allocation4 + $0x20] sm:$0xff] %v9863_v2  ;;  %411 = vst [vmem:[#allocation4 + $0x28] sm:$0x3] %v9863_v2 }
  0x31   : > { %412 = vst [vmem:[#allocation4 + $0x30] sm:$0xff] %v9863_v2  ;;  %413 = vst [vmem:[#allocation4 + $0x38] sm:$0x3] %v9863_v2 }
  0x32   : > { %414 = vst [vmem:[#allocation4 + $0x40] sm:$0xff] %v9863_v2  ;;  %415 = vst [vmem:[#allocation4 + $0x48] sm:$0x3] %v9863_v2 }
  0x33   : > { %416 = vst [vmem:[#allocation4 + $0x50] sm:$0xff] %v9863_v2  ;;  %417 = vst [vmem:[#allocation4 + $0x58] sm:$0x3] %v9863_v2 }
  0x34   : > { %418 = vst [vmem:[#allocation4 + $0x60] sm:$0xff] %v9863_v2  ;;  %419 = vst [vmem:[#allocation4 + $0x68] sm:$0x3] %v9863_v2 }
  0x35   : > { %420 = vst [vmem:[#allocation4 + $0x70] sm:$0xff] %v9863_v2  ;;  %421 = vst [vmem:[#allocation4 + $0x78] sm:$0x3] %v9863_v2 }
  0x36   : > { %422 = vst [vmem:[#allocation4 + $0x80] sm:$0xff] %v9863_v2  ;;  %423 = vst [vmem:[#allocation4 + $0x88] sm:$0x3] %v9863_v2  ;;  %8263 = vmatmul.mubr.bf16.gmra.mrb[8].mxu0 %v9529_v19  ;;  %8279 = vmatmul.mubr.bf16.gmra.mrb[8].mxu1 %v9530_v20 }
  0x37   : > { %424 = vst [vmem:[#allocation4 + $0x90] sm:$0xff] %v9863_v2  ;;  %425 = vst [vmem:[#allocation4 + $0x98] sm:$0x3] %v9863_v2  ;;  %8266 = vmatprep.mubr.bf16.mxu0 %v9531_v21  ;;  %8282 = vmatprep.mubr.bf16.mxu1 %v9532_v22 }
  0x38   : > { %426 = vst [vmem:[#allocation5] sm:$0xff] %v9863_v2  ;;  %427 = vst [vmem:[#allocation5 + $0x8] sm:$0x3] %v9863_v2 }
  0x39   : > { %428 = vst [vmem:[#allocation5 + $0x10] sm:$0xff] %v9863_v2  ;;  %429 = vst [vmem:[#allocation5 + $0x18] sm:$0x3] %v9863_v2 }
  0x3a   : > { %430 = vst [vmem:[#allocation5 + $0x20] sm:$0xff] %v9863_v2  ;;  %431 = vst [vmem:[#allocation5 + $0x28] sm:$0x3] %v9863_v2 }
  0x3b   : > { %432 = vst [vmem:[#allocation5 + $0x30] sm:$0xff] %v9863_v2  ;;  %433 = vst [vmem:[#allocation5 + $0x38] sm:$0x3] %v9863_v2 }
  0x3c   : > { %434 = vst [vmem:[#allocation5 + $0x40] sm:$0xff] %v9863_v2  ;;  %435 = vst [vmem:[#allocation5 + $0x48] sm:$0x3] %v9863_v2 }
  0x3d   : > { %436 = vst [vmem:[#allocation5 + $0x50] sm:$0xff] %v9863_v2  ;;  %437 = vst [vmem:[#allocation5 + $0x58] sm:$0x3] %v9863_v2 }
  0x3e   : > { %438 = vst [vmem:[#allocation5 + $0x60] sm:$0xff] %v9863_v2  ;;  %439 = vst [vmem:[#allocation5 + $0x68] sm:$0x3] %v9863_v2  ;;  %8267 = vmatmul.mubr.bf16.gmra.mrb[12].mxu0 %v9533_v23  ;;  %8283 = vmatmul.mubr.bf16.gmra.mrb[12].mxu1 %v9534_v24 }
  0x3f   : > { %440 = vst [vmem:[#allocation5 + $0x70] sm:$0xff] %v9863_v2  ;;  %441 = vst [vmem:[#allocation5 + $0x78] sm:$0x3] %v9863_v2 }
  0x40   : > { %442 = vst [vmem:[#allocation5 + $0x80] sm:$0xff] %v9863_v2  ;;  %443 = vst [vmem:[#allocation5 + $0x88] sm:$0x3] %v9863_v2 }
  0x41   : > { %444 = vst [vmem:[#allocation5 + $0x90] sm:$0xff] %v9863_v2  ;;  %445 = vst [vmem:[#allocation5 + $0x98] sm:$0x3] %v9863_v2 }
  0x42   : > { %289 = vst [vmem:[#allocation2 + $0x48] sm:$0xff] %v9863_v2  ;;  %290 = vst [vmem:[#allocation2 + $0x50] sm:$0xff] %v9863_v2 }
  0x43   : > { %291 = vst [vmem:[#allocation2 + $0x58] sm:$0x3f] %v9863_v2  ;;  %294 = vst [vmem:[#allocation2 + $0x70] sm:$0x3f] %v9863_v2 }
  0x44   : > { %295 = vst [vmem:[#allocation2 + $0x78] sm:$0xff] %v9863_v2  ;;  %296 = vst [vmem:[#allocation2 + $0x80] sm:$0xff] %v9863_v2 }
  0x45   : > { %297 = vst [vmem:[#allocation2 + $0x88] sm:$0x3f] %v9863_v2  ;;  %298 = vst [vmem:[#allocation2 + $0x90] sm:$0xff] %v9863_v2 }
  0x46   : > { %299 = vst [vmem:[#allocation2 + $0x98] sm:$0xff] %v9863_v2  ;;  %300 = vst [vmem:[#allocation2 + $0xa0] sm:$0x3f] %v9863_v2 }
  0x47   : > { %301 = vst [vmem:[#allocation2 + $0xa8] sm:$0xff] %v9863_v2  ;;  %302 = vst [vmem:[#allocation2 + $0xb0] sm:$0xff] %v9863_v2 }
  0x48   : > { %303 = vst [vmem:[#allocation2 + $0xb8] sm:$0x3f] %v9863_v2  ;;  %304 = vst [vmem:[#allocation2 + $0xc0] sm:$0xff] %v9863_v2 }
  0x49   : > { %305 = vst [vmem:[#allocation2 + $0xc8] sm:$0xff] %v9863_v2  ;;  %306 = vst [vmem:[#allocation2 + $0xd0] sm:$0x3f] %v9863_v2 }
  0x4a   : > { %307 = vst [vmem:[#allocation2 + $0xd8] sm:$0xff] %v9863_v2  ;;  %308 = vst [vmem:[#allocation2 + $0xe0] sm:$0xff] %v9863_v2 }
  0x4b   : > { %309 = vst [vmem:[#allocation2 + $0xe8] sm:$0x3f] %v9863_v2  ;;  %310 = vst [vmem:[#allocation2 + $0xf0] sm:$0xff] %v9863_v2 }
  0x4c   : > { %311 = vst [vmem:[#allocation2 + $0xf8] sm:$0xff] %v9863_v2  ;;  %312 = vst [vmem:[#allocation2 + $0x100] sm:$0x3f] %v9863_v2 }
  0x4d   : > { %313 = vst [vmem:[#allocation2 + $0x108] sm:$0xff] %v9863_v2  ;;  %314 = vst [vmem:[#allocation2 + $0x110] sm:$0xff] %v9863_v2 }
  0x4e   : > { %315 = vst [vmem:[#allocation2 + $0x118] sm:$0x3f] %v9863_v2  ;;  %316 = vst [vmem:[#allocation2 + $0x120] sm:$0xff] %v9863_v2 }
  0x4f   : > { %317 = vst [vmem:[#allocation2 + $0x128] sm:$0xff] %v9863_v2  ;;  %318 = vst [vmem:[#allocation2 + $0x130] sm:$0x3f] %v9863_v2 }
  0x50   : > { %319 = vst [vmem:[#allocation2 + $0x138] sm:$0xff] %v9863_v2  ;;  %320 = vst [vmem:[#allocation2 + $0x140] sm:$0xff] %v9863_v2 }
  0x51   : > { %321 = vst [vmem:[#allocation2 + $0x148] sm:$0x3f] %v9863_v2  ;;  %322 = vst [vmem:[#allocation2 + $0x150] sm:$0xff] %v9863_v2 }
  0x52   : > { %323 = vst [vmem:[#allocation2 + $0x158] sm:$0xff] %v9863_v2  ;;  %324 = vst [vmem:[#allocation2 + $0x160] sm:$0x3f] %v9863_v2 }
  0x53   : > { %325 = vst [vmem:[#allocation2 + $0x168] sm:$0xff] %v9863_v2  ;;  %326 = vst [vmem:[#allocation2 + $0x170] sm:$0xff] %v9863_v2 }
  0x54   : > { %327 = vst [vmem:[#allocation2 + $0x178] sm:$0x3f] %v9863_v2  ;;  %328 = vst [vmem:[#allocation2 + $0x180] sm:$0xff] %v9863_v2 }
  0x55   : > { %329 = vst [vmem:[#allocation2 + $0x188] sm:$0xff] %v9863_v2  ;;  %330 = vst [vmem:[#allocation2 + $0x190] sm:$0x3f] %v9863_v2 }
  0x56   : > { %331 = vst [vmem:[#allocation2 + $0x198] sm:$0xff] %v9863_v2  ;;  %332 = vst [vmem:[#allocation2 + $0x1a0] sm:$0xff] %v9863_v2 }
  0x57   : > { %333 = vst [vmem:[#allocation2 + $0x1a8] sm:$0x3f] %v9863_v2  ;;  %334 = vst [vmem:[#allocation2 + $0x1b0] sm:$0xff] %v9863_v2 }
  0x58   : > { %335 = vst [vmem:[#allocation2 + $0x1b8] sm:$0xff] %v9863_v2  ;;  %336 = vst [vmem:[#allocation2 + $0x1c0] sm:$0x3f] %v9863_v2 }
  0x59   : > { %928 = vst [vmem:[#allocation6] sm:$0xff] %v9863_v2  ;;  %929 = vst [vmem:[#allocation6 + $0x8] sm:$0xff] %v9863_v2 }
  0x5a   : > { %930 = vst [vmem:[#allocation6 + $0x10] sm:$0xff] %v9863_v2  ;;  %931 = vst [vmem:[#allocation6 + $0x18] sm:$0xff] %v9863_v2 }
  0x5b   : > { %932 = vst [vmem:[#allocation6 + $0x20] sm:$0xff] %v9863_v2  ;;  %933 = vst [vmem:[#allocation6 + $0x28] sm:$0xff] %v9863_v2 }
  0x5c   : > { %934 = vst [vmem:[#allocation6 + $0x30] sm:$0xff] %v9863_v2  ;;  %935 = vst [vmem:[#allocation6 + $0x38] sm:$0xff] %v9863_v2 }
  0x5d   : > { %936 = vst [vmem:[#allocation6 + $0x40] sm:$0xff] %v9863_v2  ;;  %937 = vst [vmem:[#allocation6 + $0x48] sm:$0xff] %v9863_v2 }
  0x5e   : > { %938 = vst [vmem:[#allocation6 + $0x50] sm:$0xff] %v9863_v2  ;;  %939 = vst [vmem:[#allocation6 + $0x58] sm:$0xff] %v9863_v2 }
  0x5f   : > { %940 = vst [vmem:[#allocation6 + $0x60] sm:$0xff] %v9863_v2  ;;  %941 = vst [vmem:[#allocation6 + $0x68] sm:$0xff] %v9863_v2 }
  0x60   : > { %942 = vst [vmem:[#allocation6 + $0x70] sm:$0xff] %v9863_v2  ;;  %943 = vst [vmem:[#allocation6 + $0x78] sm:$0xff] %v9863_v2 }
  0x61   : > { %944 = vst [vmem:[#allocation6 + $0x80] sm:$0xff] %v9863_v2  ;;  %945 = vst [vmem:[#allocation6 + $0x88] sm:$0xff] %v9863_v2 }
  0x62   : > { %946 = vst [vmem:[#allocation6 + $0x90] sm:$0xff] %v9863_v2  ;;  %947 = vst [vmem:[#allocation6 + $0x98] sm:$0xff] %v9863_v2 }
  0x63   : > { %948 = vst [vmem:[#allocation6 + $0xa0] sm:$0xff] %v9863_v2  ;;  %949 = vst [vmem:[#allocation6 + $0xa8] sm:$0xff] %v9863_v2 }
  0x64   : > { %950 = vst [vmem:[#allocation6 + $0xb0] sm:$0xff] %v9863_v2  ;;  %951 = vst [vmem:[#allocation6 + $0xb8] sm:$0xff] %v9863_v2 }
  0x65   : > { %952 = vst [vmem:[#allocation6 + $0xc0] sm:$0xff] %v9863_v2  ;;  %953 = vst [vmem:[#allocation6 + $0xc8] sm:$0xff] %v9863_v2 }
  0x66   : > { %954 = vst [vmem:[#allocation6 + $0xd0] sm:$0xff] %v9863_v2  ;;  %955 = vst [vmem:[#allocation6 + $0xd8] sm:$0xff] %v9863_v2 }
  0x67   : > { %956 = vst [vmem:[#allocation6 + $0xe0] sm:$0xff] %v9863_v2  ;;  %957 = vst [vmem:[#allocation6 + $0xe8] sm:$0xff] %v9863_v2 }
  0x68   : > { %958 = vst [vmem:[#allocation6 + $0xf0] sm:$0xff] %v9863_v2  ;;  %959 = vst [vmem:[#allocation6 + $0xf8] sm:$0xff] %v9863_v2 }
  0xf9   : > { %v8256_v25 = vpop.f32.mrb[0].mxu0  ;;  %v8272_v26 = vpop.f32.mrb[0].mxu1 }
  0xfa   : > { %vm801_vm0 = vcmp.ge.f32.partialorder %v8256_v25, 0.0  ;;  %v833_v27 = vmul.f32 0.2, %v8256_v25  ;;  %vm817_vm1 = vcmp.ge.f32.partialorder %v8272_v26, 0.0  ;;  %v849_v28 = vmul.f32 0.2, %v8272_v26 }
  0xfb   : > { %v672_v29 = vpop.f32.mrb[1].mxu0  ;;  %v736_v30 = vpop.f32.mrb[1].mxu1 }
  0xfc   : > { %v865_v31 = vsel %vm801_vm0, %v8256_v25, %v833_v27  ;;  %v881_v32 = vsel %vm817_vm1, %v8272_v26, %v849_v28  ;;  %vm799_vm2 = vcmp.ge.f32.partialorder %v672_v29, 0.0  ;;  %v831_v33 = vmul.f32 0.2, %v672_v29  ;;  %v8257_v34 = vpop.f32.mrb[2].mxu0  ;;  %v8273_v35 = vpop.f32.mrb[2].mxu1 }
  0xfd   : > { %898 = vst [vmem:[#allocation2 + $0x63] sm:$0xff] %v865_v31  ;;  %914 = vst [vmem:[#allocation2 + $0x123] sm:$0xff] %v881_v32  ;;  %vm815_vm3 = vcmp.ge.f32.partialorder %v736_v30, 0.0  ;;  %v847_v36 = vmul.f32 0.2, %v736_v30  ;;  %vm802_vm4 = vcmp.ge.f32.partialorder %v8257_v34, 0.0 }
  0xfe   : > { %v834_v37 = vmul.f32 0.2, %v8257_v34  ;;  %v863_v38 = vsel %vm799_vm2, %v672_v29, %v831_v33  ;;  %vm818_vm5 = vcmp.ge.f32.partialorder %v8273_v35, 0.0  ;;  %v850_v39 = vmul.f32 0.2, %v8273_v35  ;;  %v675_v40 = vpop.f32.mrb[3].mxu0 }
  0xff   : > { %v739_v41 = vpop.f32.mrb[3].mxu1  ;;  %896 = vst [vmem:[#allocation2 + $0x4b] sm:$0xff] %v863_v38  ;;  %v879_v42 = vsel %vm815_vm3, %v736_v30, %v847_v36  ;;  %vm800_vm6 = vcmp.ge.f32.partialorder %v675_v40, 0.0  ;;  %v832_v44 = vmul.f32 0.2, %v675_v40 }
 0x100   : > { %v866_v43 = vsel %vm802_vm4, %v8257_v34, %v834_v37  ;;  %912 = vst [vmem:[#allocation2 + $0x10b] sm:$0xff] %v879_v42  ;;  %v882_v45 = vsel %vm818_vm5, %v8273_v35, %v850_v39  ;;  %vm816_vm7 = vcmp.ge.f32.partialorder %v739_v41, 0.0  ;;  %v848_v46 = vmul.f32 0.2, %v739_v41 }
 0x101   : > { %899 = vst [vmem:[#allocation2 + $0x6b] sm:$0xff] %v866_v43  ;;  %915 = vst [vmem:[#allocation2 + $0x12b] sm:$0xff] %v882_v45  ;;  %v864_v47 = vsel %vm800_vm6, %v675_v40, %v832_v44  ;;  %v8260_v48 = vpop.f32.mrb[4].mxu0  ;;  %v8276_v49 = vpop.f32.mrb[4].mxu1 }
 0x102   : > { %897 = vst [vmem:[#allocation2 + $0x53] sm:$0xff] %v864_v47  ;;  %v880_v50 = vsel %vm816_vm7, %v739_v41, %v848_v46  ;;  %vm805_vm8 = vcmp.ge.f32.partialorder %v8260_v48, 0.0  ;;  %v837_v51 = vmul.f32 0.2, %v8260_v48  ;;  %vm821_vm9 = vcmp.ge.f32.partialorder %v8276_v49, 0.0  ;;  %v688_v52 = vpop.f32.mrb[5].mxu0 }
 0x103   : > { %v752_v53 = vpop.f32.mrb[5].mxu1  ;;  %913 = vst [vmem:[#allocation2 + $0x113] sm:$0xff] %v880_v50  ;;  %v853_v54 = vmul.f32 0.2, %v8276_v49  ;;  %vm803_vm10 = vcmp.ge.f32.partialorder %v688_v52, 0.0  ;;  %v8261_v58 = vpop.f32.mrb[6].mxu0 }
 0x104   : > { %v835_v55 = vmul.f32 0.2, %v688_v52  ;;  %vm819_vm11 = vcmp.ge.f32.partialorder %v752_v53, 0.0  ;;  %v869_v56 = vsel %vm805_vm8, %v8260_v48, %v837_v51  ;;  %v851_v57 = vmul.f32 0.2, %v752_v53  ;;  %v8277_v59 = vpop.f32.mrb[6].mxu1 }
 0x105   : > { %902 = vst [vmem:[#allocation2 + $0x93] sm:$0xff] %v869_v56  ;;  %v885_v60 = vsel %vm821_vm9, %v8276_v49, %v853_v54  ;;  %vm806_vm12 = vcmp.ge.f32.partialorder %v8261_v58, 0.0  ;;  %v838_v62 = vmul.f32 0.2, %v8261_v58  ;;  %v691_v63 = vpop.f32.mrb[7].mxu0  ;;  %v755_v0 = vpop.f32.mrb[7].mxu1 }
 0x106   : > { %v867_v61 = vsel %vm803_vm10, %v688_v52, %v835_v55  ;;  %918 = vst [vmem:[#allocation2 + $0x153] sm:$0xff] %v885_v60  ;;  %v883_v1 = vsel %vm819_vm11, %v752_v53, %v851_v57  ;;  %vm822_vm13 = vcmp.ge.f32.partialorder %v8277_v59, 0.0  ;;  %v854_v3 = vmul.f32 0.2, %v8277_v59 }
 0x107   : > { %900 = vst [vmem:[#allocation2 + $0x7b] sm:$0xff] %v867_v61  ;;  %vm804_vm14 = vcmp.ge.f32.partialorder %v691_v63, 0.0  ;;  %916 = vst [vmem:[#allocation2 + $0x13b] sm:$0xff] %v883_v1  ;;  %v870_v4 = vsel %vm806_vm12, %v8261_v58, %v838_v62  ;;  %v836_v5 = vmul.f32 0.2, %v691_v63  ;;  %vm820_vm15 = vcmp.ge.f32.partialorder %v755_v0, 0.0 }
 0x108   : > { %v852_v6 = vmul.f32 0.2, %v755_v0  ;;  %903 = vst [vmem:[#allocation2 + $0x9b] sm:$0xff] %v870_v4  ;;  %v886_v7 = vsel %vm822_vm13, %v8277_v59, %v854_v3 }
 0x109   : > { %919 = vst [vmem:[#allocation2 + $0x15b] sm:$0xff] %v886_v7  ;;  %v868_v8 = vsel %vm804_vm14, %v691_v63, %v836_v5  ;;  %v8264_v10 = vpop.f32.mrb[8].mxu0  ;;  %v8280_v11 = vpop.f32.mrb[8].mxu1 }
 0x10a   : > { %v884_v9 = vsel %vm820_vm15, %v755_v0, %v852_v6  ;;  %901 = vst [vmem:[#allocation2 + $0x83] sm:$0xff] %v868_v8  ;;  %vm809_vm0 = vcmp.ge.f32.partialorder %v8264_v10, 0.0  ;;  %v841_v12 = vmul.f32 0.2, %v8264_v10  ;;  %vm825_vm1 = vcmp.ge.f32.partialorder %v8280_v11, 0.0  ;;  %v704_v14 = vpop.f32.mrb[9].mxu0 }
 0x10b   : > { %917 = vst [vmem:[#allocation2 + $0x143] sm:$0xff] %v884_v9  ;;  %v857_v13 = vmul.f32 0.2, %v8280_v11  ;;  %v768_v15 = vpop.f32.mrb[9].mxu1  ;;  %vm807_vm2 = vcmp.ge.f32.partialorder %v704_v14, 0.0  ;;  %v8265_v19 = vpop.f32.mrb[10].mxu0 }
 0x10c   : > { %v873_v16 = vsel %vm809_vm0, %v8264_v10, %v841_v12  ;;  %v839_v18 = vmul.f32 0.2, %v704_v14  ;;  %v8281_v20 = vpop.f32.mrb[10].mxu1  ;;  %vm823_vm3 = vcmp.ge.f32.partialorder %v768_v15, 0.0  ;;  %v855_v21 = vmul.f32 0.2, %v768_v15 }
 0x10d   : > { %v889_v17 = vsel %vm825_vm1, %v8280_v11, %v857_v13  ;;  %906 = vst [vmem:[#allocation2 + $0xc3] sm:$0xff] %v873_v16  ;;  %vm810_vm4 = vcmp.ge.f32.partialorder %v8265_v19, 0.0  ;;  %v842_v22 = vmul.f32 0.2, %v8265_v19  ;;  %vm826_vm5 = vcmp.ge.f32.partialorder %v8281_v20, 0.0  ;;  %v707_v25 = vpop.f32.mrb[11].mxu0 }
 0x10e   : > { %922 = vst [vmem:[#allocation2 + $0x183] sm:$0xff] %v889_v17  ;;  %v871_v23 = vsel %vm807_vm2, %v704_v14, %v839_v18  ;;  %v858_v24 = vmul.f32 0.2, %v8281_v20  ;;  %v771_v26 = vpop.f32.mrb[11].mxu1  ;;  %v887_v27 = vsel %vm823_vm3, %v768_v15, %v855_v21  ;;  %vm808_vm6 = vcmp.ge.f32.partialorder %v707_v25, 0.0 }
 0x10f   : > { %904 = vst [vmem:[#allocation2 + $0xab] sm:$0xff] %v871_v23  ;;  %v874_v28 = vsel %vm810_vm4, %v8265_v19, %v842_v22  ;;  %v840_v29 = vmul.f32 0.2, %v707_v25  ;;  %920 = vst [vmem:[#allocation2 + $0x16b] sm:$0xff] %v887_v27  ;;  %vm824_vm7 = vcmp.ge.f32.partialorder %v771_v26, 0.0 }
 0x110   : > { %907 = vst [vmem:[#allocation2 + $0xcb] sm:$0xff] %v874_v28  ;;  %v890_v30 = vsel %vm826_vm5, %v8281_v20, %v858_v24  ;;  %v856_v31 = vmul.f32 0.2, %v771_v26 }
 0x111   : > { %923 = vst [vmem:[#allocation2 + $0x18b] sm:$0xff] %v890_v30  ;;  %v872_v32 = vsel %vm808_vm6, %v707_v25, %v840_v29  ;;  %v8268_v33 = vpop.f32.mrb[12].mxu0  ;;  %v8284_v34 = vpop.f32.mrb[12].mxu1 }
 0x112   : > { %905 = vst [vmem:[#allocation2 + $0xb3] sm:$0xff] %v872_v32  ;;  %v888_v35 = vsel %vm824_vm7, %v771_v26, %v856_v31  ;;  %vm813_vm8 = vcmp.ge.f32.partialorder %v8268_v33, 0.0  ;;  %v845_v36 = vmul.f32 0.2, %v8268_v33  ;;  %vm829_vm9 = vcmp.ge.f32.partialorder %v8284_v34, 0.0  ;;  %v720_v37 = vpop.f32.mrb[13].mxu0 }
 0x113   : > { %v784_v38 = vpop.f32.mrb[13].mxu1  ;;  %921 = vst [vmem:[#allocation2 + $0x173] sm:$0xff] %v888_v35  ;;  %v861_v39 = vmul.f32 0.2, %v8284_v34  ;;  %vm811_vm10 = vcmp.ge.f32.partialorder %v720_v37, 0.0  ;;  %v8269_v43 = vpop.f32.mrb[14].mxu0 }
 0x114   : > { %v843_v40 = vmul.f32 0.2, %v720_v37  ;;  %vm827_vm11 = vcmp.ge.f32.partialorder %v784_v38, 0.0  ;;  %v877_v41 = vsel %vm813_vm8, %v8268_v33, %v845_v36  ;;  %v859_v42 = vmul.f32 0.2, %v784_v38  ;;  %v8285_v44 = vpop.f32.mrb[14].mxu1 }
 0x115   : > { %910 = vst [vmem:[#allocation2 + $0xf3] sm:$0xff] %v877_v41  ;;  %v893_v45 = vsel %vm829_vm9, %v8284_v34, %v861_v39  ;;  %vm814_vm12 = vcmp.ge.f32.partialorder %v8269_v43, 0.0  ;;  %v846_v47 = vmul.f32 0.2, %v8269_v43  ;;  %v723_v48 = vpop.f32.mrb[15].mxu0  ;;  %v787_v49 = vpop.f32.mrb[15].mxu1 }
 0x116   : > { %v875_v46 = vsel %vm811_vm10, %v720_v37, %v843_v40  ;;  %926 = vst [vmem:[#allocation2 + $0x1b3] sm:$0xff] %v893_v45  ;;  %v891_v50 = vsel %vm827_vm11, %v784_v38, %v859_v42  ;;  %vm830_vm13 = vcmp.ge.f32.partialorder %v8285_v44, 0.0  ;;  %v862_v51 = vmul.f32 0.2, %v8285_v44 }
 0x117   : > { %908 = vst [vmem:[#allocation2 + $0xdb] sm:$0xff] %v875_v46  ;;  %vm812_vm14 = vcmp.ge.f32.partialorder %v723_v48, 0.0  ;;  %924 = vst [vmem:[#allocation2 + $0x19b] sm:$0xff] %v891_v50  ;;  %v878_v52 = vsel %vm814_vm12, %v8269_v43, %v846_v47  ;;  %v844_v53 = vmul.f32 0.2, %v723_v48  ;;  %vm828_vm15 = vcmp.ge.f32.partialorder %v787_v49, 0.0 }
 0x118   : > { %v860_v54 = vmul.f32 0.2, %v787_v49  ;;  %911 = vst [vmem:[#allocation2 + $0xfb] sm:$0xff] %v878_v52  ;;  %v894_v55 = vsel %vm830_vm13, %v8285_v44, %v862_v51 }
 0x119   : > { %927 = vst [vmem:[#allocation2 + $0x1bb] sm:$0xff] %v894_v55  ;;  %v876_v56 = vsel %vm812_vm14, %v723_v48, %v844_v53 }
 0x11a   : > { %v892_v57 = vsel %vm828_vm15, %v787_v49, %v860_v54  ;;  %909 = vst [vmem:[#allocation2 + $0xe3] sm:$0xff] %v876_v56 }
 0x11b   : > { %925 = vst [vmem:[#allocation2 + $0x1a3] sm:$0xff] %v892_v57 }
 0x11c LB: >> { %s966_s29 = smul.u32 24, %s9793_s28  ;;  %v1018_v51 = vld [vmem:[#allocation6 + $0x10] sm:$0xff]  ;;  %v1016_v53 = vld [vmem:[#allocation6] sm:$0xff]  ;;  %v1019_v57 = vld [vmem:[#allocation6 + $0x18] sm:$0xff]  ;;  %s9793_s28 = sphi %s10176_s28, %s965_s28  }
 0x11d   : >> { %s7794_s30 = smul.u32 448, %s9793_s28  ;;  %v1034_v52 = vld [vmem:[#allocation6 + $0x90] sm:$0xff]  ;;  %v1032_v54 = vld [vmem:[#allocation6 + $0x80] sm:$0xff]  ;;  %s965_s28 = sadd.s32 1, %s9793_s28  }
 0x11e   : >> { %s10188_s11 = scalar_lea.vmem [#allocation2], %s966_s29  ;;  %p962_p4 = scmp.ge.s32.totalorder %s965_s28, 7  }
 0x11f   : >> { %s10186_s10 = scalar_lea.vmem %s11234_s2, %s7794_s30  ;;  %s10233_s12 = smov (%p962_p4), 0  }
 0x120   : >> { %v9535_v60 = vld [vmem:[%s10186_s10] sm:$0xff]   ;;  %v9536_v61 = vld [vmem:[%s10186_s10 + $0x8] sm:$0xff]   ;;  %v9537_v63 = vld [vmem:[%s10186_s10 + $0x10] sm:$0xff]  }
 0x121   : >> { %8286 = vmatprep.subr.bf16.mxu0 %v9535_v60  ;;  %9054 = vmatprep.subr.bf16.mxu1 %v9535_v60  ;;  %v9538_v1 = vld [vmem:[%s10186_s10 + $0x18] sm:$0xff]   ;;  %v9539_v5 = vld [vmem:[%s10186_s10 + $0x20] sm:$0xff]   ;;  %v9540_v6 = vld [vmem:[%s10186_s10 + $0x28] sm:$0xff]  }
 0x122   : >> { %v968_v58 = vld [vmem:[%s10188_s11] sm:$0xff]  ;;  %v969_v59 = vld [vmem:[%s10188_s11 + $0x8] sm:$0xff]  ;;  %8287 = vmatpush3.bf16.msra.mxu0 %v9535_v60  ;;  %9062 = vmatpush3.bf16.msra.mxu1 %v9535_v60  ;;  %v9541_v7 = vld [vmem:[%s10186_s10 + $0x30] sm:$0xff]  }
 0x123   : >> { %v1000_v62 = vpack.c.bf16 %v969_v59, %v968_v58  ;;  %8288 = vmatprep.subr.bf16.mxu0 %v9536_v61  ;;  %9055 = vmatprep.subr.bf16.mxu1 %v9536_v61  ;;  %v984_v0 = vld [vmem:[%s10188_s11 + $0xc0] sm:$0xff]  ;;  %v985_v3 = vld [vmem:[%s10188_s11 + $0xc8] sm:$0xff]  ;;  %v9542_v8 = vld [vmem:[%s10186_s10 + $0x38] sm:$0xff]  }
 0x124   : >> { %v1008_v4 = vpack.c.bf16 %v985_v3, %v984_v0  ;;  %v970_v9 = vld [vmem:[%s10188_s11 + $0x18] sm:$0xff]  ;;  %v971_v10 = vld [vmem:[%s10188_s11 + $0x20] sm:$0xff]  ;;  %v972_v13 = vld [vmem:[%s10188_s11 + $0x30] sm:$0xff] }
 0x125   : >> { %8302 = vmatprep.mubr.bf16.mxu0 %v1000_v62  ;;  %v986_v11 = vld [vmem:[%s10188_s11 + $0xd8] sm:$0xff]  ;;  %v987_v12 = vld [vmem:[%s10188_s11 + $0xe0] sm:$0xff]  ;;  %v988_v15 = vld [vmem:[%s10188_s11 + $0xf0] sm:$0xff]  ;;  %v1001_v17 = vpack.c.bf16 %v971_v10, %v970_v9 }
 0x126   : >> { %8289 = vmatpush3.bf16.msra.mxu0 %v9536_v61  ;;  %9063 = vmatpush3.bf16.msra.mxu1 %v9536_v61  ;;  %v973_v14 = vld [vmem:[%s10188_s11 + $0x38] sm:$0xff]  ;;  %v1009_v18 = vpack.c.bf16 %v987_v12, %v986_v11  ;;  %v974_v21 = vld [vmem:[%s10188_s11 + $0x48] sm:$0xff]  ;;  %v975_v22 = vld [vmem:[%s10188_s11 + $0x50] sm:$0xff] }
 0x127   : >> { %8290 = vmatprep.subr.bf16.mxu0 %v9537_v63  ;;  %9056 = vmatprep.subr.bf16.mxu1 %v9537_v63  ;;  %v989_v16 = vld [vmem:[%s10188_s11 + $0xf8] sm:$0xff]  ;;  %v1002_v19 = vpack.c.bf16 %v973_v14, %v972_v13  ;;  %v990_v23 = vld [vmem:[%s10188_s11 + $0x108] sm:$0xff]  ;;  %v991_v24 = vld [vmem:[%s10188_s11 + $0x110] sm:$0xff]  ;;  %v1003_v29 = vpack.c.bf16 %v975_v22, %v974_v21 }
 0x128   : >> { %8318 = vmatprep.mubr.bf16.mxu1 %v1008_v4  ;;  %v1010_v20 = vpack.c.bf16 %v989_v16, %v988_v15  ;;  %v976_v25 = vld [vmem:[%s10188_s11 + $0x60] sm:$0xff]  ;;  %v977_v26 = vld [vmem:[%s10188_s11 + $0x68] sm:$0xff]  ;;  %v1011_v30 = vpack.c.bf16 %v991_v24, %v990_v23  ;;  %v978_v33 = vld [vmem:[%s10188_s11 + $0x78] sm:$0xff] }
 0x129   : >> { %v992_v27 = vld [vmem:[%s10188_s11 + $0x120] sm:$0xff]  ;;  %v993_v28 = vld [vmem:[%s10188_s11 + $0x128] sm:$0xff]  ;;  %v1004_v31 = vpack.c.bf16 %v977_v26, %v976_v25  ;;  %v994_v35 = vld [vmem:[%s10188_s11 + $0x138] sm:$0xff] }
 0x12a   : >> { %8291 = vmatpush3.bf16.msra.mxu0 %v9537_v63  ;;  %9064 = vmatpush3.bf16.msra.mxu1 %v9537_v63  ;;  %v1012_v32 = vpack.c.bf16 %v993_v28, %v992_v27  ;;  %v979_v34 = vld [vmem:[%s10188_s11 + $0x80] sm:$0xff]  ;;  %v980_v37 = vld [vmem:[%s10188_s11 + $0x90] sm:$0xff]  ;;  %v981_v38 = vld [vmem:[%s10188_s11 + $0x98] sm:$0xff] }
 0x12b   : >> { %8292 = vmatprep.subr.bf16.mxu0 %v9538_v1  ;;  %9057 = vmatprep.subr.bf16.mxu1 %v9538_v1  ;;  %v995_v36 = vld [vmem:[%s10188_s11 + $0x140] sm:$0xff]  ;;  %v996_v39 = vld [vmem:[%s10188_s11 + $0x150] sm:$0xff]  ;;  %v997_v40 = vld [vmem:[%s10188_s11 + $0x158] sm:$0xff]  ;;  %v1005_v41 = vpack.c.bf16 %v979_v34, %v978_v33  ;;  %v1006_v43 = vpack.c.bf16 %v981_v38, %v980_v37 }
 0x12c   : >> { %v1013_v42 = vpack.c.bf16 %v995_v36, %v994_v35  ;;  %v1014_v44 = vpack.c.bf16 %v997_v40, %v996_v39  ;;  %v982_v45 = vld [vmem:[%s10188_s11 + $0xa8] sm:$0xff]  ;;  %v983_v46 = vld [vmem:[%s10188_s11 + $0xb0] sm:$0xff]  ;;  %v1017_v63 = vld [vmem:[#allocation6 + $0x8] sm:$0xff] }
 0x12d   : >> { %v998_v47 = vld [vmem:[%s10188_s11 + $0x168] sm:$0xff]  ;;  %v999_v48 = vld [vmem:[%s10188_s11 + $0x170] sm:$0xff]  ;;  %v1007_v49 = vpack.c.bf16 %v983_v46, %v982_v45  ;;  %v1033_v0 = vld [vmem:[#allocation6 + $0x88] sm:$0xff] }
 0x12e   : >> { %8293 = vmatpush3.bf16.msra.mxu0 %v9538_v1  ;;  %9065 = vmatpush3.bf16.msra.mxu1 %v9538_v1  ;;  %v1015_v50 = vpack.c.bf16 %v999_v48, %v998_v47  ;;  %v1035_v58 = vld [vmem:[#allocation6 + $0x98] sm:$0xff]  ;;  %v1022_v12 = vld [vmem:[#allocation6 + $0x30] sm:$0xff]  ;;  %v1020_v14 = vld [vmem:[#allocation6 + $0x20] sm:$0xff] }
 0x12f   : >> { %8294 = vmatprep.subr.bf16.mxu0 %v9539_v5  ;;  %9058 = vmatprep.subr.bf16.mxu1 %v9539_v5  ;;  %v1038_v13 = vld [vmem:[#allocation6 + $0xb0] sm:$0xff]  ;;  %v1036_v15 = vld [vmem:[#allocation6 + $0xa0] sm:$0xff]  ;;  %v1021_v24 = vld [vmem:[#allocation6 + $0x28] sm:$0xff] }
 0x130   : >> { %v1037_v25 = vld [vmem:[#allocation6 + $0xa8] sm:$0xff]  ;;  %v1026_v36 = vld [vmem:[#allocation6 + $0x50] sm:$0xff]  ;;  %v1024_v38 = vld [vmem:[#allocation6 + $0x40] sm:$0xff] }
 0x131   : >> { %v1042_v37 = vld [vmem:[#allocation6 + $0xd0] sm:$0xff]  ;;  %v1040_v39 = vld [vmem:[#allocation6 + $0xc0] sm:$0xff]  ;;  %v1025_v48 = vld [vmem:[#allocation6 + $0x48] sm:$0xff] }
 0x132   : >> { %8295 = vmatpush3.bf16.msra.mxu0 %v9539_v5  ;;  %9066 = vmatpush3.bf16.msra.mxu1 %v9539_v5 }
 0x133   : >> { %8296 = vmatprep.subr.bf16.mxu0 %v9540_v6  ;;  %9059 = vmatprep.subr.bf16.mxu1 %v9540_v6 }
 0x136   : >> { %8297 = vmatpush3.bf16.msra.mxu0 %v9540_v6  ;;  %9067 = vmatpush3.bf16.msra.mxu1 %v9540_v6 }
 0x137   : >> { %8298 = vmatprep.subr.bf16.mxu0 %v9541_v7  ;;  %9060 = vmatprep.subr.bf16.mxu1 %v9541_v7 }
 0x13a   : >> { %8299 = vmatpush3.bf16.msra.mxu0 %v9541_v7  ;;  %9068 = vmatpush3.bf16.msra.mxu1 %v9541_v7 }
 0x13b   : >> { %8300 = vmatprep.subr.bf16.mxu0 %v9542_v8  ;;  %9061 = vmatprep.subr.bf16.mxu1 %v9542_v8 }
 0x13e   : >> { %8301 = vmatpush3.bf16.msra.mxu0 %v9542_v8  ;;  %9069 = vmatpush3.bf16.msra.mxu1 %v9542_v8 }
 0x141   : >> { %8303 = vmatmul.mubr.bf16.vlgmr.msra.gmra.mrb[0].mxu0 %v1001_v17  ;;  %8319 = vmatmul.mubr.bf16.vlgmr.msra.gmra.mrb[0].mxu1 %v1009_v18  ;;  %v1023_v18 = vld [vmem:[#allocation6 + $0x38] sm:$0xff] }
 0x142   : >> { %8306 = vmatprep.mubr.bf16.mxu0 %v1002_v19  ;;  %8322 = vmatprep.mubr.bf16.mxu1 %v1010_v20  ;;  %v1039_v19 = vld [vmem:[#allocation6 + $0xb8] sm:$0xff] }
 0x149   : >> { %8307 = vmatmul.mubr.bf16.gmra.mrb[4].mxu0 %v1003_v29  ;;  %8323 = vmatmul.mubr.bf16.gmra.mrb[4].mxu1 %v1011_v30 }
 0x14a   : >> { %8310 = vmatprep.mubr.bf16.mxu0 %v1004_v31  ;;  %8326 = vmatprep.mubr.bf16.mxu1 %v1012_v32 }
 0x151   : >> { %8311 = vmatmul.mubr.bf16.gmra.mrb[8].mxu0 %v1005_v41  ;;  %8327 = vmatmul.mubr.bf16.gmra.mrb[8].mxu1 %v1013_v42  ;;  %v1027_v42 = vld [vmem:[#allocation6 + $0x58] sm:$0xff] }
 0x152   : >> { %8314 = vmatprep.mubr.bf16.mxu0 %v1006_v43  ;;  %8330 = vmatprep.mubr.bf16.mxu1 %v1014_v44  ;;  %v1043_v43 = vld [vmem:[#allocation6 + $0xd8] sm:$0xff] }
 0x159   : >> { %8315 = vmatmul.mubr.bf16.gmra.mrb[12].mxu0 %v1007_v49  ;;  %8331 = vmatmul.mubr.bf16.gmra.mrb[12].mxu1 %v1015_v50  ;;  %v1041_v49 = vld [vmem:[#allocation6 + $0xc8] sm:$0xff] }
 0x214   : >> { %v8304_v55 = vpop.f32.mrb[0].mxu0  ;;  %v8320_v56 = vpop.f32.mrb[0].mxu1 }
 0x215   : >> { %v1279_v59 = vadd.f32 %v8304_v55, %v1018_v51  ;;  %v1295_v60 = vadd.f32 %v8320_v56, %v1034_v52  ;;  %v1150_v61 = vpop.f32.mrb[1].mxu0  ;;  %v1214_v62 = vpop.f32.mrb[1].mxu1 }
 0x216   : >> { %v1277_v1 = vadd.f32 %v1150_v61, %v1016_v53  ;;  %v1293_v3 = vadd.f32 %v1214_v62, %v1032_v54  ;;  %v8305_v4 = vpop.f32.mrb[2].mxu0  ;;  %v8321_v5 = vpop.f32.mrb[2].mxu1  ;;  %v1046_v61 = vld [vmem:[#allocation6 + $0xf0] sm:$0xff]  ;;  %v1028_v62 = vld [vmem:[#allocation6 + $0x60] sm:$0xff] }
 0x217   : >> { %1311 = vst [vmem:[#allocation6 + $0x10] sm:$0xff] %v1279_v59  ;;  %1327 = vst [vmem:[#allocation6 + $0x90] sm:$0xff] %v1295_v60  ;;  %v1280_v6 = vadd.f32 %v8305_v4, %v1019_v57  ;;  %v1296_v7 = vadd.f32 %v8321_v5, %v1035_v58  ;;  %v1153_v8 = vpop.f32.mrb[3].mxu0  ;;  %v1217_v9 = vpop.f32.mrb[3].mxu1  ;;  %v1030_v60 = vld [vmem:[#allocation6 + $0x70] sm:$0xff]  ;;  %v1047_v4 = vld [vmem:[#allocation6 + $0xf8] sm:$0xff] }
 0x218   : >> { %1309 = vst [vmem:[#allocation6] sm:$0xff] %v1277_v1  ;;  %1325 = vst [vmem:[#allocation6 + $0x80] sm:$0xff] %v1293_v3  ;;  %v1278_v10 = vadd.f32 %v1153_v8, %v1017_v63  ;;  %v1294_v11 = vadd.f32 %v1217_v9, %v1033_v0  ;;  %v1044_v63 = vld [vmem:[#allocation6 + $0xe0] sm:$0xff]  ;;  %v1031_v3 = vld [vmem:[#allocation6 + $0x78] sm:$0xff] }
 0x219   : >> { %1312 = vst [vmem:[#allocation6 + $0x18] sm:$0xff] %v1280_v6  ;;  %1328 = vst [vmem:[#allocation6 + $0x98] sm:$0xff] %v1296_v7  ;;  %v1029_v9 = vld [vmem:[#allocation6 + $0x68] sm:$0xff] }
 0x21a   : >> { %1310 = vst [vmem:[#allocation6 + $0x8] sm:$0xff] %v1278_v10  ;;  %1326 = vst [vmem:[#allocation6 + $0x88] sm:$0xff] %v1294_v11  ;;  %v1045_v10 = vld [vmem:[#allocation6 + $0xe8] sm:$0xff] }
 0x21c   : >> { %v8308_v16 = vpop.f32.mrb[4].mxu0  ;;  %v8324_v17 = vpop.f32.mrb[4].mxu1 }
 0x21d   : >> { %v1283_v20 = vadd.f32 %v8308_v16, %v1022_v12  ;;  %v1299_v21 = vadd.f32 %v8324_v17, %v1038_v13  ;;  %v1166_v22 = vpop.f32.mrb[5].mxu0  ;;  %v1230_v23 = vpop.f32.mrb[5].mxu1 }
 0x21e   : >> { %v1281_v26 = vadd.f32 %v1166_v22, %v1020_v14  ;;  %v1297_v27 = vadd.f32 %v1230_v23, %v1036_v15  ;;  %v8309_v28 = vpop.f32.mrb[6].mxu0  ;;  %v8325_v29 = vpop.f32.mrb[6].mxu1 }
 0x21f   : >> { %1315 = vst [vmem:[#allocation6 + $0x30] sm:$0xff] %v1283_v20  ;;  %1331 = vst [vmem:[#allocation6 + $0xb0] sm:$0xff] %v1299_v21  ;;  %v1284_v30 = vadd.f32 %v8309_v28, %v1023_v18  ;;  %v1300_v31 = vadd.f32 %v8325_v29, %v1039_v19  ;;  %v1169_v32 = vpop.f32.mrb[7].mxu0  ;;  %v1233_v33 = vpop.f32.mrb[7].mxu1 }
 0x220   : >> { %1313 = vst [vmem:[#allocation6 + $0x20] sm:$0xff] %v1281_v26  ;;  %1329 = vst [vmem:[#allocation6 + $0xa0] sm:$0xff] %v1297_v27  ;;  %v1282_v34 = vadd.f32 %v1169_v32, %v1021_v24  ;;  %v1298_v35 = vadd.f32 %v1233_v33, %v1037_v25 }
 0x221   : >> { %1316 = vst [vmem:[#allocation6 + $0x38] sm:$0xff] %v1284_v30  ;;  %1332 = vst [vmem:[#allocation6 + $0xb8] sm:$0xff] %v1300_v31 }
 0x222   : >> { %1314 = vst [vmem:[#allocation6 + $0x28] sm:$0xff] %v1282_v34  ;;  %1330 = vst [vmem:[#allocation6 + $0xa8] sm:$0xff] %v1298_v35 }
 0x224   : >> { %v8312_v40 = vpop.f32.mrb[8].mxu0  ;;  %v8328_v41 = vpop.f32.mrb[8].mxu1 }
 0x225   : >> { %v1287_v44 = vadd.f32 %v8312_v40, %v1026_v36  ;;  %v1303_v45 = vadd.f32 %v8328_v41, %v1042_v37  ;;  %v1182_v46 = vpop.f32.mrb[9].mxu0  ;;  %v1246_v47 = vpop.f32.mrb[9].mxu1 }
 0x226   : >> { %v1285_v50 = vadd.f32 %v1182_v46, %v1024_v38  ;;  %v1301_v51 = vadd.f32 %v1246_v47, %v1040_v39  ;;  %v8313_v52 = vpop.f32.mrb[10].mxu0  ;;  %v8329_v53 = vpop.f32.mrb[10].mxu1 }
 0x227   : >> { %1319 = vst [vmem:[#allocation6 + $0x50] sm:$0xff] %v1287_v44  ;;  %1335 = vst [vmem:[#allocation6 + $0xd0] sm:$0xff] %v1303_v45  ;;  %v1288_v54 = vadd.f32 %v8313_v52, %v1027_v42  ;;  %v1304_v55 = vadd.f32 %v8329_v53, %v1043_v43  ;;  %v1185_v56 = vpop.f32.mrb[11].mxu0  ;;  %v1249_v57 = vpop.f32.mrb[11].mxu1 }
 0x228   : >> { %1317 = vst [vmem:[#allocation6 + $0x40] sm:$0xff] %v1285_v50  ;;  %1333 = vst [vmem:[#allocation6 + $0xc0] sm:$0xff] %v1301_v51  ;;  %v1286_v58 = vadd.f32 %v1185_v56, %v1025_v48  ;;  %v1302_v59 = vadd.f32 %v1249_v57, %v1041_v49 }
 0x229   : >> { %1320 = vst [vmem:[#allocation6 + $0x58] sm:$0xff] %v1288_v54  ;;  %1336 = vst [vmem:[#allocation6 + $0xd8] sm:$0xff] %v1304_v55 }
 0x22a   : >> { %1318 = vst [vmem:[#allocation6 + $0x48] sm:$0xff] %v1286_v58  ;;  %1334 = vst [vmem:[#allocation6 + $0xc8] sm:$0xff] %v1302_v59 }
 0x22c   : >> { %v8316_v0 = vpop.f32.mrb[12].mxu0  ;;  %v8332_v1 = vpop.f32.mrb[12].mxu1  ;;  %964 = sbr.rel (!%p962_p4) target bundleno = 284 (0x11c), region = 244 }
 0x22d   : >> { %v1291_v5 = vadd.f32 %v8316_v0, %v1030_v60  ;;  %v1307_v6 = vadd.f32 %v8332_v1, %v1046_v61  ;;  %v1198_v7 = vpop.f32.mrb[13].mxu0  ;;  %v1262_v8 = vpop.f32.mrb[13].mxu1 }
 0x22e   : >> { %v1289_v11 = vadd.f32 %v1198_v7, %v1028_v62  ;;  %v1305_v12 = vadd.f32 %v1262_v8, %v1044_v63  ;;  %v8317_v13 = vpop.f32.mrb[14].mxu0  ;;  %v8333_v14 = vpop.f32.mrb[14].mxu1 }
 0x22f   : >> { %1323 = vst [vmem:[#allocation6 + $0x70] sm:$0xff] %v1291_v5  ;;  %1339 = vst [vmem:[#allocation6 + $0xf0] sm:$0xff] %v1307_v6  ;;  %v1292_v15 = vadd.f32 %v8317_v13, %v1031_v3  ;;  %v1308_v16 = vadd.f32 %v8333_v14, %v1047_v4  ;;  %v1201_v17 = vpop.f32.mrb[15].mxu0  ;;  %v1265_v18 = vpop.f32.mrb[15].mxu1 }
 0x230   : >> { %1321 = vst [vmem:[#allocation6 + $0x60] sm:$0xff] %v1289_v11  ;;  %1337 = vst [vmem:[#allocation6 + $0xe0] sm:$0xff] %v1305_v12  ;;  %v1290_v19 = vadd.f32 %v1201_v17, %v1029_v9  ;;  %v1306_v20 = vadd.f32 %v1265_v18, %v1045_v10 }
 0x231   : >> { %1324 = vst [vmem:[#allocation6 + $0x78] sm:$0xff] %v1292_v15  ;;  %1340 = vst [vmem:[#allocation6 + $0xf8] sm:$0xff] %v1308_v16 }
 0x232   : >> { %1322 = vst [vmem:[#allocation6 + $0x68] sm:$0xff] %v1290_v19  ;;  %1338 = vst [vmem:[#allocation6 + $0xe8] sm:$0xff] %v1306_v20 }
 0x233 LB: >> { %s1347_s13 = smul.u32 24, %s9797_s12  ;;  %v1399_v14 = vld [vmem:[#allocation6 + $0x10] sm:$0xff]  ;;  %v1397_v16 = vld [vmem:[#allocation6] sm:$0xff]  ;;  %v1400_v20 = vld [vmem:[#allocation6 + $0x18] sm:$0xff]  ;;  %s9797_s12 = sphi %s10233_s12, %s1346_s12  }
 0x234   : >> { %s7396_s14 = smul.u32 448, %s9797_s12  ;;  %v1415_v15 = vld [vmem:[#allocation6 + $0x90] sm:$0xff]  ;;  %v1413_v17 = vld [vmem:[#allocation6 + $0x80] sm:$0xff]  ;;  %s1346_s12 = sadd.s32 1, %s9797_s12  }
 0x235   : >> { %s10245_s19 = scalar_lea.vmem [#allocation2], %s1347_s13  ;;  %p1343_p5 = scmp.ge.s32.totalorder %s1346_s12, 7  }
 0x236   : >> { %s10243_s18 = scalar_lea.vmem %s11234_s2, %s7396_s14  ;;  %v1349_v21 = vld [vmem:[%s10245_s19 + $0x1] sm:$0xff]  ;;  %v1350_v22 = vld [vmem:[%s10245_s19 + $0x9] sm:$0xff]  ;;  %v1351_v35 = vld [vmem:[%s10245_s19 + $0x19] sm:$0xff]  ;;  %s10290_s20 = smov (%p1343_p5), 0  }
 0x237   : >> { %v9543_v23 = vld [vmem:[%s10243_s18 + $0x40] sm:$0xff]   ;;  %v9544_v24 = vld [vmem:[%s10243_s18 + $0x48] sm:$0xff]   ;;  %v1381_v25 = vpack.c.bf16 %v1350_v22, %v1349_v21  ;;  %v9545_v26 = vld [vmem:[%s10243_s18 + $0x50] sm:$0xff]  }
 0x238   : >> { %8334 = vmatprep.subr.bf16.mxu0 %v9543_v23  ;;  %9070 = vmatprep.subr.bf16.mxu1 %v9543_v23  ;;  %v1365_v27 = vld [vmem:[%s10245_s19 + $0xc1] sm:$0xff]  ;;  %v9546_v28 = vld [vmem:[%s10243_s18 + $0x58] sm:$0xff]   ;;  %v1366_v29 = vld [vmem:[%s10245_s19 + $0xc9] sm:$0xff] }
 0x239   : >> { %8335 = vmatpush3.bf16.msra.mxu0 %v9543_v23  ;;  %9078 = vmatpush3.bf16.msra.mxu1 %v9543_v23  ;;  %v1389_v30 = vpack.c.bf16 %v1366_v29, %v1365_v27  ;;  %v9547_v31 = vld [vmem:[%s10243_s18 + $0x60] sm:$0xff]   ;;  %v9548_v32 = vld [vmem:[%s10243_s18 + $0x68] sm:$0xff]   ;;  %v9549_v33 = vld [vmem:[%s10243_s18 + $0x70] sm:$0xff]  }
 0x23a   : >> { %8336 = vmatprep.subr.bf16.mxu0 %v9544_v24  ;;  %9071 = vmatprep.subr.bf16.mxu1 %v9544_v24  ;;  %v9550_v34 = vld [vmem:[%s10243_s18 + $0x78] sm:$0xff]   ;;  %v1352_v36 = vld [vmem:[%s10245_s19 + $0x21] sm:$0xff]  ;;  %v1355_v47 = vld [vmem:[%s10245_s19 + $0x49] sm:$0xff] }
 0x23b   : >> { %8350 = vmatprep.mubr.bf16.mxu0 %v1381_v25  ;;  %8366 = vmatprep.mubr.bf16.mxu1 %v1389_v30  ;;  %v1367_v37 = vld [vmem:[%s10245_s19 + $0xd9] sm:$0xff]  ;;  %v1368_v38 = vld [vmem:[%s10245_s19 + $0xe1] sm:$0xff]  ;;  %v1353_v39 = vld [vmem:[%s10245_s19 + $0x31] sm:$0xff]  ;;  %v1382_v43 = vpack.c.bf16 %v1352_v36, %v1351_v35 }
 0x23c   : >> { %v1354_v40 = vld [vmem:[%s10245_s19 + $0x39] sm:$0xff]  ;;  %v1369_v41 = vld [vmem:[%s10245_s19 + $0xf1] sm:$0xff]  ;;  %v1390_v44 = vpack.c.bf16 %v1368_v38, %v1367_v37  ;;  %v1371_v49 = vld [vmem:[%s10245_s19 + $0x109] sm:$0xff] }
 0x23d   : >> { %8337 = vmatpush3.bf16.msra.mxu0 %v9544_v24  ;;  %9079 = vmatpush3.bf16.msra.mxu1 %v9544_v24  ;;  %v1370_v42 = vld [vmem:[%s10245_s19 + $0xf9] sm:$0xff]  ;;  %v1383_v45 = vpack.c.bf16 %v1354_v40, %v1353_v39  ;;  %v1356_v48 = vld [vmem:[%s10245_s19 + $0x51] sm:$0xff]  ;;  %v1357_v51 = vld [vmem:[%s10245_s19 + $0x61] sm:$0xff] }
 0x23e   : >> { %8338 = vmatprep.subr.bf16.mxu0 %v9545_v26  ;;  %9072 = vmatprep.subr.bf16.mxu1 %v9545_v26  ;;  %v1391_v46 = vpack.c.bf16 %v1370_v42, %v1369_v41  ;;  %v1372_v50 = vld [vmem:[%s10245_s19 + $0x111] sm:$0xff]  ;;  %v1358_v52 = vld [vmem:[%s10245_s19 + $0x69] sm:$0xff]  ;;  %v1373_v53 = vld [vmem:[%s10245_s19 + $0x121] sm:$0xff]  ;;  %v1384_v55 = vpack.c.bf16 %v1356_v48, %v1355_v47 }
 0x23f   : >> { %v1374_v54 = vld [vmem:[%s10245_s19 + $0x129] sm:$0xff]  ;;  %v1392_v56 = vpack.c.bf16 %v1372_v50, %v1371_v49  ;;  %v1385_v57 = vpack.c.bf16 %v1358_v52, %v1357_v51  ;;  %v1359_v59 = vld [vmem:[%s10245_s19 + $0x79] sm:$0xff]  ;;  %v1360_v60 = vld [vmem:[%s10245_s19 + $0x81] sm:$0xff] }
 0x240   : >> { %v1393_v58 = vpack.c.bf16 %v1374_v54, %v1373_v53  ;;  %v1375_v61 = vld [vmem:[%s10245_s19 + $0x139] sm:$0xff]  ;;  %v1376_v62 = vld [vmem:[%s10245_s19 + $0x141] sm:$0xff]  ;;  %v1361_v63 = vld [vmem:[%s10245_s19 + $0x91] sm:$0xff]  ;;  %v1386_v4 = vpack.c.bf16 %v1360_v60, %v1359_v59 }
 0x241   : >> { %8339 = vmatpush3.bf16.msra.mxu0 %v9545_v26  ;;  %9080 = vmatpush3.bf16.msra.mxu1 %v9545_v26  ;;  %v1362_v0 = vld [vmem:[%s10245_s19 + $0x99] sm:$0xff]  ;;  %v1377_v1 = vld [vmem:[%s10245_s19 + $0x151] sm:$0xff]  ;;  %v1394_v5 = vpack.c.bf16 %v1376_v62, %v1375_v61  ;;  %v1363_v8 = vld [vmem:[%s10245_s19 + $0xa9] sm:$0xff] }
 0x242   : >> { %8340 = vmatprep.subr.bf16.mxu0 %v9546_v28  ;;  %9073 = vmatprep.subr.bf16.mxu1 %v9546_v28  ;;  %v1378_v3 = vld [vmem:[%s10245_s19 + $0x159] sm:$0xff]  ;;  %v1387_v6 = vpack.c.bf16 %v1362_v0, %v1361_v63  ;;  %v1364_v9 = vld [vmem:[%s10245_s19 + $0xb1] sm:$0xff]  ;;  %v1379_v10 = vld [vmem:[%s10245_s19 + $0x169] sm:$0xff] }
 0x243   : >> { %v1395_v7 = vpack.c.bf16 %v1378_v3, %v1377_v1  ;;  %v1380_v11 = vld [vmem:[%s10245_s19 + $0x171] sm:$0xff]  ;;  %v1388_v12 = vpack.c.bf16 %v1364_v9, %v1363_v8  ;;  %v1416_v21 = vld [vmem:[#allocation6 + $0x98] sm:$0xff]  ;;  %v1403_v38 = vld [vmem:[#allocation6 + $0x30] sm:$0xff] }
 0x244   : >> { %v1396_v13 = vpack.c.bf16 %v1380_v11, %v1379_v10  ;;  %v1398_v26 = vld [vmem:[#allocation6 + $0x8] sm:$0xff]  ;;  %v1419_v39 = vld [vmem:[#allocation6 + $0xb0] sm:$0xff]  ;;  %v1401_v40 = vld [vmem:[#allocation6 + $0x20] sm:$0xff] }
 0x245   : >> { %8341 = vmatpush3.bf16.msra.mxu0 %v9546_v28  ;;  %9081 = vmatpush3.bf16.msra.mxu1 %v9546_v28  ;;  %v1414_v27 = vld [vmem:[#allocation6 + $0x88] sm:$0xff]  ;;  %v1417_v41 = vld [vmem:[#allocation6 + $0xa0] sm:$0xff]  ;;  %v1407_v62 = vld [vmem:[#allocation6 + $0x50] sm:$0xff] }
 0x246   : >> { %8342 = vmatprep.subr.bf16.mxu0 %v9547_v31  ;;  %9074 = vmatprep.subr.bf16.mxu1 %v9547_v31  ;;  %v1402_v50 = vld [vmem:[#allocation6 + $0x28] sm:$0xff]  ;;  %v1423_v63 = vld [vmem:[#allocation6 + $0xd0] sm:$0xff]  ;;  %v1405_v0 = vld [vmem:[#allocation6 + $0x40] sm:$0xff] }
 0x247   : >> { %v1418_v51 = vld [vmem:[#allocation6 + $0xa8] sm:$0xff]  ;;  %v1421_v1 = vld [vmem:[#allocation6 + $0xc0] sm:$0xff] }
 0x248   : >> { %v1406_v11 = vld [vmem:[#allocation6 + $0x48] sm:$0xff] }
 0x249   : >> { %8343 = vmatpush3.bf16.msra.mxu0 %v9547_v31  ;;  %9082 = vmatpush3.bf16.msra.mxu1 %v9547_v31 }
 0x24a   : >> { %8344 = vmatprep.subr.bf16.mxu0 %v9548_v32  ;;  %9075 = vmatprep.subr.bf16.mxu1 %v9548_v32 }
 0x24d   : >> { %8345 = vmatpush3.bf16.msra.mxu0 %v9548_v32  ;;  %9083 = vmatpush3.bf16.msra.mxu1 %v9548_v32 }
 0x24e   : >> { %8346 = vmatprep.subr.bf16.mxu0 %v9549_v33  ;;  %9076 = vmatprep.subr.bf16.mxu1 %v9549_v33 }
 0x251   : >> { %8347 = vmatpush3.bf16.msra.mxu0 %v9549_v33  ;;  %9084 = vmatpush3.bf16.msra.mxu1 %v9549_v33 }
 0x252   : >> { %8348 = vmatprep.subr.bf16.mxu0 %v9550_v34  ;;  %9077 = vmatprep.subr.bf16.mxu1 %v9550_v34 }
 0x255   : >> { %8349 = vmatpush3.bf16.msra.mxu0 %v9550_v34  ;;  %9085 = vmatpush3.bf16.msra.mxu1 %v9550_v34 }
 0x258   : >> { %8351 = vmatmul.mubr.bf16.vlgmr.msra.gmra.mrb[0].mxu0 %v1382_v43  ;;  %8367 = vmatmul.mubr.bf16.vlgmr.msra.gmra.mrb[0].mxu1 %v1390_v44  ;;  %v1404_v44 = vld [vmem:[#allocation6 + $0x38] sm:$0xff] }
 0x259   : >> { %8354 = vmatprep.mubr.bf16.mxu0 %v1383_v45  ;;  %8370 = vmatprep.mubr.bf16.mxu1 %v1391_v46  ;;  %v1420_v45 = vld [vmem:[#allocation6 + $0xb8] sm:$0xff] }
 0x260   : >> { %8355 = vmatmul.mubr.bf16.gmra.mrb[4].mxu0 %v1384_v55  ;;  %8371 = vmatmul.mubr.bf16.gmra.mrb[4].mxu1 %v1392_v56 }
 0x261   : >> { %8358 = vmatprep.mubr.bf16.mxu0 %v1385_v57  ;;  %8374 = vmatprep.mubr.bf16.mxu1 %v1393_v58 }
 0x268   : >> { %8359 = vmatmul.mubr.bf16.gmra.mrb[8].mxu0 %v1386_v4  ;;  %8375 = vmatmul.mubr.bf16.gmra.mrb[8].mxu1 %v1394_v5  ;;  %v1408_v5 = vld [vmem:[#allocation6 + $0x58] sm:$0xff] }
 0x269   : >> { %8362 = vmatprep.mubr.bf16.mxu0 %v1387_v6  ;;  %8378 = vmatprep.mubr.bf16.mxu1 %v1395_v7  ;;  %v1424_v6 = vld [vmem:[#allocation6 + $0xd8] sm:$0xff] }
 0x270   : >> { %8363 = vmatmul.mubr.bf16.gmra.mrb[12].mxu0 %v1388_v12  ;;  %8379 = vmatmul.mubr.bf16.gmra.mrb[12].mxu1 %v1396_v13  ;;  %v1422_v12 = vld [vmem:[#allocation6 + $0xc8] sm:$0xff] }
 0x32b   : >> { %v8352_v18 = vpop.f32.mrb[0].mxu0  ;;  %v8368_v19 = vpop.f32.mrb[0].mxu1 }
 0x32c   : >> { %v1661_v22 = vadd.f32 %v8352_v18, %v1399_v14  ;;  %v1677_v23 = vadd.f32 %v8368_v19, %v1415_v15  ;;  %v1532_v24 = vpop.f32.mrb[1].mxu0  ;;  %v1596_v25 = vpop.f32.mrb[1].mxu1 }
 0x32d   : >> { %v1659_v28 = vadd.f32 %v1532_v24, %v1397_v16  ;;  %v1675_v29 = vadd.f32 %v1596_v25, %v1413_v17  ;;  %v8353_v30 = vpop.f32.mrb[2].mxu0  ;;  %v8369_v31 = vpop.f32.mrb[2].mxu1  ;;  %v1427_v24 = vld [vmem:[#allocation6 + $0xf0] sm:$0xff]  ;;  %v1409_v25 = vld [vmem:[#allocation6 + $0x60] sm:$0xff] }
 0x32e   : >> { %1693 = vst [vmem:[#allocation6 + $0x10] sm:$0xff] %v1661_v22  ;;  %1709 = vst [vmem:[#allocation6 + $0x90] sm:$0xff] %v1677_v23  ;;  %v1662_v32 = vadd.f32 %v8353_v30, %v1400_v20  ;;  %v1678_v33 = vadd.f32 %v8369_v31, %v1416_v21  ;;  %v1535_v34 = vpop.f32.mrb[3].mxu0  ;;  %v1599_v35 = vpop.f32.mrb[3].mxu1  ;;  %v1411_v23 = vld [vmem:[#allocation6 + $0x70] sm:$0xff]  ;;  %v1428_v30 = vld [vmem:[#allocation6 + $0xf8] sm:$0xff] }
 0x32f   : >> { %1691 = vst [vmem:[#allocation6] sm:$0xff] %v1659_v28  ;;  %1707 = vst [vmem:[#allocation6 + $0x80] sm:$0xff] %v1675_v29  ;;  %v1660_v36 = vadd.f32 %v1535_v34, %v1398_v26  ;;  %v1676_v37 = vadd.f32 %v1599_v35, %v1414_v27  ;;  %v1425_v26 = vld [vmem:[#allocation6 + $0xe0] sm:$0xff]  ;;  %v1412_v29 = vld [vmem:[#allocation6 + $0x78] sm:$0xff] }
 0x330   : >> { %1694 = vst [vmem:[#allocation6 + $0x18] sm:$0xff] %v1662_v32  ;;  %1710 = vst [vmem:[#allocation6 + $0x98] sm:$0xff] %v1678_v33  ;;  %v1410_v35 = vld [vmem:[#allocation6 + $0x68] sm:$0xff] }
 0x331   : >> { %1692 = vst [vmem:[#allocation6 + $0x8] sm:$0xff] %v1660_v36  ;;  %1708 = vst [vmem:[#allocation6 + $0x88] sm:$0xff] %v1676_v37  ;;  %v1426_v36 = vld [vmem:[#allocation6 + $0xe8] sm:$0xff] }
 0x333   : >> { %v8356_v42 = vpop.f32.mrb[4].mxu0  ;;  %v8372_v43 = vpop.f32.mrb[4].mxu1 }
 0x334   : >> { %v1665_v46 = vadd.f32 %v8356_v42, %v1403_v38  ;;  %v1681_v47 = vadd.f32 %v8372_v43, %v1419_v39  ;;  %v1548_v48 = vpop.f32.mrb[5].mxu0  ;;  %v1612_v49 = vpop.f32.mrb[5].mxu1 }
 0x335   : >> { %v1663_v52 = vadd.f32 %v1548_v48, %v1401_v40  ;;  %v1679_v53 = vadd.f32 %v1612_v49, %v1417_v41  ;;  %v8357_v54 = vpop.f32.mrb[6].mxu0  ;;  %v8373_v55 = vpop.f32.mrb[6].mxu1 }
 0x336   : >> { %1697 = vst [vmem:[#allocation6 + $0x30] sm:$0xff] %v1665_v46  ;;  %1713 = vst [vmem:[#allocation6 + $0xb0] sm:$0xff] %v1681_v47  ;;  %v1666_v56 = vadd.f32 %v8357_v54, %v1404_v44  ;;  %v1682_v57 = vadd.f32 %v8373_v55, %v1420_v45  ;;  %v1551_v58 = vpop.f32.mrb[7].mxu0  ;;  %v1615_v59 = vpop.f32.mrb[7].mxu1 }
 0x337   : >> { %1695 = vst [vmem:[#allocation6 + $0x20] sm:$0xff] %v1663_v52  ;;  %1711 = vst [vmem:[#allocation6 + $0xa0] sm:$0xff] %v1679_v53  ;;  %v1664_v60 = vadd.f32 %v1551_v58, %v1402_v50  ;;  %v1680_v61 = vadd.f32 %v1615_v59, %v1418_v51 }
 0x338   : >> { %1698 = vst [vmem:[#allocation6 + $0x38] sm:$0xff] %v1666_v56  ;;  %1714 = vst [vmem:[#allocation6 + $0xb8] sm:$0xff] %v1682_v57 }
 0x339   : >> { %1696 = vst [vmem:[#allocation6 + $0x28] sm:$0xff] %v1664_v60  ;;  %1712 = vst [vmem:[#allocation6 + $0xa8] sm:$0xff] %v1680_v61 }
 0x33b   : >> { %v8360_v3 = vpop.f32.mrb[8].mxu0  ;;  %v8376_v4 = vpop.f32.mrb[8].mxu1 }
 0x33c   : >> { %v1669_v7 = vadd.f32 %v8360_v3, %v1407_v62  ;;  %v1685_v8 = vadd.f32 %v8376_v4, %v1423_v63  ;;  %v1564_v9 = vpop.f32.mrb[9].mxu0  ;;  %v1628_v10 = vpop.f32.mrb[9].mxu1 }
 0x33d   : >> { %v1667_v13 = vadd.f32 %v1564_v9, %v1405_v0  ;;  %v1683_v14 = vadd.f32 %v1628_v10, %v1421_v1  ;;  %v8361_v15 = vpop.f32.mrb[10].mxu0  ;;  %v8377_v16 = vpop.f32.mrb[10].mxu1 }
 0x33e   : >> { %1701 = vst [vmem:[#allocation6 + $0x50] sm:$0xff] %v1669_v7  ;;  %1717 = vst [vmem:[#allocation6 + $0xd0] sm:$0xff] %v1685_v8  ;;  %v1670_v17 = vadd.f32 %v8361_v15, %v1408_v5  ;;  %v1686_v18 = vadd.f32 %v8377_v16, %v1424_v6  ;;  %v1567_v19 = vpop.f32.mrb[11].mxu0  ;;  %v1631_v20 = vpop.f32.mrb[11].mxu1 }
 0x33f   : >> { %1699 = vst [vmem:[#allocation6 + $0x40] sm:$0xff] %v1667_v13  ;;  %1715 = vst [vmem:[#allocation6 + $0xc0] sm:$0xff] %v1683_v14  ;;  %v1668_v21 = vadd.f32 %v1567_v19, %v1406_v11  ;;  %v1684_v22 = vadd.f32 %v1631_v20, %v1422_v12 }
 0x340   : >> { %1702 = vst [vmem:[#allocation6 + $0x58] sm:$0xff] %v1670_v17  ;;  %1718 = vst [vmem:[#allocation6 + $0xd8] sm:$0xff] %v1686_v18 }
 0x341   : >> { %1700 = vst [vmem:[#allocation6 + $0x48] sm:$0xff] %v1668_v21  ;;  %1716 = vst [vmem:[#allocation6 + $0xc8] sm:$0xff] %v1684_v22 }
 0x343   : >> { %v8364_v27 = vpop.f32.mrb[12].mxu0  ;;  %v8380_v28 = vpop.f32.mrb[12].mxu1  ;;  %1345 = sbr.rel (!%p1343_p5) target bundleno = 563 (0x233), region = 255 }
 0x344   : >> { %v1673_v31 = vadd.f32 %v8364_v27, %v1411_v23  ;;  %v1689_v32 = vadd.f32 %v8380_v28, %v1427_v24  ;;  %v1580_v33 = vpop.f32.mrb[13].mxu0  ;;  %v1644_v34 = vpop.f32.mrb[13].mxu1 }
 0x345   : >> { %v1671_v37 = vadd.f32 %v1580_v33, %v1409_v25  ;;  %v1687_v38 = vadd.f32 %v1644_v34, %v1425_v26  ;;  %v8365_v39 = vpop.f32.mrb[14].mxu0  ;;  %v8381_v40 = vpop.f32.mrb[14].mxu1 }
 0x346   : >> { %1705 = vst [vmem:[#allocation6 + $0x70] sm:$0xff] %v1673_v31  ;;  %1721 = vst [vmem:[#allocation6 + $0xf0] sm:$0xff] %v1689_v32  ;;  %v1674_v41 = vadd.f32 %v8365_v39, %v1412_v29  ;;  %v1690_v42 = vadd.f32 %v8381_v40, %v1428_v30  ;;  %v1583_v43 = vpop.f32.mrb[15].mxu0  ;;  %v1647_v44 = vpop.f32.mrb[15].mxu1 }
 0x347   : >> { %1703 = vst [vmem:[#allocation6 + $0x60] sm:$0xff] %v1671_v37  ;;  %1719 = vst [vmem:[#allocation6 + $0xe0] sm:$0xff] %v1687_v38  ;;  %v1672_v45 = vadd.f32 %v1583_v43, %v1410_v35  ;;  %v1688_v46 = vadd.f32 %v1647_v44, %v1426_v36 }
 0x348   : >> { %1706 = vst [vmem:[#allocation6 + $0x78] sm:$0xff] %v1674_v41  ;;  %1722 = vst [vmem:[#allocation6 + $0xf8] sm:$0xff] %v1690_v42 }
 0x349   : >> { %1704 = vst [vmem:[#allocation6 + $0x68] sm:$0xff] %v1672_v45  ;;  %1720 = vst [vmem:[#allocation6 + $0xe8] sm:$0xff] %v1688_v46 }
 0x34a LB: >> { %s1729_s21 = smul.u32 24, %s9801_s20  ;;  %v1781_v40 = vld [vmem:[#allocation6 + $0x10] sm:$0xff]  ;;  %v1779_v42 = vld [vmem:[#allocation6] sm:$0xff]  ;;  %v1782_v46 = vld [vmem:[#allocation6 + $0x18] sm:$0xff]  ;;  %s9801_s20 = sphi %s10290_s20, %s1728_s20  }
 0x34b   : >> { %s7421_s22 = smul.u32 448, %s9801_s20  ;;  %v1797_v41 = vld [vmem:[#allocation6 + $0x90] sm:$0xff]  ;;  %v1795_v43 = vld [vmem:[#allocation6 + $0x80] sm:$0xff]  ;;  %s1728_s20 = sadd.s32 1, %s9801_s20  }
 0x34c   : >> { %s10302_s27 = scalar_lea.vmem [#allocation2], %s1729_s21  ;;  %p1725_p6 = scmp.ge.s32.totalorder %s1728_s20, 7  }
 0x34d   : >> { %s10300_s26 = scalar_lea.vmem %s11234_s2, %s7421_s22  ;;  %v1731_v47 = vld [vmem:[%s10302_s27 + $0x2] sm:$0xff]  ;;  %v1732_v48 = vld [vmem:[%s10302_s27 + $0xa] sm:$0xff]  ;;  %v1733_v61 = vld [vmem:[%s10302_s27 + $0x1a] sm:$0xff]  ;;  %s10347_s28 = smov (%p1725_p6), 0  }
 0x34e   : >> { %v9551_v49 = vld [vmem:[%s10300_s26 + $0x80] sm:$0xff]   ;;  %v9552_v50 = vld [vmem:[%s10300_s26 + $0x88] sm:$0xff]   ;;  %v1763_v51 = vpack.c.bf16 %v1732_v48, %v1731_v47  ;;  %v9553_v52 = vld [vmem:[%s10300_s26 + $0x90] sm:$0xff]  }
 0x34f   : >> { %8382 = vmatprep.subr.bf16.mxu0 %v9551_v49  ;;  %9086 = vmatprep.subr.bf16.mxu1 %v9551_v49  ;;  %v1747_v53 = vld [vmem:[%s10302_s27 + $0xc2] sm:$0xff]  ;;  %v9554_v54 = vld [vmem:[%s10300_s26 + $0x98] sm:$0xff]   ;;  %v1748_v55 = vld [vmem:[%s10302_s27 + $0xca] sm:$0xff] }
 0x350   : >> { %8383 = vmatpush3.bf16.msra.mxu0 %v9551_v49  ;;  %9094 = vmatpush3.bf16.msra.mxu1 %v9551_v49  ;;  %v1771_v56 = vpack.c.bf16 %v1748_v55, %v1747_v53  ;;  %v9555_v57 = vld [vmem:[%s10300_s26 + $0xa0] sm:$0xff]   ;;  %v9556_v58 = vld [vmem:[%s10300_s26 + $0xa8] sm:$0xff]   ;;  %v9557_v59 = vld [vmem:[%s10300_s26 + $0xb0] sm:$0xff]  }
 0x351   : >> { %8384 = vmatprep.subr.bf16.mxu0 %v9552_v50  ;;  %9087 = vmatprep.subr.bf16.mxu1 %v9552_v50  ;;  %v9558_v60 = vld [vmem:[%s10300_s26 + $0xb8] sm:$0xff]   ;;  %v1734_v62 = vld [vmem:[%s10302_s27 + $0x22] sm:$0xff]  ;;  %v1737_v10 = vld [vmem:[%s10302_s27 + $0x4a] sm:$0xff] }
 0x352   : >> { %8398 = vmatprep.mubr.bf16.mxu0 %v1763_v51  ;;  %8414 = vmatprep.mubr.bf16.mxu1 %v1771_v56  ;;  %v1749_v63 = vld [vmem:[%s10302_s27 + $0xda] sm:$0xff]  ;;  %v1750_v0 = vld [vmem:[%s10302_s27 + $0xe2] sm:$0xff]  ;;  %v1735_v1 = vld [vmem:[%s10302_s27 + $0x32] sm:$0xff]  ;;  %v1764_v6 = vpack.c.bf16 %v1734_v62, %v1733_v61 }
 0x353   : >> { %v1736_v3 = vld [vmem:[%s10302_s27 + $0x3a] sm:$0xff]  ;;  %v1751_v4 = vld [vmem:[%s10302_s27 + $0xf2] sm:$0xff]  ;;  %v1772_v7 = vpack.c.bf16 %v1750_v0, %v1749_v63  ;;  %v1753_v12 = vld [vmem:[%s10302_s27 + $0x10a] sm:$0xff] }
 0x354   : >> { %8385 = vmatpush3.bf16.msra.mxu0 %v9552_v50  ;;  %9095 = vmatpush3.bf16.msra.mxu1 %v9552_v50  ;;  %v1752_v5 = vld [vmem:[%s10302_s27 + $0xfa] sm:$0xff]  ;;  %v1765_v8 = vpack.c.bf16 %v1736_v3, %v1735_v1  ;;  %v1738_v11 = vld [vmem:[%s10302_s27 + $0x52] sm:$0xff]  ;;  %v1739_v14 = vld [vmem:[%s10302_s27 + $0x62] sm:$0xff] }
 0x355   : >> { %8386 = vmatprep.subr.bf16.mxu0 %v9553_v52  ;;  %9088 = vmatprep.subr.bf16.mxu1 %v9553_v52  ;;  %v1773_v9 = vpack.c.bf16 %v1752_v5, %v1751_v4  ;;  %v1754_v13 = vld [vmem:[%s10302_s27 + $0x112] sm:$0xff]  ;;  %v1740_v15 = vld [vmem:[%s10302_s27 + $0x6a] sm:$0xff]  ;;  %v1755_v16 = vld [vmem:[%s10302_s27 + $0x122] sm:$0xff]  ;;  %v1766_v18 = vpack.c.bf16 %v1738_v11, %v1737_v10 }
 0x356   : >> { %v1756_v17 = vld [vmem:[%s10302_s27 + $0x12a] sm:$0xff]  ;;  %v1774_v19 = vpack.c.bf16 %v1754_v13, %v1753_v12  ;;  %v1767_v20 = vpack.c.bf16 %v1740_v15, %v1739_v14  ;;  %v1741_v22 = vld [vmem:[%s10302_s27 + $0x7a] sm:$0xff]  ;;  %v1742_v23 = vld [vmem:[%s10302_s27 + $0x82] sm:$0xff] }
 0x357   : >> { %v1775_v21 = vpack.c.bf16 %v1756_v17, %v1755_v16  ;;  %v1757_v24 = vld [vmem:[%s10302_s27 + $0x13a] sm:$0xff]  ;;  %v1758_v25 = vld [vmem:[%s10302_s27 + $0x142] sm:$0xff]  ;;  %v1743_v26 = vld [vmem:[%s10302_s27 + $0x92] sm:$0xff]  ;;  %v1768_v30 = vpack.c.bf16 %v1742_v23, %v1741_v22 }
 0x358   : >> { %8387 = vmatpush3.bf16.msra.mxu0 %v9553_v52  ;;  %9096 = vmatpush3.bf16.msra.mxu1 %v9553_v52  ;;  %v1744_v27 = vld [vmem:[%s10302_s27 + $0x9a] sm:$0xff]  ;;  %v1759_v28 = vld [vmem:[%s10302_s27 + $0x152] sm:$0xff]  ;;  %v1776_v31 = vpack.c.bf16 %v1758_v25, %v1757_v24  ;;  %v1745_v34 = vld [vmem:[%s10302_s27 + $0xaa] sm:$0xff] }
 0x359   : >> { %8388 = vmatprep.subr.bf16.mxu0 %v9554_v54  ;;  %9089 = vmatprep.subr.bf16.mxu1 %v9554_v54  ;;  %v1760_v29 = vld [vmem:[%s10302_s27 + $0x15a] sm:$0xff]  ;;  %v1769_v32 = vpack.c.bf16 %v1744_v27, %v1743_v26  ;;  %v1746_v35 = vld [vmem:[%s10302_s27 + $0xb2] sm:$0xff]  ;;  %v1761_v36 = vld [vmem:[%s10302_s27 + $0x16a] sm:$0xff] }
 0x35a   : >> { %v1777_v33 = vpack.c.bf16 %v1760_v29, %v1759_v28  ;;  %v1762_v37 = vld [vmem:[%s10302_s27 + $0x172] sm:$0xff]  ;;  %v1770_v38 = vpack.c.bf16 %v1746_v35, %v1745_v34  ;;  %v1798_v47 = vld [vmem:[#allocation6 + $0x98] sm:$0xff]  ;;  %v1785_v0 = vld [vmem:[#allocation6 + $0x30] sm:$0xff] }
 0x35b   : >> { %v1778_v39 = vpack.c.bf16 %v1762_v37, %v1761_v36  ;;  %v1780_v52 = vld [vmem:[#allocation6 + $0x8] sm:$0xff]  ;;  %v1801_v1 = vld [vmem:[#allocation6 + $0xb0] sm:$0xff]  ;;  %v1783_v3 = vld [vmem:[#allocation6 + $0x20] sm:$0xff] }
 0x35c   : >> { %8389 = vmatpush3.bf16.msra.mxu0 %v9554_v54  ;;  %9097 = vmatpush3.bf16.msra.mxu1 %v9554_v54  ;;  %v1796_v53 = vld [vmem:[#allocation6 + $0x88] sm:$0xff]  ;;  %v1799_v4 = vld [vmem:[#allocation6 + $0xa0] sm:$0xff]  ;;  %v1789_v25 = vld [vmem:[#allocation6 + $0x50] sm:$0xff] }
 0x35d   : >> { %8390 = vmatprep.subr.bf16.mxu0 %v9555_v57  ;;  %9090 = vmatprep.subr.bf16.mxu1 %v9555_v57  ;;  %v1784_v13 = vld [vmem:[#allocation6 + $0x28] sm:$0xff]  ;;  %v1805_v26 = vld [vmem:[#allocation6 + $0xd0] sm:$0xff]  ;;  %v1787_v27 = vld [vmem:[#allocation6 + $0x40] sm:$0xff] }
 0x35e   : >> { %v1800_v14 = vld [vmem:[#allocation6 + $0xa8] sm:$0xff]  ;;  %v1803_v28 = vld [vmem:[#allocation6 + $0xc0] sm:$0xff] }
 0x35f   : >> { %v1788_v37 = vld [vmem:[#allocation6 + $0x48] sm:$0xff] }
 0x360   : >> { %8391 = vmatpush3.bf16.msra.mxu0 %v9555_v57  ;;  %9098 = vmatpush3.bf16.msra.mxu1 %v9555_v57 }
 0x361   : >> { %8392 = vmatprep.subr.bf16.mxu0 %v9556_v58  ;;  %9091 = vmatprep.subr.bf16.mxu1 %v9556_v58 }
 0x364   : >> { %8393 = vmatpush3.bf16.msra.mxu0 %v9556_v58  ;;  %9099 = vmatpush3.bf16.msra.mxu1 %v9556_v58 }
 0x365   : >> { %8394 = vmatprep.subr.bf16.mxu0 %v9557_v59  ;;  %9092 = vmatprep.subr.bf16.mxu1 %v9557_v59 }
 0x368   : >> { %8395 = vmatpush3.bf16.msra.mxu0 %v9557_v59  ;;  %9100 = vmatpush3.bf16.msra.mxu1 %v9557_v59 }
 0x369   : >> { %8396 = vmatprep.subr.bf16.mxu0 %v9558_v60  ;;  %9093 = vmatprep.subr.bf16.mxu1 %v9558_v60 }
 0x36c   : >> { %8397 = vmatpush3.bf16.msra.mxu0 %v9558_v60  ;;  %9101 = vmatpush3.bf16.msra.mxu1 %v9558_v60 }
 0x36f   : >> { %8399 = vmatmul.mubr.bf16.vlgmr.msra.gmra.mrb[0].mxu0 %v1764_v6  ;;  %8415 = vmatmul.mubr.bf16.vlgmr.msra.gmra.mrb[0].mxu1 %v1772_v7  ;;  %v1786_v7 = vld [vmem:[#allocation6 + $0x38] sm:$0xff] }
 0x370   : >> { %8402 = vmatprep.mubr.bf16.mxu0 %v1765_v8  ;;  %8418 = vmatprep.mubr.bf16.mxu1 %v1773_v9  ;;  %v1802_v8 = vld [vmem:[#allocation6 + $0xb8] sm:$0xff] }
 0x377   : >> { %8403 = vmatmul.mubr.bf16.gmra.mrb[4].mxu0 %v1766_v18  ;;  %8419 = vmatmul.mubr.bf16.gmra.mrb[4].mxu1 %v1774_v19 }
 0x378   : >> { %8406 = vmatprep.mubr.bf16.mxu0 %v1767_v20  ;;  %8422 = vmatprep.mubr.bf16.mxu1 %v1775_v21 }
 0x37f   : >> { %8407 = vmatmul.mubr.bf16.gmra.mrb[8].mxu0 %v1768_v30  ;;  %8423 = vmatmul.mubr.bf16.gmra.mrb[8].mxu1 %v1776_v31  ;;  %v1790_v31 = vld [vmem:[#allocation6 + $0x58] sm:$0xff] }
 0x380   : >> { %8410 = vmatprep.mubr.bf16.mxu0 %v1769_v32  ;;  %8426 = vmatprep.mubr.bf16.mxu1 %v1777_v33  ;;  %v1806_v32 = vld [vmem:[#allocation6 + $0xd8] sm:$0xff] }
 0x387   : >> { %8411 = vmatmul.mubr.bf16.gmra.mrb[12].mxu0 %v1770_v38  ;;  %8427 = vmatmul.mubr.bf16.gmra.mrb[12].mxu1 %v1778_v39  ;;  %v1804_v38 = vld [vmem:[#allocation6 + $0xc8] sm:$0xff] }
 0x442   : >> { %v8400_v44 = vpop.f32.mrb[0].mxu0  ;;  %v8416_v45 = vpop.f32.mrb[0].mxu1 }
 0x443   : >> { %v2043_v48 = vadd.f32 %v8400_v44, %v1781_v40  ;;  %v2059_v49 = vadd.f32 %v8416_v45, %v1797_v41  ;;  %v1914_v50 = vpop.f32.mrb[1].mxu0  ;;  %v1978_v51 = vpop.f32.mrb[1].mxu1 }
 0x444   : >> { %v2041_v54 = vadd.f32 %v1914_v50, %v1779_v42  ;;  %v2057_v55 = vadd.f32 %v1978_v51, %v1795_v43  ;;  %v8401_v56 = vpop.f32.mrb[2].mxu0  ;;  %v8417_v57 = vpop.f32.mrb[2].mxu1  ;;  %v1809_v50 = vld [vmem:[#allocation6 + $0xf0] sm:$0xff]  ;;  %v1791_v51 = vld [vmem:[#allocation6 + $0x60] sm:$0xff] }
 0x445   : >> { %2075 = vst [vmem:[#allocation6 + $0x10] sm:$0xff] %v2043_v48  ;;  %2091 = vst [vmem:[#allocation6 + $0x90] sm:$0xff] %v2059_v49  ;;  %v2044_v58 = vadd.f32 %v8401_v56, %v1782_v46  ;;  %v2060_v59 = vadd.f32 %v8417_v57, %v1798_v47  ;;  %v1917_v60 = vpop.f32.mrb[3].mxu0  ;;  %v1981_v61 = vpop.f32.mrb[3].mxu1  ;;  %v1793_v49 = vld [vmem:[#allocation6 + $0x70] sm:$0xff]  ;;  %v1810_v56 = vld [vmem:[#allocation6 + $0xf8] sm:$0xff] }
 0x446   : >> { %2073 = vst [vmem:[#allocation6] sm:$0xff] %v2041_v54  ;;  %2089 = vst [vmem:[#allocation6 + $0x80] sm:$0xff] %v2057_v55  ;;  %v2042_v62 = vadd.f32 %v1917_v60, %v1780_v52  ;;  %v2058_v63 = vadd.f32 %v1981_v61, %v1796_v53  ;;  %v1807_v52 = vld [vmem:[#allocation6 + $0xe0] sm:$0xff]  ;;  %v1794_v55 = vld [vmem:[#allocation6 + $0x78] sm:$0xff] }
 0x447   : >> { %2076 = vst [vmem:[#allocation6 + $0x18] sm:$0xff] %v2044_v58  ;;  %2092 = vst [vmem:[#allocation6 + $0x98] sm:$0xff] %v2060_v59  ;;  %v1792_v61 = vld [vmem:[#allocation6 + $0x68] sm:$0xff] }
 0x448   : >> { %2074 = vst [vmem:[#allocation6 + $0x8] sm:$0xff] %v2042_v62  ;;  %2090 = vst [vmem:[#allocation6 + $0x88] sm:$0xff] %v2058_v63  ;;  %v1808_v62 = vld [vmem:[#allocation6 + $0xe8] sm:$0xff] }
 0x44a   : >> { %v8404_v5 = vpop.f32.mrb[4].mxu0  ;;  %v8420_v6 = vpop.f32.mrb[4].mxu1 }
 0x44b   : >> { %v2047_v9 = vadd.f32 %v8404_v5, %v1785_v0  ;;  %v2063_v10 = vadd.f32 %v8420_v6, %v1801_v1  ;;  %v1930_v11 = vpop.f32.mrb[5].mxu0  ;;  %v1994_v12 = vpop.f32.mrb[5].mxu1 }
 0x44c   : >> { %v2045_v15 = vadd.f32 %v1930_v11, %v1783_v3  ;;  %v2061_v16 = vadd.f32 %v1994_v12, %v1799_v4  ;;  %v8405_v17 = vpop.f32.mrb[6].mxu0  ;;  %v8421_v18 = vpop.f32.mrb[6].mxu1 }
 0x44d   : >> { %2079 = vst [vmem:[#allocation6 + $0x30] sm:$0xff] %v2047_v9  ;;  %2095 = vst [vmem:[#allocation6 + $0xb0] sm:$0xff] %v2063_v10  ;;  %v2048_v19 = vadd.f32 %v8405_v17, %v1786_v7  ;;  %v2064_v20 = vadd.f32 %v8421_v18, %v1802_v8  ;;  %v1933_v21 = vpop.f32.mrb[7].mxu0  ;;  %v1997_v22 = vpop.f32.mrb[7].mxu1 }
 0x44e   : >> { %2077 = vst [vmem:[#allocation6 + $0x20] sm:$0xff] %v2045_v15  ;;  %2093 = vst [vmem:[#allocation6 + $0xa0] sm:$0xff] %v2061_v16  ;;  %v2046_v23 = vadd.f32 %v1933_v21, %v1784_v13  ;;  %v2062_v24 = vadd.f32 %v1997_v22, %v1800_v14 }
 0x44f   : >> { %2080 = vst [vmem:[#allocation6 + $0x38] sm:$0xff] %v2048_v19  ;;  %2096 = vst [vmem:[#allocation6 + $0xb8] sm:$0xff] %v2064_v20 }
 0x450   : >> { %2078 = vst [vmem:[#allocation6 + $0x28] sm:$0xff] %v2046_v23  ;;  %2094 = vst [vmem:[#allocation6 + $0xa8] sm:$0xff] %v2062_v24 }
 0x452   : >> { %v8408_v29 = vpop.f32.mrb[8].mxu0  ;;  %v8424_v30 = vpop.f32.mrb[8].mxu1 }
 0x453   : >> { %v2051_v33 = vadd.f32 %v8408_v29, %v1789_v25  ;;  %v2067_v34 = vadd.f32 %v8424_v30, %v1805_v26  ;;  %v1946_v35 = vpop.f32.mrb[9].mxu0  ;;  %v2010_v36 = vpop.f32.mrb[9].mxu1 }
 0x454   : >> { %v2049_v39 = vadd.f32 %v1946_v35, %v1787_v27  ;;  %v2065_v40 = vadd.f32 %v2010_v36, %v1803_v28  ;;  %v8409_v41 = vpop.f32.mrb[10].mxu0  ;;  %v8425_v42 = vpop.f32.mrb[10].mxu1 }
 0x455   : >> { %2083 = vst [vmem:[#allocation6 + $0x50] sm:$0xff] %v2051_v33  ;;  %2099 = vst [vmem:[#allocation6 + $0xd0] sm:$0xff] %v2067_v34  ;;  %v2052_v43 = vadd.f32 %v8409_v41, %v1790_v31  ;;  %v2068_v44 = vadd.f32 %v8425_v42, %v1806_v32  ;;  %v1949_v45 = vpop.f32.mrb[11].mxu0  ;;  %v2013_v46 = vpop.f32.mrb[11].mxu1 }
 0x456   : >> { %2081 = vst [vmem:[#allocation6 + $0x40] sm:$0xff] %v2049_v39  ;;  %2097 = vst [vmem:[#allocation6 + $0xc0] sm:$0xff] %v2065_v40  ;;  %v2050_v47 = vadd.f32 %v1949_v45, %v1788_v37  ;;  %v2066_v48 = vadd.f32 %v2013_v46, %v1804_v38 }
 0x457   : >> { %2084 = vst [vmem:[#allocation6 + $0x58] sm:$0xff] %v2052_v43  ;;  %2100 = vst [vmem:[#allocation6 + $0xd8] sm:$0xff] %v2068_v44 }
 0x458   : >> { %2082 = vst [vmem:[#allocation6 + $0x48] sm:$0xff] %v2050_v47  ;;  %2098 = vst [vmem:[#allocation6 + $0xc8] sm:$0xff] %v2066_v48 }
 0x45a   : >> { %v8412_v53 = vpop.f32.mrb[12].mxu0  ;;  %v8428_v54 = vpop.f32.mrb[12].mxu1  ;;  %1727 = sbr.rel (!%p1725_p6) target bundleno = 842 (0x34a), region = 266 }
 0x45b   : >> { %v2055_v57 = vadd.f32 %v8412_v53, %v1793_v49  ;;  %v2071_v58 = vadd.f32 %v8428_v54, %v1809_v50  ;;  %v1962_v59 = vpop.f32.mrb[13].mxu0  ;;  %v2026_v60 = vpop.f32.mrb[13].mxu1 }
 0x45c   : >> { %v2053_v63 = vadd.f32 %v1962_v59, %v1791_v51  ;;  %v2069_v0 = vadd.f32 %v2026_v60, %v1807_v52  ;;  %v8413_v1 = vpop.f32.mrb[14].mxu0  ;;  %v8429_v3 = vpop.f32.mrb[14].mxu1 }
 0x45d   : >> { %2087 = vst [vmem:[#allocation6 + $0x70] sm:$0xff] %v2055_v57  ;;  %2103 = vst [vmem:[#allocation6 + $0xf0] sm:$0xff] %v2071_v58  ;;  %v2056_v4 = vadd.f32 %v8413_v1, %v1794_v55  ;;  %v2072_v5 = vadd.f32 %v8429_v3, %v1810_v56  ;;  %v1965_v6 = vpop.f32.mrb[15].mxu0  ;;  %v2029_v7 = vpop.f32.mrb[15].mxu1 }
 0x45e   : >> { %2085 = vst [vmem:[#allocation6 + $0x60] sm:$0xff] %v2053_v63  ;;  %2101 = vst [vmem:[#allocation6 + $0xe0] sm:$0xff] %v2069_v0  ;;  %v2054_v8 = vadd.f32 %v1965_v6, %v1792_v61  ;;  %v2070_v9 = vadd.f32 %v2029_v7, %v1808_v62 }
 0x45f   : >> { %2088 = vst [vmem:[#allocation6 + $0x78] sm:$0xff] %v2056_v4  ;;  %2104 = vst [vmem:[#allocation6 + $0xf8] sm:$0xff] %v2072_v5 }
 0x460   : >> { %2086 = vst [vmem:[#allocation6 + $0x68] sm:$0xff] %v2054_v8  ;;  %2102 = vst [vmem:[#allocation6 + $0xe8] sm:$0xff] %v2070_v9 }
 0x461 LB: >> { %s2111_s29 = smul.u32 24, %s9805_s28  ;;  %v2163_v3 = vld [vmem:[#allocation6 + $0x10] sm:$0xff]  ;;  %v2161_v5 = vld [vmem:[#allocation6] sm:$0xff]  ;;  %v2164_v9 = vld [vmem:[#allocation6 + $0x18] sm:$0xff]  ;;  %s9805_s28 = sphi %s10347_s28, %s2110_s28  }
 0x462   : >> { %s7446_s30 = smul.u32 448, %s9805_s28  ;;  %v2179_v4 = vld [vmem:[#allocation6 + $0x90] sm:$0xff]  ;;  %v2177_v6 = vld [vmem:[#allocation6 + $0x80] sm:$0xff]  ;;  %s2110_s28 = sadd.s32 1, %s9805_s28  }
 0x463   : >> { %s10359_s11 = scalar_lea.vmem [#allocation2], %s2111_s29  ;;  %p2107_p7 = scmp.ge.s32.totalorder %s2110_s28, 7  }
 0x464   : >> { %s10357_s10 = scalar_lea.vmem %s11234_s2, %s7446_s30  ;;  %v2113_v10 = vld [vmem:[%s10359_s11 + $0x3] sm:$0xff]  ;;  %v2114_v11 = vld [vmem:[%s10359_s11 + $0xb] sm:$0xff]  ;;  %v2115_v24 = vld [vmem:[%s10359_s11 + $0x1b] sm:$0xff]  ;;  %s10404_s12 = smov (%p2107_p7), 0  }
 0x465   : >> { %v9559_v12 = vld [vmem:[%s10357_s10 + $0xc0] sm:$0xff]   ;;  %v9560_v13 = vld [vmem:[%s10357_s10 + $0xc8] sm:$0xff]   ;;  %v2145_v14 = vpack.c.bf16 %v2114_v11, %v2113_v10  ;;  %v9561_v15 = vld [vmem:[%s10357_s10 + $0xd0] sm:$0xff]  }
 0x466   : >> { %8430 = vmatprep.subr.bf16.mxu0 %v9559_v12  ;;  %9102 = vmatprep.subr.bf16.mxu1 %v9559_v12  ;;  %v2129_v16 = vld [vmem:[%s10359_s11 + $0xc3] sm:$0xff]  ;;  %v9562_v17 = vld [vmem:[%s10357_s10 + $0xd8] sm:$0xff]   ;;  %v2130_v18 = vld [vmem:[%s10359_s11 + $0xcb] sm:$0xff] }
 0x467   : >> { %8431 = vmatpush3.bf16.msra.mxu0 %v9559_v12  ;;  %9110 = vmatpush3.bf16.msra.mxu1 %v9559_v12  ;;  %v2153_v19 = vpack.c.bf16 %v2130_v18, %v2129_v16  ;;  %v9563_v20 = vld [vmem:[%s10357_s10 + $0xe0] sm:$0xff]   ;;  %v9564_v21 = vld [vmem:[%s10357_s10 + $0xe8] sm:$0xff]   ;;  %v9565_v22 = vld [vmem:[%s10357_s10 + $0xf0] sm:$0xff]  }
 0x468   : >> { %8432 = vmatprep.subr.bf16.mxu0 %v9560_v13  ;;  %9103 = vmatprep.subr.bf16.mxu1 %v9560_v13  ;;  %v9566_v23 = vld [vmem:[%s10357_s10 + $0xf8] sm:$0xff]   ;;  %v2116_v25 = vld [vmem:[%s10359_s11 + $0x23] sm:$0xff]  ;;  %v2119_v36 = vld [vmem:[%s10359_s11 + $0x4b] sm:$0xff] }
 0x469   : >> { %8446 = vmatprep.mubr.bf16.mxu0 %v2145_v14  ;;  %8462 = vmatprep.mubr.bf16.mxu1 %v2153_v19  ;;  %v2131_v26 = vld [vmem:[%s10359_s11 + $0xdb] sm:$0xff]  ;;  %v2132_v27 = vld [vmem:[%s10359_s11 + $0xe3] sm:$0xff]  ;;  %v2117_v28 = vld [vmem:[%s10359_s11 + $0x33] sm:$0xff]  ;;  %v2146_v32 = vpack.c.bf16 %v2116_v25, %v2115_v24 }
 0x46a   : >> { %v2118_v29 = vld [vmem:[%s10359_s11 + $0x3b] sm:$0xff]  ;;  %v2133_v30 = vld [vmem:[%s10359_s11 + $0xf3] sm:$0xff]  ;;  %v2154_v33 = vpack.c.bf16 %v2132_v27, %v2131_v26  ;;  %v2135_v38 = vld [vmem:[%s10359_s11 + $0x10b] sm:$0xff] }
 0x46b   : >> { %8433 = vmatpush3.bf16.msra.mxu0 %v9560_v13  ;;  %9111 = vmatpush3.bf16.msra.mxu1 %v9560_v13  ;;  %v2134_v31 = vld [vmem:[%s10359_s11 + $0xfb] sm:$0xff]  ;;  %v2147_v34 = vpack.c.bf16 %v2118_v29, %v2117_v28  ;;  %v2120_v37 = vld [vmem:[%s10359_s11 + $0x53] sm:$0xff]  ;;  %v2121_v40 = vld [vmem:[%s10359_s11 + $0x63] sm:$0xff] }
 0x46c   : >> { %8434 = vmatprep.subr.bf16.mxu0 %v9561_v15  ;;  %9104 = vmatprep.subr.bf16.mxu1 %v9561_v15  ;;  %v2155_v35 = vpack.c.bf16 %v2134_v31, %v2133_v30  ;;  %v2136_v39 = vld [vmem:[%s10359_s11 + $0x113] sm:$0xff]  ;;  %v2122_v41 = vld [vmem:[%s10359_s11 + $0x6b] sm:$0xff]  ;;  %v2137_v42 = vld [vmem:[%s10359_s11 + $0x123] sm:$0xff]  ;;  %v2148_v44 = vpack.c.bf16 %v2120_v37, %v2119_v36 }
 0x46d   : >> { %v2138_v43 = vld [vmem:[%s10359_s11 + $0x12b] sm:$0xff]  ;;  %v2156_v45 = vpack.c.bf16 %v2136_v39, %v2135_v38  ;;  %v2149_v46 = vpack.c.bf16 %v2122_v41, %v2121_v40  ;;  %v2123_v48 = vld [vmem:[%s10359_s11 + $0x7b] sm:$0xff]  ;;  %v2124_v49 = vld [vmem:[%s10359_s11 + $0x83] sm:$0xff] }
 0x46e   : >> { %v2157_v47 = vpack.c.bf16 %v2138_v43, %v2137_v42  ;;  %v2139_v50 = vld [vmem:[%s10359_s11 + $0x13b] sm:$0xff]  ;;  %v2140_v51 = vld [vmem:[%s10359_s11 + $0x143] sm:$0xff]  ;;  %v2125_v52 = vld [vmem:[%s10359_s11 + $0x93] sm:$0xff]  ;;  %v2150_v56 = vpack.c.bf16 %v2124_v49, %v2123_v48 }
 0x46f   : >> { %8435 = vmatpush3.bf16.msra.mxu0 %v9561_v15  ;;  %9112 = vmatpush3.bf16.msra.mxu1 %v9561_v15  ;;  %v2126_v53 = vld [vmem:[%s10359_s11 + $0x9b] sm:$0xff]  ;;  %v2141_v54 = vld [vmem:[%s10359_s11 + $0x153] sm:$0xff]  ;;  %v2158_v57 = vpack.c.bf16 %v2140_v51, %v2139_v50  ;;  %v2127_v60 = vld [vmem:[%s10359_s11 + $0xab] sm:$0xff] }
 0x470   : >> { %8436 = vmatprep.subr.bf16.mxu0 %v9562_v17  ;;  %9105 = vmatprep.subr.bf16.mxu1 %v9562_v17  ;;  %v2142_v55 = vld [vmem:[%s10359_s11 + $0x15b] sm:$0xff]  ;;  %v2151_v58 = vpack.c.bf16 %v2126_v53, %v2125_v52  ;;  %v2128_v61 = vld [vmem:[%s10359_s11 + $0xb3] sm:$0xff]  ;;  %v2143_v62 = vld [vmem:[%s10359_s11 + $0x16b] sm:$0xff] }
 0x471   : >> { %v2159_v59 = vpack.c.bf16 %v2142_v55, %v2141_v54  ;;  %v2144_v63 = vld [vmem:[%s10359_s11 + $0x173] sm:$0xff]  ;;  %v2152_v0 = vpack.c.bf16 %v2128_v61, %v2127_v60  ;;  %v2180_v10 = vld [vmem:[#allocation6 + $0x98] sm:$0xff]  ;;  %v2167_v27 = vld [vmem:[#allocation6 + $0x30] sm:$0xff] }
 0x472   : >> { %v2160_v1 = vpack.c.bf16 %v2144_v63, %v2143_v62  ;;  %v2162_v15 = vld [vmem:[#allocation6 + $0x8] sm:$0xff]  ;;  %v2183_v28 = vld [vmem:[#allocation6 + $0xb0] sm:$0xff]  ;;  %v2165_v29 = vld [vmem:[#allocation6 + $0x20] sm:$0xff] }
 0x473   : >> { %8437 = vmatpush3.bf16.msra.mxu0 %v9562_v17  ;;  %9113 = vmatpush3.bf16.msra.mxu1 %v9562_v17  ;;  %v2178_v16 = vld [vmem:[#allocation6 + $0x88] sm:$0xff]  ;;  %v2181_v30 = vld [vmem:[#allocation6 + $0xa0] sm:$0xff]  ;;  %v2171_v51 = vld [vmem:[#allocation6 + $0x50] sm:$0xff] }
 0x474   : >> { %8438 = vmatprep.subr.bf16.mxu0 %v9563_v20  ;;  %9106 = vmatprep.subr.bf16.mxu1 %v9563_v20  ;;  %v2166_v39 = vld [vmem:[#allocation6 + $0x28] sm:$0xff]  ;;  %v2187_v52 = vld [vmem:[#allocation6 + $0xd0] sm:$0xff]  ;;  %v2169_v53 = vld [vmem:[#allocation6 + $0x40] sm:$0xff] }
 0x475   : >> { %v2182_v40 = vld [vmem:[#allocation6 + $0xa8] sm:$0xff]  ;;  %v2185_v54 = vld [vmem:[#allocation6 + $0xc0] sm:$0xff] }
 0x476   : >> { %v2170_v63 = vld [vmem:[#allocation6 + $0x48] sm:$0xff] }
 0x477   : >> { %8439 = vmatpush3.bf16.msra.mxu0 %v9563_v20  ;;  %9114 = vmatpush3.bf16.msra.mxu1 %v9563_v20 }
 0x478   : >> { %8440 = vmatprep.subr.bf16.mxu0 %v9564_v21  ;;  %9107 = vmatprep.subr.bf16.mxu1 %v9564_v21 }
 0x47b   : >> { %8441 = vmatpush3.bf16.msra.mxu0 %v9564_v21  ;;  %9115 = vmatpush3.bf16.msra.mxu1 %v9564_v21 }
 0x47c   : >> { %8442 = vmatprep.subr.bf16.mxu0 %v9565_v22  ;;  %9108 = vmatprep.subr.bf16.mxu1 %v9565_v22 }
 0x47f   : >> { %8443 = vmatpush3.bf16.msra.mxu0 %v9565_v22  ;;  %9116 = vmatpush3.bf16.msra.mxu1 %v9565_v22 }
 0x480   : >> { %8444 = vmatprep.subr.bf16.mxu0 %v9566_v23  ;;  %9109 = vmatprep.subr.bf16.mxu1 %v9566_v23 }
 0x483   : >> { %8445 = vmatpush3.bf16.msra.mxu0 %v9566_v23  ;;  %9117 = vmatpush3.bf16.msra.mxu1 %v9566_v23 }
 0x486   : >> { %8447 = vmatmul.mubr.bf16.vlgmr.msra.gmra.mrb[0].mxu0 %v2146_v32  ;;  %8463 = vmatmul.mubr.bf16.vlgmr.msra.gmra.mrb[0].mxu1 %v2154_v33  ;;  %v2168_v33 = vld [vmem:[#allocation6 + $0x38] sm:$0xff] }
 0x487   : >> { %8450 = vmatprep.mubr.bf16.mxu0 %v2147_v34  ;;  %8466 = vmatprep.mubr.bf16.mxu1 %v2155_v35  ;;  %v2184_v34 = vld [vmem:[#allocation6 + $0xb8] sm:$0xff] }
 0x48e   : >> { %8451 = vmatmul.mubr.bf16.gmra.mrb[4].mxu0 %v2148_v44  ;;  %8467 = vmatmul.mubr.bf16.gmra.mrb[4].mxu1 %v2156_v45 }
 0x48f   : >> { %8454 = vmatprep.mubr.bf16.mxu0 %v2149_v46  ;;  %8470 = vmatprep.mubr.bf16.mxu1 %v2157_v47 }
 0x496   : >> { %8455 = vmatmul.mubr.bf16.gmra.mrb[8].mxu0 %v2150_v56  ;;  %8471 = vmatmul.mubr.bf16.gmra.mrb[8].mxu1 %v2158_v57  ;;  %v2172_v57 = vld [vmem:[#allocation6 + $0x58] sm:$0xff] }
 0x497   : >> { %8458 = vmatprep.mubr.bf16.mxu0 %v2151_v58  ;;  %8474 = vmatprep.mubr.bf16.mxu1 %v2159_v59  ;;  %v2188_v58 = vld [vmem:[#allocation6 + $0xd8] sm:$0xff] }
 0x49e   : >> { %8459 = vmatmul.mubr.bf16.gmra.mrb[12].mxu0 %v2152_v0  ;;  %8475 = vmatmul.mubr.bf16.gmra.mrb[12].mxu1 %v2160_v1  ;;  %v2186_v0 = vld [vmem:[#allocation6 + $0xc8] sm:$0xff] }
 0x559   : >> { %v8448_v7 = vpop.f32.mrb[0].mxu0  ;;  %v8464_v8 = vpop.f32.mrb[0].mxu1 }
 0x55a   : >> { %v2425_v11 = vadd.f32 %v8448_v7, %v2163_v3  ;;  %v2441_v12 = vadd.f32 %v8464_v8, %v2179_v4  ;;  %v2296_v13 = vpop.f32.mrb[1].mxu0  ;;  %v2360_v14 = vpop.f32.mrb[1].mxu1 }
 0x55b   : >> { %v2423_v17 = vadd.f32 %v2296_v13, %v2161_v5  ;;  %v2439_v18 = vadd.f32 %v2360_v14, %v2177_v6  ;;  %v8449_v19 = vpop.f32.mrb[2].mxu0  ;;  %v8465_v20 = vpop.f32.mrb[2].mxu1  ;;  %v2191_v13 = vld [vmem:[#allocation6 + $0xf0] sm:$0xff]  ;;  %v2173_v14 = vld [vmem:[#allocation6 + $0x60] sm:$0xff] }
 0x55c   : >> { %2457 = vst [vmem:[#allocation6 + $0x10] sm:$0xff] %v2425_v11  ;;  %2473 = vst [vmem:[#allocation6 + $0x90] sm:$0xff] %v2441_v12  ;;  %v2426_v21 = vadd.f32 %v8449_v19, %v2164_v9  ;;  %v2442_v22 = vadd.f32 %v8465_v20, %v2180_v10  ;;  %v2299_v23 = vpop.f32.mrb[3].mxu0  ;;  %v2363_v24 = vpop.f32.mrb[3].mxu1  ;;  %v2175_v12 = vld [vmem:[#allocation6 + $0x70] sm:$0xff]  ;;  %v2192_v19 = vld [vmem:[#allocation6 + $0xf8] sm:$0xff] }
 0x55d   : >> { %2455 = vst [vmem:[#allocation6] sm:$0xff] %v2423_v17  ;;  %2471 = vst [vmem:[#allocation6 + $0x80] sm:$0xff] %v2439_v18  ;;  %v2424_v25 = vadd.f32 %v2299_v23, %v2162_v15  ;;  %v2440_v26 = vadd.f32 %v2363_v24, %v2178_v16  ;;  %v2189_v15 = vld [vmem:[#allocation6 + $0xe0] sm:$0xff]  ;;  %v2176_v18 = vld [vmem:[#allocation6 + $0x78] sm:$0xff] }
 0x55e   : >> { %2458 = vst [vmem:[#allocation6 + $0x18] sm:$0xff] %v2426_v21  ;;  %2474 = vst [vmem:[#allocation6 + $0x98] sm:$0xff] %v2442_v22  ;;  %v2174_v24 = vld [vmem:[#allocation6 + $0x68] sm:$0xff] }
 0x55f   : >> { %2456 = vst [vmem:[#allocation6 + $0x8] sm:$0xff] %v2424_v25  ;;  %2472 = vst [vmem:[#allocation6 + $0x88] sm:$0xff] %v2440_v26  ;;  %v2190_v25 = vld [vmem:[#allocation6 + $0xe8] sm:$0xff] }
 0x561   : >> { %v8452_v31 = vpop.f32.mrb[4].mxu0  ;;  %v8468_v32 = vpop.f32.mrb[4].mxu1 }
 0x562   : >> { %v2429_v35 = vadd.f32 %v8452_v31, %v2167_v27  ;;  %v2445_v36 = vadd.f32 %v8468_v32, %v2183_v28  ;;  %v2312_v37 = vpop.f32.mrb[5].mxu0  ;;  %v2376_v38 = vpop.f32.mrb[5].mxu1 }
 0x563   : >> { %v2427_v41 = vadd.f32 %v2312_v37, %v2165_v29  ;;  %v2443_v42 = vadd.f32 %v2376_v38, %v2181_v30  ;;  %v8453_v43 = vpop.f32.mrb[6].mxu0  ;;  %v8469_v44 = vpop.f32.mrb[6].mxu1 }
 0x564   : >> { %2461 = vst [vmem:[#allocation6 + $0x30] sm:$0xff] %v2429_v35  ;;  %2477 = vst [vmem:[#allocation6 + $0xb0] sm:$0xff] %v2445_v36  ;;  %v2430_v45 = vadd.f32 %v8453_v43, %v2168_v33  ;;  %v2446_v46 = vadd.f32 %v8469_v44, %v2184_v34  ;;  %v2315_v47 = vpop.f32.mrb[7].mxu0  ;;  %v2379_v48 = vpop.f32.mrb[7].mxu1 }
 0x565   : >> { %2459 = vst [vmem:[#allocation6 + $0x20] sm:$0xff] %v2427_v41  ;;  %2475 = vst [vmem:[#allocation6 + $0xa0] sm:$0xff] %v2443_v42  ;;  %v2428_v49 = vadd.f32 %v2315_v47, %v2166_v39  ;;  %v2444_v50 = vadd.f32 %v2379_v48, %v2182_v40 }
 0x566   : >> { %2462 = vst [vmem:[#allocation6 + $0x38] sm:$0xff] %v2430_v45  ;;  %2478 = vst [vmem:[#allocation6 + $0xb8] sm:$0xff] %v2446_v46 }
 0x567   : >> { %2460 = vst [vmem:[#allocation6 + $0x28] sm:$0xff] %v2428_v49  ;;  %2476 = vst [vmem:[#allocation6 + $0xa8] sm:$0xff] %v2444_v50 }
 0x569   : >> { %v8456_v55 = vpop.f32.mrb[8].mxu0  ;;  %v8472_v56 = vpop.f32.mrb[8].mxu1 }
 0x56a   : >> { %v2433_v59 = vadd.f32 %v8456_v55, %v2171_v51  ;;  %v2449_v60 = vadd.f32 %v8472_v56, %v2187_v52  ;;  %v2328_v61 = vpop.f32.mrb[9].mxu0  ;;  %v2392_v62 = vpop.f32.mrb[9].mxu1 }
 0x56b   : >> { %v2431_v1 = vadd.f32 %v2328_v61, %v2169_v53  ;;  %v2447_v3 = vadd.f32 %v2392_v62, %v2185_v54  ;;  %v8457_v4 = vpop.f32.mrb[10].mxu0  ;;  %v8473_v5 = vpop.f32.mrb[10].mxu1 }
 0x56c   : >> { %2465 = vst [vmem:[#allocation6 + $0x50] sm:$0xff] %v2433_v59  ;;  %2481 = vst [vmem:[#allocation6 + $0xd0] sm:$0xff] %v2449_v60  ;;  %v2434_v6 = vadd.f32 %v8457_v4, %v2172_v57  ;;  %v2450_v7 = vadd.f32 %v8473_v5, %v2188_v58  ;;  %v2331_v8 = vpop.f32.mrb[11].mxu0  ;;  %v2395_v9 = vpop.f32.mrb[11].mxu1 }
 0x56d   : >> { %2463 = vst [vmem:[#allocation6 + $0x40] sm:$0xff] %v2431_v1  ;;  %2479 = vst [vmem:[#allocation6 + $0xc0] sm:$0xff] %v2447_v3  ;;  %v2432_v10 = vadd.f32 %v2331_v8, %v2170_v63  ;;  %v2448_v11 = vadd.f32 %v2395_v9, %v2186_v0 }
 0x56e   : >> { %2466 = vst [vmem:[#allocation6 + $0x58] sm:$0xff] %v2434_v6  ;;  %2482 = vst [vmem:[#allocation6 + $0xd8] sm:$0xff] %v2450_v7 }
 0x56f   : >> { %2464 = vst [vmem:[#allocation6 + $0x48] sm:$0xff] %v2432_v10  ;;  %2480 = vst [vmem:[#allocation6 + $0xc8] sm:$0xff] %v2448_v11 }
 0x571   : >> { %v8460_v16 = vpop.f32.mrb[12].mxu0  ;;  %v8476_v17 = vpop.f32.mrb[12].mxu1  ;;  %2109 = sbr.rel (!%p2107_p7) target bundleno = 1121 (0x461), region = 277 }
 0x572   : >> { %v2437_v20 = vadd.f32 %v8460_v16, %v2175_v12  ;;  %v2453_v21 = vadd.f32 %v8476_v17, %v2191_v13  ;;  %v2344_v22 = vpop.f32.mrb[13].mxu0  ;;  %v2408_v23 = vpop.f32.mrb[13].mxu1 }
 0x573   : >> { %v2435_v26 = vadd.f32 %v2344_v22, %v2173_v14  ;;  %v2451_v27 = vadd.f32 %v2408_v23, %v2189_v15  ;;  %v8461_v28 = vpop.f32.mrb[14].mxu0  ;;  %v8477_v29 = vpop.f32.mrb[14].mxu1 }
 0x574   : >> { %2469 = vst [vmem:[#allocation6 + $0x70] sm:$0xff] %v2437_v20  ;;  %2485 = vst [vmem:[#allocation6 + $0xf0] sm:$0xff] %v2453_v21  ;;  %v2438_v30 = vadd.f32 %v8461_v28, %v2176_v18  ;;  %v2454_v31 = vadd.f32 %v8477_v29, %v2192_v19  ;;  %v2347_v32 = vpop.f32.mrb[15].mxu0  ;;  %v2411_v33 = vpop.f32.mrb[15].mxu1 }
 0x575   : >> { %2467 = vst [vmem:[#allocation6 + $0x60] sm:$0xff] %v2435_v26  ;;  %2483 = vst [vmem:[#allocation6 + $0xe0] sm:$0xff] %v2451_v27  ;;  %v2436_v34 = vadd.f32 %v2347_v32, %v2174_v24  ;;  %v2452_v35 = vadd.f32 %v2411_v33, %v2190_v25 }
 0x576   : >> { %2470 = vst [vmem:[#allocation6 + $0x78] sm:$0xff] %v2438_v30  ;;  %2486 = vst [vmem:[#allocation6 + $0xf8] sm:$0xff] %v2454_v31 }
 0x577   : >> { %2468 = vst [vmem:[#allocation6 + $0x68] sm:$0xff] %v2436_v34  ;;  %2484 = vst [vmem:[#allocation6 + $0xe8] sm:$0xff] %v2452_v35 }
 0x578 LB: >> { %s2493_s13 = smul.u32 24, %s9809_s12  ;;  %v2545_v29 = vld [vmem:[#allocation6 + $0x10] sm:$0xff]  ;;  %v2543_v31 = vld [vmem:[#allocation6] sm:$0xff]  ;;  %v2546_v35 = vld [vmem:[#allocation6 + $0x18] sm:$0xff]  ;;  %s9809_s12 = sphi %s10404_s12, %s2492_s12  }
 0x579   : >> { %s7471_s14 = smul.u32 448, %s9809_s12  ;;  %v2561_v30 = vld [vmem:[#allocation6 + $0x90] sm:$0xff]  ;;  %v2559_v32 = vld [vmem:[#allocation6 + $0x80] sm:$0xff]  ;;  %s2492_s12 = sadd.s32 1, %s9809_s12  }
 0x57a   : >> { %s10416_s19 = scalar_lea.vmem [#allocation2], %s2493_s13  ;;  %p2489_p8 = scmp.ge.s32.totalorder %s2492_s12, 7  }
 0x57b   : >> { %s10414_s18 = scalar_lea.vmem %s11234_s2, %s7471_s14  ;;  %v2495_v36 = vld [vmem:[%s10416_s19 + $0x4] sm:$0xff]  ;;  %v2496_v37 = vld [vmem:[%s10416_s19 + $0xc] sm:$0xff]  ;;  %v2497_v50 = vld [vmem:[%s10416_s19 + $0x1c] sm:$0xff]  ;;  %s10461_s20 = smov (%p2489_p8), 0  }
 0x57c   : >> { %v9567_v38 = vld [vmem:[%s10414_s18 + $0x100] sm:$0xff]   ;;  %v9568_v39 = vld [vmem:[%s10414_s18 + $0x108] sm:$0xff]   ;;  %v2527_v40 = vpack.c.bf16 %v2496_v37, %v2495_v36  ;;  %v9569_v41 = vld [vmem:[%s10414_s18 + $0x110] sm:$0xff]  }
 0x57d   : >> { %8478 = vmatprep.subr.bf16.mxu0 %v9567_v38  ;;  %9118 = vmatprep.subr.bf16.mxu1 %v9567_v38  ;;  %v2511_v42 = vld [vmem:[%s10416_s19 + $0xc4] sm:$0xff]  ;;  %v9570_v43 = vld [vmem:[%s10414_s18 + $0x118] sm:$0xff]   ;;  %v2512_v44 = vld [vmem:[%s10416_s19 + $0xcc] sm:$0xff] }
 0x57e   : >> { %8479 = vmatpush3.bf16.msra.mxu0 %v9567_v38  ;;  %9126 = vmatpush3.bf16.msra.mxu1 %v9567_v38  ;;  %v2535_v45 = vpack.c.bf16 %v2512_v44, %v2511_v42  ;;  %v9571_v46 = vld [vmem:[%s10414_s18 + $0x120] sm:$0xff]   ;;  %v9572_v47 = vld [vmem:[%s10414_s18 + $0x128] sm:$0xff]   ;;  %v9573_v48 = vld [vmem:[%s10414_s18 + $0x130] sm:$0xff]  }
 0x57f   : >> { %8480 = vmatprep.subr.bf16.mxu0 %v9568_v39  ;;  %9119 = vmatprep.subr.bf16.mxu1 %v9568_v39  ;;  %v9574_v49 = vld [vmem:[%s10414_s18 + $0x138] sm:$0xff]   ;;  %v2498_v51 = vld [vmem:[%s10416_s19 + $0x24] sm:$0xff]  ;;  %v2501_v62 = vld [vmem:[%s10416_s19 + $0x4c] sm:$0xff] }
 0x580   : >> { %8494 = vmatprep.mubr.bf16.mxu0 %v2527_v40  ;;  %8510 = vmatprep.mubr.bf16.mxu1 %v2535_v45  ;;  %v2513_v52 = vld [vmem:[%s10416_s19 + $0xdc] sm:$0xff]  ;;  %v2514_v53 = vld [vmem:[%s10416_s19 + $0xe4] sm:$0xff]  ;;  %v2499_v54 = vld [vmem:[%s10416_s19 + $0x34] sm:$0xff]  ;;  %v2528_v58 = vpack.c.bf16 %v2498_v51, %v2497_v50 }
 0x581   : >> { %v2500_v55 = vld [vmem:[%s10416_s19 + $0x3c] sm:$0xff]  ;;  %v2515_v56 = vld [vmem:[%s10416_s19 + $0xf4] sm:$0xff]  ;;  %v2536_v59 = vpack.c.bf16 %v2514_v53, %v2513_v52  ;;  %v2517_v0 = vld [vmem:[%s10416_s19 + $0x10c] sm:$0xff] }
 0x582   : >> { %8481 = vmatpush3.bf16.msra.mxu0 %v9568_v39  ;;  %9127 = vmatpush3.bf16.msra.mxu1 %v9568_v39  ;;  %v2516_v57 = vld [vmem:[%s10416_s19 + $0xfc] sm:$0xff]  ;;  %v2529_v60 = vpack.c.bf16 %v2500_v55, %v2499_v54  ;;  %v2502_v63 = vld [vmem:[%s10416_s19 + $0x54] sm:$0xff]  ;;  %v2503_v3 = vld [vmem:[%s10416_s19 + $0x64] sm:$0xff] }
 0x583   : >> { %8482 = vmatprep.subr.bf16.mxu0 %v9569_v41  ;;  %9120 = vmatprep.subr.bf16.mxu1 %v9569_v41  ;;  %v2537_v61 = vpack.c.bf16 %v2516_v57, %v2515_v56  ;;  %v2518_v1 = vld [vmem:[%s10416_s19 + $0x114] sm:$0xff]  ;;  %v2504_v4 = vld [vmem:[%s10416_s19 + $0x6c] sm:$0xff]  ;;  %v2519_v5 = vld [vmem:[%s10416_s19 + $0x124] sm:$0xff]  ;;  %v2530_v7 = vpack.c.bf16 %v2502_v63, %v2501_v62 }
 0x584   : >> { %v2520_v6 = vld [vmem:[%s10416_s19 + $0x12c] sm:$0xff]  ;;  %v2538_v8 = vpack.c.bf16 %v2518_v1, %v2517_v0  ;;  %v2531_v9 = vpack.c.bf16 %v2504_v4, %v2503_v3  ;;  %v2505_v11 = vld [vmem:[%s10416_s19 + $0x7c] sm:$0xff]  ;;  %v2506_v12 = vld [vmem:[%s10416_s19 + $0x84] sm:$0xff] }
 0x585   : >> { %v2539_v10 = vpack.c.bf16 %v2520_v6, %v2519_v5  ;;  %v2521_v13 = vld [vmem:[%s10416_s19 + $0x13c] sm:$0xff]  ;;  %v2522_v14 = vld [vmem:[%s10416_s19 + $0x144] sm:$0xff]  ;;  %v2507_v15 = vld [vmem:[%s10416_s19 + $0x94] sm:$0xff]  ;;  %v2532_v19 = vpack.c.bf16 %v2506_v12, %v2505_v11 }
 0x586   : >> { %8483 = vmatpush3.bf16.msra.mxu0 %v9569_v41  ;;  %9128 = vmatpush3.bf16.msra.mxu1 %v9569_v41  ;;  %v2508_v16 = vld [vmem:[%s10416_s19 + $0x9c] sm:$0xff]  ;;  %v2523_v17 = vld [vmem:[%s10416_s19 + $0x154] sm:$0xff]  ;;  %v2540_v20 = vpack.c.bf16 %v2522_v14, %v2521_v13  ;;  %v2509_v23 = vld [vmem:[%s10416_s19 + $0xac] sm:$0xff] }
 0x587   : >> { %8484 = vmatprep.subr.bf16.mxu0 %v9570_v43  ;;  %9121 = vmatprep.subr.bf16.mxu1 %v9570_v43  ;;  %v2524_v18 = vld [vmem:[%s10416_s19 + $0x15c] sm:$0xff]  ;;  %v2533_v21 = vpack.c.bf16 %v2508_v16, %v2507_v15  ;;  %v2510_v24 = vld [vmem:[%s10416_s19 + $0xb4] sm:$0xff]  ;;  %v2525_v25 = vld [vmem:[%s10416_s19 + $0x16c] sm:$0xff] }
 0x588   : >> { %v2541_v22 = vpack.c.bf16 %v2524_v18, %v2523_v17  ;;  %v2526_v26 = vld [vmem:[%s10416_s19 + $0x174] sm:$0xff]  ;;  %v2534_v27 = vpack.c.bf16 %v2510_v24, %v2509_v23  ;;  %v2562_v36 = vld [vmem:[#allocation6 + $0x98] sm:$0xff]  ;;  %v2549_v53 = vld [vmem:[#allocation6 + $0x30] sm:$0xff] }
 0x589   : >> { %v2542_v28 = vpack.c.bf16 %v2526_v26, %v2525_v25  ;;  %v2544_v41 = vld [vmem:[#allocation6 + $0x8] sm:$0xff]  ;;  %v2565_v54 = vld [vmem:[#allocation6 + $0xb0] sm:$0xff]  ;;  %v2547_v55 = vld [vmem:[#allocation6 + $0x20] sm:$0xff] }
 0x58a   : >> { %8485 = vmatpush3.bf16.msra.mxu0 %v9570_v43  ;;  %9129 = vmatpush3.bf16.msra.mxu1 %v9570_v43  ;;  %v2560_v42 = vld [vmem:[#allocation6 + $0x88] sm:$0xff]  ;;  %v2563_v56 = vld [vmem:[#allocation6 + $0xa0] sm:$0xff]  ;;  %v2553_v14 = vld [vmem:[#allocation6 + $0x50] sm:$0xff] }
 0x58b   : >> { %8486 = vmatprep.subr.bf16.mxu0 %v9571_v46  ;;  %9122 = vmatprep.subr.bf16.mxu1 %v9571_v46  ;;  %v2548_v1 = vld [vmem:[#allocation6 + $0x28] sm:$0xff]  ;;  %v2569_v15 = vld [vmem:[#allocation6 + $0xd0] sm:$0xff]  ;;  %v2551_v16 = vld [vmem:[#allocation6 + $0x40] sm:$0xff] }
 0x58c   : >> { %v2564_v3 = vld [vmem:[#allocation6 + $0xa8] sm:$0xff]  ;;  %v2567_v17 = vld [vmem:[#allocation6 + $0xc0] sm:$0xff] }
 0x58d   : >> { %v2552_v26 = vld [vmem:[#allocation6 + $0x48] sm:$0xff] }
 0x58e   : >> { %8487 = vmatpush3.bf16.msra.mxu0 %v9571_v46  ;;  %9130 = vmatpush3.bf16.msra.mxu1 %v9571_v46 }
 0x58f   : >> { %8488 = vmatprep.subr.bf16.mxu0 %v9572_v47  ;;  %9123 = vmatprep.subr.bf16.mxu1 %v9572_v47 }
 0x592   : >> { %8489 = vmatpush3.bf16.msra.mxu0 %v9572_v47  ;;  %9131 = vmatpush3.bf16.msra.mxu1 %v9572_v47 }
 0x593   : >> { %8490 = vmatprep.subr.bf16.mxu0 %v9573_v48  ;;  %9124 = vmatprep.subr.bf16.mxu1 %v9573_v48 }
 0x596   : >> { %8491 = vmatpush3.bf16.msra.mxu0 %v9573_v48  ;;  %9132 = vmatpush3.bf16.msra.mxu1 %v9573_v48 }
 0x597   : >> { %8492 = vmatprep.subr.bf16.mxu0 %v9574_v49  ;;  %9125 = vmatprep.subr.bf16.mxu1 %v9574_v49 }
 0x59a   : >> { %8493 = vmatpush3.bf16.msra.mxu0 %v9574_v49  ;;  %9133 = vmatpush3.bf16.msra.mxu1 %v9574_v49 }
 0x59d   : >> { %8495 = vmatmul.mubr.bf16.vlgmr.msra.gmra.mrb[0].mxu0 %v2528_v58  ;;  %8511 = vmatmul.mubr.bf16.vlgmr.msra.gmra.mrb[0].mxu1 %v2536_v59  ;;  %v2550_v59 = vld [vmem:[#allocation6 + $0x38] sm:$0xff] }
 0x59e   : >> { %8498 = vmatprep.mubr.bf16.mxu0 %v2529_v60  ;;  %8514 = vmatprep.mubr.bf16.mxu1 %v2537_v61  ;;  %v2566_v60 = vld [vmem:[#allocation6 + $0xb8] sm:$0xff] }
 0x5a5   : >> { %8499 = vmatmul.mubr.bf16.gmra.mrb[4].mxu0 %v2530_v7  ;;  %8515 = vmatmul.mubr.bf16.gmra.mrb[4].mxu1 %v2538_v8 }
 0x5a6   : >> { %8502 = vmatprep.mubr.bf16.mxu0 %v2531_v9  ;;  %8518 = vmatprep.mubr.bf16.mxu1 %v2539_v10 }
 0x5ad   : >> { %8503 = vmatmul.mubr.bf16.gmra.mrb[8].mxu0 %v2532_v19  ;;  %8519 = vmatmul.mubr.bf16.gmra.mrb[8].mxu1 %v2540_v20  ;;  %v2554_v20 = vld [vmem:[#allocation6 + $0x58] sm:$0xff] }
 0x5ae   : >> { %8506 = vmatprep.mubr.bf16.mxu0 %v2533_v21  ;;  %8522 = vmatprep.mubr.bf16.mxu1 %v2541_v22  ;;  %v2570_v21 = vld [vmem:[#allocation6 + $0xd8] sm:$0xff] }
 0x5b5   : >> { %8507 = vmatmul.mubr.bf16.gmra.mrb[12].mxu0 %v2534_v27  ;;  %8523 = vmatmul.mubr.bf16.gmra.mrb[12].mxu1 %v2542_v28  ;;  %v2568_v27 = vld [vmem:[#allocation6 + $0xc8] sm:$0xff] }
 0x670   : >> { %v8496_v33 = vpop.f32.mrb[0].mxu0  ;;  %v8512_v34 = vpop.f32.mrb[0].mxu1 }
 0x671   : >> { %v2807_v37 = vadd.f32 %v8496_v33, %v2545_v29  ;;  %v2823_v38 = vadd.f32 %v8512_v34, %v2561_v30  ;;  %v2678_v39 = vpop.f32.mrb[1].mxu0  ;;  %v2742_v40 = vpop.f32.mrb[1].mxu1 }
 0x672   : >> { %v2805_v43 = vadd.f32 %v2678_v39, %v2543_v31  ;;  %v2821_v44 = vadd.f32 %v2742_v40, %v2559_v32  ;;  %v8497_v45 = vpop.f32.mrb[2].mxu0  ;;  %v8513_v46 = vpop.f32.mrb[2].mxu1  ;;  %v2573_v39 = vld [vmem:[#allocation6 + $0xf0] sm:$0xff]  ;;  %v2555_v40 = vld [vmem:[#allocation6 + $0x60] sm:$0xff] }
 0x673   : >> { %2839 = vst [vmem:[#allocation6 + $0x10] sm:$0xff] %v2807_v37  ;;  %2855 = vst [vmem:[#allocation6 + $0x90] sm:$0xff] %v2823_v38  ;;  %v2808_v47 = vadd.f32 %v8497_v45, %v2546_v35  ;;  %v2824_v48 = vadd.f32 %v8513_v46, %v2562_v36  ;;  %v2681_v49 = vpop.f32.mrb[3].mxu0  ;;  %v2745_v50 = vpop.f32.mrb[3].mxu1  ;;  %v2557_v38 = vld [vmem:[#allocation6 + $0x70] sm:$0xff]  ;;  %v2574_v45 = vld [vmem:[#allocation6 + $0xf8] sm:$0xff] }
 0x674   : >> { %2837 = vst [vmem:[#allocation6] sm:$0xff] %v2805_v43  ;;  %2853 = vst [vmem:[#allocation6 + $0x80] sm:$0xff] %v2821_v44  ;;  %v2806_v51 = vadd.f32 %v2681_v49, %v2544_v41  ;;  %v2822_v52 = vadd.f32 %v2745_v50, %v2560_v42  ;;  %v2571_v41 = vld [vmem:[#allocation6 + $0xe0] sm:$0xff]  ;;  %v2558_v44 = vld [vmem:[#allocation6 + $0x78] sm:$0xff] }
 0x675   : >> { %2840 = vst [vmem:[#allocation6 + $0x18] sm:$0xff] %v2808_v47  ;;  %2856 = vst [vmem:[#allocation6 + $0x98] sm:$0xff] %v2824_v48  ;;  %v2556_v50 = vld [vmem:[#allocation6 + $0x68] sm:$0xff] }
 0x676   : >> { %2838 = vst [vmem:[#allocation6 + $0x8] sm:$0xff] %v2806_v51  ;;  %2854 = vst [vmem:[#allocation6 + $0x88] sm:$0xff] %v2822_v52  ;;  %v2572_v51 = vld [vmem:[#allocation6 + $0xe8] sm:$0xff] }
 0x678   : >> { %v8500_v57 = vpop.f32.mrb[4].mxu0  ;;  %v8516_v58 = vpop.f32.mrb[4].mxu1 }
 0x679   : >> { %v2811_v61 = vadd.f32 %v8500_v57, %v2549_v53  ;;  %v2827_v62 = vadd.f32 %v8516_v58, %v2565_v54  ;;  %v2694_v63 = vpop.f32.mrb[5].mxu0  ;;  %v2758_v0 = vpop.f32.mrb[5].mxu1 }
 0x67a   : >> { %v2809_v4 = vadd.f32 %v2694_v63, %v2547_v55  ;;  %v2825_v5 = vadd.f32 %v2758_v0, %v2563_v56  ;;  %v8501_v6 = vpop.f32.mrb[6].mxu0  ;;  %v8517_v7 = vpop.f32.mrb[6].mxu1 }
 0x67b   : >> { %2843 = vst [vmem:[#allocation6 + $0x30] sm:$0xff] %v2811_v61  ;;  %2859 = vst [vmem:[#allocation6 + $0xb0] sm:$0xff] %v2827_v62  ;;  %v2812_v8 = vadd.f32 %v8501_v6, %v2550_v59  ;;  %v2828_v9 = vadd.f32 %v8517_v7, %v2566_v60  ;;  %v2697_v10 = vpop.f32.mrb[7].mxu0  ;;  %v2761_v11 = vpop.f32.mrb[7].mxu1 }
 0x67c   : >> { %2841 = vst [vmem:[#allocation6 + $0x20] sm:$0xff] %v2809_v4  ;;  %2857 = vst [vmem:[#allocation6 + $0xa0] sm:$0xff] %v2825_v5  ;;  %v2810_v12 = vadd.f32 %v2697_v10, %v2548_v1  ;;  %v2826_v13 = vadd.f32 %v2761_v11, %v2564_v3 }
 0x67d   : >> { %2844 = vst [vmem:[#allocation6 + $0x38] sm:$0xff] %v2812_v8  ;;  %2860 = vst [vmem:[#allocation6 + $0xb8] sm:$0xff] %v2828_v9 }
 0x67e   : >> { %2842 = vst [vmem:[#allocation6 + $0x28] sm:$0xff] %v2810_v12  ;;  %2858 = vst [vmem:[#allocation6 + $0xa8] sm:$0xff] %v2826_v13 }
 0x680   : >> { %v8504_v18 = vpop.f32.mrb[8].mxu0  ;;  %v8520_v19 = vpop.f32.mrb[8].mxu1 }
 0x681   : >> { %v2815_v22 = vadd.f32 %v8504_v18, %v2553_v14  ;;  %v2831_v23 = vadd.f32 %v8520_v19, %v2569_v15  ;;  %v2710_v24 = vpop.f32.mrb[9].mxu0  ;;  %v2774_v25 = vpop.f32.mrb[9].mxu1 }
 0x682   : >> { %v2813_v28 = vadd.f32 %v2710_v24, %v2551_v16  ;;  %v2829_v29 = vadd.f32 %v2774_v25, %v2567_v17  ;;  %v8505_v30 = vpop.f32.mrb[10].mxu0  ;;  %v8521_v31 = vpop.f32.mrb[10].mxu1 }
 0x683   : >> { %2847 = vst [vmem:[#allocation6 + $0x50] sm:$0xff] %v2815_v22  ;;  %2863 = vst [vmem:[#allocation6 + $0xd0] sm:$0xff] %v2831_v23  ;;  %v2816_v32 = vadd.f32 %v8505_v30, %v2554_v20  ;;  %v2832_v33 = vadd.f32 %v8521_v31, %v2570_v21  ;;  %v2713_v34 = vpop.f32.mrb[11].mxu0  ;;  %v2777_v35 = vpop.f32.mrb[11].mxu1 }
 0x684   : >> { %2845 = vst [vmem:[#allocation6 + $0x40] sm:$0xff] %v2813_v28  ;;  %2861 = vst [vmem:[#allocation6 + $0xc0] sm:$0xff] %v2829_v29  ;;  %v2814_v36 = vadd.f32 %v2713_v34, %v2552_v26  ;;  %v2830_v37 = vadd.f32 %v2777_v35, %v2568_v27 }
 0x685   : >> { %2848 = vst [vmem:[#allocation6 + $0x58] sm:$0xff] %v2816_v32  ;;  %2864 = vst [vmem:[#allocation6 + $0xd8] sm:$0xff] %v2832_v33 }
 0x686   : >> { %2846 = vst [vmem:[#allocation6 + $0x48] sm:$0xff] %v2814_v36  ;;  %2862 = vst [vmem:[#allocation6 + $0xc8] sm:$0xff] %v2830_v37 }
 0x688   : >> { %v8508_v42 = vpop.f32.mrb[12].mxu0  ;;  %v8524_v43 = vpop.f32.mrb[12].mxu1  ;;  %2491 = sbr.rel (!%p2489_p8) target bundleno = 1400 (0x578), region = 288 }
 0x689   : >> { %v2819_v46 = vadd.f32 %v8508_v42, %v2557_v38  ;;  %v2835_v47 = vadd.f32 %v8524_v43, %v2573_v39  ;;  %v2726_v48 = vpop.f32.mrb[13].mxu0  ;;  %v2790_v49 = vpop.f32.mrb[13].mxu1 }
 0x68a   : >> { %v2817_v52 = vadd.f32 %v2726_v48, %v2555_v40  ;;  %v2833_v53 = vadd.f32 %v2790_v49, %v2571_v41  ;;  %v8509_v54 = vpop.f32.mrb[14].mxu0  ;;  %v8525_v55 = vpop.f32.mrb[14].mxu1 }
 0x68b   : >> { %2851 = vst [vmem:[#allocation6 + $0x70] sm:$0xff] %v2819_v46  ;;  %2867 = vst [vmem:[#allocation6 + $0xf0] sm:$0xff] %v2835_v47  ;;  %v2820_v56 = vadd.f32 %v8509_v54, %v2558_v44  ;;  %v2836_v57 = vadd.f32 %v8525_v55, %v2574_v45  ;;  %v2729_v58 = vpop.f32.mrb[15].mxu0  ;;  %v2793_v59 = vpop.f32.mrb[15].mxu1 }
 0x68c   : >> { %2849 = vst [vmem:[#allocation6 + $0x60] sm:$0xff] %v2817_v52  ;;  %2865 = vst [vmem:[#allocation6 + $0xe0] sm:$0xff] %v2833_v53  ;;  %v2818_v60 = vadd.f32 %v2729_v58, %v2556_v50  ;;  %v2834_v61 = vadd.f32 %v2793_v59, %v2572_v51 }
 0x68d   : >> { %2852 = vst [vmem:[#allocation6 + $0x78] sm:$0xff] %v2820_v56  ;;  %2868 = vst [vmem:[#allocation6 + $0xf8] sm:$0xff] %v2836_v57 }
 0x68e   : >> { %2850 = vst [vmem:[#allocation6 + $0x68] sm:$0xff] %v2818_v60  ;;  %2866 = vst [vmem:[#allocation6 + $0xe8] sm:$0xff] %v2834_v61 }
 0x68f LB: >> { %s2875_s21 = smul.u32 24, %s9813_s20  ;;  %v2927_v55 = vld [vmem:[#allocation6 + $0x10] sm:$0xff]  ;;  %v2925_v57 = vld [vmem:[#allocation6] sm:$0xff]  ;;  %v2928_v61 = vld [vmem:[#allocation6 + $0x18] sm:$0xff]  ;;  %s9813_s20 = sphi %s10461_s20, %s2874_s20  }
 0x690   : >> { %s7496_s22 = smul.u32 448, %s9813_s20  ;;  %v2943_v56 = vld [vmem:[#allocation6 + $0x90] sm:$0xff]  ;;  %v2941_v58 = vld [vmem:[#allocation6 + $0x80] sm:$0xff]  ;;  %s2874_s20 = sadd.s32 1, %s9813_s20  }
 0x691   : >> { %s10473_s27 = scalar_lea.vmem [#allocation2], %s2875_s21  ;;  %p2871_p9 = scmp.ge.s32.totalorder %s2874_s20, 7  }
 0x692   : >> { %s10471_s26 = scalar_lea.vmem %s11234_s2, %s7496_s22  ;;  %v2877_v62 = vld [vmem:[%s10473_s27 + $0x5] sm:$0xff]  ;;  %v2878_v63 = vld [vmem:[%s10473_s27 + $0xd] sm:$0xff]  ;;  %v2879_v13 = vld [vmem:[%s10473_s27 + $0x1d] sm:$0xff]  ;;  %s10518_s28 = smov (%p2871_p9), 0  }
 0x693   : >> { %v9575_v0 = vld [vmem:[%s10471_s26 + $0x140] sm:$0xff]   ;;  %v9576_v1 = vld [vmem:[%s10471_s26 + $0x148] sm:$0xff]   ;;  %v2909_v3 = vpack.c.bf16 %v2878_v63, %v2877_v62  ;;  %v9577_v4 = vld [vmem:[%s10471_s26 + $0x150] sm:$0xff]  }
 0x694   : >> { %8526 = vmatprep.subr.bf16.mxu0 %v9575_v0  ;;  %9134 = vmatprep.subr.bf16.mxu1 %v9575_v0  ;;  %v2893_v5 = vld [vmem:[%s10473_s27 + $0xc5] sm:$0xff]  ;;  %v9578_v6 = vld [vmem:[%s10471_s26 + $0x158] sm:$0xff]   ;;  %v2894_v7 = vld [vmem:[%s10473_s27 + $0xcd] sm:$0xff] }
 0x695   : >> { %8527 = vmatpush3.bf16.msra.mxu0 %v9575_v0  ;;  %9142 = vmatpush3.bf16.msra.mxu1 %v9575_v0  ;;  %v2917_v8 = vpack.c.bf16 %v2894_v7, %v2893_v5  ;;  %v9579_v9 = vld [vmem:[%s10471_s26 + $0x160] sm:$0xff]   ;;  %v9580_v10 = vld [vmem:[%s10471_s26 + $0x168] sm:$0xff]   ;;  %v9581_v11 = vld [vmem:[%s10471_s26 + $0x170] sm:$0xff]  }
 0x696   : >> { %8528 = vmatprep.subr.bf16.mxu0 %v9576_v1  ;;  %9135 = vmatprep.subr.bf16.mxu1 %v9576_v1  ;;  %v9582_v12 = vld [vmem:[%s10471_s26 + $0x178] sm:$0xff]   ;;  %v2880_v14 = vld [vmem:[%s10473_s27 + $0x25] sm:$0xff]  ;;  %v2883_v25 = vld [vmem:[%s10473_s27 + $0x4d] sm:$0xff] }
 0x697   : >> { %8542 = vmatprep.mubr.bf16.mxu0 %v2909_v3  ;;  %8558 = vmatprep.mubr.bf16.mxu1 %v2917_v8  ;;  %v2895_v15 = vld [vmem:[%s10473_s27 + $0xdd] sm:$0xff]  ;;  %v2896_v16 = vld [vmem:[%s10473_s27 + $0xe5] sm:$0xff]  ;;  %v2881_v17 = vld [vmem:[%s10473_s27 + $0x35] sm:$0xff]  ;;  %v2910_v21 = vpack.c.bf16 %v2880_v14, %v2879_v13 }
 0x698   : >> { %v2882_v18 = vld [vmem:[%s10473_s27 + $0x3d] sm:$0xff]  ;;  %v2897_v19 = vld [vmem:[%s10473_s27 + $0xf5] sm:$0xff]  ;;  %v2918_v22 = vpack.c.bf16 %v2896_v16, %v2895_v15  ;;  %v2899_v27 = vld [vmem:[%s10473_s27 + $0x10d] sm:$0xff] }
 0x699   : >> { %8529 = vmatpush3.bf16.msra.mxu0 %v9576_v1  ;;  %9143 = vmatpush3.bf16.msra.mxu1 %v9576_v1  ;;  %v2898_v20 = vld [vmem:[%s10473_s27 + $0xfd] sm:$0xff]  ;;  %v2911_v23 = vpack.c.bf16 %v2882_v18, %v2881_v17  ;;  %v2884_v26 = vld [vmem:[%s10473_s27 + $0x55] sm:$0xff]  ;;  %v2885_v29 = vld [vmem:[%s10473_s27 + $0x65] sm:$0xff] }
 0x69a   : >> { %8530 = vmatprep.subr.bf16.mxu0 %v9577_v4  ;;  %9136 = vmatprep.subr.bf16.mxu1 %v9577_v4  ;;  %v2919_v24 = vpack.c.bf16 %v2898_v20, %v2897_v19  ;;  %v2900_v28 = vld [vmem:[%s10473_s27 + $0x115] sm:$0xff]  ;;  %v2886_v30 = vld [vmem:[%s10473_s27 + $0x6d] sm:$0xff]  ;;  %v2901_v31 = vld [vmem:[%s10473_s27 + $0x125] sm:$0xff]  ;;  %v2912_v33 = vpack.c.bf16 %v2884_v26, %v2883_v25 }
 0x69b   : >> { %v2902_v32 = vld [vmem:[%s10473_s27 + $0x12d] sm:$0xff]  ;;  %v2920_v34 = vpack.c.bf16 %v2900_v28, %v2899_v27  ;;  %v2913_v35 = vpack.c.bf16 %v2886_v30, %v2885_v29  ;;  %v2887_v37 = vld [vmem:[%s10473_s27 + $0x7d] sm:$0xff]  ;;  %v2888_v38 = vld [vmem:[%s10473_s27 + $0x85] sm:$0xff] }
 0x69c   : >> { %v2921_v36 = vpack.c.bf16 %v2902_v32, %v2901_v31  ;;  %v2903_v39 = vld [vmem:[%s10473_s27 + $0x13d] sm:$0xff]  ;;  %v2904_v40 = vld [vmem:[%s10473_s27 + $0x145] sm:$0xff]  ;;  %v2889_v41 = vld [vmem:[%s10473_s27 + $0x95] sm:$0xff]  ;;  %v2914_v45 = vpack.c.bf16 %v2888_v38, %v2887_v37 }
 0x69d   : >> { %8531 = vmatpush3.bf16.msra.mxu0 %v9577_v4  ;;  %9144 = vmatpush3.bf16.msra.mxu1 %v9577_v4  ;;  %v2890_v42 = vld [vmem:[%s10473_s27 + $0x9d] sm:$0xff]  ;;  %v2905_v43 = vld [vmem:[%s10473_s27 + $0x155] sm:$0xff]  ;;  %v2922_v46 = vpack.c.bf16 %v2904_v40, %v2903_v39  ;;  %v2891_v49 = vld [vmem:[%s10473_s27 + $0xad] sm:$0xff] }
 0x69e   : >> { %8532 = vmatprep.subr.bf16.mxu0 %v9578_v6  ;;  %9137 = vmatprep.subr.bf16.mxu1 %v9578_v6  ;;  %v2906_v44 = vld [vmem:[%s10473_s27 + $0x15d] sm:$0xff]  ;;  %v2915_v47 = vpack.c.bf16 %v2890_v42, %v2889_v41  ;;  %v2892_v50 = vld [vmem:[%s10473_s27 + $0xb5] sm:$0xff]  ;;  %v2907_v51 = vld [vmem:[%s10473_s27 + $0x16d] sm:$0xff] }
 0x69f   : >> { %v2923_v48 = vpack.c.bf16 %v2906_v44, %v2905_v43  ;;  %v2908_v52 = vld [vmem:[%s10473_s27 + $0x175] sm:$0xff]  ;;  %v2916_v53 = vpack.c.bf16 %v2892_v50, %v2891_v49  ;;  %v2944_v62 = vld [vmem:[#allocation6 + $0x98] sm:$0xff]  ;;  %v2931_v16 = vld [vmem:[#allocation6 + $0x30] sm:$0xff] }
 0x6a0   : >> { %v2924_v54 = vpack.c.bf16 %v2908_v52, %v2907_v51  ;;  %v2926_v4 = vld [vmem:[#allocation6 + $0x8] sm:$0xff]  ;;  %v2947_v17 = vld [vmem:[#allocation6 + $0xb0] sm:$0xff]  ;;  %v2929_v18 = vld [vmem:[#allocation6 + $0x20] sm:$0xff] }
 0x6a1   : >> { %8533 = vmatpush3.bf16.msra.mxu0 %v9578_v6  ;;  %9145 = vmatpush3.bf16.msra.mxu1 %v9578_v6  ;;  %v2942_v5 = vld [vmem:[#allocation6 + $0x88] sm:$0xff]  ;;  %v2945_v19 = vld [vmem:[#allocation6 + $0xa0] sm:$0xff]  ;;  %v2935_v40 = vld [vmem:[#allocation6 + $0x50] sm:$0xff] }
 0x6a2   : >> { %8534 = vmatprep.subr.bf16.mxu0 %v9579_v9  ;;  %9138 = vmatprep.subr.bf16.mxu1 %v9579_v9  ;;  %v2930_v28 = vld [vmem:[#allocation6 + $0x28] sm:$0xff]  ;;  %v2951_v41 = vld [vmem:[#allocation6 + $0xd0] sm:$0xff]  ;;  %v2933_v42 = vld [vmem:[#allocation6 + $0x40] sm:$0xff] }
 0x6a3   : >> { %v2946_v29 = vld [vmem:[#allocation6 + $0xa8] sm:$0xff]  ;;  %v2949_v43 = vld [vmem:[#allocation6 + $0xc0] sm:$0xff] }
 0x6a4   : >> { %v2934_v52 = vld [vmem:[#allocation6 + $0x48] sm:$0xff] }
 0x6a5   : >> { %8535 = vmatpush3.bf16.msra.mxu0 %v9579_v9  ;;  %9146 = vmatpush3.bf16.msra.mxu1 %v9579_v9 }
 0x6a6   : >> { %8536 = vmatprep.subr.bf16.mxu0 %v9580_v10  ;;  %9139 = vmatprep.subr.bf16.mxu1 %v9580_v10 }
 0x6a9   : >> { %8537 = vmatpush3.bf16.msra.mxu0 %v9580_v10  ;;  %9147 = vmatpush3.bf16.msra.mxu1 %v9580_v10 }
 0x6aa   : >> { %8538 = vmatprep.subr.bf16.mxu0 %v9581_v11  ;;  %9140 = vmatprep.subr.bf16.mxu1 %v9581_v11 }
 0x6ad   : >> { %8539 = vmatpush3.bf16.msra.mxu0 %v9581_v11  ;;  %9148 = vmatpush3.bf16.msra.mxu1 %v9581_v11 }
 0x6ae   : >> { %8540 = vmatprep.subr.bf16.mxu0 %v9582_v12  ;;  %9141 = vmatprep.subr.bf16.mxu1 %v9582_v12 }
 0x6b1   : >> { %8541 = vmatpush3.bf16.msra.mxu0 %v9582_v12  ;;  %9149 = vmatpush3.bf16.msra.mxu1 %v9582_v12 }
 0x6b4   : >> { %8543 = vmatmul.mubr.bf16.vlgmr.msra.gmra.mrb[0].mxu0 %v2910_v21  ;;  %8559 = vmatmul.mubr.bf16.vlgmr.msra.gmra.mrb[0].mxu1 %v2918_v22  ;;  %v2932_v22 = vld [vmem:[#allocation6 + $0x38] sm:$0xff] }
 0x6b5   : >> { %8546 = vmatprep.mubr.bf16.mxu0 %v2911_v23  ;;  %8562 = vmatprep.mubr.bf16.mxu1 %v2919_v24  ;;  %v2948_v23 = vld [vmem:[#allocation6 + $0xb8] sm:$0xff] }
 0x6bc   : >> { %8547 = vmatmul.mubr.bf16.gmra.mrb[4].mxu0 %v2912_v33  ;;  %8563 = vmatmul.mubr.bf16.gmra.mrb[4].mxu1 %v2920_v34 }
 0x6bd   : >> { %8550 = vmatprep.mubr.bf16.mxu0 %v2913_v35  ;;  %8566 = vmatprep.mubr.bf16.mxu1 %v2921_v36 }
 0x6c4   : >> { %8551 = vmatmul.mubr.bf16.gmra.mrb[8].mxu0 %v2914_v45  ;;  %8567 = vmatmul.mubr.bf16.gmra.mrb[8].mxu1 %v2922_v46  ;;  %v2936_v46 = vld [vmem:[#allocation6 + $0x58] sm:$0xff] }
 0x6c5   : >> { %8554 = vmatprep.mubr.bf16.mxu0 %v2915_v47  ;;  %8570 = vmatprep.mubr.bf16.mxu1 %v2923_v48  ;;  %v2952_v47 = vld [vmem:[#allocation6 + $0xd8] sm:$0xff] }
 0x6cc   : >> { %8555 = vmatmul.mubr.bf16.gmra.mrb[12].mxu0 %v2916_v53  ;;  %8571 = vmatmul.mubr.bf16.gmra.mrb[12].mxu1 %v2924_v54  ;;  %v2950_v53 = vld [vmem:[#allocation6 + $0xc8] sm:$0xff] }
 0x787   : >> { %v8544_v59 = vpop.f32.mrb[0].mxu0  ;;  %v8560_v60 = vpop.f32.mrb[0].mxu1 }
 0x788   : >> { %v3189_v63 = vadd.f32 %v8544_v59, %v2927_v55  ;;  %v3205_v0 = vadd.f32 %v8560_v60, %v2943_v56  ;;  %v3060_v1 = vpop.f32.mrb[1].mxu0  ;;  %v3124_v3 = vpop.f32.mrb[1].mxu1 }
 0x789   : >> { %v3187_v6 = vadd.f32 %v3060_v1, %v2925_v57  ;;  %v3203_v7 = vadd.f32 %v3124_v3, %v2941_v58  ;;  %v8545_v8 = vpop.f32.mrb[2].mxu0  ;;  %v8561_v9 = vpop.f32.mrb[2].mxu1  ;;  %v2955_v1 = vld [vmem:[#allocation6 + $0xf0] sm:$0xff]  ;;  %v2937_v3 = vld [vmem:[#allocation6 + $0x60] sm:$0xff] }
 0x78a   : >> { %3221 = vst [vmem:[#allocation6 + $0x10] sm:$0xff] %v3189_v63  ;;  %3237 = vst [vmem:[#allocation6 + $0x90] sm:$0xff] %v3205_v0  ;;  %v3190_v10 = vadd.f32 %v8545_v8, %v2928_v61  ;;  %v3206_v11 = vadd.f32 %v8561_v9, %v2944_v62  ;;  %v3063_v12 = vpop.f32.mrb[3].mxu0  ;;  %v3127_v13 = vpop.f32.mrb[3].mxu1  ;;  %v2939_v0 = vld [vmem:[#allocation6 + $0x70] sm:$0xff]  ;;  %v2956_v8 = vld [vmem:[#allocation6 + $0xf8] sm:$0xff] }
 0x78b   : >> { %3219 = vst [vmem:[#allocation6] sm:$0xff] %v3187_v6  ;;  %3235 = vst [vmem:[#allocation6 + $0x80] sm:$0xff] %v3203_v7  ;;  %v3188_v14 = vadd.f32 %v3063_v12, %v2926_v4  ;;  %v3204_v15 = vadd.f32 %v3127_v13, %v2942_v5  ;;  %v2953_v4 = vld [vmem:[#allocation6 + $0xe0] sm:$0xff]  ;;  %v2940_v7 = vld [vmem:[#allocation6 + $0x78] sm:$0xff] }
 0x78c   : >> { %3222 = vst [vmem:[#allocation6 + $0x18] sm:$0xff] %v3190_v10  ;;  %3238 = vst [vmem:[#allocation6 + $0x98] sm:$0xff] %v3206_v11  ;;  %v2938_v13 = vld [vmem:[#allocation6 + $0x68] sm:$0xff] }
 0x78d   : >> { %3220 = vst [vmem:[#allocation6 + $0x8] sm:$0xff] %v3188_v14  ;;  %3236 = vst [vmem:[#allocation6 + $0x88] sm:$0xff] %v3204_v15  ;;  %v2954_v14 = vld [vmem:[#allocation6 + $0xe8] sm:$0xff] }
 0x78f   : >> { %v8548_v20 = vpop.f32.mrb[4].mxu0  ;;  %v8564_v21 = vpop.f32.mrb[4].mxu1 }
 0x790   : >> { %v3193_v24 = vadd.f32 %v8548_v20, %v2931_v16  ;;  %v3209_v25 = vadd.f32 %v8564_v21, %v2947_v17  ;;  %v3076_v26 = vpop.f32.mrb[5].mxu0  ;;  %v3140_v27 = vpop.f32.mrb[5].mxu1 }
 0x791   : >> { %v3191_v30 = vadd.f32 %v3076_v26, %v2929_v18  ;;  %v3207_v31 = vadd.f32 %v3140_v27, %v2945_v19  ;;  %v8549_v32 = vpop.f32.mrb[6].mxu0  ;;  %v8565_v33 = vpop.f32.mrb[6].mxu1 }
 0x792   : >> { %3225 = vst [vmem:[#allocation6 + $0x30] sm:$0xff] %v3193_v24  ;;  %3241 = vst [vmem:[#allocation6 + $0xb0] sm:$0xff] %v3209_v25  ;;  %v3194_v34 = vadd.f32 %v8549_v32, %v2932_v22  ;;  %v3210_v35 = vadd.f32 %v8565_v33, %v2948_v23  ;;  %v3079_v36 = vpop.f32.mrb[7].mxu0  ;;  %v3143_v37 = vpop.f32.mrb[7].mxu1 }
 0x793   : >> { %3223 = vst [vmem:[#allocation6 + $0x20] sm:$0xff] %v3191_v30  ;;  %3239 = vst [vmem:[#allocation6 + $0xa0] sm:$0xff] %v3207_v31  ;;  %v3192_v38 = vadd.f32 %v3079_v36, %v2930_v28  ;;  %v3208_v39 = vadd.f32 %v3143_v37, %v2946_v29 }
 0x794   : >> { %3226 = vst [vmem:[#allocation6 + $0x38] sm:$0xff] %v3194_v34  ;;  %3242 = vst [vmem:[#allocation6 + $0xb8] sm:$0xff] %v3210_v35 }
 0x795   : >> { %3224 = vst [vmem:[#allocation6 + $0x28] sm:$0xff] %v3192_v38  ;;  %3240 = vst [vmem:[#allocation6 + $0xa8] sm:$0xff] %v3208_v39 }
 0x797   : >> { %v8552_v44 = vpop.f32.mrb[8].mxu0  ;;  %v8568_v45 = vpop.f32.mrb[8].mxu1 }
 0x798   : >> { %v3197_v48 = vadd.f32 %v8552_v44, %v2935_v40  ;;  %v3213_v49 = vadd.f32 %v8568_v45, %v2951_v41  ;;  %v3092_v50 = vpop.f32.mrb[9].mxu0  ;;  %v3156_v51 = vpop.f32.mrb[9].mxu1 }
 0x799   : >> { %v3195_v54 = vadd.f32 %v3092_v50, %v2933_v42  ;;  %v3211_v55 = vadd.f32 %v3156_v51, %v2949_v43  ;;  %v8553_v56 = vpop.f32.mrb[10].mxu0  ;;  %v8569_v57 = vpop.f32.mrb[10].mxu1 }
 0x79a   : >> { %3229 = vst [vmem:[#allocation6 + $0x50] sm:$0xff] %v3197_v48  ;;  %3245 = vst [vmem:[#allocation6 + $0xd0] sm:$0xff] %v3213_v49  ;;  %v3198_v58 = vadd.f32 %v8553_v56, %v2936_v46  ;;  %v3214_v59 = vadd.f32 %v8569_v57, %v2952_v47  ;;  %v3095_v60 = vpop.f32.mrb[11].mxu0  ;;  %v3159_v61 = vpop.f32.mrb[11].mxu1 }
 0x79b   : >> { %3227 = vst [vmem:[#allocation6 + $0x40] sm:$0xff] %v3195_v54  ;;  %3243 = vst [vmem:[#allocation6 + $0xc0] sm:$0xff] %v3211_v55  ;;  %v3196_v62 = vadd.f32 %v3095_v60, %v2934_v52  ;;  %v3212_v63 = vadd.f32 %v3159_v61, %v2950_v53 }
 0x79c   : >> { %3230 = vst [vmem:[#allocation6 + $0x58] sm:$0xff] %v3198_v58  ;;  %3246 = vst [vmem:[#allocation6 + $0xd8] sm:$0xff] %v3214_v59 }
 0x79d   : >> { %3228 = vst [vmem:[#allocation6 + $0x48] sm:$0xff] %v3196_v62  ;;  %3244 = vst [vmem:[#allocation6 + $0xc8] sm:$0xff] %v3212_v63 }
 0x79f   : >> { %v8556_v5 = vpop.f32.mrb[12].mxu0  ;;  %v8572_v6 = vpop.f32.mrb[12].mxu1  ;;  %2873 = sbr.rel (!%p2871_p9) target bundleno = 1679 (0x68f), region = 299 }
 0x7a0   : >> { %v3201_v9 = vadd.f32 %v8556_v5, %v2939_v0  ;;  %v3217_v10 = vadd.f32 %v8572_v6, %v2955_v1  ;;  %v3108_v11 = vpop.f32.mrb[13].mxu0  ;;  %v3172_v12 = vpop.f32.mrb[13].mxu1 }
 0x7a1   : >> { %v3199_v15 = vadd.f32 %v3108_v11, %v2937_v3  ;;  %v3215_v16 = vadd.f32 %v3172_v12, %v2953_v4  ;;  %v8557_v17 = vpop.f32.mrb[14].mxu0  ;;  %v8573_v18 = vpop.f32.mrb[14].mxu1 }
 0x7a2   : >> { %3233 = vst [vmem:[#allocation6 + $0x70] sm:$0xff] %v3201_v9  ;;  %3249 = vst [vmem:[#allocation6 + $0xf0] sm:$0xff] %v3217_v10  ;;  %v3202_v19 = vadd.f32 %v8557_v17, %v2940_v7  ;;  %v3218_v20 = vadd.f32 %v8573_v18, %v2956_v8  ;;  %v3111_v21 = vpop.f32.mrb[15].mxu0  ;;  %v3175_v22 = vpop.f32.mrb[15].mxu1 }
 0x7a3   : >> { %3231 = vst [vmem:[#allocation6 + $0x60] sm:$0xff] %v3199_v15  ;;  %3247 = vst [vmem:[#allocation6 + $0xe0] sm:$0xff] %v3215_v16  ;;  %v3200_v23 = vadd.f32 %v3111_v21, %v2938_v13  ;;  %v3216_v24 = vadd.f32 %v3175_v22, %v2954_v14 }
 0x7a4   : >> { %3234 = vst [vmem:[#allocation6 + $0x78] sm:$0xff] %v3202_v19  ;;  %3250 = vst [vmem:[#allocation6 + $0xf8] sm:$0xff] %v3218_v20 }
 0x7a5   : >> { %3232 = vst [vmem:[#allocation6 + $0x68] sm:$0xff] %v3200_v23  ;;  %3248 = vst [vmem:[#allocation6 + $0xe8] sm:$0xff] %v3216_v24 }
 0x7a6 LB: >> { %s3257_s29 = smul.u32 24, %s9817_s28  ;;  %v3309_v18 = vld [vmem:[#allocation6 + $0x10] sm:$0xff]  ;;  %v3307_v20 = vld [vmem:[#allocation6] sm:$0xff]  ;;  %v3310_v24 = vld [vmem:[#allocation6 + $0x18] sm:$0xff]  ;;  %s9817_s28 = sphi %s10518_s28, %s3256_s28  }
 0x7a7   : >> { %s7521_s30 = smul.u32 448, %s9817_s28  ;;  %v3325_v19 = vld [vmem:[#allocation6 + $0x90] sm:$0xff]  ;;  %v3323_v21 = vld [vmem:[#allocation6 + $0x80] sm:$0xff]  ;;  %s3256_s28 = sadd.s32 1, %s9817_s28  }
 0x7a8   : >> { %s10530_s11 = scalar_lea.vmem [#allocation2], %s3257_s29  ;;  %p3253_p10 = scmp.ge.s32.totalorder %s3256_s28, 7  }
 0x7a9   : >> { %s10528_s10 = scalar_lea.vmem %s11234_s2, %s7521_s30  ;;  %v3259_v25 = vld [vmem:[%s10530_s11 + $0x6] sm:$0xff]  ;;  %v3260_v26 = vld [vmem:[%s10530_s11 + $0xe] sm:$0xff]  ;;  %v3261_v39 = vld [vmem:[%s10530_s11 + $0x1e] sm:$0xff]  ;;  %s10672_s12 = smov (%p3253_p10), 0  }
 0x7aa   : >> { %v9583_v27 = vld [vmem:[%s10528_s10 + $0x180] sm:$0xff]   ;;  %v9584_v28 = vld [vmem:[%s10528_s10 + $0x188] sm:$0xff]   ;;  %v3291_v29 = vpack.c.bf16 %v3260_v26, %v3259_v25  ;;  %v9585_v30 = vld [vmem:[%s10528_s10 + $0x190] sm:$0xff]  }
 0x7ab   : >> { %8574 = vmatprep.subr.bf16.mxu0 %v9583_v27  ;;  %9150 = vmatprep.subr.bf16.mxu1 %v9583_v27  ;;  %v3275_v31 = vld [vmem:[%s10530_s11 + $0xc6] sm:$0xff]  ;;  %v9586_v32 = vld [vmem:[%s10528_s10 + $0x198] sm:$0xff]   ;;  %v3276_v33 = vld [vmem:[%s10530_s11 + $0xce] sm:$0xff] }
 0x7ac   : >> { %8575 = vmatpush3.bf16.msra.mxu0 %v9583_v27  ;;  %9158 = vmatpush3.bf16.msra.mxu1 %v9583_v27  ;;  %v3299_v34 = vpack.c.bf16 %v3276_v33, %v3275_v31  ;;  %v9587_v35 = vld [vmem:[%s10528_s10 + $0x1a0] sm:$0xff]   ;;  %v9588_v36 = vld [vmem:[%s10528_s10 + $0x1a8] sm:$0xff]   ;;  %v9589_v37 = vld [vmem:[%s10528_s10 + $0x1b0] sm:$0xff]  }
 0x7ad   : >> { %8576 = vmatprep.subr.bf16.mxu0 %v9584_v28  ;;  %9151 = vmatprep.subr.bf16.mxu1 %v9584_v28  ;;  %v9590_v38 = vld [vmem:[%s10528_s10 + $0x1b8] sm:$0xff]   ;;  %v3262_v40 = vld [vmem:[%s10530_s11 + $0x26] sm:$0xff]  ;;  %v3265_v51 = vld [vmem:[%s10530_s11 + $0x4e] sm:$0xff] }
 0x7ae   : >> { %8590 = vmatprep.mubr.bf16.mxu0 %v3291_v29  ;;  %8606 = vmatprep.mubr.bf16.mxu1 %v3299_v34  ;;  %v3277_v41 = vld [vmem:[%s10530_s11 + $0xde] sm:$0xff]  ;;  %v3278_v42 = vld [vmem:[%s10530_s11 + $0xe6] sm:$0xff]  ;;  %v3263_v43 = vld [vmem:[%s10530_s11 + $0x36] sm:$0xff]  ;;  %v3292_v47 = vpack.c.bf16 %v3262_v40, %v3261_v39 }
 0x7af   : >> { %v3264_v44 = vld [vmem:[%s10530_s11 + $0x3e] sm:$0xff]  ;;  %v3279_v45 = vld [vmem:[%s10530_s11 + $0xf6] sm:$0xff]  ;;  %v3300_v48 = vpack.c.bf16 %v3278_v42, %v3277_v41  ;;  %v3281_v53 = vld [vmem:[%s10530_s11 + $0x10e] sm:$0xff] }
 0x7b0   : >> { %8577 = vmatpush3.bf16.msra.mxu0 %v9584_v28  ;;  %9159 = vmatpush3.bf16.msra.mxu1 %v9584_v28  ;;  %v3280_v46 = vld [vmem:[%s10530_s11 + $0xfe] sm:$0xff]  ;;  %v3293_v49 = vpack.c.bf16 %v3264_v44, %v3263_v43  ;;  %v3266_v52 = vld [vmem:[%s10530_s11 + $0x56] sm:$0xff]  ;;  %v3267_v55 = vld [vmem:[%s10530_s11 + $0x66] sm:$0xff] }
 0x7b1   : >> { %8578 = vmatprep.subr.bf16.mxu0 %v9585_v30  ;;  %9152 = vmatprep.subr.bf16.mxu1 %v9585_v30  ;;  %v3301_v50 = vpack.c.bf16 %v3280_v46, %v3279_v45  ;;  %v3282_v54 = vld [vmem:[%s10530_s11 + $0x116] sm:$0xff]  ;;  %v3268_v56 = vld [vmem:[%s10530_s11 + $0x6e] sm:$0xff]  ;;  %v3283_v57 = vld [vmem:[%s10530_s11 + $0x126] sm:$0xff]  ;;  %v3294_v59 = vpack.c.bf16 %v3266_v52, %v3265_v51 }
 0x7b2   : >> { %v3284_v58 = vld [vmem:[%s10530_s11 + $0x12e] sm:$0xff]  ;;  %v3302_v60 = vpack.c.bf16 %v3282_v54, %v3281_v53  ;;  %v3295_v61 = vpack.c.bf16 %v3268_v56, %v3267_v55  ;;  %v3269_v63 = vld [vmem:[%s10530_s11 + $0x7e] sm:$0xff]  ;;  %v3270_v0 = vld [vmem:[%s10530_s11 + $0x86] sm:$0xff] }
 0x7b3   : >> { %v3303_v62 = vpack.c.bf16 %v3284_v58, %v3283_v57  ;;  %v3285_v1 = vld [vmem:[%s10530_s11 + $0x13e] sm:$0xff]  ;;  %v3286_v3 = vld [vmem:[%s10530_s11 + $0x146] sm:$0xff]  ;;  %v3271_v4 = vld [vmem:[%s10530_s11 + $0x96] sm:$0xff]  ;;  %v3296_v8 = vpack.c.bf16 %v3270_v0, %v3269_v63 }
 0x7b4   : >> { %8579 = vmatpush3.bf16.msra.mxu0 %v9585_v30  ;;  %9160 = vmatpush3.bf16.msra.mxu1 %v9585_v30  ;;  %v3272_v5 = vld [vmem:[%s10530_s11 + $0x9e] sm:$0xff]  ;;  %v3287_v6 = vld [vmem:[%s10530_s11 + $0x156] sm:$0xff]  ;;  %v3304_v9 = vpack.c.bf16 %v3286_v3, %v3285_v1  ;;  %v3273_v12 = vld [vmem:[%s10530_s11 + $0xae] sm:$0xff] }
 0x7b5   : >> { %8580 = vmatprep.subr.bf16.mxu0 %v9586_v32  ;;  %9153 = vmatprep.subr.bf16.mxu1 %v9586_v32  ;;  %v3288_v7 = vld [vmem:[%s10530_s11 + $0x15e] sm:$0xff]  ;;  %v3297_v10 = vpack.c.bf16 %v3272_v5, %v3271_v4  ;;  %v3274_v13 = vld [vmem:[%s10530_s11 + $0xb6] sm:$0xff]  ;;  %v3289_v14 = vld [vmem:[%s10530_s11 + $0x16e] sm:$0xff] }
 0x7b6   : >> { %v3305_v11 = vpack.c.bf16 %v3288_v7, %v3287_v6  ;;  %v3290_v15 = vld [vmem:[%s10530_s11 + $0x176] sm:$0xff]  ;;  %v3298_v16 = vpack.c.bf16 %v3274_v13, %v3273_v12  ;;  %v3326_v25 = vld [vmem:[#allocation6 + $0x98] sm:$0xff]  ;;  %v3313_v42 = vld [vmem:[#allocation6 + $0x30] sm:$0xff] }
 0x7b7   : >> { %v3306_v17 = vpack.c.bf16 %v3290_v15, %v3289_v14  ;;  %v3308_v30 = vld [vmem:[#allocation6 + $0x8] sm:$0xff]  ;;  %v3329_v43 = vld [vmem:[#allocation6 + $0xb0] sm:$0xff]  ;;  %v3311_v44 = vld [vmem:[#allocation6 + $0x20] sm:$0xff] }
 0x7b8   : >> { %8581 = vmatpush3.bf16.msra.mxu0 %v9586_v32  ;;  %9161 = vmatpush3.bf16.msra.mxu1 %v9586_v32  ;;  %v3324_v31 = vld [vmem:[#allocation6 + $0x88] sm:$0xff]  ;;  %v3327_v45 = vld [vmem:[#allocation6 + $0xa0] sm:$0xff]  ;;  %v3317_v3 = vld [vmem:[#allocation6 + $0x50] sm:$0xff] }
 0x7b9   : >> { %8582 = vmatprep.subr.bf16.mxu0 %v9587_v35  ;;  %9154 = vmatprep.subr.bf16.mxu1 %v9587_v35  ;;  %v3312_v54 = vld [vmem:[#allocation6 + $0x28] sm:$0xff]  ;;  %v3333_v4 = vld [vmem:[#allocation6 + $0xd0] sm:$0xff]  ;;  %v3315_v5 = vld [vmem:[#allocation6 + $0x40] sm:$0xff] }
 0x7ba   : >> { %v3328_v55 = vld [vmem:[#allocation6 + $0xa8] sm:$0xff]  ;;  %v3331_v6 = vld [vmem:[#allocation6 + $0xc0] sm:$0xff] }
 0x7bb   : >> { %v3316_v15 = vld [vmem:[#allocation6 + $0x48] sm:$0xff] }
 0x7bc   : >> { %8583 = vmatpush3.bf16.msra.mxu0 %v9587_v35  ;;  %9162 = vmatpush3.bf16.msra.mxu1 %v9587_v35 }
 0x7bd   : >> { %8584 = vmatprep.subr.bf16.mxu0 %v9588_v36  ;;  %9155 = vmatprep.subr.bf16.mxu1 %v9588_v36 }
 0x7c0   : >> { %8585 = vmatpush3.bf16.msra.mxu0 %v9588_v36  ;;  %9163 = vmatpush3.bf16.msra.mxu1 %v9588_v36 }
 0x7c1   : >> { %8586 = vmatprep.subr.bf16.mxu0 %v9589_v37  ;;  %9156 = vmatprep.subr.bf16.mxu1 %v9589_v37 }
 0x7c4   : >> { %8587 = vmatpush3.bf16.msra.mxu0 %v9589_v37  ;;  %9164 = vmatpush3.bf16.msra.mxu1 %v9589_v37 }
 0x7c5   : >> { %8588 = vmatprep.subr.bf16.mxu0 %v9590_v38  ;;  %9157 = vmatprep.subr.bf16.mxu1 %v9590_v38 }
 0x7c8   : >> { %8589 = vmatpush3.bf16.msra.mxu0 %v9590_v38  ;;  %9165 = vmatpush3.bf16.msra.mxu1 %v9590_v38 }
 0x7cb   : >> { %8591 = vmatmul.mubr.bf16.vlgmr.msra.gmra.mrb[0].mxu0 %v3292_v47  ;;  %8607 = vmatmul.mubr.bf16.vlgmr.msra.gmra.mrb[0].mxu1 %v3300_v48  ;;  %v3314_v48 = vld [vmem:[#allocation6 + $0x38] sm:$0xff] }
 0x7cc   : >> { %8594 = vmatprep.mubr.bf16.mxu0 %v3293_v49  ;;  %8610 = vmatprep.mubr.bf16.mxu1 %v3301_v50  ;;  %v3330_v49 = vld [vmem:[#allocation6 + $0xb8] sm:$0xff] }
 0x7d3   : >> { %8595 = vmatmul.mubr.bf16.gmra.mrb[4].mxu0 %v3294_v59  ;;  %8611 = vmatmul.mubr.bf16.gmra.mrb[4].mxu1 %v3302_v60 }
 0x7d4   : >> { %8598 = vmatprep.mubr.bf16.mxu0 %v3295_v61  ;;  %8614 = vmatprep.mubr.bf16.mxu1 %v3303_v62 }
 0x7db   : >> { %8599 = vmatmul.mubr.bf16.gmra.mrb[8].mxu0 %v3296_v8  ;;  %8615 = vmatmul.mubr.bf16.gmra.mrb[8].mxu1 %v3304_v9  ;;  %v3318_v9 = vld [vmem:[#allocation6 + $0x58] sm:$0xff] }
 0x7dc   : >> { %8602 = vmatprep.mubr.bf16.mxu0 %v3297_v10  ;;  %8618 = vmatprep.mubr.bf16.mxu1 %v3305_v11  ;;  %v3334_v10 = vld [vmem:[#allocation6 + $0xd8] sm:$0xff] }
 0x7e3   : >> { %8603 = vmatmul.mubr.bf16.gmra.mrb[12].mxu0 %v3298_v16  ;;  %8619 = vmatmul.mubr.bf16.gmra.mrb[12].mxu1 %v3306_v17  ;;  %v3332_v16 = vld [vmem:[#allocation6 + $0xc8] sm:$0xff] }
 0x89e   : >> { %v8592_v22 = vpop.f32.mrb[0].mxu0  ;;  %v8608_v23 = vpop.f32.mrb[0].mxu1 }
 0x89f   : >> { %v3571_v26 = vadd.f32 %v8592_v22, %v3309_v18  ;;  %v3587_v27 = vadd.f32 %v8608_v23, %v3325_v19  ;;  %v3442_v28 = vpop.f32.mrb[1].mxu0  ;;  %v3506_v29 = vpop.f32.mrb[1].mxu1 }
 0x8a0   : >> { %v3569_v32 = vadd.f32 %v3442_v28, %v3307_v20  ;;  %v3585_v33 = vadd.f32 %v3506_v29, %v3323_v21  ;;  %v8593_v34 = vpop.f32.mrb[2].mxu0  ;;  %v8609_v35 = vpop.f32.mrb[2].mxu1  ;;  %v3337_v28 = vld [vmem:[#allocation6 + $0xf0] sm:$0xff]  ;;  %v3319_v29 = vld [vmem:[#allocation6 + $0x60] sm:$0xff] }
 0x8a1   : >> { %3603 = vst [vmem:[#allocation6 + $0x10] sm:$0xff] %v3571_v26  ;;  %3619 = vst [vmem:[#allocation6 + $0x90] sm:$0xff] %v3587_v27  ;;  %v3572_v36 = vadd.f32 %v8593_v34, %v3310_v24  ;;  %v3588_v37 = vadd.f32 %v8609_v35, %v3326_v25  ;;  %v3445_v38 = vpop.f32.mrb[3].mxu0  ;;  %v3509_v39 = vpop.f32.mrb[3].mxu1  ;;  %v3321_v27 = vld [vmem:[#allocation6 + $0x70] sm:$0xff]  ;;  %v3338_v34 = vld [vmem:[#allocation6 + $0xf8] sm:$0xff] }
 0x8a2   : >> { %3601 = vst [vmem:[#allocation6] sm:$0xff] %v3569_v32  ;;  %3617 = vst [vmem:[#allocation6 + $0x80] sm:$0xff] %v3585_v33  ;;  %v3570_v40 = vadd.f32 %v3445_v38, %v3308_v30  ;;  %v3586_v41 = vadd.f32 %v3509_v39, %v3324_v31  ;;  %v3335_v30 = vld [vmem:[#allocation6 + $0xe0] sm:$0xff]  ;;  %v3322_v33 = vld [vmem:[#allocation6 + $0x78] sm:$0xff] }
 0x8a3   : >> { %3604 = vst [vmem:[#allocation6 + $0x18] sm:$0xff] %v3572_v36  ;;  %3620 = vst [vmem:[#allocation6 + $0x98] sm:$0xff] %v3588_v37  ;;  %v3320_v39 = vld [vmem:[#allocation6 + $0x68] sm:$0xff] }
 0x8a4   : >> { %3602 = vst [vmem:[#allocation6 + $0x8] sm:$0xff] %v3570_v40  ;;  %3618 = vst [vmem:[#allocation6 + $0x88] sm:$0xff] %v3586_v41  ;;  %v3336_v40 = vld [vmem:[#allocation6 + $0xe8] sm:$0xff] }
 0x8a6   : >> { %v8596_v46 = vpop.f32.mrb[4].mxu0  ;;  %v8612_v47 = vpop.f32.mrb[4].mxu1 }
 0x8a7   : >> { %v3575_v50 = vadd.f32 %v8596_v46, %v3313_v42  ;;  %v3591_v51 = vadd.f32 %v8612_v47, %v3329_v43  ;;  %v3458_v52 = vpop.f32.mrb[5].mxu0  ;;  %v3522_v53 = vpop.f32.mrb[5].mxu1 }
 0x8a8   : >> { %v3573_v56 = vadd.f32 %v3458_v52, %v3311_v44  ;;  %v3589_v57 = vadd.f32 %v3522_v53, %v3327_v45  ;;  %v8597_v58 = vpop.f32.mrb[6].mxu0  ;;  %v8613_v59 = vpop.f32.mrb[6].mxu1  ;;  %v3635_v53 = vld [vmem:[#allocation6 + $0x10] sm:$0xff] (%p3253_p10) }
 0x8a9   : >> { %3607 = vst [vmem:[#allocation6 + $0x30] sm:$0xff] %v3575_v50  ;;  %3623 = vst [vmem:[#allocation6 + $0xb0] sm:$0xff] %v3591_v51  ;;  %v3576_v60 = vadd.f32 %v8597_v58, %v3314_v48  ;;  %v3592_v61 = vadd.f32 %v8613_v59, %v3330_v49  ;;  %v3461_v62 = vpop.f32.mrb[7].mxu0  ;;  %v3525_v63 = vpop.f32.mrb[7].mxu1  ;;  %v3633_v51 = vld [vmem:[#allocation6] sm:$0xff] (%p3253_p10)  ;;  %vm3667_vm2 = vcmp.ge.f32.partialorder (%p3253_p10), %v3635_v53, 0.0 }
 0x8aa   : >> { %3605 = vst [vmem:[#allocation6 + $0x20] sm:$0xff] %v3573_v56  ;;  %3621 = vst [vmem:[#allocation6 + $0xa0] sm:$0xff] %v3589_v57  ;;  %v3574_v0 = vadd.f32 %v3461_v62, %v3312_v54  ;;  %v3590_v1 = vadd.f32 %v3525_v63, %v3328_v55  ;;  %vm3665_vm0 = vcmp.ge.f32.partialorder (%p3253_p10), %v3633_v51, 0.0  ;;  %v3697_v54 = vmul.f32 (%p3253_p10), 0.2, %v3633_v51  ;;  %v3636_v57 = vld [vmem:[#allocation6 + $0x18] sm:$0xff] (%p3253_p10) }
 0x8ab   : >> { %3608 = vst [vmem:[#allocation6 + $0x38] sm:$0xff] %v3576_v60  ;;  %3624 = vst [vmem:[#allocation6 + $0xb8] sm:$0xff] %v3592_v61  ;;  %v3634_v52 = vld [vmem:[#allocation6 + $0x8] sm:$0xff] (%p3253_p10)  ;;  %v3699_v56 = vmul.f32 (%p3253_p10), 0.2, %v3635_v53  ;;  %vm3668_vm3 = vcmp.ge.f32.partialorder (%p3253_p10), %v3636_v57, 0.0 }
 0x8ac   : >> { %3606 = vst [vmem:[#allocation6 + $0x28] sm:$0xff] %v3574_v0  ;;  %3622 = vst [vmem:[#allocation6 + $0xa8] sm:$0xff] %v3590_v1  ;;  %vm3666_vm1 = vcmp.ge.f32.partialorder (%p3253_p10), %v3634_v52, 0.0  ;;  %v3698_v55 = vmul.f32 (%p3253_p10), 0.2, %v3634_v52  ;;  %v3729_v60 = vsel (%p3253_p10), %vm3665_vm0, %v3633_v51, %v3697_v54 }
 0x8ad   : > { %3794 = vst [vmem:[#allocation6] sm:$0xff] (%p3253_p10), %v9863_v2  ;;  %3795 = vst [vmem:[#allocation6 + $0x8] sm:$0xff] (%p3253_p10), %v9863_v2  ;;  %v3700_v62 = vmul.f32 (%p3253_p10), 0.2, %v3636_v57 }
 0x8ae   : >> { %v8600_v7 = vpop.f32.mrb[8].mxu0  ;;  %v8616_v8 = vpop.f32.mrb[8].mxu1  ;;  %3796 = vst [vmem:[#allocation6 + $0x10] sm:$0xff] (%p3253_p10), %v9863_v2  ;;  %v3730_v61 = vsel (%p3253_p10), %vm3666_vm1, %v3634_v52, %v3698_v55  ;;  %3797 = vst [vmem:[#allocation6 + $0x18] sm:$0xff] (%p3253_p10), %v9863_v2 }
 0x8af   : >> { %v3579_v11 = vadd.f32 %v8600_v7, %v3317_v3  ;;  %v3595_v12 = vadd.f32 %v8616_v8, %v3333_v4  ;;  %v3474_v13 = vpop.f32.mrb[9].mxu0  ;;  %v3538_v14 = vpop.f32.mrb[9].mxu1  ;;  %3762 = vst [vmem:[#allocation3 + $0x32] sm:$0xff] (%p3253_p10), %v3729_v60  ;;  %3763 = vst [vmem:[#allocation3 + $0x3a] sm:$0xff] (%p3253_p10), %v3730_v61  ;;  %v3731_v3 = vsel (%p3253_p10), %vm3667_vm2, %v3635_v53, %v3699_v56 }
 0x8b0   : >> { %v3577_v17 = vadd.f32 %v3474_v13, %v3315_v5  ;;  %v3593_v18 = vadd.f32 %v3538_v14, %v3331_v6  ;;  %v8601_v19 = vpop.f32.mrb[10].mxu0  ;;  %v8617_v20 = vpop.f32.mrb[10].mxu1  ;;  %v3639_v63 = vld [vmem:[#allocation6 + $0x30] sm:$0xff] (%p3253_p10)  ;;  %3764 = vst [vmem:[#allocation3 + $0x4a] sm:$0xff] (%p3253_p10), %v3731_v3  ;;  %v3732_v7 = vsel (%p3253_p10), %vm3668_vm3, %v3636_v57, %v3700_v62 }
 0x8b1   : >> { %3611 = vst [vmem:[#allocation6 + $0x50] sm:$0xff] %v3579_v11  ;;  %3627 = vst [vmem:[#allocation6 + $0xd0] sm:$0xff] %v3595_v12  ;;  %v3580_v21 = vadd.f32 %v8601_v19, %v3318_v9  ;;  %v3596_v22 = vadd.f32 %v8617_v20, %v3334_v10  ;;  %v3477_v23 = vpop.f32.mrb[11].mxu0  ;;  %v3541_v24 = vpop.f32.mrb[11].mxu1  ;;  %v3637_v58 = vld [vmem:[#allocation6 + $0x20] sm:$0xff] (%p3253_p10)  ;;  %vm3671_vm6 = vcmp.ge.f32.partialorder (%p3253_p10), %v3639_v63, 0.0 }
 0x8b2   : >> { %3609 = vst [vmem:[#allocation6 + $0x40] sm:$0xff] %v3577_v17  ;;  %3625 = vst [vmem:[#allocation6 + $0xc0] sm:$0xff] %v3593_v18  ;;  %v3578_v25 = vadd.f32 %v3477_v23, %v3316_v15  ;;  %v3594_v26 = vadd.f32 %v3541_v24, %v3332_v16  ;;  %v3640_v0 = vld [vmem:[#allocation6 + $0x38] sm:$0xff] (%p3253_p10)  ;;  %vm3669_vm4 = vcmp.ge.f32.partialorder (%p3253_p10), %v3637_v58, 0.0  ;;  %v3701_v4 = vmul.f32 (%p3253_p10), 0.2, %v3637_v58 }
 0x8b3   : >> { %3612 = vst [vmem:[#allocation6 + $0x58] sm:$0xff] %v3580_v21  ;;  %3628 = vst [vmem:[#allocation6 + $0xd8] sm:$0xff] %v3596_v22  ;;  %v3638_v59 = vld [vmem:[#allocation6 + $0x28] sm:$0xff] (%p3253_p10)  ;;  %v3703_v9 = vmul.f32 (%p3253_p10), 0.2, %v3639_v63  ;;  %vm3672_vm7 = vcmp.ge.f32.partialorder (%p3253_p10), %v3640_v0, 0.0 }
 0x8b4   : >> { %3610 = vst [vmem:[#allocation6 + $0x48] sm:$0xff] %v3578_v25  ;;  %3626 = vst [vmem:[#allocation6 + $0xc8] sm:$0xff] %v3594_v26  ;;  %vm3670_vm5 = vcmp.ge.f32.partialorder (%p3253_p10), %v3638_v59, 0.0  ;;  %v3702_v8 = vmul.f32 (%p3253_p10), 0.2, %v3638_v59  ;;  %v3733_v11 = vsel (%p3253_p10), %vm3669_vm4, %v3637_v58, %v3701_v4  ;;  %v10593_v20 = vld [vmem:[#allocation6 + $0x80] sm:$0xff] (%p3253_p10) }
 0x8b5   : > { %3798 = vst [vmem:[#allocation6 + $0x20] sm:$0xff] (%p3253_p10), %v9863_v2  ;;  %3799 = vst [vmem:[#allocation6 + $0x28] sm:$0xff] (%p3253_p10), %v9863_v2  ;;  %v3704_v12 = vmul.f32 (%p3253_p10), 0.2, %v3640_v0  ;;  %v3735_v16 = vsel (%p3253_p10), %vm3671_vm6, %v3639_v63, %v3703_v9  ;;  %v10599_v24 = vld [vmem:[#allocation6 + $0x88] sm:$0xff] (%p3253_p10)  ;;  %vm3681_vm0 = vcmp.ge.f32.partialorder (%p3253_p10), %v10593_v20, 0.0 }
 0x8b6   : >> { %v8604_v31 = vpop.f32.mrb[12].mxu0  ;;  %v8620_v32 = vpop.f32.mrb[12].mxu1  ;;  %3255 = sbr.rel (!%p3253_p10) target bundleno = 1958 (0x7a6), region = 310  ;;  %3800 = vst [vmem:[#allocation6 + $0x30] sm:$0xff] (%p3253_p10), %v9863_v2  ;;  %3801 = vst [vmem:[#allocation6 + $0x38] sm:$0xff] (%p3253_p10), %v9863_v2  ;;  %v3734_v15 = vsel (%p3253_p10), %vm3670_vm5, %v3638_v59, %v3702_v8  ;;  %vm3682_vm1 = vcmp.ge.f32.partialorder (%p3253_p10), %v10599_v24, 0.0 }
 0x8b7   : >> { %v3583_v35 = vadd.f32 %v8604_v31, %v3321_v27  ;;  %v3599_v36 = vadd.f32 %v8620_v32, %v3337_v28  ;;  %v3490_v37 = vpop.f32.mrb[13].mxu0  ;;  %v3554_v38 = vpop.f32.mrb[13].mxu1  ;;  %3765 = vst [vmem:[#allocation3 + $0x52] sm:$0xff] (%p3253_p10), %v3732_v7  ;;  %3766 = vst [vmem:[#allocation3 + $0x62] sm:$0xff] (%p3253_p10), %v3733_v11  ;;  %v3736_v21 = vsel (%p3253_p10), %vm3672_vm7, %v3640_v0, %v3704_v12  ;;  %v3651_v27 = vld [vmem:[#allocation6 + $0x90] sm:$0xff] (%p3253_p10)  ;;  %v10603_v28 = vld [vmem:[#allocation6 + $0x98] sm:$0xff] (%p3253_p10) }
 0x8b8   : >> { %v3581_v41 = vadd.f32 %v3490_v37, %v3319_v29  ;;  %v3597_v42 = vadd.f32 %v3554_v38, %v3335_v30  ;;  %v8605_v43 = vpop.f32.mrb[14].mxu0  ;;  %v8621_v44 = vpop.f32.mrb[14].mxu1  ;;  %v3643_v6 = vld [vmem:[#allocation6 + $0x50] sm:$0xff] (%p3253_p10)  ;;  %3767 = vst [vmem:[#allocation3 + $0x6a] sm:$0xff] (%p3253_p10), %v3734_v15  ;;  %3768 = vst [vmem:[#allocation3 + $0x7a] sm:$0xff] (%p3253_p10), %v3735_v16  ;;  %v10609_v32 = vld [vmem:[#allocation6 + $0xa0] sm:$0xff] (%p3253_p10) }
 0x8b9   : >> { %3615 = vst [vmem:[#allocation6 + $0x70] sm:$0xff] %v3583_v35  ;;  %3631 = vst [vmem:[#allocation6 + $0xf0] sm:$0xff] %v3599_v36  ;;  %v3584_v45 = vadd.f32 %v8605_v43, %v3322_v33  ;;  %v3600_v46 = vadd.f32 %v8621_v44, %v3338_v34  ;;  %v3493_v47 = vpop.f32.mrb[15].mxu0  ;;  %v3557_v48 = vpop.f32.mrb[15].mxu1  ;;  %v3641_v1 = vld [vmem:[#allocation6 + $0x40] sm:$0xff] (%p3253_p10)  ;;  %vm3675_vm10 = vcmp.ge.f32.partialorder (%p3253_p10), %v3643_v6, 0.0 }
 0x8ba   : >> { %3613 = vst [vmem:[#allocation6 + $0x60] sm:$0xff] %v3581_v41  ;;  %3629 = vst [vmem:[#allocation6 + $0xe0] sm:$0xff] %v3597_v42  ;;  %v3582_v49 = vadd.f32 %v3493_v47, %v3320_v39  ;;  %v3598_v50 = vadd.f32 %v3557_v48, %v3336_v40  ;;  %v3644_v10 = vld [vmem:[#allocation6 + $0x58] sm:$0xff] (%p3253_p10)  ;;  %vm3673_vm8 = vcmp.ge.f32.partialorder (%p3253_p10), %v3641_v1, 0.0  ;;  %v3705_v17 = vmul.f32 (%p3253_p10), 0.2, %v3641_v1 }
 0x8bb   : >> { %3616 = vst [vmem:[#allocation6 + $0x78] sm:$0xff] %v3584_v45  ;;  %3632 = vst [vmem:[#allocation6 + $0xf8] sm:$0xff] %v3600_v46  ;;  %v3642_v5 = vld [vmem:[#allocation6 + $0x48] sm:$0xff] (%p3253_p10)  ;;  %v3707_v23 = vmul.f32 (%p3253_p10), 0.2, %v3643_v6  ;;  %vm3676_vm11 = vcmp.ge.f32.partialorder (%p3253_p10), %v3644_v10, 0.0 }
 0x8bc   : >> { %3614 = vst [vmem:[#allocation6 + $0x68] sm:$0xff] %v3582_v49  ;;  %3630 = vst [vmem:[#allocation6 + $0xe8] sm:$0xff] %v3598_v50  ;;  %vm3674_vm9 = vcmp.ge.f32.partialorder (%p3253_p10), %v3642_v5, 0.0  ;;  %v3706_v22 = vmul.f32 (%p3253_p10), 0.2, %v3642_v5  ;;  %v3737_v25 = vsel (%p3253_p10), %vm3673_vm8, %v3641_v1, %v3705_v17  ;;  %v10611_v33 = vld [vmem:[#allocation6 + $0xa8] sm:$0xff] (%p3253_p10) }
 0x8bd   : > { %3802 = vst [vmem:[#allocation6 + $0x40] sm:$0xff] %v9863_v2  ;;  %3803 = vst [vmem:[#allocation6 + $0x48] sm:$0xff] %v9863_v2  ;;  %v3708_v26 = vmul.f32 0.2, %v3644_v10  ;;  %v3739_v30 = vsel %vm3675_vm10, %v3643_v6, %v3707_v23  ;;  %v10613_v34 = vld [vmem:[#allocation6 + $0xb0] sm:$0xff]  ;;  %v10619_v38 = vld [vmem:[#allocation6 + $0xb8] sm:$0xff] }
 0x8be   : > { %3804 = vst [vmem:[#allocation6 + $0x50] sm:$0xff] %v9863_v2  ;;  %3805 = vst [vmem:[#allocation6 + $0x58] sm:$0xff] %v9863_v2  ;;  %v3738_v29 = vsel %vm3674_vm9, %v3642_v5, %v3706_v22  ;;  %v3657_v41 = vld [vmem:[#allocation6 + $0xc0] sm:$0xff]  ;;  %v10624_v42 = vld [vmem:[#allocation6 + $0xc8] sm:$0xff]  ;;  %v3713_v45 = vmul.f32 0.2, %v10593_v20 }
 0x8bf   : > { %3810 = vst [vmem:[#allocation6 + $0x80] sm:$0xff] %v9863_v2  ;;  %3769 = vst [vmem:[#allocation3 + $0x82] sm:$0xff] %v3736_v21  ;;  %v3740_v35 = vsel %vm3676_vm11, %v3644_v10, %v3708_v26  ;;  %v3659_v46 = vld [vmem:[#allocation6 + $0xd0] sm:$0xff]  ;;  %v3660_v47 = vld [vmem:[#allocation6 + $0xd8] sm:$0xff]  ;;  %v3714_v50 = vmul.f32 0.2, %v10599_v24 }
 0x8c0   : > { %v3647_v18 = vld [vmem:[#allocation6 + $0x70] sm:$0xff]  ;;  %3811 = vst [vmem:[#allocation6 + $0x88] sm:$0xff] %v9863_v2  ;;  %3770 = vst [vmem:[#allocation3 + $0x92] sm:$0xff] %v3737_v25  ;;  %vm3683_vm2 = vcmp.ge.f32.partialorder %v3651_v27, 0.0  ;;  %v3715_v51 = vmul.f32 0.2, %v3651_v27  ;;  %v3745_v53 = vsel %vm3681_vm0, %v10593_v20, %v3713_v45 }
 0x8c1   : > { %v3645_v13 = vld [vmem:[#allocation6 + $0x60] sm:$0xff]  ;;  %3808 = vst [vmem:[#allocation6 + $0x70] sm:$0xff] %v9863_v2  ;;  %3812 = vst [vmem:[#allocation6 + $0x90] sm:$0xff] %v9863_v2  ;;  %vm3679_vm14 = vcmp.ge.f32.partialorder %v3647_v18, 0.0  ;;  %v3711_v37 = vmul.f32 0.2, %v3647_v18  ;;  %v3746_v57 = vsel %vm3682_vm1, %v10599_v24, %v3714_v50 }
 0x8c2   : > { %3806 = vst [vmem:[#allocation6 + $0x60] sm:$0xff] %v9863_v2  ;;  %v3648_v19 = vld [vmem:[#allocation6 + $0x78] sm:$0xff]  ;;  %vm3677_vm12 = vcmp.ge.f32.partialorder %v3645_v13, 0.0  ;;  %v3709_v31 = vmul.f32 0.2, %v3645_v13  ;;  %3813 = vst [vmem:[#allocation6 + $0x98] sm:$0xff] %v9863_v2  ;;  %v3747_v58 = vsel %vm3683_vm2, %v3651_v27, %v3715_v51 }
 0x8c3   : > { %v3646_v14 = vld [vmem:[#allocation6 + $0x68] sm:$0xff]  ;;  %3809 = vst [vmem:[#allocation6 + $0x78] sm:$0xff] %v9863_v2  ;;  %3771 = vst [vmem:[#allocation3 + $0x9a] sm:$0xff] %v3738_v29  ;;  %vm3680_vm15 = vcmp.ge.f32.partialorder %v3648_v19, 0.0  ;;  %v3712_v40 = vmul.f32 0.2, %v3648_v19  ;;  %v3743_v44 = vsel %vm3679_vm14, %v3647_v18, %v3711_v37 }
 0x8c4   : > { %3807 = vst [vmem:[#allocation6 + $0x68] sm:$0xff] %v9863_v2  ;;  %vm3678_vm13 = vcmp.ge.f32.partialorder %v3646_v14, 0.0  ;;  %3772 = vst [vmem:[#allocation3 + $0xaa] sm:$0xff] %v3739_v30  ;;  %v3710_v36 = vmul.f32 0.2, %v3646_v14  ;;  %v3741_v39 = vsel %vm3677_vm12, %v3645_v13, %v3709_v31  ;;  %v10632_v48 = vld [vmem:[#allocation6 + $0xe0] sm:$0xff] }
 0x8c5   : > { %3814 = vst [vmem:[#allocation6 + $0xa0] sm:$0xff] %v9863_v2  ;;  %3815 = vst [vmem:[#allocation6 + $0xa8] sm:$0xff] %v9863_v2  ;;  %v3744_v49 = vsel %vm3680_vm15, %v3648_v19, %v3712_v40  ;;  %v3662_v52 = vld [vmem:[#allocation6 + $0xe8] sm:$0xff]  ;;  %vm3684_vm3 = vcmp.ge.f32.partialorder %v10603_v28, 0.0  ;;  %v3716_v54 = vmul.f32 0.2, %v10603_v28 }
 0x8c6   : > { %3816 = vst [vmem:[#allocation6 + $0xb0] sm:$0xff] %v9863_v2  ;;  %3773 = vst [vmem:[#allocation3 + $0xb2] sm:$0xff] %v3740_v35  ;;  %v3742_v43 = vsel %vm3678_vm13, %v3646_v14, %v3710_v36  ;;  %vm3685_vm4 = vcmp.ge.f32.partialorder %v10609_v32, 0.0  ;;  %v3663_v55 = vld [vmem:[#allocation6 + $0xf0] sm:$0xff]  ;;  %v3664_v56 = vld [vmem:[#allocation6 + $0xf8] sm:$0xff]  ;;  %vm3686_vm5 = vcmp.ge.f32.partialorder %v10611_v33, 0.0 }
 0x8c7   : > { %3817 = vst [vmem:[#allocation6 + $0xb8] sm:$0xff] %v9863_v2  ;;  %3774 = vst [vmem:[#allocation3 + $0xc2] sm:$0xff] %v3741_v39  ;;  %v3717_v59 = vmul.f32 0.2, %v10609_v32  ;;  %v3748_v60 = vsel %vm3684_vm3, %v10603_v28, %v3716_v54  ;;  %v3718_v61 = vmul.f32 0.2, %v10611_v33 }
 0x8c8   : > { %3818 = vst [vmem:[#allocation6 + $0xc0] sm:$0xff] %v9863_v2  ;;  %3819 = vst [vmem:[#allocation6 + $0xc8] sm:$0xff] %v9863_v2  ;;  %vm3687_vm6 = vcmp.ge.f32.partialorder %v10613_v34, 0.0  ;;  %v3719_v62 = vmul.f32 0.2, %v10613_v34  ;;  %vm3688_vm7 = vcmp.ge.f32.partialorder %v10619_v38, 0.0 }
 0x8c9   : > { %3775 = vst [vmem:[#allocation3 + $0xca] sm:$0xff] %v3742_v43  ;;  %3776 = vst [vmem:[#allocation3 + $0xda] sm:$0xff] %v3743_v44  ;;  %v3749_v63 = vsel %vm3685_vm4, %v10609_v32, %v3717_v59  ;;  %v3720_v0 = vmul.f32 0.2, %v10619_v38  ;;  %vm3689_vm8 = vcmp.ge.f32.partialorder %v3657_v41, 0.0  ;;  %v3750_v1 = vsel %vm3686_vm5, %v10611_v33, %v3718_v61 }
 0x8ca   : > { %3820 = vst [vmem:[#allocation6 + $0xd0] sm:$0xff] %v9863_v2  ;;  %3821 = vst [vmem:[#allocation6 + $0xd8] sm:$0xff] %v9863_v2  ;;  %v3751_v3 = vsel %vm3687_vm6, %v10613_v34, %v3719_v62  ;;  %v3721_v4 = vmul.f32 0.2, %v3657_v41  ;;  %vm3690_vm9 = vcmp.ge.f32.partialorder %v10624_v42, 0.0  ;;  %vm3691_vm10 = vcmp.ge.f32.partialorder %v3659_v46, 0.0 }
 0x8cb   : > { %3822 = vst [vmem:[#allocation6 + $0xe0] sm:$0xff] %v9863_v2  ;;  %3777 = vst [vmem:[#allocation3 + $0xe2] sm:$0xff] %v3744_v49  ;;  %v3752_v5 = vsel %vm3688_vm7, %v10619_v38, %v3720_v0  ;;  %v3722_v6 = vmul.f32 0.2, %v10624_v42  ;;  %v3723_v7 = vmul.f32 0.2, %v3659_v46 }
 0x8cc   : > { %3823 = vst [vmem:[#allocation6 + $0xe8] sm:$0xff] %v9863_v2  ;;  %3778 = vst [vmem:[#allocation3 + $0xf2] sm:$0xff] %v3745_v53  ;;  %v3753_v8 = vsel %vm3689_vm8, %v3657_v41, %v3721_v4  ;;  %vm3692_vm11 = vcmp.ge.f32.partialorder %v3660_v47, 0.0  ;;  %v3724_v9 = vmul.f32 0.2, %v3660_v47  ;;  %vm3693_vm12 = vcmp.ge.f32.partialorder %v10632_v48, 0.0 }
 0x8cd   : > { %3824 = vst [vmem:[#allocation6 + $0xf0] sm:$0xff] %v9863_v2  ;;  %3825 = vst [vmem:[#allocation6 + $0xf8] sm:$0xff] %v9863_v2  ;;  %v3754_v10 = vsel %vm3690_vm9, %v10624_v42, %v3722_v6  ;;  %v3755_v11 = vsel %vm3691_vm10, %v3659_v46, %v3723_v7  ;;  %v3725_v12 = vmul.f32 0.2, %v10632_v48  ;;  %vm3694_vm13 = vcmp.ge.f32.partialorder %v3662_v52, 0.0 }
 0x8ce   : > { %3779 = vst [vmem:[#allocation3 + $0xfa] sm:$0xff] %v3746_v57  ;;  %3780 = vst [vmem:[#allocation3 + $0x10a] sm:$0xff] %v3747_v58  ;;  %v3756_v13 = vsel %vm3692_vm11, %v3660_v47, %v3724_v9  ;;  %v3726_v14 = vmul.f32 0.2, %v3662_v52  ;;  %vm3695_vm14 = vcmp.ge.f32.partialorder %v3663_v55, 0.0  ;;  %vm3696_vm15 = vcmp.ge.f32.partialorder %v3664_v56, 0.0 }
 0x8cf   : > { %3781 = vst [vmem:[#allocation3 + $0x112] sm:$0xff] %v3748_v60  ;;  %3782 = vst [vmem:[#allocation3 + $0x122] sm:$0xff] %v3749_v63  ;;  %v3727_v15 = vmul.f32 0.2, %v3663_v55  ;;  %v3757_v16 = vsel %vm3693_vm12, %v10632_v48, %v3725_v12  ;;  %v3728_v17 = vmul.f32 0.2, %v3664_v56 }
 0x8d0   : > { %3783 = vst [vmem:[#allocation3 + $0x12a] sm:$0xff] %v3750_v1  ;;  %3784 = vst [vmem:[#allocation3 + $0x13a] sm:$0xff] %v3751_v3  ;;  %v3758_v18 = vsel %vm3694_vm13, %v3662_v52, %v3726_v14 }
 0x8d1   : > { %3785 = vst [vmem:[#allocation3 + $0x142] sm:$0xff] %v3752_v5  ;;  %3786 = vst [vmem:[#allocation3 + $0x152] sm:$0xff] %v3753_v8  ;;  %v3759_v19 = vsel %vm3695_vm14, %v3663_v55, %v3727_v15  ;;  %v3760_v20 = vsel %vm3696_vm15, %v3664_v56, %v3728_v17 }
 0x8d2   : > { %3787 = vst [vmem:[#allocation3 + $0x15a] sm:$0xff] %v3754_v10  ;;  %3788 = vst [vmem:[#allocation3 + $0x16a] sm:$0xff] %v3755_v11 }
 0x8d3   : > { %3789 = vst [vmem:[#allocation3 + $0x172] sm:$0xff] %v3756_v13  ;;  %3790 = vst [vmem:[#allocation3 + $0x182] sm:$0xff] %v3757_v16 }
 0x8d4   : > { %3791 = vst [vmem:[#allocation3 + $0x18a] sm:$0xff] %v3758_v18  ;;  %3792 = vst [vmem:[#allocation3 + $0x19a] sm:$0xff] %v3759_v19 }
 0x8d5   : > { %3793 = vst [vmem:[#allocation3 + $0x1a2] sm:$0xff] %v3760_v20 }
 0x8d6 LB: >> { %s3832_s13 = smul.u32 24, %s9821_s12  ;;  %v3884_v14 = vld [vmem:[#allocation6 + $0x10] sm:$0xff]  ;;  %v3882_v16 = vld [vmem:[#allocation6] sm:$0xff]  ;;  %v3885_v20 = vld [vmem:[#allocation6 + $0x18] sm:$0xff]  ;;  %s9821_s12 = sphi %s10672_s12, %s3831_s12  }
 0x8d7   : >> { %s7795_s14 = smul.u32 320, %s9821_s12  ;;  %v3900_v15 = vld [vmem:[#allocation6 + $0x90] sm:$0xff]  ;;  %v3898_v17 = vld [vmem:[#allocation6 + $0x80] sm:$0xff]  ;;  %s3831_s12 = sadd.s32 1, %s9821_s12  }
 0x8d8   : >> { %s10684_s19 = scalar_lea.vmem [#allocation3], %s3832_s13  ;;  %p3828_p11 = scmp.ge.s32.totalorder %s3831_s12, 5  }
 0x8d9   : >> { %s10682_s18 = scalar_lea.vmem %s11235_s3, %s7795_s14  ;;  %s10729_s20 = smov (%p3828_p11), 0  }
 0x8da   : >> { %v9591_v23 = vld [vmem:[%s10682_s18] sm:$0xff]   ;;  %v9592_v24 = vld [vmem:[%s10682_s18 + $0x8] sm:$0xff]   ;;  %v9593_v26 = vld [vmem:[%s10682_s18 + $0x10] sm:$0xff]  }
 0x8db   : >> { %8622 = vmatprep.subr.bf16.mxu0 %v9591_v23  ;;  %9166 = vmatprep.subr.bf16.mxu1 %v9591_v23  ;;  %v9594_v28 = vld [vmem:[%s10682_s18 + $0x18] sm:$0xff]   ;;  %v9595_v31 = vld [vmem:[%s10682_s18 + $0x20] sm:$0xff]   ;;  %v9596_v32 = vld [vmem:[%s10682_s18 + $0x28] sm:$0xff]  }
 0x8dc   : >> { %v3834_v21 = vld [vmem:[%s10684_s19] sm:$0xff]  ;;  %v3835_v22 = vld [vmem:[%s10684_s19 + $0x8] sm:$0xff]  ;;  %8623 = vmatpush3.bf16.msra.mxu0 %v9591_v23  ;;  %9174 = vmatpush3.bf16.msra.mxu1 %v9591_v23  ;;  %v9597_v33 = vld [vmem:[%s10682_s18 + $0x30] sm:$0xff]  }
 0x8dd   : >> { %v3866_v25 = vpack.c.bf16 %v3835_v22, %v3834_v21  ;;  %8624 = vmatprep.subr.bf16.mxu0 %v9592_v24  ;;  %9167 = vmatprep.subr.bf16.mxu1 %v9592_v24  ;;  %v3850_v27 = vld [vmem:[%s10684_s19 + $0xc0] sm:$0xff]  ;;  %v3851_v29 = vld [vmem:[%s10684_s19 + $0xc8] sm:$0xff]  ;;  %v9598_v34 = vld [vmem:[%s10682_s18 + $0x38] sm:$0xff]  }
 0x8de   : >> { %v3874_v30 = vpack.c.bf16 %v3851_v29, %v3850_v27  ;;  %v3836_v35 = vld [vmem:[%s10684_s19 + $0x18] sm:$0xff]  ;;  %v3837_v36 = vld [vmem:[%s10684_s19 + $0x20] sm:$0xff]  ;;  %v3838_v39 = vld [vmem:[%s10684_s19 + $0x30] sm:$0xff] }
 0x8df   : >> { %8638 = vmatprep.mubr.bf16.mxu0 %v3866_v25  ;;  %v3852_v37 = vld [vmem:[%s10684_s19 + $0xd8] sm:$0xff]  ;;  %v3853_v38 = vld [vmem:[%s10684_s19 + $0xe0] sm:$0xff]  ;;  %v3854_v41 = vld [vmem:[%s10684_s19 + $0xf0] sm:$0xff]  ;;  %v3867_v43 = vpack.c.bf16 %v3837_v36, %v3836_v35 }
 0x8e0   : >> { %8625 = vmatpush3.bf16.msra.mxu0 %v9592_v24  ;;  %9175 = vmatpush3.bf16.msra.mxu1 %v9592_v24  ;;  %v3839_v40 = vld [vmem:[%s10684_s19 + $0x38] sm:$0xff]  ;;  %v3875_v44 = vpack.c.bf16 %v3853_v38, %v3852_v37  ;;  %v3840_v47 = vld [vmem:[%s10684_s19 + $0x48] sm:$0xff]  ;;  %v3841_v48 = vld [vmem:[%s10684_s19 + $0x50] sm:$0xff] }
 0x8e1   : >> { %8626 = vmatprep.subr.bf16.mxu0 %v9593_v26  ;;  %9168 = vmatprep.subr.bf16.mxu1 %v9593_v26  ;;  %v3855_v42 = vld [vmem:[%s10684_s19 + $0xf8] sm:$0xff]  ;;  %v3868_v45 = vpack.c.bf16 %v3839_v40, %v3838_v39  ;;  %v3856_v49 = vld [vmem:[%s10684_s19 + $0x108] sm:$0xff]  ;;  %v3857_v50 = vld [vmem:[%s10684_s19 + $0x110] sm:$0xff]  ;;  %v3869_v55 = vpack.c.bf16 %v3841_v48, %v3840_v47 }
 0x8e2   : >> { %8654 = vmatprep.mubr.bf16.mxu1 %v3874_v30  ;;  %v3876_v46 = vpack.c.bf16 %v3855_v42, %v3854_v41  ;;  %v3842_v51 = vld [vmem:[%s10684_s19 + $0x60] sm:$0xff]  ;;  %v3843_v52 = vld [vmem:[%s10684_s19 + $0x68] sm:$0xff]  ;;  %v3877_v56 = vpack.c.bf16 %v3857_v50, %v3856_v49  ;;  %v3844_v59 = vld [vmem:[%s10684_s19 + $0x78] sm:$0xff] }
 0x8e3   : >> { %v3858_v53 = vld [vmem:[%s10684_s19 + $0x120] sm:$0xff]  ;;  %v3859_v54 = vld [vmem:[%s10684_s19 + $0x128] sm:$0xff]  ;;  %v3870_v57 = vpack.c.bf16 %v3843_v52, %v3842_v51  ;;  %v3860_v61 = vld [vmem:[%s10684_s19 + $0x138] sm:$0xff] }
 0x8e4   : >> { %8627 = vmatpush3.bf16.msra.mxu0 %v9593_v26  ;;  %9176 = vmatpush3.bf16.msra.mxu1 %v9593_v26  ;;  %v3878_v58 = vpack.c.bf16 %v3859_v54, %v3858_v53  ;;  %v3845_v60 = vld [vmem:[%s10684_s19 + $0x80] sm:$0xff]  ;;  %v3846_v63 = vld [vmem:[%s10684_s19 + $0x90] sm:$0xff]  ;;  %v3847_v0 = vld [vmem:[%s10684_s19 + $0x98] sm:$0xff] }
 0x8e5   : >> { %8628 = vmatprep.subr.bf16.mxu0 %v9594_v28  ;;  %9169 = vmatprep.subr.bf16.mxu1 %v9594_v28  ;;  %v3861_v62 = vld [vmem:[%s10684_s19 + $0x140] sm:$0xff]  ;;  %v3862_v1 = vld [vmem:[%s10684_s19 + $0x150] sm:$0xff]  ;;  %v3863_v3 = vld [vmem:[%s10684_s19 + $0x158] sm:$0xff]  ;;  %v3871_v4 = vpack.c.bf16 %v3845_v60, %v3844_v59  ;;  %v3872_v6 = vpack.c.bf16 %v3847_v0, %v3846_v63 }
 0x8e6   : >> { %v3879_v5 = vpack.c.bf16 %v3861_v62, %v3860_v61  ;;  %v3880_v7 = vpack.c.bf16 %v3863_v3, %v3862_v1  ;;  %v3848_v8 = vld [vmem:[%s10684_s19 + $0xa8] sm:$0xff]  ;;  %v3849_v9 = vld [vmem:[%s10684_s19 + $0xb0] sm:$0xff]  ;;  %v3883_v26 = vld [vmem:[#allocation6 + $0x8] sm:$0xff] }
 0x8e7   : >> { %v3864_v10 = vld [vmem:[%s10684_s19 + $0x168] sm:$0xff]  ;;  %v3865_v11 = vld [vmem:[%s10684_s19 + $0x170] sm:$0xff]  ;;  %v3873_v12 = vpack.c.bf16 %v3849_v9, %v3848_v8  ;;  %v3899_v27 = vld [vmem:[#allocation6 + $0x88] sm:$0xff] }
 0x8e8   : >> { %8629 = vmatpush3.bf16.msra.mxu0 %v9594_v28  ;;  %9177 = vmatpush3.bf16.msra.mxu1 %v9594_v28  ;;  %v3881_v13 = vpack.c.bf16 %v3865_v11, %v3864_v10  ;;  %v3901_v21 = vld [vmem:[#allocation6 + $0x98] sm:$0xff]  ;;  %v3888_v38 = vld [vmem:[#allocation6 + $0x30] sm:$0xff]  ;;  %v3886_v40 = vld [vmem:[#allocation6 + $0x20] sm:$0xff] }
 0x8e9   : >> { %8630 = vmatprep.subr.bf16.mxu0 %v9595_v31  ;;  %9170 = vmatprep.subr.bf16.mxu1 %v9595_v31  ;;  %v3904_v39 = vld [vmem:[#allocation6 + $0xb0] sm:$0xff]  ;;  %v3902_v41 = vld [vmem:[#allocation6 + $0xa0] sm:$0xff]  ;;  %v3887_v50 = vld [vmem:[#allocation6 + $0x28] sm:$0xff] }
 0x8ea   : >> { %v3903_v51 = vld [vmem:[#allocation6 + $0xa8] sm:$0xff]  ;;  %v3892_v62 = vld [vmem:[#allocation6 + $0x50] sm:$0xff]  ;;  %v3890_v0 = vld [vmem:[#allocation6 + $0x40] sm:$0xff] }
 0x8eb   : >> { %v3908_v63 = vld [vmem:[#allocation6 + $0xd0] sm:$0xff]  ;;  %v3906_v1 = vld [vmem:[#allocation6 + $0xc0] sm:$0xff]  ;;  %v3891_v11 = vld [vmem:[#allocation6 + $0x48] sm:$0xff] }
 0x8ec   : >> { %8631 = vmatpush3.bf16.msra.mxu0 %v9595_v31  ;;  %9178 = vmatpush3.bf16.msra.mxu1 %v9595_v31 }
 0x8ed   : >> { %8632 = vmatprep.subr.bf16.mxu0 %v9596_v32  ;;  %9171 = vmatprep.subr.bf16.mxu1 %v9596_v32 }
 0x8f0   : >> { %8633 = vmatpush3.bf16.msra.mxu0 %v9596_v32  ;;  %9179 = vmatpush3.bf16.msra.mxu1 %v9596_v32 }
 0x8f1   : >> { %8634 = vmatprep.subr.bf16.mxu0 %v9597_v33  ;;  %9172 = vmatprep.subr.bf16.mxu1 %v9597_v33 }
 0x8f4   : >> { %8635 = vmatpush3.bf16.msra.mxu0 %v9597_v33  ;;  %9180 = vmatpush3.bf16.msra.mxu1 %v9597_v33 }
 0x8f5   : >> { %8636 = vmatprep.subr.bf16.mxu0 %v9598_v34  ;;  %9173 = vmatprep.subr.bf16.mxu1 %v9598_v34 }
 0x8f8   : >> { %8637 = vmatpush3.bf16.msra.mxu0 %v9598_v34  ;;  %9181 = vmatpush3.bf16.msra.mxu1 %v9598_v34 }
 0x8fb   : >> { %8639 = vmatmul.mubr.bf16.vlgmr.msra.gmra.mrb[0].mxu0 %v3867_v43  ;;  %8655 = vmatmul.mubr.bf16.vlgmr.msra.gmra.mrb[0].mxu1 %v3875_v44  ;;  %v3889_v44 = vld [vmem:[#allocation6 + $0x38] sm:$0xff] }
 0x8fc   : >> { %8642 = vmatprep.mubr.bf16.mxu0 %v3868_v45  ;;  %8658 = vmatprep.mubr.bf16.mxu1 %v3876_v46  ;;  %v3905_v45 = vld [vmem:[#allocation6 + $0xb8] sm:$0xff] }
 0x903   : >> { %8643 = vmatmul.mubr.bf16.gmra.mrb[4].mxu0 %v3869_v55  ;;  %8659 = vmatmul.mubr.bf16.gmra.mrb[4].mxu1 %v3877_v56 }
 0x904   : >> { %8646 = vmatprep.mubr.bf16.mxu0 %v3870_v57  ;;  %8662 = vmatprep.mubr.bf16.mxu1 %v3878_v58 }
 0x90b   : >> { %8647 = vmatmul.mubr.bf16.gmra.mrb[8].mxu0 %v3871_v4  ;;  %8663 = vmatmul.mubr.bf16.gmra.mrb[8].mxu1 %v3879_v5  ;;  %v3893_v5 = vld [vmem:[#allocation6 + $0x58] sm:$0xff] }
 0x90c   : >> { %8650 = vmatprep.mubr.bf16.mxu0 %v3872_v6  ;;  %8666 = vmatprep.mubr.bf16.mxu1 %v3880_v7  ;;  %v3909_v6 = vld [vmem:[#allocation6 + $0xd8] sm:$0xff] }
 0x913   : >> { %8651 = vmatmul.mubr.bf16.gmra.mrb[12].mxu0 %v3873_v12  ;;  %8667 = vmatmul.mubr.bf16.gmra.mrb[12].mxu1 %v3881_v13  ;;  %v3907_v12 = vld [vmem:[#allocation6 + $0xc8] sm:$0xff] }
 0x9ce   : >> { %v8640_v18 = vpop.f32.mrb[0].mxu0  ;;  %v8656_v19 = vpop.f32.mrb[0].mxu1 }
 0x9cf   : >> { %v4145_v22 = vadd.f32 %v8640_v18, %v3884_v14  ;;  %v4161_v23 = vadd.f32 %v8656_v19, %v3900_v15  ;;  %v4016_v24 = vpop.f32.mrb[1].mxu0  ;;  %v4080_v25 = vpop.f32.mrb[1].mxu1 }
 0x9d0   : >> { %v4143_v28 = vadd.f32 %v4016_v24, %v3882_v16  ;;  %v4159_v29 = vadd.f32 %v4080_v25, %v3898_v17  ;;  %v8641_v30 = vpop.f32.mrb[2].mxu0  ;;  %v8657_v31 = vpop.f32.mrb[2].mxu1  ;;  %v3912_v24 = vld [vmem:[#allocation6 + $0xf0] sm:$0xff]  ;;  %v3894_v25 = vld [vmem:[#allocation6 + $0x60] sm:$0xff] }
 0x9d1   : >> { %4177 = vst [vmem:[#allocation6 + $0x10] sm:$0xff] %v4145_v22  ;;  %4193 = vst [vmem:[#allocation6 + $0x90] sm:$0xff] %v4161_v23  ;;  %v4146_v32 = vadd.f32 %v8641_v30, %v3885_v20  ;;  %v4162_v33 = vadd.f32 %v8657_v31, %v3901_v21  ;;  %v4019_v34 = vpop.f32.mrb[3].mxu0  ;;  %v4083_v35 = vpop.f32.mrb[3].mxu1  ;;  %v3896_v23 = vld [vmem:[#allocation6 + $0x70] sm:$0xff]  ;;  %v3913_v30 = vld [vmem:[#allocation6 + $0xf8] sm:$0xff] }
 0x9d2   : >> { %4175 = vst [vmem:[#allocation6] sm:$0xff] %v4143_v28  ;;  %4191 = vst [vmem:[#allocation6 + $0x80] sm:$0xff] %v4159_v29  ;;  %v4144_v36 = vadd.f32 %v4019_v34, %v3883_v26  ;;  %v4160_v37 = vadd.f32 %v4083_v35, %v3899_v27  ;;  %v3910_v26 = vld [vmem:[#allocation6 + $0xe0] sm:$0xff]  ;;  %v3897_v29 = vld [vmem:[#allocation6 + $0x78] sm:$0xff] }
 0x9d3   : >> { %4178 = vst [vmem:[#allocation6 + $0x18] sm:$0xff] %v4146_v32  ;;  %4194 = vst [vmem:[#allocation6 + $0x98] sm:$0xff] %v4162_v33  ;;  %v3895_v35 = vld [vmem:[#allocation6 + $0x68] sm:$0xff] }
 0x9d4   : >> { %4176 = vst [vmem:[#allocation6 + $0x8] sm:$0xff] %v4144_v36  ;;  %4192 = vst [vmem:[#allocation6 + $0x88] sm:$0xff] %v4160_v37  ;;  %v3911_v36 = vld [vmem:[#allocation6 + $0xe8] sm:$0xff] }
 0x9d6   : >> { %v8644_v42 = vpop.f32.mrb[4].mxu0  ;;  %v8660_v43 = vpop.f32.mrb[4].mxu1 }
 0x9d7   : >> { %v4149_v46 = vadd.f32 %v8644_v42, %v3888_v38  ;;  %v4165_v47 = vadd.f32 %v8660_v43, %v3904_v39  ;;  %v4032_v48 = vpop.f32.mrb[5].mxu0  ;;  %v4096_v49 = vpop.f32.mrb[5].mxu1 }
 0x9d8   : >> { %v4147_v52 = vadd.f32 %v4032_v48, %v3886_v40  ;;  %v4163_v53 = vadd.f32 %v4096_v49, %v3902_v41  ;;  %v8645_v54 = vpop.f32.mrb[6].mxu0  ;;  %v8661_v55 = vpop.f32.mrb[6].mxu1 }
 0x9d9   : >> { %4181 = vst [vmem:[#allocation6 + $0x30] sm:$0xff] %v4149_v46  ;;  %4197 = vst [vmem:[#allocation6 + $0xb0] sm:$0xff] %v4165_v47  ;;  %v4150_v56 = vadd.f32 %v8645_v54, %v3889_v44  ;;  %v4166_v57 = vadd.f32 %v8661_v55, %v3905_v45  ;;  %v4035_v58 = vpop.f32.mrb[7].mxu0  ;;  %v4099_v59 = vpop.f32.mrb[7].mxu1 }
 0x9da   : >> { %4179 = vst [vmem:[#allocation6 + $0x20] sm:$0xff] %v4147_v52  ;;  %4195 = vst [vmem:[#allocation6 + $0xa0] sm:$0xff] %v4163_v53  ;;  %v4148_v60 = vadd.f32 %v4035_v58, %v3887_v50  ;;  %v4164_v61 = vadd.f32 %v4099_v59, %v3903_v51 }
 0x9db   : >> { %4182 = vst [vmem:[#allocation6 + $0x38] sm:$0xff] %v4150_v56  ;;  %4198 = vst [vmem:[#allocation6 + $0xb8] sm:$0xff] %v4166_v57 }
 0x9dc   : >> { %4180 = vst [vmem:[#allocation6 + $0x28] sm:$0xff] %v4148_v60  ;;  %4196 = vst [vmem:[#allocation6 + $0xa8] sm:$0xff] %v4164_v61 }
 0x9de   : >> { %v8648_v3 = vpop.f32.mrb[8].mxu0  ;;  %v8664_v4 = vpop.f32.mrb[8].mxu1 }
 0x9df   : >> { %v4153_v7 = vadd.f32 %v8648_v3, %v3892_v62  ;;  %v4169_v8 = vadd.f32 %v8664_v4, %v3908_v63  ;;  %v4048_v9 = vpop.f32.mrb[9].mxu0  ;;  %v4112_v10 = vpop.f32.mrb[9].mxu1 }
 0x9e0   : >> { %v4151_v13 = vadd.f32 %v4048_v9, %v3890_v0  ;;  %v4167_v14 = vadd.f32 %v4112_v10, %v3906_v1  ;;  %v8649_v15 = vpop.f32.mrb[10].mxu0  ;;  %v8665_v16 = vpop.f32.mrb[10].mxu1 }
 0x9e1   : >> { %4185 = vst [vmem:[#allocation6 + $0x50] sm:$0xff] %v4153_v7  ;;  %4201 = vst [vmem:[#allocation6 + $0xd0] sm:$0xff] %v4169_v8  ;;  %v4154_v17 = vadd.f32 %v8649_v15, %v3893_v5  ;;  %v4170_v18 = vadd.f32 %v8665_v16, %v3909_v6  ;;  %v4051_v19 = vpop.f32.mrb[11].mxu0  ;;  %v4115_v20 = vpop.f32.mrb[11].mxu1 }
 0x9e2   : >> { %4183 = vst [vmem:[#allocation6 + $0x40] sm:$0xff] %v4151_v13  ;;  %4199 = vst [vmem:[#allocation6 + $0xc0] sm:$0xff] %v4167_v14  ;;  %v4152_v21 = vadd.f32 %v4051_v19, %v3891_v11  ;;  %v4168_v22 = vadd.f32 %v4115_v20, %v3907_v12 }
 0x9e3   : >> { %4186 = vst [vmem:[#allocation6 + $0x58] sm:$0xff] %v4154_v17  ;;  %4202 = vst [vmem:[#allocation6 + $0xd8] sm:$0xff] %v4170_v18 }
 0x9e4   : >> { %4184 = vst [vmem:[#allocation6 + $0x48] sm:$0xff] %v4152_v21  ;;  %4200 = vst [vmem:[#allocation6 + $0xc8] sm:$0xff] %v4168_v22 }
 0x9e6   : >> { %v8652_v27 = vpop.f32.mrb[12].mxu0  ;;  %v8668_v28 = vpop.f32.mrb[12].mxu1  ;;  %3830 = sbr.rel (!%p3828_p11) target bundleno = 2262 (0x8d6), region = 321 }
 0x9e7   : >> { %v4157_v31 = vadd.f32 %v8652_v27, %v3896_v23  ;;  %v4173_v32 = vadd.f32 %v8668_v28, %v3912_v24  ;;  %v4064_v33 = vpop.f32.mrb[13].mxu0  ;;  %v4128_v34 = vpop.f32.mrb[13].mxu1 }
 0x9e8   : >> { %v4155_v37 = vadd.f32 %v4064_v33, %v3894_v25  ;;  %v4171_v38 = vadd.f32 %v4128_v34, %v3910_v26  ;;  %v8653_v39 = vpop.f32.mrb[14].mxu0  ;;  %v8669_v40 = vpop.f32.mrb[14].mxu1 }
 0x9e9   : >> { %4189 = vst [vmem:[#allocation6 + $0x70] sm:$0xff] %v4157_v31  ;;  %4205 = vst [vmem:[#allocation6 + $0xf0] sm:$0xff] %v4173_v32  ;;  %v4158_v41 = vadd.f32 %v8653_v39, %v3897_v29  ;;  %v4174_v42 = vadd.f32 %v8669_v40, %v3913_v30  ;;  %v4067_v43 = vpop.f32.mrb[15].mxu0  ;;  %v4131_v44 = vpop.f32.mrb[15].mxu1 }
 0x9ea   : >> { %4187 = vst [vmem:[#allocation6 + $0x60] sm:$0xff] %v4155_v37  ;;  %4203 = vst [vmem:[#allocation6 + $0xe0] sm:$0xff] %v4171_v38  ;;  %v4156_v45 = vadd.f32 %v4067_v43, %v3895_v35  ;;  %v4172_v46 = vadd.f32 %v4131_v44, %v3911_v36 }
 0x9eb   : >> { %4190 = vst [vmem:[#allocation6 + $0x78] sm:$0xff] %v4158_v41  ;;  %4206 = vst [vmem:[#allocation6 + $0xf8] sm:$0xff] %v4174_v42 }
 0x9ec   : >> { %4188 = vst [vmem:[#allocation6 + $0x68] sm:$0xff] %v4156_v45  ;;  %4204 = vst [vmem:[#allocation6 + $0xe8] sm:$0xff] %v4172_v46 }
 0x9ed LB: >> { %s4213_s21 = smul.u32 24, %s9825_s20  ;;  %v4265_v40 = vld [vmem:[#allocation6 + $0x10] sm:$0xff]  ;;  %v4263_v42 = vld [vmem:[#allocation6] sm:$0xff]  ;;  %v4266_v46 = vld [vmem:[#allocation6 + $0x18] sm:$0xff]  ;;  %s9825_s20 = sphi %s10729_s20, %s4212_s20  }
 0x9ee   : >> { %s7556_s22 = smul.u32 320, %s9825_s20  ;;  %v4281_v41 = vld [vmem:[#allocation6 + $0x90] sm:$0xff]  ;;  %v4279_v43 = vld [vmem:[#allocation6 + $0x80] sm:$0xff]  ;;  %s4212_s20 = sadd.s32 1, %s9825_s20  }
 0x9ef   : >> { %s10741_s27 = scalar_lea.vmem [#allocation3], %s4213_s21  ;;  %p4209_p12 = scmp.ge.s32.totalorder %s4212_s20, 5  }
 0x9f0   : >> { %s10739_s26 = scalar_lea.vmem %s11235_s3, %s7556_s22  ;;  %v4215_v47 = vld [vmem:[%s10741_s27 + $0x1] sm:$0xff]  ;;  %v4216_v48 = vld [vmem:[%s10741_s27 + $0x9] sm:$0xff]  ;;  %v4217_v61 = vld [vmem:[%s10741_s27 + $0x19] sm:$0xff]  ;;  %s10786_s28 = smov (%p4209_p12), 0  }
 0x9f1   : >> { %v9599_v49 = vld [vmem:[%s10739_s26 + $0x40] sm:$0xff]   ;;  %v9600_v50 = vld [vmem:[%s10739_s26 + $0x48] sm:$0xff]   ;;  %v4247_v51 = vpack.c.bf16 %v4216_v48, %v4215_v47  ;;  %v9601_v52 = vld [vmem:[%s10739_s26 + $0x50] sm:$0xff]  }
 0x9f2   : >> { %8670 = vmatprep.subr.bf16.mxu0 %v9599_v49  ;;  %9182 = vmatprep.subr.bf16.mxu1 %v9599_v49  ;;  %v4231_v53 = vld [vmem:[%s10741_s27 + $0xc1] sm:$0xff]  ;;  %v9602_v54 = vld [vmem:[%s10739_s26 + $0x58] sm:$0xff]   ;;  %v4232_v55 = vld [vmem:[%s10741_s27 + $0xc9] sm:$0xff] }
 0x9f3   : >> { %8671 = vmatpush3.bf16.msra.mxu0 %v9599_v49  ;;  %9190 = vmatpush3.bf16.msra.mxu1 %v9599_v49  ;;  %v4255_v56 = vpack.c.bf16 %v4232_v55, %v4231_v53  ;;  %v9603_v57 = vld [vmem:[%s10739_s26 + $0x60] sm:$0xff]   ;;  %v9604_v58 = vld [vmem:[%s10739_s26 + $0x68] sm:$0xff]   ;;  %v9605_v59 = vld [vmem:[%s10739_s26 + $0x70] sm:$0xff]  }
 0x9f4   : >> { %8672 = vmatprep.subr.bf16.mxu0 %v9600_v50  ;;  %9183 = vmatprep.subr.bf16.mxu1 %v9600_v50  ;;  %v9606_v60 = vld [vmem:[%s10739_s26 + $0x78] sm:$0xff]   ;;  %v4218_v62 = vld [vmem:[%s10741_s27 + $0x21] sm:$0xff]  ;;  %v4221_v10 = vld [vmem:[%s10741_s27 + $0x49] sm:$0xff] }
 0x9f5   : >> { %8686 = vmatprep.mubr.bf16.mxu0 %v4247_v51  ;;  %8702 = vmatprep.mubr.bf16.mxu1 %v4255_v56  ;;  %v4233_v63 = vld [vmem:[%s10741_s27 + $0xd9] sm:$0xff]  ;;  %v4234_v0 = vld [vmem:[%s10741_s27 + $0xe1] sm:$0xff]  ;;  %v4219_v1 = vld [vmem:[%s10741_s27 + $0x31] sm:$0xff]  ;;  %v4248_v6 = vpack.c.bf16 %v4218_v62, %v4217_v61 }
 0x9f6   : >> { %v4220_v3 = vld [vmem:[%s10741_s27 + $0x39] sm:$0xff]  ;;  %v4235_v4 = vld [vmem:[%s10741_s27 + $0xf1] sm:$0xff]  ;;  %v4256_v7 = vpack.c.bf16 %v4234_v0, %v4233_v63  ;;  %v4237_v12 = vld [vmem:[%s10741_s27 + $0x109] sm:$0xff] }
 0x9f7   : >> { %8673 = vmatpush3.bf16.msra.mxu0 %v9600_v50  ;;  %9191 = vmatpush3.bf16.msra.mxu1 %v9600_v50  ;;  %v4236_v5 = vld [vmem:[%s10741_s27 + $0xf9] sm:$0xff]  ;;  %v4249_v8 = vpack.c.bf16 %v4220_v3, %v4219_v1  ;;  %v4222_v11 = vld [vmem:[%s10741_s27 + $0x51] sm:$0xff]  ;;  %v4223_v14 = vld [vmem:[%s10741_s27 + $0x61] sm:$0xff] }
 0x9f8   : >> { %8674 = vmatprep.subr.bf16.mxu0 %v9601_v52  ;;  %9184 = vmatprep.subr.bf16.mxu1 %v9601_v52  ;;  %v4257_v9 = vpack.c.bf16 %v4236_v5, %v4235_v4  ;;  %v4238_v13 = vld [vmem:[%s10741_s27 + $0x111] sm:$0xff]  ;;  %v4224_v15 = vld [vmem:[%s10741_s27 + $0x69] sm:$0xff]  ;;  %v4239_v16 = vld [vmem:[%s10741_s27 + $0x121] sm:$0xff]  ;;  %v4250_v18 = vpack.c.bf16 %v4222_v11, %v4221_v10 }
 0x9f9   : >> { %v4240_v17 = vld [vmem:[%s10741_s27 + $0x129] sm:$0xff]  ;;  %v4258_v19 = vpack.c.bf16 %v4238_v13, %v4237_v12  ;;  %v4251_v20 = vpack.c.bf16 %v4224_v15, %v4223_v14  ;;  %v4225_v22 = vld [vmem:[%s10741_s27 + $0x79] sm:$0xff]  ;;  %v4226_v23 = vld [vmem:[%s10741_s27 + $0x81] sm:$0xff] }
 0x9fa   : >> { %v4259_v21 = vpack.c.bf16 %v4240_v17, %v4239_v16  ;;  %v4241_v24 = vld [vmem:[%s10741_s27 + $0x139] sm:$0xff]  ;;  %v4242_v25 = vld [vmem:[%s10741_s27 + $0x141] sm:$0xff]  ;;  %v4227_v26 = vld [vmem:[%s10741_s27 + $0x91] sm:$0xff]  ;;  %v4252_v30 = vpack.c.bf16 %v4226_v23, %v4225_v22 }
 0x9fb   : >> { %8675 = vmatpush3.bf16.msra.mxu0 %v9601_v52  ;;  %9192 = vmatpush3.bf16.msra.mxu1 %v9601_v52  ;;  %v4228_v27 = vld [vmem:[%s10741_s27 + $0x99] sm:$0xff]  ;;  %v4243_v28 = vld [vmem:[%s10741_s27 + $0x151] sm:$0xff]  ;;  %v4260_v31 = vpack.c.bf16 %v4242_v25, %v4241_v24  ;;  %v4229_v34 = vld [vmem:[%s10741_s27 + $0xa9] sm:$0xff] }
 0x9fc   : >> { %8676 = vmatprep.subr.bf16.mxu0 %v9602_v54  ;;  %9185 = vmatprep.subr.bf16.mxu1 %v9602_v54  ;;  %v4244_v29 = vld [vmem:[%s10741_s27 + $0x159] sm:$0xff]  ;;  %v4253_v32 = vpack.c.bf16 %v4228_v27, %v4227_v26  ;;  %v4230_v35 = vld [vmem:[%s10741_s27 + $0xb1] sm:$0xff]  ;;  %v4245_v36 = vld [vmem:[%s10741_s27 + $0x169] sm:$0xff] }
 0x9fd   : >> { %v4261_v33 = vpack.c.bf16 %v4244_v29, %v4243_v28  ;;  %v4246_v37 = vld [vmem:[%s10741_s27 + $0x171] sm:$0xff]  ;;  %v4254_v38 = vpack.c.bf16 %v4230_v35, %v4229_v34  ;;  %v4282_v47 = vld [vmem:[#allocation6 + $0x98] sm:$0xff]  ;;  %v4269_v0 = vld [vmem:[#allocation6 + $0x30] sm:$0xff] }
 0x9fe   : >> { %v4262_v39 = vpack.c.bf16 %v4246_v37, %v4245_v36  ;;  %v4264_v52 = vld [vmem:[#allocation6 + $0x8] sm:$0xff]  ;;  %v4285_v1 = vld [vmem:[#allocation6 + $0xb0] sm:$0xff]  ;;  %v4267_v3 = vld [vmem:[#allocation6 + $0x20] sm:$0xff] }
 0x9ff   : >> { %8677 = vmatpush3.bf16.msra.mxu0 %v9602_v54  ;;  %9193 = vmatpush3.bf16.msra.mxu1 %v9602_v54  ;;  %v4280_v53 = vld [vmem:[#allocation6 + $0x88] sm:$0xff]  ;;  %v4283_v4 = vld [vmem:[#allocation6 + $0xa0] sm:$0xff]  ;;  %v4273_v25 = vld [vmem:[#allocation6 + $0x50] sm:$0xff] }
 0xa00   : >> { %8678 = vmatprep.subr.bf16.mxu0 %v9603_v57  ;;  %9186 = vmatprep.subr.bf16.mxu1 %v9603_v57  ;;  %v4268_v13 = vld [vmem:[#allocation6 + $0x28] sm:$0xff]  ;;  %v4289_v26 = vld [vmem:[#allocation6 + $0xd0] sm:$0xff]  ;;  %v4271_v27 = vld [vmem:[#allocation6 + $0x40] sm:$0xff] }
 0xa01   : >> { %v4284_v14 = vld [vmem:[#allocation6 + $0xa8] sm:$0xff]  ;;  %v4287_v28 = vld [vmem:[#allocation6 + $0xc0] sm:$0xff] }
 0xa02   : >> { %v4272_v37 = vld [vmem:[#allocation6 + $0x48] sm:$0xff] }
 0xa03   : >> { %8679 = vmatpush3.bf16.msra.mxu0 %v9603_v57  ;;  %9194 = vmatpush3.bf16.msra.mxu1 %v9603_v57 }
 0xa04   : >> { %8680 = vmatprep.subr.bf16.mxu0 %v9604_v58  ;;  %9187 = vmatprep.subr.bf16.mxu1 %v9604_v58 }
 0xa07   : >> { %8681 = vmatpush3.bf16.msra.mxu0 %v9604_v58  ;;  %9195 = vmatpush3.bf16.msra.mxu1 %v9604_v58 }
 0xa08   : >> { %8682 = vmatprep.subr.bf16.mxu0 %v9605_v59  ;;  %9188 = vmatprep.subr.bf16.mxu1 %v9605_v59 }
 0xa0b   : >> { %8683 = vmatpush3.bf16.msra.mxu0 %v9605_v59  ;;  %9196 = vmatpush3.bf16.msra.mxu1 %v9605_v59 }
 0xa0c   : >> { %8684 = vmatprep.subr.bf16.mxu0 %v9606_v60  ;;  %9189 = vmatprep.subr.bf16.mxu1 %v9606_v60 }
 0xa0f   : >> { %8685 = vmatpush3.bf16.msra.mxu0 %v9606_v60  ;;  %9197 = vmatpush3.bf16.msra.mxu1 %v9606_v60 }
 0xa12   : >> { %8687 = vmatmul.mubr.bf16.vlgmr.msra.gmra.mrb[0].mxu0 %v4248_v6  ;;  %8703 = vmatmul.mubr.bf16.vlgmr.msra.gmra.mrb[0].mxu1 %v4256_v7  ;;  %v4270_v7 = vld [vmem:[#allocation6 + $0x38] sm:$0xff] }
 0xa13   : >> { %8690 = vmatprep.mubr.bf16.mxu0 %v4249_v8  ;;  %8706 = vmatprep.mubr.bf16.mxu1 %v4257_v9  ;;  %v4286_v8 = vld [vmem:[#allocation6 + $0xb8] sm:$0xff] }
 0xa1a   : >> { %8691 = vmatmul.mubr.bf16.gmra.mrb[4].mxu0 %v4250_v18  ;;  %8707 = vmatmul.mubr.bf16.gmra.mrb[4].mxu1 %v4258_v19 }
 0xa1b   : >> { %8694 = vmatprep.mubr.bf16.mxu0 %v4251_v20  ;;  %8710 = vmatprep.mubr.bf16.mxu1 %v4259_v21 }
 0xa22   : >> { %8695 = vmatmul.mubr.bf16.gmra.mrb[8].mxu0 %v4252_v30  ;;  %8711 = vmatmul.mubr.bf16.gmra.mrb[8].mxu1 %v4260_v31  ;;  %v4274_v31 = vld [vmem:[#allocation6 + $0x58] sm:$0xff] }
 0xa23   : >> { %8698 = vmatprep.mubr.bf16.mxu0 %v4253_v32  ;;  %8714 = vmatprep.mubr.bf16.mxu1 %v4261_v33  ;;  %v4290_v32 = vld [vmem:[#allocation6 + $0xd8] sm:$0xff] }
 0xa2a   : >> { %8699 = vmatmul.mubr.bf16.gmra.mrb[12].mxu0 %v4254_v38  ;;  %8715 = vmatmul.mubr.bf16.gmra.mrb[12].mxu1 %v4262_v39  ;;  %v4288_v38 = vld [vmem:[#allocation6 + $0xc8] sm:$0xff] }
 0xae5   : >> { %v8688_v44 = vpop.f32.mrb[0].mxu0  ;;  %v8704_v45 = vpop.f32.mrb[0].mxu1 }
 0xae6   : >> { %v4527_v48 = vadd.f32 %v8688_v44, %v4265_v40  ;;  %v4543_v49 = vadd.f32 %v8704_v45, %v4281_v41  ;;  %v4398_v50 = vpop.f32.mrb[1].mxu0  ;;  %v4462_v51 = vpop.f32.mrb[1].mxu1 }
 0xae7   : >> { %v4525_v54 = vadd.f32 %v4398_v50, %v4263_v42  ;;  %v4541_v55 = vadd.f32 %v4462_v51, %v4279_v43  ;;  %v8689_v56 = vpop.f32.mrb[2].mxu0  ;;  %v8705_v57 = vpop.f32.mrb[2].mxu1  ;;  %v4293_v50 = vld [vmem:[#allocation6 + $0xf0] sm:$0xff]  ;;  %v4275_v51 = vld [vmem:[#allocation6 + $0x60] sm:$0xff] }
 0xae8   : >> { %4559 = vst [vmem:[#allocation6 + $0x10] sm:$0xff] %v4527_v48  ;;  %4575 = vst [vmem:[#allocation6 + $0x90] sm:$0xff] %v4543_v49  ;;  %v4528_v58 = vadd.f32 %v8689_v56, %v4266_v46  ;;  %v4544_v59 = vadd.f32 %v8705_v57, %v4282_v47  ;;  %v4401_v60 = vpop.f32.mrb[3].mxu0  ;;  %v4465_v61 = vpop.f32.mrb[3].mxu1  ;;  %v4277_v49 = vld [vmem:[#allocation6 + $0x70] sm:$0xff]  ;;  %v4294_v56 = vld [vmem:[#allocation6 + $0xf8] sm:$0xff] }
 0xae9   : >> { %4557 = vst [vmem:[#allocation6] sm:$0xff] %v4525_v54  ;;  %4573 = vst [vmem:[#allocation6 + $0x80] sm:$0xff] %v4541_v55  ;;  %v4526_v62 = vadd.f32 %v4401_v60, %v4264_v52  ;;  %v4542_v63 = vadd.f32 %v4465_v61, %v4280_v53  ;;  %v4291_v52 = vld [vmem:[#allocation6 + $0xe0] sm:$0xff]  ;;  %v4278_v55 = vld [vmem:[#allocation6 + $0x78] sm:$0xff] }
 0xaea   : >> { %4560 = vst [vmem:[#allocation6 + $0x18] sm:$0xff] %v4528_v58  ;;  %4576 = vst [vmem:[#allocation6 + $0x98] sm:$0xff] %v4544_v59  ;;  %v4276_v61 = vld [vmem:[#allocation6 + $0x68] sm:$0xff] }
 0xaeb   : >> { %4558 = vst [vmem:[#allocation6 + $0x8] sm:$0xff] %v4526_v62  ;;  %4574 = vst [vmem:[#allocation6 + $0x88] sm:$0xff] %v4542_v63  ;;  %v4292_v62 = vld [vmem:[#allocation6 + $0xe8] sm:$0xff] }
 0xaed   : >> { %v8692_v5 = vpop.f32.mrb[4].mxu0  ;;  %v8708_v6 = vpop.f32.mrb[4].mxu1 }
 0xaee   : >> { %v4531_v9 = vadd.f32 %v8692_v5, %v4269_v0  ;;  %v4547_v10 = vadd.f32 %v8708_v6, %v4285_v1  ;;  %v4414_v11 = vpop.f32.mrb[5].mxu0  ;;  %v4478_v12 = vpop.f32.mrb[5].mxu1 }
 0xaef   : >> { %v4529_v15 = vadd.f32 %v4414_v11, %v4267_v3  ;;  %v4545_v16 = vadd.f32 %v4478_v12, %v4283_v4  ;;  %v8693_v17 = vpop.f32.mrb[6].mxu0  ;;  %v8709_v18 = vpop.f32.mrb[6].mxu1 }
 0xaf0   : >> { %4563 = vst [vmem:[#allocation6 + $0x30] sm:$0xff] %v4531_v9  ;;  %4579 = vst [vmem:[#allocation6 + $0xb0] sm:$0xff] %v4547_v10  ;;  %v4532_v19 = vadd.f32 %v8693_v17, %v4270_v7  ;;  %v4548_v20 = vadd.f32 %v8709_v18, %v4286_v8  ;;  %v4417_v21 = vpop.f32.mrb[7].mxu0  ;;  %v4481_v22 = vpop.f32.mrb[7].mxu1 }
 0xaf1   : >> { %4561 = vst [vmem:[#allocation6 + $0x20] sm:$0xff] %v4529_v15  ;;  %4577 = vst [vmem:[#allocation6 + $0xa0] sm:$0xff] %v4545_v16  ;;  %v4530_v23 = vadd.f32 %v4417_v21, %v4268_v13  ;;  %v4546_v24 = vadd.f32 %v4481_v22, %v4284_v14 }
 0xaf2   : >> { %4564 = vst [vmem:[#allocation6 + $0x38] sm:$0xff] %v4532_v19  ;;  %4580 = vst [vmem:[#allocation6 + $0xb8] sm:$0xff] %v4548_v20 }
 0xaf3   : >> { %4562 = vst [vmem:[#allocation6 + $0x28] sm:$0xff] %v4530_v23  ;;  %4578 = vst [vmem:[#allocation6 + $0xa8] sm:$0xff] %v4546_v24 }
 0xaf5   : >> { %v8696_v29 = vpop.f32.mrb[8].mxu0  ;;  %v8712_v30 = vpop.f32.mrb[8].mxu1 }
 0xaf6   : >> { %v4535_v33 = vadd.f32 %v8696_v29, %v4273_v25  ;;  %v4551_v34 = vadd.f32 %v8712_v30, %v4289_v26  ;;  %v4430_v35 = vpop.f32.mrb[9].mxu0  ;;  %v4494_v36 = vpop.f32.mrb[9].mxu1 }
 0xaf7   : >> { %v4533_v39 = vadd.f32 %v4430_v35, %v4271_v27  ;;  %v4549_v40 = vadd.f32 %v4494_v36, %v4287_v28  ;;  %v8697_v41 = vpop.f32.mrb[10].mxu0  ;;  %v8713_v42 = vpop.f32.mrb[10].mxu1 }
 0xaf8   : >> { %4567 = vst [vmem:[#allocation6 + $0x50] sm:$0xff] %v4535_v33  ;;  %4583 = vst [vmem:[#allocation6 + $0xd0] sm:$0xff] %v4551_v34  ;;  %v4536_v43 = vadd.f32 %v8697_v41, %v4274_v31  ;;  %v4552_v44 = vadd.f32 %v8713_v42, %v4290_v32  ;;  %v4433_v45 = vpop.f32.mrb[11].mxu0  ;;  %v4497_v46 = vpop.f32.mrb[11].mxu1 }
 0xaf9   : >> { %4565 = vst [vmem:[#allocation6 + $0x40] sm:$0xff] %v4533_v39  ;;  %4581 = vst [vmem:[#allocation6 + $0xc0] sm:$0xff] %v4549_v40  ;;  %v4534_v47 = vadd.f32 %v4433_v45, %v4272_v37  ;;  %v4550_v48 = vadd.f32 %v4497_v46, %v4288_v38 }
 0xafa   : >> { %4568 = vst [vmem:[#allocation6 + $0x58] sm:$0xff] %v4536_v43  ;;  %4584 = vst [vmem:[#allocation6 + $0xd8] sm:$0xff] %v4552_v44 }
 0xafb   : >> { %4566 = vst [vmem:[#allocation6 + $0x48] sm:$0xff] %v4534_v47  ;;  %4582 = vst [vmem:[#allocation6 + $0xc8] sm:$0xff] %v4550_v48 }
 0xafd   : >> { %v8700_v53 = vpop.f32.mrb[12].mxu0  ;;  %v8716_v54 = vpop.f32.mrb[12].mxu1  ;;  %4211 = sbr.rel (!%p4209_p12) target bundleno = 2541 (0x9ed), region = 332 }
 0xafe   : >> { %v4539_v57 = vadd.f32 %v8700_v53, %v4277_v49  ;;  %v4555_v58 = vadd.f32 %v8716_v54, %v4293_v50  ;;  %v4446_v59 = vpop.f32.mrb[13].mxu0  ;;  %v4510_v60 = vpop.f32.mrb[13].mxu1 }
 0xaff   : >> { %v4537_v63 = vadd.f32 %v4446_v59, %v4275_v51  ;;  %v4553_v0 = vadd.f32 %v4510_v60, %v4291_v52  ;;  %v8701_v1 = vpop.f32.mrb[14].mxu0  ;;  %v8717_v3 = vpop.f32.mrb[14].mxu1 }
 0xb00   : >> { %4571 = vst [vmem:[#allocation6 + $0x70] sm:$0xff] %v4539_v57  ;;  %4587 = vst [vmem:[#allocation6 + $0xf0] sm:$0xff] %v4555_v58  ;;  %v4540_v4 = vadd.f32 %v8701_v1, %v4278_v55  ;;  %v4556_v5 = vadd.f32 %v8717_v3, %v4294_v56  ;;  %v4449_v6 = vpop.f32.mrb[15].mxu0  ;;  %v4513_v7 = vpop.f32.mrb[15].mxu1 }
 0xb01   : >> { %4569 = vst [vmem:[#allocation6 + $0x60] sm:$0xff] %v4537_v63  ;;  %4585 = vst [vmem:[#allocation6 + $0xe0] sm:$0xff] %v4553_v0  ;;  %v4538_v8 = vadd.f32 %v4449_v6, %v4276_v61  ;;  %v4554_v9 = vadd.f32 %v4513_v7, %v4292_v62 }
 0xb02   : >> { %4572 = vst [vmem:[#allocation6 + $0x78] sm:$0xff] %v4540_v4  ;;  %4588 = vst [vmem:[#allocation6 + $0xf8] sm:$0xff] %v4556_v5 }
 0xb03   : >> { %4570 = vst [vmem:[#allocation6 + $0x68] sm:$0xff] %v4538_v8  ;;  %4586 = vst [vmem:[#allocation6 + $0xe8] sm:$0xff] %v4554_v9 }
 0xb04 LB: >> { %s4595_s29 = smul.u32 24, %s9829_s28  ;;  %v4647_v3 = vld [vmem:[#allocation6 + $0x10] sm:$0xff]  ;;  %v4645_v5 = vld [vmem:[#allocation6] sm:$0xff]  ;;  %v4648_v9 = vld [vmem:[#allocation6 + $0x18] sm:$0xff]  ;;  %s9829_s28 = sphi %s10786_s28, %s4594_s28  }
 0xb05   : >> { %s7581_s30 = smul.u32 320, %s9829_s28  ;;  %v4663_v4 = vld [vmem:[#allocation6 + $0x90] sm:$0xff]  ;;  %v4661_v6 = vld [vmem:[#allocation6 + $0x80] sm:$0xff]  ;;  %s4594_s28 = sadd.s32 1, %s9829_s28  }
 0xb06   : >> { %s10798_s11 = scalar_lea.vmem [#allocation3], %s4595_s29  ;;  %p4591_p13 = scmp.ge.s32.totalorder %s4594_s28, 5  }
 0xb07   : >> { %s10796_s10 = scalar_lea.vmem %s11235_s3, %s7581_s30  ;;  %v4597_v10 = vld [vmem:[%s10798_s11 + $0x2] sm:$0xff]  ;;  %v4598_v11 = vld [vmem:[%s10798_s11 + $0xa] sm:$0xff]  ;;  %v4599_v24 = vld [vmem:[%s10798_s11 + $0x1a] sm:$0xff]  ;;  %s10843_s12 = smov (%p4591_p13), 0  }
 0xb08   : >> { %v9607_v12 = vld [vmem:[%s10796_s10 + $0x80] sm:$0xff]   ;;  %v9608_v13 = vld [vmem:[%s10796_s10 + $0x88] sm:$0xff]   ;;  %v4629_v14 = vpack.c.bf16 %v4598_v11, %v4597_v10  ;;  %v9609_v15 = vld [vmem:[%s10796_s10 + $0x90] sm:$0xff]  }
 0xb09   : >> { %8718 = vmatprep.subr.bf16.mxu0 %v9607_v12  ;;  %9198 = vmatprep.subr.bf16.mxu1 %v9607_v12  ;;  %v4613_v16 = vld [vmem:[%s10798_s11 + $0xc2] sm:$0xff]  ;;  %v9610_v17 = vld [vmem:[%s10796_s10 + $0x98] sm:$0xff]   ;;  %v4614_v18 = vld [vmem:[%s10798_s11 + $0xca] sm:$0xff] }
 0xb0a   : >> { %8719 = vmatpush3.bf16.msra.mxu0 %v9607_v12  ;;  %9206 = vmatpush3.bf16.msra.mxu1 %v9607_v12  ;;  %v4637_v19 = vpack.c.bf16 %v4614_v18, %v4613_v16  ;;  %v9611_v20 = vld [vmem:[%s10796_s10 + $0xa0] sm:$0xff]   ;;  %v9612_v21 = vld [vmem:[%s10796_s10 + $0xa8] sm:$0xff]   ;;  %v9613_v22 = vld [vmem:[%s10796_s10 + $0xb0] sm:$0xff]  }
 0xb0b   : >> { %8720 = vmatprep.subr.bf16.mxu0 %v9608_v13  ;;  %9199 = vmatprep.subr.bf16.mxu1 %v9608_v13  ;;  %v9614_v23 = vld [vmem:[%s10796_s10 + $0xb8] sm:$0xff]   ;;  %v4600_v25 = vld [vmem:[%s10798_s11 + $0x22] sm:$0xff]  ;;  %v4603_v36 = vld [vmem:[%s10798_s11 + $0x4a] sm:$0xff] }
 0xb0c   : >> { %8734 = vmatprep.mubr.bf16.mxu0 %v4629_v14  ;;  %8750 = vmatprep.mubr.bf16.mxu1 %v4637_v19  ;;  %v4615_v26 = vld [vmem:[%s10798_s11 + $0xda] sm:$0xff]  ;;  %v4616_v27 = vld [vmem:[%s10798_s11 + $0xe2] sm:$0xff]  ;;  %v4601_v28 = vld [vmem:[%s10798_s11 + $0x32] sm:$0xff]  ;;  %v4630_v32 = vpack.c.bf16 %v4600_v25, %v4599_v24 }
 0xb0d   : >> { %v4602_v29 = vld [vmem:[%s10798_s11 + $0x3a] sm:$0xff]  ;;  %v4617_v30 = vld [vmem:[%s10798_s11 + $0xf2] sm:$0xff]  ;;  %v4638_v33 = vpack.c.bf16 %v4616_v27, %v4615_v26  ;;  %v4619_v38 = vld [vmem:[%s10798_s11 + $0x10a] sm:$0xff] }
 0xb0e   : >> { %8721 = vmatpush3.bf16.msra.mxu0 %v9608_v13  ;;  %9207 = vmatpush3.bf16.msra.mxu1 %v9608_v13  ;;  %v4618_v31 = vld [vmem:[%s10798_s11 + $0xfa] sm:$0xff]  ;;  %v4631_v34 = vpack.c.bf16 %v4602_v29, %v4601_v28  ;;  %v4604_v37 = vld [vmem:[%s10798_s11 + $0x52] sm:$0xff]  ;;  %v4605_v40 = vld [vmem:[%s10798_s11 + $0x62] sm:$0xff] }
 0xb0f   : >> { %8722 = vmatprep.subr.bf16.mxu0 %v9609_v15  ;;  %9200 = vmatprep.subr.bf16.mxu1 %v9609_v15  ;;  %v4639_v35 = vpack.c.bf16 %v4618_v31, %v4617_v30  ;;  %v4620_v39 = vld [vmem:[%s10798_s11 + $0x112] sm:$0xff]  ;;  %v4606_v41 = vld [vmem:[%s10798_s11 + $0x6a] sm:$0xff]  ;;  %v4621_v42 = vld [vmem:[%s10798_s11 + $0x122] sm:$0xff]  ;;  %v4632_v44 = vpack.c.bf16 %v4604_v37, %v4603_v36 }
 0xb10   : >> { %v4622_v43 = vld [vmem:[%s10798_s11 + $0x12a] sm:$0xff]  ;;  %v4640_v45 = vpack.c.bf16 %v4620_v39, %v4619_v38  ;;  %v4633_v46 = vpack.c.bf16 %v4606_v41, %v4605_v40  ;;  %v4607_v48 = vld [vmem:[%s10798_s11 + $0x7a] sm:$0xff]  ;;  %v4608_v49 = vld [vmem:[%s10798_s11 + $0x82] sm:$0xff] }
 0xb11   : >> { %v4641_v47 = vpack.c.bf16 %v4622_v43, %v4621_v42  ;;  %v4623_v50 = vld [vmem:[%s10798_s11 + $0x13a] sm:$0xff]  ;;  %v4624_v51 = vld [vmem:[%s10798_s11 + $0x142] sm:$0xff]  ;;  %v4609_v52 = vld [vmem:[%s10798_s11 + $0x92] sm:$0xff]  ;;  %v4634_v56 = vpack.c.bf16 %v4608_v49, %v4607_v48 }
 0xb12   : >> { %8723 = vmatpush3.bf16.msra.mxu0 %v9609_v15  ;;  %9208 = vmatpush3.bf16.msra.mxu1 %v9609_v15  ;;  %v4610_v53 = vld [vmem:[%s10798_s11 + $0x9a] sm:$0xff]  ;;  %v4625_v54 = vld [vmem:[%s10798_s11 + $0x152] sm:$0xff]  ;;  %v4642_v57 = vpack.c.bf16 %v4624_v51, %v4623_v50  ;;  %v4611_v60 = vld [vmem:[%s10798_s11 + $0xaa] sm:$0xff] }
 0xb13   : >> { %8724 = vmatprep.subr.bf16.mxu0 %v9610_v17  ;;  %9201 = vmatprep.subr.bf16.mxu1 %v9610_v17  ;;  %v4626_v55 = vld [vmem:[%s10798_s11 + $0x15a] sm:$0xff]  ;;  %v4635_v58 = vpack.c.bf16 %v4610_v53, %v4609_v52  ;;  %v4612_v61 = vld [vmem:[%s10798_s11 + $0xb2] sm:$0xff]  ;;  %v4627_v62 = vld [vmem:[%s10798_s11 + $0x16a] sm:$0xff] }
 0xb14   : >> { %v4643_v59 = vpack.c.bf16 %v4626_v55, %v4625_v54  ;;  %v4628_v63 = vld [vmem:[%s10798_s11 + $0x172] sm:$0xff]  ;;  %v4636_v0 = vpack.c.bf16 %v4612_v61, %v4611_v60  ;;  %v4664_v10 = vld [vmem:[#allocation6 + $0x98] sm:$0xff]  ;;  %v4651_v27 = vld [vmem:[#allocation6 + $0x30] sm:$0xff] }
 0xb15   : >> { %v4644_v1 = vpack.c.bf16 %v4628_v63, %v4627_v62  ;;  %v4646_v15 = vld [vmem:[#allocation6 + $0x8] sm:$0xff]  ;;  %v4667_v28 = vld [vmem:[#allocation6 + $0xb0] sm:$0xff]  ;;  %v4649_v29 = vld [vmem:[#allocation6 + $0x20] sm:$0xff] }
 0xb16   : >> { %8725 = vmatpush3.bf16.msra.mxu0 %v9610_v17  ;;  %9209 = vmatpush3.bf16.msra.mxu1 %v9610_v17  ;;  %v4662_v16 = vld [vmem:[#allocation6 + $0x88] sm:$0xff]  ;;  %v4665_v30 = vld [vmem:[#allocation6 + $0xa0] sm:$0xff]  ;;  %v4655_v51 = vld [vmem:[#allocation6 + $0x50] sm:$0xff] }
 0xb17   : >> { %8726 = vmatprep.subr.bf16.mxu0 %v9611_v20  ;;  %9202 = vmatprep.subr.bf16.mxu1 %v9611_v20  ;;  %v4650_v39 = vld [vmem:[#allocation6 + $0x28] sm:$0xff]  ;;  %v4671_v52 = vld [vmem:[#allocation6 + $0xd0] sm:$0xff]  ;;  %v4653_v53 = vld [vmem:[#allocation6 + $0x40] sm:$0xff] }
 0xb18   : >> { %v4666_v40 = vld [vmem:[#allocation6 + $0xa8] sm:$0xff]  ;;  %v4669_v54 = vld [vmem:[#allocation6 + $0xc0] sm:$0xff] }
 0xb19   : >> { %v4654_v63 = vld [vmem:[#allocation6 + $0x48] sm:$0xff] }
 0xb1a   : >> { %8727 = vmatpush3.bf16.msra.mxu0 %v9611_v20  ;;  %9210 = vmatpush3.bf16.msra.mxu1 %v9611_v20 }
 0xb1b   : >> { %8728 = vmatprep.subr.bf16.mxu0 %v9612_v21  ;;  %9203 = vmatprep.subr.bf16.mxu1 %v9612_v21 }
 0xb1e   : >> { %8729 = vmatpush3.bf16.msra.mxu0 %v9612_v21  ;;  %9211 = vmatpush3.bf16.msra.mxu1 %v9612_v21 }
 0xb1f   : >> { %8730 = vmatprep.subr.bf16.mxu0 %v9613_v22  ;;  %9204 = vmatprep.subr.bf16.mxu1 %v9613_v22 }
 0xb22   : >> { %8731 = vmatpush3.bf16.msra.mxu0 %v9613_v22  ;;  %9212 = vmatpush3.bf16.msra.mxu1 %v9613_v22 }
 0xb23   : >> { %8732 = vmatprep.subr.bf16.mxu0 %v9614_v23  ;;  %9205 = vmatprep.subr.bf16.mxu1 %v9614_v23 }
 0xb26   : >> { %8733 = vmatpush3.bf16.msra.mxu0 %v9614_v23  ;;  %9213 = vmatpush3.bf16.msra.mxu1 %v9614_v23 }
 0xb29   : >> { %8735 = vmatmul.mubr.bf16.vlgmr.msra.gmra.mrb[0].mxu0 %v4630_v32  ;;  %8751 = vmatmul.mubr.bf16.vlgmr.msra.gmra.mrb[0].mxu1 %v4638_v33  ;;  %v4652_v33 = vld [vmem:[#allocation6 + $0x38] sm:$0xff] }
 0xb2a   : >> { %8738 = vmatprep.mubr.bf16.mxu0 %v4631_v34  ;;  %8754 = vmatprep.mubr.bf16.mxu1 %v4639_v35  ;;  %v4668_v34 = vld [vmem:[#allocation6 + $0xb8] sm:$0xff] }
 0xb31   : >> { %8739 = vmatmul.mubr.bf16.gmra.mrb[4].mxu0 %v4632_v44  ;;  %8755 = vmatmul.mubr.bf16.gmra.mrb[4].mxu1 %v4640_v45 }
 0xb32   : >> { %8742 = vmatprep.mubr.bf16.mxu0 %v4633_v46  ;;  %8758 = vmatprep.mubr.bf16.mxu1 %v4641_v47 }
 0xb39   : >> { %8743 = vmatmul.mubr.bf16.gmra.mrb[8].mxu0 %v4634_v56  ;;  %8759 = vmatmul.mubr.bf16.gmra.mrb[8].mxu1 %v4642_v57  ;;  %v4656_v57 = vld [vmem:[#allocation6 + $0x58] sm:$0xff] }
 0xb3a   : >> { %8746 = vmatprep.mubr.bf16.mxu0 %v4635_v58  ;;  %8762 = vmatprep.mubr.bf16.mxu1 %v4643_v59  ;;  %v4672_v58 = vld [vmem:[#allocation6 + $0xd8] sm:$0xff] }
 0xb41   : >> { %8747 = vmatmul.mubr.bf16.gmra.mrb[12].mxu0 %v4636_v0  ;;  %8763 = vmatmul.mubr.bf16.gmra.mrb[12].mxu1 %v4644_v1  ;;  %v4670_v0 = vld [vmem:[#allocation6 + $0xc8] sm:$0xff] }
 0xbfc   : >> { %v8736_v7 = vpop.f32.mrb[0].mxu0  ;;  %v8752_v8 = vpop.f32.mrb[0].mxu1 }
 0xbfd   : >> { %v4909_v11 = vadd.f32 %v8736_v7, %v4647_v3  ;;  %v4925_v12 = vadd.f32 %v8752_v8, %v4663_v4  ;;  %v4780_v13 = vpop.f32.mrb[1].mxu0  ;;  %v4844_v14 = vpop.f32.mrb[1].mxu1 }
 0xbfe   : >> { %v4907_v17 = vadd.f32 %v4780_v13, %v4645_v5  ;;  %v4923_v18 = vadd.f32 %v4844_v14, %v4661_v6  ;;  %v8737_v19 = vpop.f32.mrb[2].mxu0  ;;  %v8753_v20 = vpop.f32.mrb[2].mxu1  ;;  %v4675_v13 = vld [vmem:[#allocation6 + $0xf0] sm:$0xff]  ;;  %v4657_v14 = vld [vmem:[#allocation6 + $0x60] sm:$0xff] }
 0xbff   : >> { %4941 = vst [vmem:[#allocation6 + $0x10] sm:$0xff] %v4909_v11  ;;  %4957 = vst [vmem:[#allocation6 + $0x90] sm:$0xff] %v4925_v12  ;;  %v4910_v21 = vadd.f32 %v8737_v19, %v4648_v9  ;;  %v4926_v22 = vadd.f32 %v8753_v20, %v4664_v10  ;;  %v4783_v23 = vpop.f32.mrb[3].mxu0  ;;  %v4847_v24 = vpop.f32.mrb[3].mxu1  ;;  %v4659_v12 = vld [vmem:[#allocation6 + $0x70] sm:$0xff]  ;;  %v4676_v19 = vld [vmem:[#allocation6 + $0xf8] sm:$0xff] }
 0xc00   : >> { %4939 = vst [vmem:[#allocation6] sm:$0xff] %v4907_v17  ;;  %4955 = vst [vmem:[#allocation6 + $0x80] sm:$0xff] %v4923_v18  ;;  %v4908_v25 = vadd.f32 %v4783_v23, %v4646_v15  ;;  %v4924_v26 = vadd.f32 %v4847_v24, %v4662_v16  ;;  %v4673_v15 = vld [vmem:[#allocation6 + $0xe0] sm:$0xff]  ;;  %v4660_v18 = vld [vmem:[#allocation6 + $0x78] sm:$0xff] }
 0xc01   : >> { %4942 = vst [vmem:[#allocation6 + $0x18] sm:$0xff] %v4910_v21  ;;  %4958 = vst [vmem:[#allocation6 + $0x98] sm:$0xff] %v4926_v22  ;;  %v4658_v24 = vld [vmem:[#allocation6 + $0x68] sm:$0xff] }
 0xc02   : >> { %4940 = vst [vmem:[#allocation6 + $0x8] sm:$0xff] %v4908_v25  ;;  %4956 = vst [vmem:[#allocation6 + $0x88] sm:$0xff] %v4924_v26  ;;  %v4674_v25 = vld [vmem:[#allocation6 + $0xe8] sm:$0xff] }
 0xc04   : >> { %v8740_v31 = vpop.f32.mrb[4].mxu0  ;;  %v8756_v32 = vpop.f32.mrb[4].mxu1 }
 0xc05   : >> { %v4913_v35 = vadd.f32 %v8740_v31, %v4651_v27  ;;  %v4929_v36 = vadd.f32 %v8756_v32, %v4667_v28  ;;  %v4796_v37 = vpop.f32.mrb[5].mxu0  ;;  %v4860_v38 = vpop.f32.mrb[5].mxu1 }
 0xc06   : >> { %v4911_v41 = vadd.f32 %v4796_v37, %v4649_v29  ;;  %v4927_v42 = vadd.f32 %v4860_v38, %v4665_v30  ;;  %v8741_v43 = vpop.f32.mrb[6].mxu0  ;;  %v8757_v44 = vpop.f32.mrb[6].mxu1 }
 0xc07   : >> { %4945 = vst [vmem:[#allocation6 + $0x30] sm:$0xff] %v4913_v35  ;;  %4961 = vst [vmem:[#allocation6 + $0xb0] sm:$0xff] %v4929_v36  ;;  %v4914_v45 = vadd.f32 %v8741_v43, %v4652_v33  ;;  %v4930_v46 = vadd.f32 %v8757_v44, %v4668_v34  ;;  %v4799_v47 = vpop.f32.mrb[7].mxu0  ;;  %v4863_v48 = vpop.f32.mrb[7].mxu1 }
 0xc08   : >> { %4943 = vst [vmem:[#allocation6 + $0x20] sm:$0xff] %v4911_v41  ;;  %4959 = vst [vmem:[#allocation6 + $0xa0] sm:$0xff] %v4927_v42  ;;  %v4912_v49 = vadd.f32 %v4799_v47, %v4650_v39  ;;  %v4928_v50 = vadd.f32 %v4863_v48, %v4666_v40 }
 0xc09   : >> { %4946 = vst [vmem:[#allocation6 + $0x38] sm:$0xff] %v4914_v45  ;;  %4962 = vst [vmem:[#allocation6 + $0xb8] sm:$0xff] %v4930_v46 }
 0xc0a   : >> { %4944 = vst [vmem:[#allocation6 + $0x28] sm:$0xff] %v4912_v49  ;;  %4960 = vst [vmem:[#allocation6 + $0xa8] sm:$0xff] %v4928_v50 }
 0xc0c   : >> { %v8744_v55 = vpop.f32.mrb[8].mxu0  ;;  %v8760_v56 = vpop.f32.mrb[8].mxu1 }
 0xc0d   : >> { %v4917_v59 = vadd.f32 %v8744_v55, %v4655_v51  ;;  %v4933_v60 = vadd.f32 %v8760_v56, %v4671_v52  ;;  %v4812_v61 = vpop.f32.mrb[9].mxu0  ;;  %v4876_v62 = vpop.f32.mrb[9].mxu1 }
 0xc0e   : >> { %v4915_v1 = vadd.f32 %v4812_v61, %v4653_v53  ;;  %v4931_v3 = vadd.f32 %v4876_v62, %v4669_v54  ;;  %v8745_v4 = vpop.f32.mrb[10].mxu0  ;;  %v8761_v5 = vpop.f32.mrb[10].mxu1 }
 0xc0f   : >> { %4949 = vst [vmem:[#allocation6 + $0x50] sm:$0xff] %v4917_v59  ;;  %4965 = vst [vmem:[#allocation6 + $0xd0] sm:$0xff] %v4933_v60  ;;  %v4918_v6 = vadd.f32 %v8745_v4, %v4656_v57  ;;  %v4934_v7 = vadd.f32 %v8761_v5, %v4672_v58  ;;  %v4815_v8 = vpop.f32.mrb[11].mxu0  ;;  %v4879_v9 = vpop.f32.mrb[11].mxu1 }
 0xc10   : >> { %4947 = vst [vmem:[#allocation6 + $0x40] sm:$0xff] %v4915_v1  ;;  %4963 = vst [vmem:[#allocation6 + $0xc0] sm:$0xff] %v4931_v3  ;;  %v4916_v10 = vadd.f32 %v4815_v8, %v4654_v63  ;;  %v4932_v11 = vadd.f32 %v4879_v9, %v4670_v0 }
 0xc11   : >> { %4950 = vst [vmem:[#allocation6 + $0x58] sm:$0xff] %v4918_v6  ;;  %4966 = vst [vmem:[#allocation6 + $0xd8] sm:$0xff] %v4934_v7 }
 0xc12   : >> { %4948 = vst [vmem:[#allocation6 + $0x48] sm:$0xff] %v4916_v10  ;;  %4964 = vst [vmem:[#allocation6 + $0xc8] sm:$0xff] %v4932_v11 }
 0xc14   : >> { %v8748_v16 = vpop.f32.mrb[12].mxu0  ;;  %v8764_v17 = vpop.f32.mrb[12].mxu1  ;;  %4593 = sbr.rel (!%p4591_p13) target bundleno = 2820 (0xb04), region = 343 }
 0xc15   : >> { %v4921_v20 = vadd.f32 %v8748_v16, %v4659_v12  ;;  %v4937_v21 = vadd.f32 %v8764_v17, %v4675_v13  ;;  %v4828_v22 = vpop.f32.mrb[13].mxu0  ;;  %v4892_v23 = vpop.f32.mrb[13].mxu1 }
 0xc16   : >> { %v4919_v26 = vadd.f32 %v4828_v22, %v4657_v14  ;;  %v4935_v27 = vadd.f32 %v4892_v23, %v4673_v15  ;;  %v8749_v28 = vpop.f32.mrb[14].mxu0  ;;  %v8765_v29 = vpop.f32.mrb[14].mxu1 }
 0xc17   : >> { %4953 = vst [vmem:[#allocation6 + $0x70] sm:$0xff] %v4921_v20  ;;  %4969 = vst [vmem:[#allocation6 + $0xf0] sm:$0xff] %v4937_v21  ;;  %v4922_v30 = vadd.f32 %v8749_v28, %v4660_v18  ;;  %v4938_v31 = vadd.f32 %v8765_v29, %v4676_v19  ;;  %v4831_v32 = vpop.f32.mrb[15].mxu0  ;;  %v4895_v33 = vpop.f32.mrb[15].mxu1 }
 0xc18   : >> { %4951 = vst [vmem:[#allocation6 + $0x60] sm:$0xff] %v4919_v26  ;;  %4967 = vst [vmem:[#allocation6 + $0xe0] sm:$0xff] %v4935_v27  ;;  %v4920_v34 = vadd.f32 %v4831_v32, %v4658_v24  ;;  %v4936_v35 = vadd.f32 %v4895_v33, %v4674_v25 }
 0xc19   : >> { %4954 = vst [vmem:[#allocation6 + $0x78] sm:$0xff] %v4922_v30  ;;  %4970 = vst [vmem:[#allocation6 + $0xf8] sm:$0xff] %v4938_v31 }
 0xc1a   : >> { %4952 = vst [vmem:[#allocation6 + $0x68] sm:$0xff] %v4920_v34  ;;  %4968 = vst [vmem:[#allocation6 + $0xe8] sm:$0xff] %v4936_v35 }
 0xc1b LB: >> { %s4977_s13 = smul.u32 24, %s9833_s12  ;;  %v5029_v29 = vld [vmem:[#allocation6 + $0x10] sm:$0xff]  ;;  %v5027_v31 = vld [vmem:[#allocation6] sm:$0xff]  ;;  %v5030_v35 = vld [vmem:[#allocation6 + $0x18] sm:$0xff]  ;;  %s9833_s12 = sphi %s10843_s12, %s4976_s12  }
 0xc1c   : >> { %s7606_s14 = smul.u32 320, %s9833_s12  ;;  %v5045_v30 = vld [vmem:[#allocation6 + $0x90] sm:$0xff]  ;;  %v5043_v32 = vld [vmem:[#allocation6 + $0x80] sm:$0xff]  ;;  %s4976_s12 = sadd.s32 1, %s9833_s12  }
 0xc1d   : >> { %s10855_s19 = scalar_lea.vmem [#allocation3], %s4977_s13  ;;  %p4973_p0 = scmp.ge.s32.totalorder %s4976_s12, 5  }
 0xc1e   : >> { %s10853_s18 = scalar_lea.vmem %s11235_s3, %s7606_s14  ;;  %v4979_v36 = vld [vmem:[%s10855_s19 + $0x3] sm:$0xff]  ;;  %v4980_v37 = vld [vmem:[%s10855_s19 + $0xb] sm:$0xff]  ;;  %v4981_v50 = vld [vmem:[%s10855_s19 + $0x1b] sm:$0xff]  ;;  %s10900_s20 = smov (%p4973_p0), 0  }
 0xc1f   : >> { %v9615_v38 = vld [vmem:[%s10853_s18 + $0xc0] sm:$0xff]   ;;  %v9616_v39 = vld [vmem:[%s10853_s18 + $0xc8] sm:$0xff]   ;;  %v5011_v40 = vpack.c.bf16 %v4980_v37, %v4979_v36  ;;  %v9617_v41 = vld [vmem:[%s10853_s18 + $0xd0] sm:$0xff]  }
 0xc20   : >> { %8766 = vmatprep.subr.bf16.mxu0 %v9615_v38  ;;  %9214 = vmatprep.subr.bf16.mxu1 %v9615_v38  ;;  %v4995_v42 = vld [vmem:[%s10855_s19 + $0xc3] sm:$0xff]  ;;  %v9618_v43 = vld [vmem:[%s10853_s18 + $0xd8] sm:$0xff]   ;;  %v4996_v44 = vld [vmem:[%s10855_s19 + $0xcb] sm:$0xff] }
 0xc21   : >> { %8767 = vmatpush3.bf16.msra.mxu0 %v9615_v38  ;;  %9222 = vmatpush3.bf16.msra.mxu1 %v9615_v38  ;;  %v5019_v45 = vpack.c.bf16 %v4996_v44, %v4995_v42  ;;  %v9619_v46 = vld [vmem:[%s10853_s18 + $0xe0] sm:$0xff]   ;;  %v9620_v47 = vld [vmem:[%s10853_s18 + $0xe8] sm:$0xff]   ;;  %v9621_v48 = vld [vmem:[%s10853_s18 + $0xf0] sm:$0xff]  }
 0xc22   : >> { %8768 = vmatprep.subr.bf16.mxu0 %v9616_v39  ;;  %9215 = vmatprep.subr.bf16.mxu1 %v9616_v39  ;;  %v9622_v49 = vld [vmem:[%s10853_s18 + $0xf8] sm:$0xff]   ;;  %v4982_v51 = vld [vmem:[%s10855_s19 + $0x23] sm:$0xff]  ;;  %v4985_v62 = vld [vmem:[%s10855_s19 + $0x4b] sm:$0xff] }
 0xc23   : >> { %8782 = vmatprep.mubr.bf16.mxu0 %v5011_v40  ;;  %8798 = vmatprep.mubr.bf16.mxu1 %v5019_v45  ;;  %v4997_v52 = vld [vmem:[%s10855_s19 + $0xdb] sm:$0xff]  ;;  %v4998_v53 = vld [vmem:[%s10855_s19 + $0xe3] sm:$0xff]  ;;  %v4983_v54 = vld [vmem:[%s10855_s19 + $0x33] sm:$0xff]  ;;  %v5012_v58 = vpack.c.bf16 %v4982_v51, %v4981_v50 }
 0xc24   : >> { %v4984_v55 = vld [vmem:[%s10855_s19 + $0x3b] sm:$0xff]  ;;  %v4999_v56 = vld [vmem:[%s10855_s19 + $0xf3] sm:$0xff]  ;;  %v5020_v59 = vpack.c.bf16 %v4998_v53, %v4997_v52  ;;  %v5001_v0 = vld [vmem:[%s10855_s19 + $0x10b] sm:$0xff] }
 0xc25   : >> { %8769 = vmatpush3.bf16.msra.mxu0 %v9616_v39  ;;  %9223 = vmatpush3.bf16.msra.mxu1 %v9616_v39  ;;  %v5000_v57 = vld [vmem:[%s10855_s19 + $0xfb] sm:$0xff]  ;;  %v5013_v60 = vpack.c.bf16 %v4984_v55, %v4983_v54  ;;  %v4986_v63 = vld [vmem:[%s10855_s19 + $0x53] sm:$0xff]  ;;  %v4987_v3 = vld [vmem:[%s10855_s19 + $0x63] sm:$0xff] }
 0xc26   : >> { %8770 = vmatprep.subr.bf16.mxu0 %v9617_v41  ;;  %9216 = vmatprep.subr.bf16.mxu1 %v9617_v41  ;;  %v5021_v61 = vpack.c.bf16 %v5000_v57, %v4999_v56  ;;  %v5002_v1 = vld [vmem:[%s10855_s19 + $0x113] sm:$0xff]  ;;  %v4988_v4 = vld [vmem:[%s10855_s19 + $0x6b] sm:$0xff]  ;;  %v5003_v5 = vld [vmem:[%s10855_s19 + $0x123] sm:$0xff]  ;;  %v5014_v7 = vpack.c.bf16 %v4986_v63, %v4985_v62 }
 0xc27   : >> { %v5004_v6 = vld [vmem:[%s10855_s19 + $0x12b] sm:$0xff]  ;;  %v5022_v8 = vpack.c.bf16 %v5002_v1, %v5001_v0  ;;  %v5015_v9 = vpack.c.bf16 %v4988_v4, %v4987_v3  ;;  %v4989_v11 = vld [vmem:[%s10855_s19 + $0x7b] sm:$0xff]  ;;  %v4990_v12 = vld [vmem:[%s10855_s19 + $0x83] sm:$0xff] }
 0xc28   : >> { %v5023_v10 = vpack.c.bf16 %v5004_v6, %v5003_v5  ;;  %v5005_v13 = vld [vmem:[%s10855_s19 + $0x13b] sm:$0xff]  ;;  %v5006_v14 = vld [vmem:[%s10855_s19 + $0x143] sm:$0xff]  ;;  %v4991_v15 = vld [vmem:[%s10855_s19 + $0x93] sm:$0xff]  ;;  %v5016_v19 = vpack.c.bf16 %v4990_v12, %v4989_v11 }
 0xc29   : >> { %8771 = vmatpush3.bf16.msra.mxu0 %v9617_v41  ;;  %9224 = vmatpush3.bf16.msra.mxu1 %v9617_v41  ;;  %v4992_v16 = vld [vmem:[%s10855_s19 + $0x9b] sm:$0xff]  ;;  %v5007_v17 = vld [vmem:[%s10855_s19 + $0x153] sm:$0xff]  ;;  %v5024_v20 = vpack.c.bf16 %v5006_v14, %v5005_v13  ;;  %v4993_v23 = vld [vmem:[%s10855_s19 + $0xab] sm:$0xff] }
 0xc2a   : >> { %8772 = vmatprep.subr.bf16.mxu0 %v9618_v43  ;;  %9217 = vmatprep.subr.bf16.mxu1 %v9618_v43  ;;  %v5008_v18 = vld [vmem:[%s10855_s19 + $0x15b] sm:$0xff]  ;;  %v5017_v21 = vpack.c.bf16 %v4992_v16, %v4991_v15  ;;  %v4994_v24 = vld [vmem:[%s10855_s19 + $0xb3] sm:$0xff]  ;;  %v5009_v25 = vld [vmem:[%s10855_s19 + $0x16b] sm:$0xff] }
 0xc2b   : >> { %v5025_v22 = vpack.c.bf16 %v5008_v18, %v5007_v17  ;;  %v5010_v26 = vld [vmem:[%s10855_s19 + $0x173] sm:$0xff]  ;;  %v5018_v27 = vpack.c.bf16 %v4994_v24, %v4993_v23  ;;  %v5046_v36 = vld [vmem:[#allocation6 + $0x98] sm:$0xff]  ;;  %v5033_v53 = vld [vmem:[#allocation6 + $0x30] sm:$0xff] }
 0xc2c   : >> { %v5026_v28 = vpack.c.bf16 %v5010_v26, %v5009_v25  ;;  %v5028_v41 = vld [vmem:[#allocation6 + $0x8] sm:$0xff]  ;;  %v5049_v54 = vld [vmem:[#allocation6 + $0xb0] sm:$0xff]  ;;  %v5031_v55 = vld [vmem:[#allocation6 + $0x20] sm:$0xff] }
 0xc2d   : >> { %8773 = vmatpush3.bf16.msra.mxu0 %v9618_v43  ;;  %9225 = vmatpush3.bf16.msra.mxu1 %v9618_v43  ;;  %v5044_v42 = vld [vmem:[#allocation6 + $0x88] sm:$0xff]  ;;  %v5047_v56 = vld [vmem:[#allocation6 + $0xa0] sm:$0xff]  ;;  %v5037_v14 = vld [vmem:[#allocation6 + $0x50] sm:$0xff] }
 0xc2e   : >> { %8774 = vmatprep.subr.bf16.mxu0 %v9619_v46  ;;  %9218 = vmatprep.subr.bf16.mxu1 %v9619_v46  ;;  %v5032_v1 = vld [vmem:[#allocation6 + $0x28] sm:$0xff]  ;;  %v5053_v15 = vld [vmem:[#allocation6 + $0xd0] sm:$0xff]  ;;  %v5035_v16 = vld [vmem:[#allocation6 + $0x40] sm:$0xff] }
 0xc2f   : >> { %v5048_v3 = vld [vmem:[#allocation6 + $0xa8] sm:$0xff]  ;;  %v5051_v17 = vld [vmem:[#allocation6 + $0xc0] sm:$0xff] }
 0xc30   : >> { %v5036_v26 = vld [vmem:[#allocation6 + $0x48] sm:$0xff] }
 0xc31   : >> { %8775 = vmatpush3.bf16.msra.mxu0 %v9619_v46  ;;  %9226 = vmatpush3.bf16.msra.mxu1 %v9619_v46 }
 0xc32   : >> { %8776 = vmatprep.subr.bf16.mxu0 %v9620_v47  ;;  %9219 = vmatprep.subr.bf16.mxu1 %v9620_v47 }
 0xc35   : >> { %8777 = vmatpush3.bf16.msra.mxu0 %v9620_v47  ;;  %9227 = vmatpush3.bf16.msra.mxu1 %v9620_v47 }
 0xc36   : >> { %8778 = vmatprep.subr.bf16.mxu0 %v9621_v48  ;;  %9220 = vmatprep.subr.bf16.mxu1 %v9621_v48 }
 0xc39   : >> { %8779 = vmatpush3.bf16.msra.mxu0 %v9621_v48  ;;  %9228 = vmatpush3.bf16.msra.mxu1 %v9621_v48 }
 0xc3a   : >> { %8780 = vmatprep.subr.bf16.mxu0 %v9622_v49  ;;  %9221 = vmatprep.subr.bf16.mxu1 %v9622_v49 }
 0xc3d   : >> { %8781 = vmatpush3.bf16.msra.mxu0 %v9622_v49  ;;  %9229 = vmatpush3.bf16.msra.mxu1 %v9622_v49 }
 0xc40   : >> { %8783 = vmatmul.mubr.bf16.vlgmr.msra.gmra.mrb[0].mxu0 %v5012_v58  ;;  %8799 = vmatmul.mubr.bf16.vlgmr.msra.gmra.mrb[0].mxu1 %v5020_v59  ;;  %v5034_v59 = vld [vmem:[#allocation6 + $0x38] sm:$0xff] }
 0xc41   : >> { %8786 = vmatprep.mubr.bf16.mxu0 %v5013_v60  ;;  %8802 = vmatprep.mubr.bf16.mxu1 %v5021_v61  ;;  %v5050_v60 = vld [vmem:[#allocation6 + $0xb8] sm:$0xff] }
 0xc48   : >> { %8787 = vmatmul.mubr.bf16.gmra.mrb[4].mxu0 %v5014_v7  ;;  %8803 = vmatmul.mubr.bf16.gmra.mrb[4].mxu1 %v5022_v8 }
 0xc49   : >> { %8790 = vmatprep.mubr.bf16.mxu0 %v5015_v9  ;;  %8806 = vmatprep.mubr.bf16.mxu1 %v5023_v10 }
 0xc50   : >> { %8791 = vmatmul.mubr.bf16.gmra.mrb[8].mxu0 %v5016_v19  ;;  %8807 = vmatmul.mubr.bf16.gmra.mrb[8].mxu1 %v5024_v20  ;;  %v5038_v20 = vld [vmem:[#allocation6 + $0x58] sm:$0xff] }
 0xc51   : >> { %8794 = vmatprep.mubr.bf16.mxu0 %v5017_v21  ;;  %8810 = vmatprep.mubr.bf16.mxu1 %v5025_v22  ;;  %v5054_v21 = vld [vmem:[#allocation6 + $0xd8] sm:$0xff] }
 0xc58   : >> { %8795 = vmatmul.mubr.bf16.gmra.mrb[12].mxu0 %v5018_v27  ;;  %8811 = vmatmul.mubr.bf16.gmra.mrb[12].mxu1 %v5026_v28  ;;  %v5052_v27 = vld [vmem:[#allocation6 + $0xc8] sm:$0xff] }
 0xd13   : >> { %v8784_v33 = vpop.f32.mrb[0].mxu0  ;;  %v8800_v34 = vpop.f32.mrb[0].mxu1 }
 0xd14   : >> { %v5291_v37 = vadd.f32 %v8784_v33, %v5029_v29  ;;  %v5307_v38 = vadd.f32 %v8800_v34, %v5045_v30  ;;  %v5162_v39 = vpop.f32.mrb[1].mxu0  ;;  %v5226_v40 = vpop.f32.mrb[1].mxu1 }
 0xd15   : >> { %v5289_v43 = vadd.f32 %v5162_v39, %v5027_v31  ;;  %v5305_v44 = vadd.f32 %v5226_v40, %v5043_v32  ;;  %v8785_v45 = vpop.f32.mrb[2].mxu0  ;;  %v8801_v46 = vpop.f32.mrb[2].mxu1  ;;  %v5057_v39 = vld [vmem:[#allocation6 + $0xf0] sm:$0xff]  ;;  %v5039_v40 = vld [vmem:[#allocation6 + $0x60] sm:$0xff] }
 0xd16   : >> { %5323 = vst [vmem:[#allocation6 + $0x10] sm:$0xff] %v5291_v37  ;;  %5339 = vst [vmem:[#allocation6 + $0x90] sm:$0xff] %v5307_v38  ;;  %v5292_v47 = vadd.f32 %v8785_v45, %v5030_v35  ;;  %v5308_v48 = vadd.f32 %v8801_v46, %v5046_v36  ;;  %v5165_v49 = vpop.f32.mrb[3].mxu0  ;;  %v5229_v50 = vpop.f32.mrb[3].mxu1  ;;  %v5041_v38 = vld [vmem:[#allocation6 + $0x70] sm:$0xff]  ;;  %v5058_v45 = vld [vmem:[#allocation6 + $0xf8] sm:$0xff] }
 0xd17   : >> { %5321 = vst [vmem:[#allocation6] sm:$0xff] %v5289_v43  ;;  %5337 = vst [vmem:[#allocation6 + $0x80] sm:$0xff] %v5305_v44  ;;  %v5290_v51 = vadd.f32 %v5165_v49, %v5028_v41  ;;  %v5306_v52 = vadd.f32 %v5229_v50, %v5044_v42  ;;  %v5055_v41 = vld [vmem:[#allocation6 + $0xe0] sm:$0xff]  ;;  %v5042_v44 = vld [vmem:[#allocation6 + $0x78] sm:$0xff] }
 0xd18   : >> { %5324 = vst [vmem:[#allocation6 + $0x18] sm:$0xff] %v5292_v47  ;;  %5340 = vst [vmem:[#allocation6 + $0x98] sm:$0xff] %v5308_v48  ;;  %v5040_v50 = vld [vmem:[#allocation6 + $0x68] sm:$0xff] }
 0xd19   : >> { %5322 = vst [vmem:[#allocation6 + $0x8] sm:$0xff] %v5290_v51  ;;  %5338 = vst [vmem:[#allocation6 + $0x88] sm:$0xff] %v5306_v52  ;;  %v5056_v51 = vld [vmem:[#allocation6 + $0xe8] sm:$0xff] }
 0xd1b   : >> { %v8788_v57 = vpop.f32.mrb[4].mxu0  ;;  %v8804_v58 = vpop.f32.mrb[4].mxu1 }
 0xd1c   : >> { %v5295_v61 = vadd.f32 %v8788_v57, %v5033_v53  ;;  %v5311_v62 = vadd.f32 %v8804_v58, %v5049_v54  ;;  %v5178_v63 = vpop.f32.mrb[5].mxu0  ;;  %v5242_v0 = vpop.f32.mrb[5].mxu1 }
 0xd1d   : >> { %v5293_v4 = vadd.f32 %v5178_v63, %v5031_v55  ;;  %v5309_v5 = vadd.f32 %v5242_v0, %v5047_v56  ;;  %v8789_v6 = vpop.f32.mrb[6].mxu0  ;;  %v8805_v7 = vpop.f32.mrb[6].mxu1 }
 0xd1e   : >> { %5327 = vst [vmem:[#allocation6 + $0x30] sm:$0xff] %v5295_v61  ;;  %5343 = vst [vmem:[#allocation6 + $0xb0] sm:$0xff] %v5311_v62  ;;  %v5296_v8 = vadd.f32 %v8789_v6, %v5034_v59  ;;  %v5312_v9 = vadd.f32 %v8805_v7, %v5050_v60  ;;  %v5181_v10 = vpop.f32.mrb[7].mxu0  ;;  %v5245_v11 = vpop.f32.mrb[7].mxu1 }
 0xd1f   : >> { %5325 = vst [vmem:[#allocation6 + $0x20] sm:$0xff] %v5293_v4  ;;  %5341 = vst [vmem:[#allocation6 + $0xa0] sm:$0xff] %v5309_v5  ;;  %v5294_v12 = vadd.f32 %v5181_v10, %v5032_v1  ;;  %v5310_v13 = vadd.f32 %v5245_v11, %v5048_v3 }
 0xd20   : >> { %5328 = vst [vmem:[#allocation6 + $0x38] sm:$0xff] %v5296_v8  ;;  %5344 = vst [vmem:[#allocation6 + $0xb8] sm:$0xff] %v5312_v9 }
 0xd21   : >> { %5326 = vst [vmem:[#allocation6 + $0x28] sm:$0xff] %v5294_v12  ;;  %5342 = vst [vmem:[#allocation6 + $0xa8] sm:$0xff] %v5310_v13 }
 0xd23   : >> { %v8792_v18 = vpop.f32.mrb[8].mxu0  ;;  %v8808_v19 = vpop.f32.mrb[8].mxu1 }
 0xd24   : >> { %v5299_v22 = vadd.f32 %v8792_v18, %v5037_v14  ;;  %v5315_v23 = vadd.f32 %v8808_v19, %v5053_v15  ;;  %v5194_v24 = vpop.f32.mrb[9].mxu0  ;;  %v5258_v25 = vpop.f32.mrb[9].mxu1 }
 0xd25   : >> { %v5297_v28 = vadd.f32 %v5194_v24, %v5035_v16  ;;  %v5313_v29 = vadd.f32 %v5258_v25, %v5051_v17  ;;  %v8793_v30 = vpop.f32.mrb[10].mxu0  ;;  %v8809_v31 = vpop.f32.mrb[10].mxu1 }
 0xd26   : >> { %5331 = vst [vmem:[#allocation6 + $0x50] sm:$0xff] %v5299_v22  ;;  %5347 = vst [vmem:[#allocation6 + $0xd0] sm:$0xff] %v5315_v23  ;;  %v5300_v32 = vadd.f32 %v8793_v30, %v5038_v20  ;;  %v5316_v33 = vadd.f32 %v8809_v31, %v5054_v21  ;;  %v5197_v34 = vpop.f32.mrb[11].mxu0  ;;  %v5261_v35 = vpop.f32.mrb[11].mxu1 }
 0xd27   : >> { %5329 = vst [vmem:[#allocation6 + $0x40] sm:$0xff] %v5297_v28  ;;  %5345 = vst [vmem:[#allocation6 + $0xc0] sm:$0xff] %v5313_v29  ;;  %v5298_v36 = vadd.f32 %v5197_v34, %v5036_v26  ;;  %v5314_v37 = vadd.f32 %v5261_v35, %v5052_v27 }
 0xd28   : >> { %5332 = vst [vmem:[#allocation6 + $0x58] sm:$0xff] %v5300_v32  ;;  %5348 = vst [vmem:[#allocation6 + $0xd8] sm:$0xff] %v5316_v33 }
 0xd29   : >> { %5330 = vst [vmem:[#allocation6 + $0x48] sm:$0xff] %v5298_v36  ;;  %5346 = vst [vmem:[#allocation6 + $0xc8] sm:$0xff] %v5314_v37 }
 0xd2b   : >> { %v8796_v42 = vpop.f32.mrb[12].mxu0  ;;  %v8812_v43 = vpop.f32.mrb[12].mxu1  ;;  %4975 = sbr.rel (!%p4973_p0) target bundleno = 3099 (0xc1b), region = 354 }
 0xd2c   : >> { %v5303_v46 = vadd.f32 %v8796_v42, %v5041_v38  ;;  %v5319_v47 = vadd.f32 %v8812_v43, %v5057_v39  ;;  %v5210_v48 = vpop.f32.mrb[13].mxu0  ;;  %v5274_v49 = vpop.f32.mrb[13].mxu1 }
 0xd2d   : >> { %v5301_v52 = vadd.f32 %v5210_v48, %v5039_v40  ;;  %v5317_v53 = vadd.f32 %v5274_v49, %v5055_v41  ;;  %v8797_v54 = vpop.f32.mrb[14].mxu0  ;;  %v8813_v55 = vpop.f32.mrb[14].mxu1 }
 0xd2e   : >> { %5335 = vst [vmem:[#allocation6 + $0x70] sm:$0xff] %v5303_v46  ;;  %5351 = vst [vmem:[#allocation6 + $0xf0] sm:$0xff] %v5319_v47  ;;  %v5304_v56 = vadd.f32 %v8797_v54, %v5042_v44  ;;  %v5320_v57 = vadd.f32 %v8813_v55, %v5058_v45  ;;  %v5213_v58 = vpop.f32.mrb[15].mxu0  ;;  %v5277_v59 = vpop.f32.mrb[15].mxu1 }
 0xd2f   : >> { %5333 = vst [vmem:[#allocation6 + $0x60] sm:$0xff] %v5301_v52  ;;  %5349 = vst [vmem:[#allocation6 + $0xe0] sm:$0xff] %v5317_v53  ;;  %v5302_v60 = vadd.f32 %v5213_v58, %v5040_v50  ;;  %v5318_v61 = vadd.f32 %v5277_v59, %v5056_v51 }
 0xd30   : >> { %5336 = vst [vmem:[#allocation6 + $0x78] sm:$0xff] %v5304_v56  ;;  %5352 = vst [vmem:[#allocation6 + $0xf8] sm:$0xff] %v5320_v57 }
 0xd31   : >> { %5334 = vst [vmem:[#allocation6 + $0x68] sm:$0xff] %v5302_v60  ;;  %5350 = vst [vmem:[#allocation6 + $0xe8] sm:$0xff] %v5318_v61 }
 0xd32 LB: >> { %s5359_s21 = smul.u32 24, %s9837_s20  ;;  %v5411_v55 = vld [vmem:[#allocation6 + $0x10] sm:$0xff]  ;;  %v5409_v57 = vld [vmem:[#allocation6] sm:$0xff]  ;;  %v5412_v61 = vld [vmem:[#allocation6 + $0x18] sm:$0xff]  ;;  %s9837_s20 = sphi %s10900_s20, %s5358_s20  }
 0xd33   : >> { %s7631_s22 = smul.u32 320, %s9837_s20  ;;  %v5427_v56 = vld [vmem:[#allocation6 + $0x90] sm:$0xff]  ;;  %v5425_v58 = vld [vmem:[#allocation6 + $0x80] sm:$0xff]  ;;  %s5358_s20 = sadd.s32 1, %s9837_s20  }
 0xd34   : >> { %s10912_s27 = scalar_lea.vmem [#allocation3], %s5359_s21  ;;  %p5355_p1 = scmp.ge.s32.totalorder %s5358_s20, 5  }
 0xd35   : >> { %s10910_s26 = scalar_lea.vmem %s11235_s3, %s7631_s22  ;;  %v5361_v62 = vld [vmem:[%s10912_s27 + $0x4] sm:$0xff]  ;;  %v5362_v63 = vld [vmem:[%s10912_s27 + $0xc] sm:$0xff]  ;;  %v5363_v13 = vld [vmem:[%s10912_s27 + $0x1c] sm:$0xff]  ;;  %5921 = vst [vmem:[#allocation7] sm:$0xff] (%p5355_p1), %v9863_v2  ;;  %s11013_s17 = smov (%p5355_p1), 0  }
 0xd36   : >> { %v9623_v0 = vld [vmem:[%s10910_s26 + $0x100] sm:$0xff]   ;;  %v9624_v1 = vld [vmem:[%s10910_s26 + $0x108] sm:$0xff]   ;;  %v5393_v3 = vpack.c.bf16 %v5362_v63, %v5361_v62  ;;  %v9625_v4 = vld [vmem:[%s10910_s26 + $0x110] sm:$0xff]   ;;  %5922 = vst [vmem:[#allocation7 + $0x8] sm:$0xff] (%p5355_p1), %v9863_v2 }
 0xd37   : >> { %8814 = vmatprep.subr.bf16.mxu0 %v9623_v0  ;;  %9230 = vmatprep.subr.bf16.mxu1 %v9623_v0  ;;  %v5377_v5 = vld [vmem:[%s10912_s27 + $0xc4] sm:$0xff]  ;;  %v9626_v6 = vld [vmem:[%s10910_s26 + $0x118] sm:$0xff]   ;;  %v5378_v7 = vld [vmem:[%s10912_s27 + $0xcc] sm:$0xff]  ;;  %5923 = vst [vmem:[#allocation7 + $0x10] sm:$0xff] (%p5355_p1), %v9863_v2 }
 0xd38   : >> { %8815 = vmatpush3.bf16.msra.mxu0 %v9623_v0  ;;  %9238 = vmatpush3.bf16.msra.mxu1 %v9623_v0  ;;  %v5401_v8 = vpack.c.bf16 %v5378_v7, %v5377_v5  ;;  %v9627_v9 = vld [vmem:[%s10910_s26 + $0x120] sm:$0xff]   ;;  %v9628_v10 = vld [vmem:[%s10910_s26 + $0x128] sm:$0xff]   ;;  %v9629_v11 = vld [vmem:[%s10910_s26 + $0x130] sm:$0xff]   ;;  %5924 = vst [vmem:[#allocation7 + $0x18] sm:$0xff] (%p5355_p1), %v9863_v2 }
 0xd39   : >> { %8816 = vmatprep.subr.bf16.mxu0 %v9624_v1  ;;  %9231 = vmatprep.subr.bf16.mxu1 %v9624_v1  ;;  %v9630_v12 = vld [vmem:[%s10910_s26 + $0x138] sm:$0xff]   ;;  %v5364_v14 = vld [vmem:[%s10912_s27 + $0x24] sm:$0xff]  ;;  %v5367_v25 = vld [vmem:[%s10912_s27 + $0x4c] sm:$0xff]  ;;  %5925 = vst [vmem:[#allocation7 + $0x20] sm:$0xff] (%p5355_p1), %v9863_v2 }
 0xd3a   : >> { %8830 = vmatprep.mubr.bf16.mxu0 %v5393_v3  ;;  %8846 = vmatprep.mubr.bf16.mxu1 %v5401_v8  ;;  %v5379_v15 = vld [vmem:[%s10912_s27 + $0xdc] sm:$0xff]  ;;  %v5380_v16 = vld [vmem:[%s10912_s27 + $0xe4] sm:$0xff]  ;;  %v5365_v17 = vld [vmem:[%s10912_s27 + $0x34] sm:$0xff]  ;;  %v5394_v21 = vpack.c.bf16 %v5364_v14, %v5363_v13  ;;  %5926 = vst [vmem:[#allocation7 + $0x28] sm:$0xff] (%p5355_p1), %v9863_v2 }
 0xd3b   : >> { %v5366_v18 = vld [vmem:[%s10912_s27 + $0x3c] sm:$0xff]  ;;  %v5381_v19 = vld [vmem:[%s10912_s27 + $0xf4] sm:$0xff]  ;;  %v5402_v22 = vpack.c.bf16 %v5380_v16, %v5379_v15  ;;  %v5383_v27 = vld [vmem:[%s10912_s27 + $0x10c] sm:$0xff]  ;;  %5927 = vst [vmem:[#allocation7 + $0x30] sm:$0xff] (%p5355_p1), %v9863_v2 }
 0xd3c   : >> { %8817 = vmatpush3.bf16.msra.mxu0 %v9624_v1  ;;  %9239 = vmatpush3.bf16.msra.mxu1 %v9624_v1  ;;  %v5382_v20 = vld [vmem:[%s10912_s27 + $0xfc] sm:$0xff]  ;;  %v5395_v23 = vpack.c.bf16 %v5366_v18, %v5365_v17  ;;  %v5368_v26 = vld [vmem:[%s10912_s27 + $0x54] sm:$0xff]  ;;  %v5369_v29 = vld [vmem:[%s10912_s27 + $0x64] sm:$0xff]  ;;  %5928 = vst [vmem:[#allocation7 + $0x38] sm:$0xff] (%p5355_p1), %v9863_v2 }
 0xd3d   : >> { %8818 = vmatprep.subr.bf16.mxu0 %v9625_v4  ;;  %9232 = vmatprep.subr.bf16.mxu1 %v9625_v4  ;;  %v5403_v24 = vpack.c.bf16 %v5382_v20, %v5381_v19  ;;  %v5384_v28 = vld [vmem:[%s10912_s27 + $0x114] sm:$0xff]  ;;  %v5370_v30 = vld [vmem:[%s10912_s27 + $0x6c] sm:$0xff]  ;;  %v5385_v31 = vld [vmem:[%s10912_s27 + $0x124] sm:$0xff]  ;;  %v5396_v33 = vpack.c.bf16 %v5368_v26, %v5367_v25 }
 0xd3e   : >> { %v5386_v32 = vld [vmem:[%s10912_s27 + $0x12c] sm:$0xff]  ;;  %v5404_v34 = vpack.c.bf16 %v5384_v28, %v5383_v27  ;;  %v5397_v35 = vpack.c.bf16 %v5370_v30, %v5369_v29  ;;  %v5371_v37 = vld [vmem:[%s10912_s27 + $0x7c] sm:$0xff]  ;;  %v5372_v38 = vld [vmem:[%s10912_s27 + $0x84] sm:$0xff] }
 0xd3f   : >> { %v5405_v36 = vpack.c.bf16 %v5386_v32, %v5385_v31  ;;  %v5387_v39 = vld [vmem:[%s10912_s27 + $0x13c] sm:$0xff]  ;;  %v5388_v40 = vld [vmem:[%s10912_s27 + $0x144] sm:$0xff]  ;;  %v5373_v41 = vld [vmem:[%s10912_s27 + $0x94] sm:$0xff]  ;;  %v5398_v45 = vpack.c.bf16 %v5372_v38, %v5371_v37 }
 0xd40   : >> { %8819 = vmatpush3.bf16.msra.mxu0 %v9625_v4  ;;  %9240 = vmatpush3.bf16.msra.mxu1 %v9625_v4  ;;  %v5374_v42 = vld [vmem:[%s10912_s27 + $0x9c] sm:$0xff]  ;;  %v5389_v43 = vld [vmem:[%s10912_s27 + $0x154] sm:$0xff]  ;;  %v5406_v46 = vpack.c.bf16 %v5388_v40, %v5387_v39  ;;  %v5375_v49 = vld [vmem:[%s10912_s27 + $0xac] sm:$0xff] }
 0xd41   : >> { %8820 = vmatprep.subr.bf16.mxu0 %v9626_v6  ;;  %9233 = vmatprep.subr.bf16.mxu1 %v9626_v6  ;;  %v5390_v44 = vld [vmem:[%s10912_s27 + $0x15c] sm:$0xff]  ;;  %v5399_v47 = vpack.c.bf16 %v5374_v42, %v5373_v41  ;;  %v5376_v50 = vld [vmem:[%s10912_s27 + $0xb4] sm:$0xff]  ;;  %v5391_v51 = vld [vmem:[%s10912_s27 + $0x16c] sm:$0xff] }
 0xd42   : >> { %v5407_v48 = vpack.c.bf16 %v5390_v44, %v5389_v43  ;;  %v5392_v52 = vld [vmem:[%s10912_s27 + $0x174] sm:$0xff]  ;;  %v5400_v53 = vpack.c.bf16 %v5376_v50, %v5375_v49  ;;  %v5428_v62 = vld [vmem:[#allocation6 + $0x98] sm:$0xff]  ;;  %v5415_v16 = vld [vmem:[#allocation6 + $0x30] sm:$0xff] }
 0xd43   : >> { %v5408_v54 = vpack.c.bf16 %v5392_v52, %v5391_v51  ;;  %v5410_v4 = vld [vmem:[#allocation6 + $0x8] sm:$0xff]  ;;  %v5431_v17 = vld [vmem:[#allocation6 + $0xb0] sm:$0xff]  ;;  %v5413_v18 = vld [vmem:[#allocation6 + $0x20] sm:$0xff] }
 0xd44   : >> { %8821 = vmatpush3.bf16.msra.mxu0 %v9626_v6  ;;  %9241 = vmatpush3.bf16.msra.mxu1 %v9626_v6  ;;  %v5426_v5 = vld [vmem:[#allocation6 + $0x88] sm:$0xff]  ;;  %v5429_v19 = vld [vmem:[#allocation6 + $0xa0] sm:$0xff]  ;;  %v5419_v40 = vld [vmem:[#allocation6 + $0x50] sm:$0xff] }
 0xd45   : >> { %8822 = vmatprep.subr.bf16.mxu0 %v9627_v9  ;;  %9234 = vmatprep.subr.bf16.mxu1 %v9627_v9  ;;  %v5414_v28 = vld [vmem:[#allocation6 + $0x28] sm:$0xff]  ;;  %v5435_v41 = vld [vmem:[#allocation6 + $0xd0] sm:$0xff]  ;;  %v5417_v42 = vld [vmem:[#allocation6 + $0x40] sm:$0xff] }
 0xd46   : >> { %v5430_v29 = vld [vmem:[#allocation6 + $0xa8] sm:$0xff]  ;;  %v5433_v43 = vld [vmem:[#allocation6 + $0xc0] sm:$0xff] }
 0xd47   : >> { %v5418_v52 = vld [vmem:[#allocation6 + $0x48] sm:$0xff] }
 0xd48   : >> { %8823 = vmatpush3.bf16.msra.mxu0 %v9627_v9  ;;  %9242 = vmatpush3.bf16.msra.mxu1 %v9627_v9 }
 0xd49   : >> { %8824 = vmatprep.subr.bf16.mxu0 %v9628_v10  ;;  %9235 = vmatprep.subr.bf16.mxu1 %v9628_v10 }
 0xd4c   : >> { %8825 = vmatpush3.bf16.msra.mxu0 %v9628_v10  ;;  %9243 = vmatpush3.bf16.msra.mxu1 %v9628_v10 }
 0xd4d   : >> { %8826 = vmatprep.subr.bf16.mxu0 %v9629_v11  ;;  %9236 = vmatprep.subr.bf16.mxu1 %v9629_v11 }
 0xd50   : >> { %8827 = vmatpush3.bf16.msra.mxu0 %v9629_v11  ;;  %9244 = vmatpush3.bf16.msra.mxu1 %v9629_v11 }
 0xd51   : >> { %8828 = vmatprep.subr.bf16.mxu0 %v9630_v12  ;;  %9237 = vmatprep.subr.bf16.mxu1 %v9630_v12 }
 0xd54   : >> { %8829 = vmatpush3.bf16.msra.mxu0 %v9630_v12  ;;  %9245 = vmatpush3.bf16.msra.mxu1 %v9630_v12 }
 0xd57   : >> { %8831 = vmatmul.mubr.bf16.vlgmr.msra.gmra.mrb[0].mxu0 %v5394_v21  ;;  %8847 = vmatmul.mubr.bf16.vlgmr.msra.gmra.mrb[0].mxu1 %v5402_v22  ;;  %v5416_v22 = vld [vmem:[#allocation6 + $0x38] sm:$0xff] }
 0xd58   : >> { %8834 = vmatprep.mubr.bf16.mxu0 %v5395_v23  ;;  %8850 = vmatprep.mubr.bf16.mxu1 %v5403_v24  ;;  %v5432_v23 = vld [vmem:[#allocation6 + $0xb8] sm:$0xff] }
 0xd5f   : >> { %8835 = vmatmul.mubr.bf16.gmra.mrb[4].mxu0 %v5396_v33  ;;  %8851 = vmatmul.mubr.bf16.gmra.mrb[4].mxu1 %v5404_v34 }
 0xd60   : >> { %8838 = vmatprep.mubr.bf16.mxu0 %v5397_v35  ;;  %8854 = vmatprep.mubr.bf16.mxu1 %v5405_v36 }
 0xd67   : >> { %8839 = vmatmul.mubr.bf16.gmra.mrb[8].mxu0 %v5398_v45  ;;  %8855 = vmatmul.mubr.bf16.gmra.mrb[8].mxu1 %v5406_v46  ;;  %v5420_v46 = vld [vmem:[#allocation6 + $0x58] sm:$0xff] }
 0xd68   : >> { %8842 = vmatprep.mubr.bf16.mxu0 %v5399_v47  ;;  %8858 = vmatprep.mubr.bf16.mxu1 %v5407_v48  ;;  %v5436_v47 = vld [vmem:[#allocation6 + $0xd8] sm:$0xff] }
 0xd6f   : >> { %8843 = vmatmul.mubr.bf16.gmra.mrb[12].mxu0 %v5400_v53  ;;  %8859 = vmatmul.mubr.bf16.gmra.mrb[12].mxu1 %v5408_v54  ;;  %v5434_v53 = vld [vmem:[#allocation6 + $0xc8] sm:$0xff] }
 0xe2a   : >> { %v8832_v59 = vpop.f32.mrb[0].mxu0  ;;  %v8848_v60 = vpop.f32.mrb[0].mxu1 }
 0xe2b   : >> { %v5673_v63 = vadd.f32 %v8832_v59, %v5411_v55  ;;  %v5689_v0 = vadd.f32 %v8848_v60, %v5427_v56  ;;  %v5544_v1 = vpop.f32.mrb[1].mxu0  ;;  %v5608_v3 = vpop.f32.mrb[1].mxu1 }
 0xe2c   : >> { %v5671_v6 = vadd.f32 %v5544_v1, %v5409_v57  ;;  %v5687_v7 = vadd.f32 %v5608_v3, %v5425_v58  ;;  %v8833_v8 = vpop.f32.mrb[2].mxu0  ;;  %v8849_v9 = vpop.f32.mrb[2].mxu1  ;;  %v5439_v1 = vld [vmem:[#allocation6 + $0xf0] sm:$0xff]  ;;  %v5421_v3 = vld [vmem:[#allocation6 + $0x60] sm:$0xff] }
 0xe2d   : >> { %5705 = vst [vmem:[#allocation6 + $0x10] sm:$0xff] %v5673_v63  ;;  %5721 = vst [vmem:[#allocation6 + $0x90] sm:$0xff] %v5689_v0  ;;  %v5674_v10 = vadd.f32 %v8833_v8, %v5412_v61  ;;  %v5690_v11 = vadd.f32 %v8849_v9, %v5428_v62  ;;  %v5547_v12 = vpop.f32.mrb[3].mxu0  ;;  %v5611_v13 = vpop.f32.mrb[3].mxu1  ;;  %v5423_v0 = vld [vmem:[#allocation6 + $0x70] sm:$0xff]  ;;  %v5440_v8 = vld [vmem:[#allocation6 + $0xf8] sm:$0xff] }
 0xe2e   : >> { %5703 = vst [vmem:[#allocation6] sm:$0xff] %v5671_v6  ;;  %5719 = vst [vmem:[#allocation6 + $0x80] sm:$0xff] %v5687_v7  ;;  %v5672_v14 = vadd.f32 %v5547_v12, %v5410_v4  ;;  %v5688_v15 = vadd.f32 %v5611_v13, %v5426_v5  ;;  %v5437_v4 = vld [vmem:[#allocation6 + $0xe0] sm:$0xff]  ;;  %v5424_v7 = vld [vmem:[#allocation6 + $0x78] sm:$0xff] }
 0xe2f   : >> { %5706 = vst [vmem:[#allocation6 + $0x18] sm:$0xff] %v5674_v10  ;;  %5722 = vst [vmem:[#allocation6 + $0x98] sm:$0xff] %v5690_v11  ;;  %v5422_v13 = vld [vmem:[#allocation6 + $0x68] sm:$0xff] }
 0xe30   : >> { %5704 = vst [vmem:[#allocation6 + $0x8] sm:$0xff] %v5672_v14  ;;  %5720 = vst [vmem:[#allocation6 + $0x88] sm:$0xff] %v5688_v15  ;;  %v5438_v14 = vld [vmem:[#allocation6 + $0xe8] sm:$0xff] }
 0xe32   : >> { %v8836_v20 = vpop.f32.mrb[4].mxu0  ;;  %v8852_v21 = vpop.f32.mrb[4].mxu1 }
 0xe33   : >> { %v5677_v24 = vadd.f32 %v8836_v20, %v5415_v16  ;;  %v5693_v25 = vadd.f32 %v8852_v21, %v5431_v17  ;;  %v5560_v26 = vpop.f32.mrb[5].mxu0  ;;  %v5624_v27 = vpop.f32.mrb[5].mxu1 }
 0xe34   : >> { %v5675_v30 = vadd.f32 %v5560_v26, %v5413_v18  ;;  %v5691_v31 = vadd.f32 %v5624_v27, %v5429_v19  ;;  %v8837_v32 = vpop.f32.mrb[6].mxu0  ;;  %v8853_v33 = vpop.f32.mrb[6].mxu1 }
 0xe35   : >> { %5709 = vst [vmem:[#allocation6 + $0x30] sm:$0xff] %v5677_v24  ;;  %5725 = vst [vmem:[#allocation6 + $0xb0] sm:$0xff] %v5693_v25  ;;  %v5678_v34 = vadd.f32 %v8837_v32, %v5416_v22  ;;  %v5694_v35 = vadd.f32 %v8853_v33, %v5432_v23  ;;  %v5563_v36 = vpop.f32.mrb[7].mxu0  ;;  %v5627_v37 = vpop.f32.mrb[7].mxu1  ;;  %v5751_v25 = vld [vmem:[#allocation6 + $0x80] sm:$0xff] (%p5355_p1) }
 0xe36   : >> { %5707 = vst [vmem:[#allocation6 + $0x20] sm:$0xff] %v5675_v30  ;;  %5723 = vst [vmem:[#allocation6 + $0xa0] sm:$0xff] %v5691_v31  ;;  %v5676_v38 = vadd.f32 %v5563_v36, %v5414_v28  ;;  %v5692_v39 = vadd.f32 %v5627_v37, %v5430_v29  ;;  %v5735_v27 = vld [vmem:[#allocation6] sm:$0xff] (%p5355_p1)  ;;  %v5753_v30 = vld [vmem:[#allocation6 + $0x90] sm:$0xff] (%p5355_p1) }
 0xe37   : >> { %5710 = vst [vmem:[#allocation6 + $0x38] sm:$0xff] %v5678_v34  ;;  %5726 = vst [vmem:[#allocation6 + $0xb8] sm:$0xff] %v5694_v35  ;;  %v5752_v26 = vld [vmem:[#allocation6 + $0x88] sm:$0xff] (%p5355_p1)  ;;  %v5754_v31 = vld [vmem:[#allocation6 + $0x98] sm:$0xff] (%p5355_p1) }
 0xe38   : >> { %5708 = vst [vmem:[#allocation6 + $0x28] sm:$0xff] %v5676_v38  ;;  %5724 = vst [vmem:[#allocation6 + $0xa8] sm:$0xff] %v5692_v39  ;;  %v9006_v28 = vpack.c.bf16 (%p5355_p1), %v5752_v26, %v5751_v25  ;;  %v5736_v29 = vld [vmem:[#allocation6 + $0x8] sm:$0xff] (%p5355_p1)  ;;  %v9010_v33 = vpack.c.bf16 (%p5355_p1), %v5754_v31, %v5753_v30  ;;  %v5737_v34 = vld [vmem:[#allocation6 + $0x10] sm:$0xff] (%p5355_p1) }
 0xe39   : > { %v9008_v32 = vpack.c.bf16 (%p5355_p1), %v5736_v29, %v5735_v27  ;;  %v5738_v35 = vld [vmem:[#allocation6 + $0x18] sm:$0xff] (%p5355_p1)  ;;  %v5781_v25 = vld [vmem:[%s11238_s6 + $0x70] sm:$0xff] (%p5355_p1) }
 0xe3a   : >> { %v8840_v44 = vpop.f32.mrb[8].mxu0  ;;  %v8856_v45 = vpop.f32.mrb[8].mxu1  ;;  %9007 = vmatprep.subr.bf16.mxu0 (%p5355_p1), %v9006_v28  ;;  %9246 = vmatprep.subr.bf16.mxu1 (%p5355_p1), %v9006_v28  ;;  %v9012_v38 = vpack.c.bf16 (%p5355_p1), %v5738_v35, %v5737_v34 }
 0xe3b   : >> { %v5681_v48 = vadd.f32 %v8840_v44, %v5419_v40  ;;  %v5697_v49 = vadd.f32 %v8856_v45, %v5435_v41  ;;  %v5576_v50 = vpop.f32.mrb[9].mxu0  ;;  %v5640_v51 = vpop.f32.mrb[9].mxu1  ;;  %9009 = vmatpush3.bf16.msra.mxu0 (%p5355_p1), %v9008_v32  ;;  %9254 = vmatpush3.bf16.msra.mxu1 (%p5355_p1), %v9008_v32 }
 0xe3c   : >> { %v5679_v54 = vadd.f32 %v5576_v50, %v5417_v42  ;;  %v5695_v55 = vadd.f32 %v5640_v51, %v5433_v43  ;;  %v8841_v56 = vpop.f32.mrb[10].mxu0  ;;  %v8857_v57 = vpop.f32.mrb[10].mxu1  ;;  %9011 = vmatprep.subr.bf16.mxu0 (%p5355_p1), %v9010_v33  ;;  %9247 = vmatprep.subr.bf16.mxu1 (%p5355_p1), %v9010_v33  ;;  %v5757_v42 = vld [vmem:[#allocation6 + $0xb0] sm:$0xff] (%p5355_p1)  ;;  %v5768_v50 = vld [vmem:[%s11238_s6 + $0x8] sm:$0xff] (%p5355_p1) }
 0xe3d   : >> { %5713 = vst [vmem:[#allocation6 + $0x50] sm:$0xff] %v5681_v48  ;;  %5729 = vst [vmem:[#allocation6 + $0xd0] sm:$0xff] %v5697_v49  ;;  %v5682_v58 = vadd.f32 %v8841_v56, %v5420_v46  ;;  %v5698_v59 = vadd.f32 %v8857_v57, %v5436_v47  ;;  %v5579_v60 = vpop.f32.mrb[11].mxu0  ;;  %v5643_v61 = vpop.f32.mrb[11].mxu1  ;;  %v5755_v36 = vld [vmem:[#allocation6 + $0xa0] sm:$0xff] (%p5355_p1)  ;;  %v5741_v46 = vld [vmem:[#allocation6 + $0x30] sm:$0xff] (%p5355_p1)  ;;  %5847 = vmatprep.mubr.f32.mxu0 (%p5355_p1), %v5768_v50 }
 0xe3e   : >> { %5711 = vst [vmem:[#allocation6 + $0x40] sm:$0xff] %v5679_v54  ;;  %5727 = vst [vmem:[#allocation6 + $0xc0] sm:$0xff] %v5695_v55  ;;  %v5680_v62 = vadd.f32 %v5579_v60, %v5418_v52  ;;  %v5696_v63 = vadd.f32 %v5643_v61, %v5434_v53  ;;  %v5739_v40 = vld [vmem:[#allocation6 + $0x20] sm:$0xff] (%p5355_p1)  ;;  %v5758_v43 = vld [vmem:[#allocation6 + $0xb8] sm:$0xff] (%p5355_p1) }
 0xe3f   : >> { %5714 = vst [vmem:[#allocation6 + $0x58] sm:$0xff] %v5682_v58  ;;  %5730 = vst [vmem:[#allocation6 + $0xd8] sm:$0xff] %v5698_v59  ;;  %v5756_v37 = vld [vmem:[#allocation6 + $0xa8] sm:$0xff] (%p5355_p1)  ;;  %9013 = vmatpush3.bf16.msra.mxu0 (%p5355_p1), %v9012_v38  ;;  %9255 = vmatpush3.bf16.msra.mxu1 (%p5355_p1), %v9012_v38  ;;  %v9018_v45 = vpack.c.bf16 (%p5355_p1), %v5758_v43, %v5757_v42  ;;  %v5742_v47 = vld [vmem:[#allocation6 + $0x38] sm:$0xff] (%p5355_p1) }
 0xe40   : >> { %5712 = vst [vmem:[#allocation6 + $0x48] sm:$0xff] %v5680_v62  ;;  %5728 = vst [vmem:[#allocation6 + $0xc8] sm:$0xff] %v5696_v63  ;;  %v9014_v39 = vpack.c.bf16 (%p5355_p1), %v5756_v37, %v5755_v36  ;;  %v5740_v41 = vld [vmem:[#allocation6 + $0x28] sm:$0xff] (%p5355_p1)  ;;  %v5776_v51 = vld [vmem:[%s11238_s6 + $0x48] sm:$0xff] (%p5355_p1)  ;;  %v9020_v52 = vpack.c.bf16 (%p5355_p1), %v5742_v47, %v5741_v46 }
 0xe41   : > { %v9016_v44 = vpack.c.bf16 (%p5355_p1), %v5740_v41, %v5739_v40  ;;  %5867 = vmatprep.mubr.f32.mxu1 (%p5355_p1), %v5776_v51 }
 0xe42   : >> { %v8844_v5 = vpop.f32.mrb[12].mxu0  ;;  %v8860_v6 = vpop.f32.mrb[12].mxu1  ;;  %5357 = sbr.rel (!%p5355_p1) target bundleno = 3378 (0xd32), region = 365  ;;  %9015 = vmatprep.subr.bf16.mxu0 (%p5355_p1), %v9014_v39  ;;  %9248 = vmatprep.subr.bf16.mxu1 (%p5355_p1), %v9014_v39 }
 0xe43   : >> { %v5685_v9 = vadd.f32 %v8844_v5, %v5423_v0  ;;  %v5701_v10 = vadd.f32 %v8860_v6, %v5439_v1  ;;  %v5592_v11 = vpop.f32.mrb[13].mxu0  ;;  %v5656_v12 = vpop.f32.mrb[13].mxu1  ;;  %9017 = vmatpush3.bf16.msra.mxu0 (%p5355_p1), %v9016_v44  ;;  %9256 = vmatpush3.bf16.msra.mxu1 (%p5355_p1), %v9016_v44 }
 0xe44   : >> { %v5683_v15 = vadd.f32 %v5592_v11, %v5421_v3  ;;  %v5699_v16 = vadd.f32 %v5656_v12, %v5437_v4  ;;  %v8845_v17 = vpop.f32.mrb[14].mxu0  ;;  %v8861_v18 = vpop.f32.mrb[14].mxu1  ;;  %9019 = vmatprep.subr.bf16.mxu0 (%p5355_p1), %v9018_v45  ;;  %9249 = vmatprep.subr.bf16.mxu1 (%p5355_p1), %v9018_v45  ;;  %v5761_v56 = vld [vmem:[#allocation6 + $0xd0] sm:$0xff] (%p5355_p1) }
 0xe45   : >> { %5717 = vst [vmem:[#allocation6 + $0x70] sm:$0xff] %v5685_v9  ;;  %5733 = vst [vmem:[#allocation6 + $0xf0] sm:$0xff] %v5701_v10  ;;  %v5686_v19 = vadd.f32 %v8845_v17, %v5424_v7  ;;  %v5702_v20 = vadd.f32 %v8861_v18, %v5440_v8  ;;  %v5595_v21 = vpop.f32.mrb[15].mxu0  ;;  %v5659_v22 = vpop.f32.mrb[15].mxu1  ;;  %v5759_v48 = vld [vmem:[#allocation6 + $0xc0] sm:$0xff] (%p5355_p1)  ;;  %v5745_v60 = vld [vmem:[#allocation6 + $0x50] sm:$0xff] (%p5355_p1) }
 0xe46   : >> { %5715 = vst [vmem:[#allocation6 + $0x60] sm:$0xff] %v5683_v15  ;;  %5731 = vst [vmem:[#allocation6 + $0xe0] sm:$0xff] %v5699_v16  ;;  %v5684_v23 = vadd.f32 %v5595_v21, %v5422_v13  ;;  %v5700_v24 = vadd.f32 %v5659_v22, %v5438_v14  ;;  %v5743_v54 = vld [vmem:[#allocation6 + $0x40] sm:$0xff] (%p5355_p1)  ;;  %v5762_v57 = vld [vmem:[#allocation6 + $0xd8] sm:$0xff] (%p5355_p1) }
 0xe47   : >> { %5718 = vst [vmem:[#allocation6 + $0x78] sm:$0xff] %v5686_v19  ;;  %5734 = vst [vmem:[#allocation6 + $0xf8] sm:$0xff] %v5702_v20  ;;  %v5760_v49 = vld [vmem:[#allocation6 + $0xc8] sm:$0xff] (%p5355_p1)  ;;  %9021 = vmatpush3.bf16.msra.mxu0 (%p5355_p1), %v9020_v52  ;;  %9257 = vmatpush3.bf16.msra.mxu1 (%p5355_p1), %v9020_v52  ;;  %v9026_v59 = vpack.c.bf16 (%p5355_p1), %v5762_v57, %v5761_v56  ;;  %v5746_v61 = vld [vmem:[#allocation6 + $0x58] sm:$0xff] (%p5355_p1) }
 0xe48   : >> { %5716 = vst [vmem:[#allocation6 + $0x68] sm:$0xff] %v5684_v23  ;;  %5732 = vst [vmem:[#allocation6 + $0xe8] sm:$0xff] %v5700_v24  ;;  %v9022_v53 = vpack.c.bf16 (%p5355_p1), %v5760_v49, %v5759_v48  ;;  %v5744_v55 = vld [vmem:[#allocation6 + $0x48] sm:$0xff] (%p5355_p1)  ;;  %v9028_v0 = vpack.c.bf16 (%p5355_p1), %v5746_v61, %v5745_v60  ;;  %v5767_v12 = vld [vmem:[%s11238_s6] sm:$0xff] (%p5355_p1) }
 0xe49   : > { %v9024_v58 = vpack.c.bf16 %v5744_v55, %v5743_v54  ;;  %v5775_v13 = vld [vmem:[%s11238_s6 + $0x40] sm:$0xff]  ;;  %v5770_v14 = vld [vmem:[%s11238_s6 + $0x18] sm:$0xff]  ;;  %v5769_v16 = vld [vmem:[%s11238_s6 + $0x10] sm:$0xff] }
 0xe4a   : > { %9023 = vmatprep.subr.bf16.mxu0 %v9022_v53  ;;  %9250 = vmatprep.subr.bf16.mxu1 %v9022_v53  ;;  %v5778_v15 = vld [vmem:[%s11238_s6 + $0x58] sm:$0xff]  ;;  %v5777_v17 = vld [vmem:[%s11238_s6 + $0x50] sm:$0xff]  ;;  %v5772_v18 = vld [vmem:[%s11238_s6 + $0x28] sm:$0xff] }
 0xe4b   : > { %9025 = vmatpush3.bf16.msra.mxu0 %v9024_v58  ;;  %9258 = vmatpush3.bf16.msra.mxu1 %v9024_v58  ;;  %v5780_v19 = vld [vmem:[%s11238_s6 + $0x68] sm:$0xff]  ;;  %v5771_v20 = vld [vmem:[%s11238_s6 + $0x20] sm:$0xff]  ;;  %v5774_v22 = vld [vmem:[%s11238_s6 + $0x38] sm:$0xff] }
 0xe4c   : > { %9027 = vmatprep.subr.bf16.mxu0 %v9026_v59  ;;  %9251 = vmatprep.subr.bf16.mxu1 %v9026_v59  ;;  %v5765_v5 = vld [vmem:[#allocation6 + $0xf0] sm:$0xff]  ;;  %v5782_v23 = vld [vmem:[%s11238_s6 + $0x78] sm:$0xff]  ;;  %v5773_v24 = vld [vmem:[%s11238_s6 + $0x30] sm:$0xff] }
 0xe4d   : > { %v5763_v62 = vld [vmem:[#allocation6 + $0xe0] sm:$0xff]  ;;  %v5749_v9 = vld [vmem:[#allocation6 + $0x70] sm:$0xff] }
 0xe4e   : > { %v5747_v3 = vld [vmem:[#allocation6 + $0x60] sm:$0xff]  ;;  %v5766_v6 = vld [vmem:[#allocation6 + $0xf8] sm:$0xff]  ;;  %v5779_v21 = vld [vmem:[%s11238_s6 + $0x60] sm:$0xff] }
 0xe4f   : > { %v5764_v63 = vld [vmem:[#allocation6 + $0xe8] sm:$0xff]  ;;  %9029 = vmatpush3.bf16.msra.mxu0 %v9028_v0  ;;  %9259 = vmatpush3.bf16.msra.mxu1 %v9028_v0  ;;  %v9034_v8 = vpack.c.bf16 %v5766_v6, %v5765_v5  ;;  %v5750_v10 = vld [vmem:[#allocation6 + $0x78] sm:$0xff] }
 0xe50   : > { %v9030_v1 = vpack.c.bf16 %v5764_v63, %v5763_v62  ;;  %v5748_v4 = vld [vmem:[#allocation6 + $0x68] sm:$0xff]  ;;  %v9036_v11 = vpack.c.bf16 %v5750_v10, %v5749_v9 }
 0xe51   : > { %v9032_v7 = vpack.c.bf16 %v5748_v4, %v5747_v3 }
 0xe52   : > { %9031 = vmatprep.subr.bf16.mxu0 %v9030_v1  ;;  %9252 = vmatprep.subr.bf16.mxu1 %v9030_v1 }
 0xe53   : > { %9033 = vmatpush3.bf16.msra.mxu0 %v9032_v7  ;;  %9260 = vmatpush3.bf16.msra.mxu1 %v9032_v7 }
 0xe54   : > { %9035 = vmatprep.subr.bf16.mxu0 %v9034_v8  ;;  %9253 = vmatprep.subr.bf16.mxu1 %v9034_v8 }
 0xe57   : > { %9037 = vmatpush3.bf16.msra.mxu0 %v9036_v11  ;;  %9261 = vmatpush3.bf16.msra.mxu1 %v9036_v11 }
 0xe5a   : > { %5848 = vmatmul.mubr.f32.vlgmr.msra.gmra.mrb[0].mxu0 %v5767_v12  ;;  %5868 = vmatmul.mubr.f32.vlgmr.msra.gmra.mrb[0].mxu1 %v5775_v13 }
 0xe5b   : > { %5852 = vmatprep.mubr.f32.mxu0 %v5770_v14  ;;  %5872 = vmatprep.mubr.f32.mxu1 %v5778_v15 }
 0xe5e   : > { %5853 = vmatmul.mubr.f32.gmra.mrb[2].mxu0 %v5769_v16  ;;  %5873 = vmatmul.mubr.f32.gmra.mrb[2].mxu1 %v5777_v17 }
 0xe5f   : > { %5857 = vmatprep.mubr.f32.mxu0 %v5772_v18  ;;  %5877 = vmatprep.mubr.f32.mxu1 %v5780_v19 }
 0xe62   : > { %5858 = vmatmul.mubr.f32.gmra.mrb[4].mxu0 %v5771_v20  ;;  %5878 = vmatmul.mubr.f32.gmra.mrb[4].mxu1 %v5779_v21 }
 0xe63   : > { %5862 = vmatprep.mubr.f32.mxu0 %v5774_v22  ;;  %5882 = vmatprep.mubr.f32.mxu1 %v5782_v23 }
 0xe66   : > { %5863 = vmatmul.mubr.f32.gmra.mrb[6].mxu0 %v5773_v24  ;;  %5883 = vmatmul.mubr.f32.gmra.mrb[6].mxu1 %v5781_v25 }
 0xf2d   : > { %v8142_v26 = vpop.f32.mrb[0].mxu0  ;;  %v8154_v27 = vpop.f32.mrb[0].mxu1 }
 0xf2e   : > { %v8143_v28 = vpop.f32.mrb[1].mxu0  ;;  %v8155_v29 = vpop.f32.mrb[1].mxu1 }
 0xf2f   : > { %v8144_v30 = vadd.f32 %v8143_v28, %v8142_v26  ;;  %v8156_v31 = vadd.f32 %v8155_v29, %v8154_v27 }
 0xf31   : > { %vm5888_vm0 = vcmp.ge.f32.partialorder %v8144_v30, 0.0  ;;  %v5896_v32 = vmul.f32 0.2, %v8144_v30  ;;  %vm5892_vm1 = vcmp.ge.f32.partialorder %v8156_v31, 0.0  ;;  %v5900_v33 = vmul.f32 0.2, %v8156_v31 }
 0xf32   : > { %v8145_v34 = vpop.f32.mrb[2].mxu0  ;;  %v8157_v35 = vpop.f32.mrb[2].mxu1 }
 0xf33   : > { %v5904_v36 = vsel %vm5888_vm0, %v8144_v30, %v5896_v32  ;;  %v5908_v37 = vsel %vm5892_vm1, %v8156_v31, %v5900_v33  ;;  %v8146_v38 = vpop.f32.mrb[3].mxu0  ;;  %v8158_v39 = vpop.f32.mrb[3].mxu1 }
 0xf34   : > { %5913 = vst [vmem:[#allocation4 + $0x11] sm:$0xff] %v5904_v36  ;;  %5917 = vst [vmem:[#allocation4 + $0x51] sm:$0xff] %v5908_v37  ;;  %v8147_v40 = vadd.f32 %v8146_v38, %v8145_v34  ;;  %v8159_v41 = vadd.f32 %v8158_v39, %v8157_v35 }
 0xf35   : > { %v8148_v42 = vpop.f32.mrb[4].mxu0  ;;  %v8160_v43 = vpop.f32.mrb[4].mxu1 }
 0xf36   : > { %vm5889_vm2 = vcmp.ge.f32.partialorder %v8147_v40, 0.0  ;;  %v5897_v44 = vmul.f32 0.2, %v8147_v40  ;;  %vm5893_vm3 = vcmp.ge.f32.partialorder %v8159_v41, 0.0  ;;  %v5901_v45 = vmul.f32 0.2, %v8159_v41 }
 0xf37   : > { %v8149_v46 = vpop.f32.mrb[5].mxu0  ;;  %v8161_v47 = vpop.f32.mrb[5].mxu1 }
 0xf38   : > { %v5905_v48 = vsel %vm5889_vm2, %v8147_v40, %v5897_v44  ;;  %v5909_v49 = vsel %vm5893_vm3, %v8159_v41, %v5901_v45  ;;  %v8150_v50 = vadd.f32 %v8149_v46, %v8148_v42  ;;  %v8162_v51 = vadd.f32 %v8161_v47, %v8160_v43 }
 0xf39   : > { %5914 = vst [vmem:[#allocation4 + $0x21] sm:$0xff] %v5905_v48  ;;  %5918 = vst [vmem:[#allocation4 + $0x61] sm:$0xff] %v5909_v49  ;;  %v8151_v52 = vpop.f32.mrb[6].mxu0  ;;  %v8163_v53 = vpop.f32.mrb[6].mxu1 }
 0xf3a   : > { %vm5890_vm4 = vcmp.ge.f32.partialorder %v8150_v50, 0.0  ;;  %v5898_v54 = vmul.f32 0.2, %v8150_v50  ;;  %vm5894_vm5 = vcmp.ge.f32.partialorder %v8162_v51, 0.0  ;;  %v5902_v55 = vmul.f32 0.2, %v8162_v51 }
 0xf3b   : > { %v8152_v56 = vpop.f32.mrb[7].mxu0  ;;  %v8164_v57 = vpop.f32.mrb[7].mxu1 }
 0xf3c   : > { %v5906_v58 = vsel %vm5890_vm4, %v8150_v50, %v5898_v54  ;;  %v5910_v59 = vsel %vm5894_vm5, %v8162_v51, %v5902_v55  ;;  %v8153_v60 = vadd.f32 %v8152_v56, %v8151_v52  ;;  %v8165_v61 = vadd.f32 %v8164_v57, %v8163_v53 }
 0xf3d   : > { %5915 = vst [vmem:[#allocation4 + $0x31] sm:$0xff] %v5906_v58  ;;  %5919 = vst [vmem:[#allocation4 + $0x71] sm:$0xff] %v5910_v59 }
 0xf3e   : > { %vm5891_vm6 = vcmp.ge.f32.partialorder %v8153_v60, 0.0  ;;  %v5899_v62 = vmul.f32 0.2, %v8153_v60  ;;  %vm5895_vm7 = vcmp.ge.f32.partialorder %v8165_v61, 0.0  ;;  %v5903_v63 = vmul.f32 0.2, %v8165_v61 }
 0xf40   : > { %v5907_v0 = vsel %vm5891_vm6, %v8153_v60, %v5899_v62  ;;  %v5911_v1 = vsel %vm5895_vm7, %v8165_v61, %v5903_v63 }
 0xf41   : > { %5916 = vst [vmem:[#allocation4 + $0x41] sm:$0xff] %v5907_v0  ;;  %5920 = vst [vmem:[#allocation4 + $0x81] sm:$0xff] %v5911_v1 }
 0xf42 LB: >> { %s7796_s18 = smul.u32 192, %s9841_s17  ;;  %s7656_s19 = sshll.u32 %s9841_s17, 4  ;;  %v5951_v23 = vld [vmem:[#allocation7 + $0x10] sm:$0xff]  ;;  %v5949_v25 = vld [vmem:[#allocation7] sm:$0xff]  ;;  %v5952_v29 = vld [vmem:[#allocation7 + $0x18] sm:$0xff]  ;;  %s9841_s17 = sphi %s11013_s17, %s5934_s17  }
 0xf43   : >> { %s11025_s23 = scalar_lea.vmem [#allocation4], %s7656_s19  ;;  %v5955_v24 = vld [vmem:[#allocation7 + $0x30] sm:$0xff]  ;;  %v5953_v26 = vld [vmem:[#allocation7 + $0x20] sm:$0xff]  ;;  %v5956_v30 = vld [vmem:[#allocation7 + $0x38] sm:$0xff]  ;;  %s5934_s17 = sadd.s32 1, %s9841_s17  }
 0xf44   : >> { %s11023_s22 = scalar_lea.vmem %s11236_s4, %s7796_s18  ;;  %v5950_v35 = vld [vmem:[#allocation7 + $0x8] sm:$0xff]  ;;  %p5931_p2 = scmp.ge.s32.totalorder %s5934_s17, 3  }
 0xf45   : >> { %v9631_v5 = vld [vmem:[%s11023_s22] sm:$0xff]   ;;  %v9632_v6 = vld [vmem:[%s11023_s22 + $0x8] sm:$0xff]   ;;  %v9633_v8 = vld [vmem:[%s11023_s22 + $0x10] sm:$0xff]   ;;  %s11046_s25 = smov (%p5931_p2), 0  }
 0xf46   : >> { %8862 = vmatprep.subr.bf16.mxu0 %v9631_v5  ;;  %9262 = vmatprep.subr.bf16.mxu1 %v9631_v5  ;;  %v9634_v10 = vld [vmem:[%s11023_s22 + $0x18] sm:$0xff]   ;;  %v9635_v13 = vld [vmem:[%s11023_s22 + $0x20] sm:$0xff]   ;;  %v9636_v14 = vld [vmem:[%s11023_s22 + $0x28] sm:$0xff]  }
 0xf47   : >> { %8863 = vmatpush3.bf16.msra.mxu0 %v9631_v5  ;;  %9270 = vmatpush3.bf16.msra.mxu1 %v9631_v5  ;;  %v9637_v15 = vld [vmem:[%s11023_s22 + $0x30] sm:$0xff]   ;;  %v9638_v16 = vld [vmem:[%s11023_s22 + $0x38] sm:$0xff]  }
 0xf48   : >> { %v5937_v3 = vld [vmem:[%s11025_s23] sm:$0xff]  ;;  %v5938_v4 = vld [vmem:[%s11025_s23 + $0x10] sm:$0xff]  ;;  %8864 = vmatprep.subr.bf16.mxu0 %v9632_v6  ;;  %9263 = vmatprep.subr.bf16.mxu1 %v9632_v6  ;;  %v5954_v36 = vld [vmem:[#allocation7 + $0x28] sm:$0xff] }
 0xf49   : >> { %v5945_v7 = vpack.c.bf16 %v5938_v4, %v5937_v3  ;;  %v5941_v9 = vld [vmem:[%s11025_s23 + $0x40] sm:$0xff]  ;;  %v5942_v11 = vld [vmem:[%s11025_s23 + $0x50] sm:$0xff] }
 0xf4a   : >> { %v5947_v12 = vpack.c.bf16 %v5942_v11, %v5941_v9  ;;  %v5939_v17 = vld [vmem:[%s11025_s23 + $0x20] sm:$0xff]  ;;  %v5940_v18 = vld [vmem:[%s11025_s23 + $0x30] sm:$0xff] }
 0xf4b   : >> { %8878 = vmatprep.mubr.bf16.mxu0 %v5945_v7  ;;  %8865 = vmatpush3.bf16.msra.mxu0 %v9632_v6  ;;  %v5943_v19 = vld [vmem:[%s11025_s23 + $0x60] sm:$0xff]  ;;  %v5944_v20 = vld [vmem:[%s11025_s23 + $0x70] sm:$0xff]  ;;  %v5946_v21 = vpack.c.bf16 %v5940_v18, %v5939_v17 }
 0xf4c   : >> { %9271 = vmatpush3.bf16.msra.mxu1 %v9632_v6  ;;  %8866 = vmatprep.subr.bf16.mxu0 %v9633_v8  ;;  %v5948_v22 = vpack.c.bf16 %v5944_v20, %v5943_v19 }
 0xf4d   : >> { %9264 = vmatprep.subr.bf16.mxu1 %v9633_v8  ;;  %8882 = vmatprep.mubr.bf16.mxu1 %v5947_v12 }
 0xf4f   : >> { %8867 = vmatpush3.bf16.msra.mxu0 %v9633_v8 }
 0xf50   : >> { %9272 = vmatpush3.bf16.msra.mxu1 %v9633_v8  ;;  %8868 = vmatprep.subr.bf16.mxu0 %v9634_v10 }
 0xf51   : >> { %9265 = vmatprep.subr.bf16.mxu1 %v9634_v10 }
 0xf53   : >> { %8869 = vmatpush3.bf16.msra.mxu0 %v9634_v10 }
 0xf54   : >> { %9273 = vmatpush3.bf16.msra.mxu1 %v9634_v10  ;;  %8870 = vmatprep.subr.bf16.mxu0 %v9635_v13 }
 0xf55   : >> { %9266 = vmatprep.subr.bf16.mxu1 %v9635_v13 }
 0xf57   : >> { %8871 = vmatpush3.bf16.msra.mxu0 %v9635_v13 }
 0xf58   : >> { %9274 = vmatpush3.bf16.msra.mxu1 %v9635_v13  ;;  %8872 = vmatprep.subr.bf16.mxu0 %v9636_v14 }
 0xf59   : >> { %9267 = vmatprep.subr.bf16.mxu1 %v9636_v14 }
 0xf5b   : >> { %8873 = vmatpush3.bf16.msra.mxu0 %v9636_v14 }
 0xf5c   : >> { %9275 = vmatpush3.bf16.msra.mxu1 %v9636_v14  ;;  %8874 = vmatprep.subr.bf16.mxu0 %v9637_v15 }
 0xf5d   : >> { %9268 = vmatprep.subr.bf16.mxu1 %v9637_v15 }
 0xf5f   : >> { %8875 = vmatpush3.bf16.msra.mxu0 %v9637_v15 }
 0xf60   : >> { %9276 = vmatpush3.bf16.msra.mxu1 %v9637_v15  ;;  %8876 = vmatprep.subr.bf16.mxu0 %v9638_v16 }
 0xf61   : >> { %9269 = vmatprep.subr.bf16.mxu1 %v9638_v16 }
 0xf63   : >> { %8877 = vmatpush3.bf16.msra.mxu0 %v9638_v16 }
 0xf64   : >> { %9277 = vmatpush3.bf16.msra.mxu1 %v9638_v16 }
 0xf66   : >> { %8879 = vmatmul.mubr.bf16.vlgmr.msra.gmra.mrb[0].mxu0 %v5946_v21 }
 0xf67   : >> { %8883 = vmatmul.mubr.bf16.vlgmr.msra.gmra.mrb[0].mxu1 %v5948_v22 }
0x1039   : >> { %v8880_v27 = vpop.f32.mrb[0].mxu0 }
0x103a   : >> { %v8884_v28 = vpop.f32.mrb[0].mxu1  ;;  %v6092_v31 = vadd.f32 %v8880_v27, %v5951_v23  ;;  %v6059_v33 = vpop.f32.mrb[1].mxu0  ;;  %5933 = sbr.rel (!%p5931_p2) target bundleno = 3906 (0xf42), region = 376 }
0x103b   : >> { %v6096_v32 = vadd.f32 %v8884_v28, %v5955_v24  ;;  %v6075_v34 = vpop.f32.mrb[1].mxu1  ;;  %v6090_v37 = vadd.f32 %v6059_v33, %v5949_v25  ;;  %v8881_v39 = vpop.f32.mrb[2].mxu0 }
0x103c   : >> { %v6094_v38 = vadd.f32 %v6075_v34, %v5953_v26  ;;  %v8885_v40 = vpop.f32.mrb[2].mxu1  ;;  %6100 = vst [vmem:[#allocation7 + $0x10] sm:$0xff] %v6092_v31  ;;  %v6093_v41 = vadd.f32 %v8881_v39, %v5952_v29  ;;  %v6062_v43 = vpop.f32.mrb[3].mxu0 }
0x103d   : >> { %6104 = vst [vmem:[#allocation7 + $0x30] sm:$0xff] %v6096_v32  ;;  %v6097_v42 = vadd.f32 %v8885_v40, %v5956_v30  ;;  %v6078_v44 = vpop.f32.mrb[3].mxu1  ;;  %6098 = vst [vmem:[#allocation7] sm:$0xff] %v6090_v37  ;;  %v6091_v45 = vadd.f32 %v6062_v43, %v5950_v35 }
0x103e   : >> { %6102 = vst [vmem:[#allocation7 + $0x20] sm:$0xff] %v6094_v38  ;;  %v6095_v46 = vadd.f32 %v6078_v44, %v5954_v36  ;;  %6101 = vst [vmem:[#allocation7 + $0x18] sm:$0xff] %v6093_v41 }
0x103f   : >> { %6105 = vst [vmem:[#allocation7 + $0x38] sm:$0xff] %v6097_v42  ;;  %6099 = vst [vmem:[#allocation7 + $0x8] sm:$0xff] %v6091_v45 }
0x1040   : >> { %6103 = vst [vmem:[#allocation7 + $0x28] sm:$0xff] %v6095_v46 }
0x1041 LB: >> { %s7668_s26 = smul.u32 192, %s9845_s25  ;;  %s7667_s27 = sshll.u32 %s9845_s25, 4  ;;  %s9845_s25 = sphi %s11046_s25, %s6111_s25  }
0x1042   : >> { %s11058_s8 = scalar_lea.vmem [#allocation4], %s7667_s27  ;;  %s6111_s25 = sadd.s32 1, %s9845_s25  }
0x1043   : >> { %s11056_s30 = scalar_lea.vmem %s11236_s4, %s7668_s26  ;;  %v6114_v47 = vld [vmem:[%s11058_s8 + $0x1] sm:$0xff]  ;;  %v6115_v48 = vld [vmem:[%s11058_s8 + $0x11] sm:$0xff]  ;;  %p6108_p3 = scmp.ge.s32.totalorder %s6111_s25, 3  }
0x1044   : >> { %v9639_v49 = vld [vmem:[%s11056_s30 + $0x40] sm:$0xff]   ;;  %v9640_v50 = vld [vmem:[%s11056_s30 + $0x48] sm:$0xff]   ;;  %v6122_v51 = vpack.c.bf16 %v6115_v48, %v6114_v47  ;;  %v9641_v52 = vld [vmem:[%s11056_s30 + $0x50] sm:$0xff]   ;;  %s11079_s9 = smov (%p6108_p3), 0  }
0x1045   : >> { %8886 = vmatprep.subr.bf16.mxu0 %v9639_v49  ;;  %9278 = vmatprep.subr.bf16.mxu1 %v9639_v49  ;;  %v6118_v53 = vld [vmem:[%s11058_s8 + $0x41] sm:$0xff]  ;;  %v9642_v54 = vld [vmem:[%s11056_s30 + $0x58] sm:$0xff]   ;;  %v9645_v59 = vld [vmem:[%s11056_s30 + $0x70] sm:$0xff]  }
0x1046   : >> { %8887 = vmatpush3.bf16.msra.mxu0 %v9639_v49  ;;  %9286 = vmatpush3.bf16.msra.mxu1 %v9639_v49  ;;  %v6119_v55 = vld [vmem:[%s11058_s8 + $0x51] sm:$0xff]  ;;  %v9643_v57 = vld [vmem:[%s11056_s30 + $0x60] sm:$0xff]   ;;  %v9644_v58 = vld [vmem:[%s11056_s30 + $0x68] sm:$0xff]  }
0x1047   : >> { %8888 = vmatprep.subr.bf16.mxu0 %v9640_v50  ;;  %9279 = vmatprep.subr.bf16.mxu1 %v9640_v50  ;;  %v6124_v56 = vpack.c.bf16 %v6119_v55, %v6118_v53  ;;  %v9646_v60 = vld [vmem:[%s11056_s30 + $0x78] sm:$0xff]   ;;  %v6116_v61 = vld [vmem:[%s11058_s8 + $0x21] sm:$0xff]  ;;  %v6126_v6 = vld [vmem:[#allocation7] sm:$0xff] }
0x1048   : >> { %8902 = vmatprep.mubr.bf16.mxu0 %v6122_v51  ;;  %v6117_v62 = vld [vmem:[%s11058_s8 + $0x31] sm:$0xff]  ;;  %v6120_v63 = vld [vmem:[%s11058_s8 + $0x61] sm:$0xff] }
0x1049   : >> { %8906 = vmatprep.mubr.bf16.mxu1 %v6124_v56  ;;  %v6121_v0 = vld [vmem:[%s11058_s8 + $0x71] sm:$0xff]  ;;  %v6123_v1 = vpack.c.bf16 %v6117_v62, %v6116_v61  ;;  %v6128_v4 = vld [vmem:[#allocation7 + $0x10] sm:$0xff]  ;;  %v6129_v10 = vld [vmem:[#allocation7 + $0x18] sm:$0xff] }
0x104a   : >> { %8889 = vmatpush3.bf16.msra.mxu0 %v9640_v50  ;;  %9287 = vmatpush3.bf16.msra.mxu1 %v9640_v50  ;;  %v6125_v3 = vpack.c.bf16 %v6121_v0, %v6120_v63  ;;  %v6132_v5 = vld [vmem:[#allocation7 + $0x30] sm:$0xff]  ;;  %v6130_v7 = vld [vmem:[#allocation7 + $0x20] sm:$0xff]  ;;  %v6133_v11 = vld [vmem:[#allocation7 + $0x38] sm:$0xff] }
0x104b   : >> { %8890 = vmatprep.subr.bf16.mxu0 %v9641_v52  ;;  %9280 = vmatprep.subr.bf16.mxu1 %v9641_v52  ;;  %v6127_v16 = vld [vmem:[#allocation7 + $0x8] sm:$0xff] }
0x104c   : >> { %v6131_v17 = vld [vmem:[#allocation7 + $0x28] sm:$0xff] }
0x104e   : >> { %8891 = vmatpush3.bf16.msra.mxu0 %v9641_v52  ;;  %9288 = vmatpush3.bf16.msra.mxu1 %v9641_v52 }
0x104f   : >> { %8892 = vmatprep.subr.bf16.mxu0 %v9642_v54  ;;  %9281 = vmatprep.subr.bf16.mxu1 %v9642_v54 }
0x1052   : >> { %8893 = vmatpush3.bf16.msra.mxu0 %v9642_v54  ;;  %9289 = vmatpush3.bf16.msra.mxu1 %v9642_v54 }
0x1053   : >> { %8894 = vmatprep.subr.bf16.mxu0 %v9643_v57  ;;  %9282 = vmatprep.subr.bf16.mxu1 %v9643_v57 }
0x1056   : >> { %8895 = vmatpush3.bf16.msra.mxu0 %v9643_v57  ;;  %9290 = vmatpush3.bf16.msra.mxu1 %v9643_v57 }
0x1057   : >> { %8896 = vmatprep.subr.bf16.mxu0 %v9644_v58  ;;  %9283 = vmatprep.subr.bf16.mxu1 %v9644_v58 }
0x105a   : >> { %8897 = vmatpush3.bf16.msra.mxu0 %v9644_v58  ;;  %9291 = vmatpush3.bf16.msra.mxu1 %v9644_v58 }
0x105b   : >> { %8898 = vmatprep.subr.bf16.mxu0 %v9645_v59  ;;  %9284 = vmatprep.subr.bf16.mxu1 %v9645_v59 }
0x105e   : >> { %8899 = vmatpush3.bf16.msra.mxu0 %v9645_v59  ;;  %9292 = vmatpush3.bf16.msra.mxu1 %v9645_v59 }
0x105f   : >> { %8900 = vmatprep.subr.bf16.mxu0 %v9646_v60  ;;  %9285 = vmatprep.subr.bf16.mxu1 %v9646_v60 }
0x1062   : >> { %8901 = vmatpush3.bf16.msra.mxu0 %v9646_v60  ;;  %9293 = vmatpush3.bf16.msra.mxu1 %v9646_v60 }
0x1065   : >> { %8903 = vmatmul.mubr.bf16.vlgmr.msra.gmra.mrb[0].mxu0 %v6123_v1  ;;  %8907 = vmatmul.mubr.bf16.vlgmr.msra.gmra.mrb[0].mxu1 %v6125_v3 }
0x1138   : >> { %v8904_v8 = vpop.f32.mrb[0].mxu0  ;;  %v8908_v9 = vpop.f32.mrb[0].mxu1  ;;  %6110 = sbr.rel (!%p6108_p3) target bundleno = 4161 (0x1041), region = 387 }
0x1139   : >> { %v6270_v12 = vadd.f32 %v8904_v8, %v6128_v4  ;;  %v6274_v13 = vadd.f32 %v8908_v9, %v6132_v5  ;;  %v6237_v14 = vpop.f32.mrb[1].mxu0  ;;  %v6253_v15 = vpop.f32.mrb[1].mxu1 }
0x113a   : >> { %v6268_v18 = vadd.f32 %v6237_v14, %v6126_v6  ;;  %v6272_v19 = vadd.f32 %v6253_v15, %v6130_v7  ;;  %v8905_v20 = vpop.f32.mrb[2].mxu0  ;;  %v8909_v21 = vpop.f32.mrb[2].mxu1 }
0x113b   : >> { %6278 = vst [vmem:[#allocation7 + $0x10] sm:$0xff] %v6270_v12  ;;  %6282 = vst [vmem:[#allocation7 + $0x30] sm:$0xff] %v6274_v13  ;;  %v6271_v22 = vadd.f32 %v8905_v20, %v6129_v10  ;;  %v6275_v23 = vadd.f32 %v8909_v21, %v6133_v11  ;;  %v6240_v24 = vpop.f32.mrb[3].mxu0  ;;  %v6256_v25 = vpop.f32.mrb[3].mxu1 }
0x113c   : >> { %6276 = vst [vmem:[#allocation7] sm:$0xff] %v6268_v18  ;;  %6280 = vst [vmem:[#allocation7 + $0x20] sm:$0xff] %v6272_v19  ;;  %v6269_v26 = vadd.f32 %v6240_v24, %v6127_v16  ;;  %v6273_v27 = vadd.f32 %v6256_v25, %v6131_v17 }
0x113d   : >> { %6279 = vst [vmem:[#allocation7 + $0x18] sm:$0xff] %v6271_v22  ;;  %6283 = vst [vmem:[#allocation7 + $0x38] sm:$0xff] %v6275_v23 }
0x113e   : >> { %6277 = vst [vmem:[#allocation7 + $0x8] sm:$0xff] %v6269_v26  ;;  %6281 = vst [vmem:[#allocation7 + $0x28] sm:$0xff] %v6273_v27 }
0x113f LB: >> { %s7694_s10 = smul.u32 192, %s9849_s9  ;;  %s7693_s11 = sshll.u32 %s9849_s9, 4  ;;  %s9849_s9 = sphi %s11079_s9, %s6289_s9  }
0x1140   : >> { %s11091_s15 = scalar_lea.vmem [#allocation4], %s7693_s11  ;;  %s6289_s9 = sadd.s32 1, %s9849_s9  }
0x1141   : >> { %s11089_s14 = scalar_lea.vmem %s11236_s4, %s7694_s10  ;;  %v6292_v28 = vld [vmem:[%s11091_s15 + $0x2] sm:$0xff]  ;;  %v6293_v29 = vld [vmem:[%s11091_s15 + $0x12] sm:$0xff]  ;;  %p6286_p4 = scmp.ge.s32.totalorder %s6289_s9, 3  }
0x1142   : >> { %v9647_v30 = vld [vmem:[%s11089_s14 + $0x80] sm:$0xff]   ;;  %v9648_v31 = vld [vmem:[%s11089_s14 + $0x88] sm:$0xff]   ;;  %v6300_v32 = vpack.c.bf16 %v6293_v29, %v6292_v28  ;;  %v9649_v33 = vld [vmem:[%s11089_s14 + $0x90] sm:$0xff]   ;;  %s11122_s17 = smov (%p6286_p4), 0  }
0x1143   : >> { %8910 = vmatprep.subr.bf16.mxu0 %v9647_v30  ;;  %9294 = vmatprep.subr.bf16.mxu1 %v9647_v30  ;;  %v6296_v34 = vld [vmem:[%s11091_s15 + $0x42] sm:$0xff]  ;;  %v9650_v35 = vld [vmem:[%s11089_s14 + $0x98] sm:$0xff]   ;;  %v9653_v40 = vld [vmem:[%s11089_s14 + $0xb0] sm:$0xff]  }
0x1144   : >> { %8911 = vmatpush3.bf16.msra.mxu0 %v9647_v30  ;;  %9302 = vmatpush3.bf16.msra.mxu1 %v9647_v30  ;;  %v6297_v36 = vld [vmem:[%s11091_s15 + $0x52] sm:$0xff]  ;;  %v9651_v38 = vld [vmem:[%s11089_s14 + $0xa0] sm:$0xff]   ;;  %v9652_v39 = vld [vmem:[%s11089_s14 + $0xa8] sm:$0xff]  }
0x1145   : >> { %8912 = vmatprep.subr.bf16.mxu0 %v9648_v31  ;;  %9295 = vmatprep.subr.bf16.mxu1 %v9648_v31  ;;  %v6302_v37 = vpack.c.bf16 %v6297_v36, %v6296_v34  ;;  %v9654_v41 = vld [vmem:[%s11089_s14 + $0xb8] sm:$0xff]   ;;  %v6294_v42 = vld [vmem:[%s11091_s15 + $0x22] sm:$0xff]  ;;  %v6304_v50 = vld [vmem:[#allocation7] sm:$0xff] }
0x1146   : >> { %8926 = vmatprep.mubr.bf16.mxu0 %v6300_v32  ;;  %v6295_v43 = vld [vmem:[%s11091_s15 + $0x32] sm:$0xff]  ;;  %v6298_v44 = vld [vmem:[%s11091_s15 + $0x62] sm:$0xff] }
0x1147   : >> { %8930 = vmatprep.mubr.bf16.mxu1 %v6302_v37  ;;  %v6299_v45 = vld [vmem:[%s11091_s15 + $0x72] sm:$0xff]  ;;  %v6301_v46 = vpack.c.bf16 %v6295_v43, %v6294_v42  ;;  %v6306_v48 = vld [vmem:[#allocation7 + $0x10] sm:$0xff]  ;;  %v6307_v54 = vld [vmem:[#allocation7 + $0x18] sm:$0xff] }
0x1148   : >> { %8913 = vmatpush3.bf16.msra.mxu0 %v9648_v31  ;;  %9303 = vmatpush3.bf16.msra.mxu1 %v9648_v31  ;;  %v6303_v47 = vpack.c.bf16 %v6299_v45, %v6298_v44  ;;  %v6310_v49 = vld [vmem:[#allocation7 + $0x30] sm:$0xff]  ;;  %v6308_v51 = vld [vmem:[#allocation7 + $0x20] sm:$0xff]  ;;  %v6311_v55 = vld [vmem:[#allocation7 + $0x38] sm:$0xff] }
0x1149   : >> { %8914 = vmatprep.subr.bf16.mxu0 %v9649_v33  ;;  %9296 = vmatprep.subr.bf16.mxu1 %v9649_v33  ;;  %v6305_v60 = vld [vmem:[#allocation7 + $0x8] sm:$0xff] }
0x114a   : >> { %v6309_v61 = vld [vmem:[#allocation7 + $0x28] sm:$0xff] }
0x114c   : >> { %8915 = vmatpush3.bf16.msra.mxu0 %v9649_v33  ;;  %9304 = vmatpush3.bf16.msra.mxu1 %v9649_v33 }
0x114d   : >> { %8916 = vmatprep.subr.bf16.mxu0 %v9650_v35  ;;  %9297 = vmatprep.subr.bf16.mxu1 %v9650_v35 }
0x1150   : >> { %8917 = vmatpush3.bf16.msra.mxu0 %v9650_v35  ;;  %9305 = vmatpush3.bf16.msra.mxu1 %v9650_v35 }
0x1151   : >> { %8918 = vmatprep.subr.bf16.mxu0 %v9651_v38  ;;  %9298 = vmatprep.subr.bf16.mxu1 %v9651_v38 }
0x1154   : >> { %8919 = vmatpush3.bf16.msra.mxu0 %v9651_v38  ;;  %9306 = vmatpush3.bf16.msra.mxu1 %v9651_v38 }
0x1155   : >> { %8920 = vmatprep.subr.bf16.mxu0 %v9652_v39  ;;  %9299 = vmatprep.subr.bf16.mxu1 %v9652_v39 }
0x1158   : >> { %8921 = vmatpush3.bf16.msra.mxu0 %v9652_v39  ;;  %9307 = vmatpush3.bf16.msra.mxu1 %v9652_v39 }
0x1159   : >> { %8922 = vmatprep.subr.bf16.mxu0 %v9653_v40  ;;  %9300 = vmatprep.subr.bf16.mxu1 %v9653_v40 }
0x115c   : >> { %8923 = vmatpush3.bf16.msra.mxu0 %v9653_v40  ;;  %9308 = vmatpush3.bf16.msra.mxu1 %v9653_v40 }
0x115d   : >> { %8924 = vmatprep.subr.bf16.mxu0 %v9654_v41  ;;  %9301 = vmatprep.subr.bf16.mxu1 %v9654_v41 }
0x1160   : >> { %8925 = vmatpush3.bf16.msra.mxu0 %v9654_v41  ;;  %9309 = vmatpush3.bf16.msra.mxu1 %v9654_v41 }
0x1163   : >> { %8927 = vmatmul.mubr.bf16.vlgmr.msra.gmra.mrb[0].mxu0 %v6301_v46  ;;  %8931 = vmatmul.mubr.bf16.vlgmr.msra.gmra.mrb[0].mxu1 %v6303_v47 }
0x1236   : >> { %v8928_v52 = vpop.f32.mrb[0].mxu0  ;;  %v8932_v53 = vpop.f32.mrb[0].mxu1  ;;  %6288 = sbr.rel (!%p6286_p4) target bundleno = 4415 (0x113f), region = 398 }
0x1237   : >> { %v6448_v56 = vadd.f32 %v8928_v52, %v6306_v48  ;;  %v6452_v57 = vadd.f32 %v8932_v53, %v6310_v49  ;;  %v6415_v58 = vpop.f32.mrb[1].mxu0  ;;  %v6431_v59 = vpop.f32.mrb[1].mxu1 }
0x1238   : >> { %v6446_v62 = vadd.f32 %v6415_v58, %v6304_v50  ;;  %v6450_v63 = vadd.f32 %v6431_v59, %v6308_v51  ;;  %v8929_v0 = vpop.f32.mrb[2].mxu0  ;;  %v8933_v1 = vpop.f32.mrb[2].mxu1 }
0x1239   : >> { %6456 = vst [vmem:[#allocation7 + $0x10] sm:$0xff] %v6448_v56  ;;  %6460 = vst [vmem:[#allocation7 + $0x30] sm:$0xff] %v6452_v57  ;;  %v6449_v3 = vadd.f32 %v8929_v0, %v6307_v54  ;;  %v6453_v4 = vadd.f32 %v8933_v1, %v6311_v55  ;;  %v6418_v5 = vpop.f32.mrb[3].mxu0  ;;  %v6434_v6 = vpop.f32.mrb[3].mxu1 }
0x123a   : >> { %6454 = vst [vmem:[#allocation7] sm:$0xff] %v6446_v62  ;;  %6458 = vst [vmem:[#allocation7 + $0x20] sm:$0xff] %v6450_v63  ;;  %v6447_v7 = vadd.f32 %v6418_v5, %v6305_v60  ;;  %v6451_v8 = vadd.f32 %v6434_v6, %v6309_v61 }
0x123b   : >> { %6457 = vst [vmem:[#allocation7 + $0x18] sm:$0xff] %v6449_v3  ;;  %6461 = vst [vmem:[#allocation7 + $0x38] sm:$0xff] %v6453_v4 }
0x123c   : >> { %6455 = vst [vmem:[#allocation7 + $0x8] sm:$0xff] %v6447_v7  ;;  %6459 = vst [vmem:[#allocation7 + $0x28] sm:$0xff] %v6451_v8 }
0x1240   : > { %v6464_v11 = vld [vmem:[#allocation7 + $0x10] sm:$0xff] }
0x1241   : > { %v6462_v9 = vld [vmem:[#allocation7] sm:$0xff]  ;;  %6505 = vst [vmem:[#allocation7 + $0x10] sm:$0xff] %v9863_v2  ;;  %vm6472_vm10 = vcmp.ge.f32.partialorder %v6464_v11, 0.0  ;;  %v6480_v14 = vmul.f32 0.2, %v6464_v11  ;;  %v6468_v21 = vld [vmem:[#allocation7 + $0x30] sm:$0xff] }
0x1242   : > { %vm6470_vm8 = vcmp.ge.f32.partialorder %v6462_v9, 0.0  ;;  %v6478_v12 = vmul.f32 0.2, %v6462_v9  ;;  %6503 = vst [vmem:[#allocation7] sm:$0xff] %v9863_v2  ;;  %v6465_v15 = vld [vmem:[#allocation7 + $0x18] sm:$0xff]  ;;  %v6466_v16 = vld [vmem:[#allocation7 + $0x20] sm:$0xff] }
0x1243   : > { %v6463_v10 = vld [vmem:[#allocation7 + $0x8] sm:$0xff]  ;;  %vm6473_vm11 = vcmp.ge.f32.partialorder %v6465_v15, 0.0  ;;  %v6481_v20 = vmul.f32 0.2, %v6465_v15  ;;  %6506 = vst [vmem:[#allocation7 + $0x18] sm:$0xff] %v9863_v2  ;;  %6507 = vst [vmem:[#allocation7 + $0x20] sm:$0xff] %v9863_v2  ;;  %v6488_v23 = vsel %vm6472_vm10, %v6464_v11, %v6480_v14 }
0x1244   : > { %vm6471_vm9 = vcmp.ge.f32.partialorder %v6463_v10, 0.0  ;;  %v6479_v13 = vmul.f32 0.2, %v6463_v10  ;;  %6504 = vst [vmem:[#allocation7 + $0x8] sm:$0xff] %v9863_v2  ;;  %v6467_v17 = vld [vmem:[#allocation7 + $0x28] sm:$0xff]  ;;  %v6486_v18 = vsel %vm6470_vm8, %v6462_v9, %v6478_v12  ;;  %v6469_v22 = vld [vmem:[#allocation7 + $0x38] sm:$0xff] }
0x1245   : > { %6508 = vst [vmem:[#allocation7 + $0x28] sm:$0xff] %v9863_v2  ;;  %6495 = vst [vmem:[#allocation5 + $0x11] sm:$0xff] %v6486_v18  ;;  %vm6474_vm12 = vcmp.ge.f32.partialorder %v6466_v16, 0.0  ;;  %v6482_v24 = vmul.f32 0.2, %v6466_v16  ;;  %vm6475_vm13 = vcmp.ge.f32.partialorder %v6467_v17, 0.0  ;;  %v6489_v25 = vsel %vm6473_vm11, %v6465_v15, %v6481_v20 }
0x1246   : > { %v6487_v19 = vsel %vm6471_vm9, %v6463_v10, %v6479_v13  ;;  %6509 = vst [vmem:[#allocation7 + $0x30] sm:$0xff] %v9863_v2  ;;  %6510 = vst [vmem:[#allocation7 + $0x38] sm:$0xff] %v9863_v2  ;;  %v6483_v26 = vmul.f32 0.2, %v6467_v17  ;;  %vm6476_vm14 = vcmp.ge.f32.partialorder %v6468_v21, 0.0  ;;  %vm6477_vm15 = vcmp.ge.f32.partialorder %v6469_v22, 0.0 }
0x1247   : > { %6496 = vst [vmem:[#allocation5 + $0x21] sm:$0xff] %v6487_v19  ;;  %6497 = vst [vmem:[#allocation5 + $0x31] sm:$0xff] %v6488_v23  ;;  %v6484_v27 = vmul.f32 0.2, %v6468_v21  ;;  %v6490_v28 = vsel %vm6474_vm12, %v6466_v16, %v6482_v24  ;;  %v6485_v29 = vmul.f32 0.2, %v6469_v22 }
0x1248   : > { %6498 = vst [vmem:[#allocation5 + $0x41] sm:$0xff] %v6489_v25  ;;  %6499 = vst [vmem:[#allocation5 + $0x51] sm:$0xff] %v6490_v28  ;;  %v6491_v30 = vsel %vm6475_vm13, %v6467_v17, %v6483_v26 }
0x1249   : > { %v6492_v31 = vsel %vm6476_vm14, %v6468_v21, %v6484_v27  ;;  %6500 = vst [vmem:[#allocation5 + $0x61] sm:$0xff] %v6491_v30  ;;  %v6493_v32 = vsel %vm6477_vm15, %v6469_v22, %v6485_v29 }
0x124a   : > { %6501 = vst [vmem:[#allocation5 + $0x71] sm:$0xff] %v6492_v31  ;;  %6502 = vst [vmem:[#allocation5 + $0x81] sm:$0xff] %v6493_v32 }
0x124b LB: >> { %s7797_s18 = smul.u32 192, %s9853_s17  ;;  %s7719_s19 = sshll.u32 %s9853_s17, 4  ;;  %v6533_v52 = vld [vmem:[#allocation7 + $0x10] sm:$0xff]  ;;  %v6531_v54 = vld [vmem:[#allocation7] sm:$0xff]  ;;  %v6534_v58 = vld [vmem:[#allocation7 + $0x18] sm:$0xff]  ;;  %s9853_s17 = sphi %s11122_s17, %s6516_s17  }
0x124c   : >> { %s11134_s23 = scalar_lea.vmem [#allocation5], %s7719_s19  ;;  %v6535_v55 = vld [vmem:[#allocation7 + $0x20] sm:$0xff]  ;;  %v6532_v0 = vld [vmem:[#allocation7 + $0x8] sm:$0xff]  ;;  %s6516_s17 = sadd.s32 1, %s9853_s17  }
0x124d   : >> { %s11132_s22 = scalar_lea.vmem %s11237_s5, %s7797_s18  ;;  %v6537_v53 = vld [vmem:[#allocation7 + $0x30] sm:$0xff]  ;;  %v6538_v59 = vld [vmem:[#allocation7 + $0x38] sm:$0xff]  ;;  %v6536_v1 = vld [vmem:[#allocation7 + $0x28] sm:$0xff]  ;;  %p6513_p5 = scmp.ge.s32.totalorder %s6516_s17, 3  }
0x124e   : >> { %v9655_v34 = vld [vmem:[%s11132_s22] sm:$0xff]   ;;  %v9656_v35 = vld [vmem:[%s11132_s22 + $0x8] sm:$0xff]   ;;  %v9657_v37 = vld [vmem:[%s11132_s22 + $0x10] sm:$0xff]   ;;  %s11155_s25 = smov (%p6513_p5), 0  }
0x124f   : >> { %8934 = vmatprep.subr.bf16.mxu0 %v9655_v34  ;;  %9310 = vmatprep.subr.bf16.mxu1 %v9655_v34  ;;  %v9658_v39 = vld [vmem:[%s11132_s22 + $0x18] sm:$0xff]   ;;  %v9659_v42 = vld [vmem:[%s11132_s22 + $0x20] sm:$0xff]   ;;  %v9660_v43 = vld [vmem:[%s11132_s22 + $0x28] sm:$0xff]  }
0x1250   : >> { %8935 = vmatpush3.bf16.msra.mxu0 %v9655_v34  ;;  %9318 = vmatpush3.bf16.msra.mxu1 %v9655_v34  ;;  %v9661_v44 = vld [vmem:[%s11132_s22 + $0x30] sm:$0xff]   ;;  %v9662_v45 = vld [vmem:[%s11132_s22 + $0x38] sm:$0xff]  }
0x1251   : >> { %v6519_v2 = vld [vmem:[%s11134_s23] sm:$0xff]  ;;  %v6520_v33 = vld [vmem:[%s11134_s23 + $0x10] sm:$0xff]  ;;  %8936 = vmatprep.subr.bf16.mxu0 %v9656_v35  ;;  %9311 = vmatprep.subr.bf16.mxu1 %v9656_v35 }
0x1252   : >> { %v6527_v36 = vpack.c.bf16 %v6520_v33, %v6519_v2  ;;  %v6523_v38 = vld [vmem:[%s11134_s23 + $0x40] sm:$0xff]  ;;  %v6524_v40 = vld [vmem:[%s11134_s23 + $0x50] sm:$0xff] }
0x1253   : >> { %v6529_v41 = vpack.c.bf16 %v6524_v40, %v6523_v38  ;;  %v6521_v46 = vld [vmem:[%s11134_s23 + $0x20] sm:$0xff]  ;;  %v6522_v47 = vld [vmem:[%s11134_s23 + $0x30] sm:$0xff] }
0x1254   : >> { %8950 = vmatprep.mubr.bf16.mxu0 %v6527_v36  ;;  %8937 = vmatpush3.bf16.msra.mxu0 %v9656_v35  ;;  %v6525_v48 = vld [vmem:[%s11134_s23 + $0x60] sm:$0xff]  ;;  %v6526_v49 = vld [vmem:[%s11134_s23 + $0x70] sm:$0xff]  ;;  %v6528_v50 = vpack.c.bf16 %v6522_v47, %v6521_v46 }
0x1255   : >> { %9319 = vmatpush3.bf16.msra.mxu1 %v9656_v35  ;;  %8938 = vmatprep.subr.bf16.mxu0 %v9657_v37  ;;  %v6530_v51 = vpack.c.bf16 %v6526_v49, %v6525_v48 }
0x1256   : >> { %9312 = vmatprep.subr.bf16.mxu1 %v9657_v37  ;;  %8954 = vmatprep.mubr.bf16.mxu1 %v6529_v41 }
0x1258   : >> { %8939 = vmatpush3.bf16.msra.mxu0 %v9657_v37 }
0x1259   : >> { %9320 = vmatpush3.bf16.msra.mxu1 %v9657_v37  ;;  %8940 = vmatprep.subr.bf16.mxu0 %v9658_v39 }
0x125a   : >> { %9313 = vmatprep.subr.bf16.mxu1 %v9658_v39 }
0x125c   : >> { %8941 = vmatpush3.bf16.msra.mxu0 %v9658_v39 }
0x125d   : >> { %9321 = vmatpush3.bf16.msra.mxu1 %v9658_v39  ;;  %8942 = vmatprep.subr.bf16.mxu0 %v9659_v42 }
0x125e   : >> { %9314 = vmatprep.subr.bf16.mxu1 %v9659_v42 }
0x1260   : >> { %8943 = vmatpush3.bf16.msra.mxu0 %v9659_v42 }
0x1261   : >> { %9322 = vmatpush3.bf16.msra.mxu1 %v9659_v42  ;;  %8944 = vmatprep.subr.bf16.mxu0 %v9660_v43 }
0x1262   : >> { %9315 = vmatprep.subr.bf16.mxu1 %v9660_v43 }
0x1264   : >> { %8945 = vmatpush3.bf16.msra.mxu0 %v9660_v43 }
0x1265   : >> { %9323 = vmatpush3.bf16.msra.mxu1 %v9660_v43  ;;  %8946 = vmatprep.subr.bf16.mxu0 %v9661_v44 }
0x1266   : >> { %9316 = vmatprep.subr.bf16.mxu1 %v9661_v44 }
0x1268   : >> { %8947 = vmatpush3.bf16.msra.mxu0 %v9661_v44 }
0x1269   : >> { %9324 = vmatpush3.bf16.msra.mxu1 %v9661_v44  ;;  %8948 = vmatprep.subr.bf16.mxu0 %v9662_v45 }
0x126a   : >> { %9317 = vmatprep.subr.bf16.mxu1 %v9662_v45 }
0x126c   : >> { %8949 = vmatpush3.bf16.msra.mxu0 %v9662_v45 }
0x126d   : >> { %9325 = vmatpush3.bf16.msra.mxu1 %v9662_v45 }
0x126f   : >> { %8951 = vmatmul.mubr.bf16.vlgmr.msra.gmra.mrb[0].mxu0 %v6528_v50 }
0x1270   : >> { %8955 = vmatmul.mubr.bf16.vlgmr.msra.gmra.mrb[0].mxu1 %v6530_v51 }
0x1342   : >> { %v8952_v56 = vpop.f32.mrb[0].mxu0 }
0x1343   : >> { %v8956_v57 = vpop.f32.mrb[0].mxu1  ;;  %v6674_v60 = vadd.f32 %v8952_v56, %v6533_v52  ;;  %v6641_v62 = vpop.f32.mrb[1].mxu0  ;;  %6515 = sbr.rel (!%p6513_p5) target bundleno = 4683 (0x124b), region = 409 }
0x1344   : >> { %v6678_v61 = vadd.f32 %v8956_v57, %v6537_v53  ;;  %v6657_v63 = vpop.f32.mrb[1].mxu1  ;;  %v6672_v3 = vadd.f32 %v6641_v62, %v6531_v54  ;;  %v8953_v5 = vpop.f32.mrb[2].mxu0 }
0x1345   : >> { %v6676_v4 = vadd.f32 %v6657_v63, %v6535_v55  ;;  %v8957_v6 = vpop.f32.mrb[2].mxu1  ;;  %6682 = vst [vmem:[#allocation7 + $0x10] sm:$0xff] %v6674_v60  ;;  %v6675_v7 = vadd.f32 %v8953_v5, %v6534_v58  ;;  %v6644_v9 = vpop.f32.mrb[3].mxu0 }
0x1346   : >> { %6686 = vst [vmem:[#allocation7 + $0x30] sm:$0xff] %v6678_v61  ;;  %v6679_v8 = vadd.f32 %v8957_v6, %v6538_v59  ;;  %v6660_v10 = vpop.f32.mrb[3].mxu1  ;;  %6680 = vst [vmem:[#allocation7] sm:$0xff] %v6672_v3  ;;  %v6673_v11 = vadd.f32 %v6644_v9, %v6532_v0 }
0x1347   : >> { %6684 = vst [vmem:[#allocation7 + $0x20] sm:$0xff] %v6676_v4  ;;  %v6677_v12 = vadd.f32 %v6660_v10, %v6536_v1  ;;  %6683 = vst [vmem:[#allocation7 + $0x18] sm:$0xff] %v6675_v7 }
0x1348   : >> { %6687 = vst [vmem:[#allocation7 + $0x38] sm:$0xff] %v6679_v8  ;;  %6681 = vst [vmem:[#allocation7 + $0x8] sm:$0xff] %v6673_v11 }
0x1349   : >> { %6685 = vst [vmem:[#allocation7 + $0x28] sm:$0xff] %v6677_v12 }
0x134a LB: >> { %s7731_s26 = smul.u32 192, %s9857_s25  ;;  %s7730_s27 = sshll.u32 %s9857_s25, 4  ;;  %s9857_s25 = sphi %s11155_s25, %s6693_s25  }
0x134b   : >> { %s11167_s8 = scalar_lea.vmem [#allocation5], %s7730_s27  ;;  %s6693_s25 = sadd.s32 1, %s9857_s25  }
0x134c   : >> { %s11165_s30 = scalar_lea.vmem %s11237_s5, %s7731_s26  ;;  %v6696_v13 = vld [vmem:[%s11167_s8 + $0x1] sm:$0xff]  ;;  %v6697_v14 = vld [vmem:[%s11167_s8 + $0x11] sm:$0xff]  ;;  %p6690_p6 = scmp.ge.s32.totalorder %s6693_s25, 3  }
0x134d   : >> { %v9663_v15 = vld [vmem:[%s11165_s30 + $0x40] sm:$0xff]   ;;  %v9664_v16 = vld [vmem:[%s11165_s30 + $0x48] sm:$0xff]   ;;  %v6704_v17 = vpack.c.bf16 %v6697_v14, %v6696_v13  ;;  %v9665_v18 = vld [vmem:[%s11165_s30 + $0x50] sm:$0xff]   ;;  %s11188_s9 = smov (%p6690_p6), 0  }
0x134e   : >> { %8958 = vmatprep.subr.bf16.mxu0 %v9663_v15  ;;  %9326 = vmatprep.subr.bf16.mxu1 %v9663_v15  ;;  %v6700_v19 = vld [vmem:[%s11167_s8 + $0x41] sm:$0xff]  ;;  %v9666_v20 = vld [vmem:[%s11165_s30 + $0x58] sm:$0xff]   ;;  %v9669_v25 = vld [vmem:[%s11165_s30 + $0x70] sm:$0xff]  }
0x134f   : >> { %8959 = vmatpush3.bf16.msra.mxu0 %v9663_v15  ;;  %9334 = vmatpush3.bf16.msra.mxu1 %v9663_v15  ;;  %v6701_v21 = vld [vmem:[%s11167_s8 + $0x51] sm:$0xff]  ;;  %v9667_v23 = vld [vmem:[%s11165_s30 + $0x60] sm:$0xff]   ;;  %v9668_v24 = vld [vmem:[%s11165_s30 + $0x68] sm:$0xff]  }
0x1350   : >> { %8960 = vmatprep.subr.bf16.mxu0 %v9664_v16  ;;  %9327 = vmatprep.subr.bf16.mxu1 %v9664_v16  ;;  %v6706_v22 = vpack.c.bf16 %v6701_v21, %v6700_v19  ;;  %v9670_v26 = vld [vmem:[%s11165_s30 + $0x78] sm:$0xff]   ;;  %v6698_v27 = vld [vmem:[%s11167_s8 + $0x21] sm:$0xff]  ;;  %v6708_v34 = vld [vmem:[#allocation7] sm:$0xff] }
0x1351   : >> { %8974 = vmatprep.mubr.bf16.mxu0 %v6704_v17  ;;  %v6699_v28 = vld [vmem:[%s11167_s8 + $0x31] sm:$0xff]  ;;  %v6702_v29 = vld [vmem:[%s11167_s8 + $0x61] sm:$0xff] }
0x1352   : >> { %8978 = vmatprep.mubr.bf16.mxu1 %v6706_v22  ;;  %v6703_v30 = vld [vmem:[%s11167_s8 + $0x71] sm:$0xff]  ;;  %v6705_v31 = vpack.c.bf16 %v6699_v28, %v6698_v27  ;;  %v6710_v2 = vld [vmem:[#allocation7 + $0x10] sm:$0xff]  ;;  %v6711_v38 = vld [vmem:[#allocation7 + $0x18] sm:$0xff] }
0x1353   : >> { %8961 = vmatpush3.bf16.msra.mxu0 %v9664_v16  ;;  %9335 = vmatpush3.bf16.msra.mxu1 %v9664_v16  ;;  %v6707_v32 = vpack.c.bf16 %v6703_v30, %v6702_v29  ;;  %v6714_v33 = vld [vmem:[#allocation7 + $0x30] sm:$0xff]  ;;  %v6712_v35 = vld [vmem:[#allocation7 + $0x20] sm:$0xff]  ;;  %v6715_v39 = vld [vmem:[#allocation7 + $0x38] sm:$0xff] }
0x1354   : >> { %8962 = vmatprep.subr.bf16.mxu0 %v9665_v18  ;;  %9328 = vmatprep.subr.bf16.mxu1 %v9665_v18  ;;  %v6709_v44 = vld [vmem:[#allocation7 + $0x8] sm:$0xff] }
0x1355   : >> { %v6713_v45 = vld [vmem:[#allocation7 + $0x28] sm:$0xff] }
0x1357   : >> { %8963 = vmatpush3.bf16.msra.mxu0 %v9665_v18  ;;  %9336 = vmatpush3.bf16.msra.mxu1 %v9665_v18 }
0x1358   : >> { %8964 = vmatprep.subr.bf16.mxu0 %v9666_v20  ;;  %9329 = vmatprep.subr.bf16.mxu1 %v9666_v20 }
0x135b   : >> { %8965 = vmatpush3.bf16.msra.mxu0 %v9666_v20  ;;  %9337 = vmatpush3.bf16.msra.mxu1 %v9666_v20 }
0x135c   : >> { %8966 = vmatprep.subr.bf16.mxu0 %v9667_v23  ;;  %9330 = vmatprep.subr.bf16.mxu1 %v9667_v23 }
0x135f   : >> { %8967 = vmatpush3.bf16.msra.mxu0 %v9667_v23  ;;  %9338 = vmatpush3.bf16.msra.mxu1 %v9667_v23 }
0x1360   : >> { %8968 = vmatprep.subr.bf16.mxu0 %v9668_v24  ;;  %9331 = vmatprep.subr.bf16.mxu1 %v9668_v24 }
0x1363   : >> { %8969 = vmatpush3.bf16.msra.mxu0 %v9668_v24  ;;  %9339 = vmatpush3.bf16.msra.mxu1 %v9668_v24 }
0x1364   : >> { %8970 = vmatprep.subr.bf16.mxu0 %v9669_v25  ;;  %9332 = vmatprep.subr.bf16.mxu1 %v9669_v25 }
0x1367   : >> { %8971 = vmatpush3.bf16.msra.mxu0 %v9669_v25  ;;  %9340 = vmatpush3.bf16.msra.mxu1 %v9669_v25 }
0x1368   : >> { %8972 = vmatprep.subr.bf16.mxu0 %v9670_v26  ;;  %9333 = vmatprep.subr.bf16.mxu1 %v9670_v26 }
0x136b   : >> { %8973 = vmatpush3.bf16.msra.mxu0 %v9670_v26  ;;  %9341 = vmatpush3.bf16.msra.mxu1 %v9670_v26 }
0x136e   : >> { %8975 = vmatmul.mubr.bf16.vlgmr.msra.gmra.mrb[0].mxu0 %v6705_v31  ;;  %8979 = vmatmul.mubr.bf16.vlgmr.msra.gmra.mrb[0].mxu1 %v6707_v32 }
0x1441   : >> { %v8976_v36 = vpop.f32.mrb[0].mxu0  ;;  %v8980_v37 = vpop.f32.mrb[0].mxu1  ;;  %6692 = sbr.rel (!%p6690_p6) target bundleno = 4938 (0x134a), region = 420 }
0x1442   : >> { %v6852_v40 = vadd.f32 %v8976_v36, %v6710_v2  ;;  %v6856_v41 = vadd.f32 %v8980_v37, %v6714_v33  ;;  %v6819_v42 = vpop.f32.mrb[1].mxu0  ;;  %v6835_v43 = vpop.f32.mrb[1].mxu1 }
0x1443   : >> { %v6850_v46 = vadd.f32 %v6819_v42, %v6708_v34  ;;  %v6854_v47 = vadd.f32 %v6835_v43, %v6712_v35  ;;  %v8977_v48 = vpop.f32.mrb[2].mxu0  ;;  %v8981_v49 = vpop.f32.mrb[2].mxu1 }
0x1444   : >> { %6860 = vst [vmem:[#allocation7 + $0x10] sm:$0xff] %v6852_v40  ;;  %6864 = vst [vmem:[#allocation7 + $0x30] sm:$0xff] %v6856_v41  ;;  %v6853_v50 = vadd.f32 %v8977_v48, %v6711_v38  ;;  %v6857_v51 = vadd.f32 %v8981_v49, %v6715_v39  ;;  %v6822_v52 = vpop.f32.mrb[3].mxu0  ;;  %v6838_v53 = vpop.f32.mrb[3].mxu1 }
0x1445   : >> { %6858 = vst [vmem:[#allocation7] sm:$0xff] %v6850_v46  ;;  %6862 = vst [vmem:[#allocation7 + $0x20] sm:$0xff] %v6854_v47  ;;  %v6851_v54 = vadd.f32 %v6822_v52, %v6709_v44  ;;  %v6855_v55 = vadd.f32 %v6838_v53, %v6713_v45 }
0x1446   : >> { %6861 = vst [vmem:[#allocation7 + $0x18] sm:$0xff] %v6853_v50  ;;  %6865 = vst [vmem:[#allocation7 + $0x38] sm:$0xff] %v6857_v51 }
0x1447   : >> { %6859 = vst [vmem:[#allocation7 + $0x8] sm:$0xff] %v6851_v54  ;;  %6863 = vst [vmem:[#allocation7 + $0x28] sm:$0xff] %v6855_v55 }
0x1448 LB: >> { %s7757_s10 = smul.u32 192, %s9861_s9  ;;  %s7756_s11 = sshll.u32 %s9861_s9, 4  ;;  %s9861_s9 = sphi %s11188_s9, %s6871_s9  }
0x1449   : >> { %s11200_s15 = scalar_lea.vmem [#allocation5], %s7756_s11  ;;  %s6871_s9 = sadd.s32 1, %s9861_s9  }
0x144a   : >> { %s11198_s14 = scalar_lea.vmem %s11237_s5, %s7757_s10  ;;  %v6874_v56 = vld [vmem:[%s11200_s15 + $0x2] sm:$0xff]  ;;  %v6875_v57 = vld [vmem:[%s11200_s15 + $0x12] sm:$0xff]  ;;  %p6868_p7 = scmp.ge.s32.totalorder %s6871_s9, 3  }
0x144b   : >> { %v9671_v58 = vld [vmem:[%s11198_s14 + $0x80] sm:$0xff]   ;;  %v9672_v59 = vld [vmem:[%s11198_s14 + $0x88] sm:$0xff]   ;;  %v6882_v60 = vpack.c.bf16 %v6875_v57, %v6874_v56  ;;  %v9673_v61 = vld [vmem:[%s11198_s14 + $0x90] sm:$0xff]  }
0x144c   : >> { %8982 = vmatprep.subr.bf16.mxu0 %v9671_v58  ;;  %9342 = vmatprep.subr.bf16.mxu1 %v9671_v58  ;;  %v6878_v62 = vld [vmem:[%s11200_s15 + $0x42] sm:$0xff]  ;;  %v9674_v63 = vld [vmem:[%s11198_s14 + $0x98] sm:$0xff]   ;;  %v9677_v5 = vld [vmem:[%s11198_s14 + $0xb0] sm:$0xff]  }
0x144d   : >> { %8983 = vmatpush3.bf16.msra.mxu0 %v9671_v58  ;;  %9350 = vmatpush3.bf16.msra.mxu1 %v9671_v58  ;;  %v6879_v0 = vld [vmem:[%s11200_s15 + $0x52] sm:$0xff]  ;;  %v9675_v3 = vld [vmem:[%s11198_s14 + $0xa0] sm:$0xff]   ;;  %v9676_v4 = vld [vmem:[%s11198_s14 + $0xa8] sm:$0xff]  }
0x144e   : >> { %8984 = vmatprep.subr.bf16.mxu0 %v9672_v59  ;;  %9343 = vmatprep.subr.bf16.mxu1 %v9672_v59  ;;  %v6884_v1 = vpack.c.bf16 %v6879_v0, %v6878_v62  ;;  %v9678_v6 = vld [vmem:[%s11198_s14 + $0xb8] sm:$0xff]   ;;  %v6876_v7 = vld [vmem:[%s11200_s15 + $0x22] sm:$0xff]  ;;  %v6886_v15 = vld [vmem:[#allocation7] sm:$0xff] }
0x144f   : >> { %8998 = vmatprep.mubr.bf16.mxu0 %v6882_v60  ;;  %v6877_v8 = vld [vmem:[%s11200_s15 + $0x32] sm:$0xff]  ;;  %v6880_v9 = vld [vmem:[%s11200_s15 + $0x62] sm:$0xff] }
0x1450   : >> { %9002 = vmatprep.mubr.bf16.mxu1 %v6884_v1  ;;  %v6881_v10 = vld [vmem:[%s11200_s15 + $0x72] sm:$0xff]  ;;  %v6883_v11 = vpack.c.bf16 %v6877_v8, %v6876_v7  ;;  %v6888_v13 = vld [vmem:[#allocation7 + $0x10] sm:$0xff]  ;;  %v6889_v19 = vld [vmem:[#allocation7 + $0x18] sm:$0xff] }
0x1451   : >> { %8985 = vmatpush3.bf16.msra.mxu0 %v9672_v59  ;;  %9351 = vmatpush3.bf16.msra.mxu1 %v9672_v59  ;;  %v6885_v12 = vpack.c.bf16 %v6881_v10, %v6880_v9  ;;  %v6892_v14 = vld [vmem:[#allocation7 + $0x30] sm:$0xff]  ;;  %v6890_v16 = vld [vmem:[#allocation7 + $0x20] sm:$0xff]  ;;  %v6893_v20 = vld [vmem:[#allocation7 + $0x38] sm:$0xff] }
0x1452   : >> { %8986 = vmatprep.subr.bf16.mxu0 %v9673_v61  ;;  %9344 = vmatprep.subr.bf16.mxu1 %v9673_v61  ;;  %v6887_v25 = vld [vmem:[#allocation7 + $0x8] sm:$0xff] }
0x1453   : >> { %v6891_v26 = vld [vmem:[#allocation7 + $0x28] sm:$0xff] }
0x1455   : >> { %8987 = vmatpush3.bf16.msra.mxu0 %v9673_v61  ;;  %9352 = vmatpush3.bf16.msra.mxu1 %v9673_v61 }
0x1456   : >> { %8988 = vmatprep.subr.bf16.mxu0 %v9674_v63  ;;  %9345 = vmatprep.subr.bf16.mxu1 %v9674_v63 }
0x1459   : >> { %8989 = vmatpush3.bf16.msra.mxu0 %v9674_v63  ;;  %9353 = vmatpush3.bf16.msra.mxu1 %v9674_v63 }
0x145a   : >> { %8990 = vmatprep.subr.bf16.mxu0 %v9675_v3  ;;  %9346 = vmatprep.subr.bf16.mxu1 %v9675_v3 }
0x145d   : >> { %8991 = vmatpush3.bf16.msra.mxu0 %v9675_v3  ;;  %9354 = vmatpush3.bf16.msra.mxu1 %v9675_v3 }
0x145e   : >> { %8992 = vmatprep.subr.bf16.mxu0 %v9676_v4  ;;  %9347 = vmatprep.subr.bf16.mxu1 %v9676_v4 }
0x1461   : >> { %8993 = vmatpush3.bf16.msra.mxu0 %v9676_v4  ;;  %9355 = vmatpush3.bf16.msra.mxu1 %v9676_v4 }
0x1462   : >> { %8994 = vmatprep.subr.bf16.mxu0 %v9677_v5  ;;  %9348 = vmatprep.subr.bf16.mxu1 %v9677_v5 }
0x1465   : >> { %8995 = vmatpush3.bf16.msra.mxu0 %v9677_v5  ;;  %9356 = vmatpush3.bf16.msra.mxu1 %v9677_v5 }
0x1466   : >> { %8996 = vmatprep.subr.bf16.mxu0 %v9678_v6  ;;  %9349 = vmatprep.subr.bf16.mxu1 %v9678_v6 }
0x1469   : >> { %8997 = vmatpush3.bf16.msra.mxu0 %v9678_v6  ;;  %9357 = vmatpush3.bf16.msra.mxu1 %v9678_v6 }
0x146c   : >> { %8999 = vmatmul.mubr.bf16.vlgmr.msra.gmra.mrb[0].mxu0 %v6883_v11  ;;  %9003 = vmatmul.mubr.bf16.vlgmr.msra.gmra.mrb[0].mxu1 %v6885_v12 }
0x153f   : >> { %v9000_v17 = vpop.f32.mrb[0].mxu0  ;;  %v9004_v18 = vpop.f32.mrb[0].mxu1  ;;  %6870 = sbr.rel (!%p6868_p7) target bundleno = 5192 (0x1448), region = 431 }
0x1540   : >> { %v7030_v21 = vadd.f32 %v9000_v17, %v6888_v13  ;;  %v7034_v22 = vadd.f32 %v9004_v18, %v6892_v14  ;;  %v6997_v23 = vpop.f32.mrb[1].mxu0  ;;  %v7013_v24 = vpop.f32.mrb[1].mxu1 }
0x1541   : >> { %v7028_v27 = vadd.f32 %v6997_v23, %v6886_v15  ;;  %v7032_v28 = vadd.f32 %v7013_v24, %v6890_v16  ;;  %v9001_v29 = vpop.f32.mrb[2].mxu0  ;;  %v9005_v30 = vpop.f32.mrb[2].mxu1 }
0x1542   : >> { %7038 = vst [vmem:[#allocation7 + $0x10] sm:$0xff] %v7030_v21  ;;  %7042 = vst [vmem:[#allocation7 + $0x30] sm:$0xff] %v7034_v22  ;;  %v7031_v31 = vadd.f32 %v9001_v29, %v6889_v19  ;;  %v7035_v32 = vadd.f32 %v9005_v30, %v6893_v20  ;;  %v7000_v2 = vpop.f32.mrb[3].mxu0  ;;  %v7016_v33 = vpop.f32.mrb[3].mxu1 }
0x1543   : >> { %7036 = vst [vmem:[#allocation7] sm:$0xff] %v7028_v27  ;;  %7040 = vst [vmem:[#allocation7 + $0x20] sm:$0xff] %v7032_v28  ;;  %v7029_v34 = vadd.f32 %v7000_v2, %v6887_v25  ;;  %v7033_v35 = vadd.f32 %v7016_v33, %v6891_v26 }
0x1544   : >> { %7039 = vst [vmem:[#allocation7 + $0x18] sm:$0xff] %v7031_v31  ;;  %7043 = vst [vmem:[#allocation7 + $0x38] sm:$0xff] %v7035_v32 }
0x1545   : >> { %7037 = vst [vmem:[#allocation7 + $0x8] sm:$0xff] %v7029_v34  ;;  %7041 = vst [vmem:[#allocation7 + $0x28] sm:$0xff] %v7033_v35 }
0x1549   : > { %v7046_v38 = vld [vmem:[#allocation7 + $0x10] sm:$0xff] }
0x154a   : > { %v7044_v36 = vld [vmem:[#allocation7] sm:$0xff]  ;;  %v7784_v41 = vmul.f32 -1.442695, %v7046_v38  ;;  %v7050_v48 = vld [vmem:[#allocation7 + $0x30] sm:$0xff] }
0x154b   : > { %v7782_v39 = vmul.f32 -1.442695, %v7044_v36  ;;  %v7047_v42 = vld [vmem:[#allocation7 + $0x18] sm:$0xff]  ;;  %v7048_v43 = vld [vmem:[#allocation7 + $0x20] sm:$0xff]  ;;  %v7788_v50 = vmul.f32 -1.442695, %v7050_v48 }
0x154c   : > { %v7045_v37 = vld [vmem:[#allocation7 + $0x8] sm:$0xff]  ;;  %v7785_v45 = vmul.f32 -1.442695, %v7047_v42  ;;  %v7786_v46 = vmul.f32 -1.442695, %v7048_v43  ;;  %v7051_v49 = vld [vmem:[#allocation7 + $0x38] sm:$0xff] }
0x154d   : > { %v7783_v40 = vmul.f32 -1.442695, %v7045_v37  ;;  %v7049_v44 = vld [vmem:[#allocation7 + $0x28] sm:$0xff]  ;;  %9679 = vpow2.f32 %v7782_v39  ;;  %v7789_v51 = vmul.f32 -1.442695, %v7051_v49 }
0x154e   : > { %v7787_v47 = vmul.f32 -1.442695, %v7049_v44 }
0x154f   : > { %9681 = vpow2.f32 %v7783_v40 }
0x1550   : > { %9683 = vpow2.f32 %v7784_v41 }
0x1551   : > { %9685 = vpow2.f32 %v7785_v45 }
0x1552   : > { %9687 = vpow2.f32 %v7786_v46 }
0x1553   : > { %9689 = vpow2.f32 %v7787_v47 }
0x1554   : > { %9691 = vpow2.f32 %v7788_v50 }
0x1555   : > { %9693 = vpow2.f32 %v7789_v51 }
0x1557   : > { %v9680_v52 = vpop.eup %9679 }
0x1558   : > { %v7076_v54 = vadd.f32 1.0, %v9680_v52 }
0x1559   : > { %v9682_v53 = vpop.eup %9681 }
0x155a   : > { %v9684_v55 = vpop.eup %9683  ;;  %v7077_v56 = vadd.f32 1.0, %v9682_v53  ;;  %9695 = vrcp.f32 %v7076_v54 }
0x155b   : > { %v9686_v57 = vpop.eup %9685  ;;  %v7078_v58 = vadd.f32 1.0, %v9684_v55 }
0x155c   : > { %v9688_v59 = vpop.eup %9687  ;;  %9697 = vrcp.f32 %v7077_v56  ;;  %v7079_v60 = vadd.f32 1.0, %v9686_v57 }
0x155d   : > { %v9690_v61 = vpop.eup %9689  ;;  %9699 = vrcp.f32 %v7078_v58  ;;  %v7080_v62 = vadd.f32 1.0, %v9688_v59 }
0x155e   : > { %v9692_v63 = vpop.eup %9691  ;;  %9701 = vrcp.f32 %v7079_v60  ;;  %v7081_v0 = vadd.f32 1.0, %v9690_v61 }
0x155f   : > { %v9694_v1 = vpop.eup %9693  ;;  %9703 = vrcp.f32 %v7080_v62  ;;  %v7082_v3 = vadd.f32 1.0, %v9692_v63 }
0x1560   : > { %9705 = vrcp.f32 %v7081_v0  ;;  %v7083_v4 = vadd.f32 1.0, %v9694_v1 }
0x1561   : > { %9707 = vrcp.f32 %v7082_v3 }
0x1562   : > { %9709 = vrcp.f32 %v7083_v4 }
0x1564   : > { %v9696_v5 = vpop.eup %9695 }
0x1565   : > { %7100 = vst [vmem:[%s10141_s16] sm:$0xff] %v9696_v5 }
0x1566   : > { %v9698_v6 = vpop.eup %9697 }
0x1567   : > { %v9700_v7 = vpop.eup %9699  ;;  %7101 = vst [vmem:[%s10141_s16 + $0x8] sm:$0xff] %v9698_v6 }
0x1568   : > { %v9702_v8 = vpop.eup %9701  ;;  %7102 = vst [vmem:[%s10141_s16 + $0x10] sm:$0xff] %v9700_v7 }
0x1569   : > { %v9704_v9 = vpop.eup %9703  ;;  %7103 = vst [vmem:[%s10141_s16 + $0x18] sm:$0xff] %v9702_v8 }
0x156a   : > { %v9706_v10 = vpop.eup %9705  ;;  %7104 = vst [vmem:[%s10141_s16 + $0x20] sm:$0xff] %v9704_v9 }
0x156b   : > { %v9708_v11 = vpop.eup %9707  ;;  %7105 = vst [vmem:[%s10141_s16 + $0x28] sm:$0xff] %v9706_v10 }
0x156c   : > { %v9710_v12 = vpop.eup %9709  ;;  %7106 = vst [vmem:[%s10141_s16 + $0x30] sm:$0xff] %v9708_v11 }
0x156d   : > { %7107 = vst [vmem:[%s10141_s16 + $0x38] sm:$0xff] %v9710_v12 }
0x156e PF: > { %s17_s24 = sadd.s32 1, %s9789_s24  }
0x156f   : > { %p14_p8 = scmp.ge.s32.totalorder %s17_s24, 4  }
0x1571   :  { %16 = sbr.rel (!%p14_p8) target bundleno = 1 (0x1), region = 442 }

</bundles_post_ra>
